<compile_context>
chip_gen: v6e
topology: v6e:2x2x1
jax: 0.10.0
libtpu: 0.0.40
codegen_flags: <defaults>
</compile_context>

<pallas_src>
import functools

import jax
import jax.numpy as jnp
from jax.experimental import pallas as pl
from jax.experimental.pallas import tpu as pltpu

EPS = 1e-5
LANES = 128


def _round_up(x, m):
    return (x + m - 1) // m * m


def _strip_params(c_off, g):
    """128-lane column strip of the channel buffer containing [c_off, c_off+g)."""
    b0 = c_off // LANES
    b1 = (c_off + g - 1) // LANES
    if b0 == b1:                       # common case: slice inside one lane block
        return b0, LANES, c_off - b0 * LANES
    # rare fallback (slice straddles a 128 boundary): strip starts at column 0
    return 0, (b1 + 1) * LANES, c_off


# ---------------- kernel A: BN + ReLU + 1x1 conv (+ fused y stats) ----------

def _bn_relu_conv1x1_kernel(x_ref, s_ref, b_ref, w_ref, y_ref, stat_ref,
                            *, m_total, tm, need_mask):
    # x: (tm, Cp) bf16 storage -> f32 BN/ReLU math
    a = jnp.maximum(x_ref[...].astype(jnp.float32) * s_ref[...] + b_ref[...],
                    0.0)
    if need_mask:  # only emitted when m % tm != 0 (static Python check)
        rows = pl.program_id(0) * tm + jax.lax.broadcasted_iota(
            jnp.int32, (tm, 1), 0)
        a = jnp.where(rows < m_total, a, 0.0)
    y = jnp.dot(a.astype(jnp.bfloat16), w_ref[...],
                preferred_element_type=jnp.float32)            # (tm, Cbp) f32
    yq = y.astype(y_ref.dtype)                                 # bf16 storage
    y_ref[...] = yq
    yf = yq.astype(jnp.float32)
    # fused partial BN2 statistics of the *stored* activation,
    # written as one contiguous (2, Cbp) store (no 1-sublane partial stores)
    stat_ref[0, :, :] = jnp.concatenate(
        [jnp.sum(yf, axis=0, keepdims=True),
         jnp.sum(yf * yf, axis=0, keepdims=True)], axis=0)


def bn_relu_conv1x1(buf2d, scale, bias, w1p, *, tm=512):
    m, c_pad = buf2d.shape
    cb_pad = w1p.shape[1]
    tm = min(tm, m)
    grid_m = pl.cdiv(m, tm)
    kernel = functools.partial(_bn_relu_conv1x1_kernel, m_total=m, tm=tm,
                               need_mask=(m % tm != 0))
    return pl.pallas_call(
        kernel,
        out_shape=(jax.ShapeDtypeStruct((m, cb_pad), jnp.bfloat16),
                   jax.ShapeDtypeStruct((grid_m, 2, cb_pad), jnp.float32)),
        grid_spec=pltpu.PrefetchScalarGridSpec(
            num_scalar_prefetch=0,
            grid=(grid_m,),
            in_specs=[
                pl.BlockSpec((tm, c_pad), lambda i: (i, 0)),
                pl.BlockSpec((1, c_pad), lambda i: (0, 0)),
                pl.BlockSpec((1, c_pad), lambda i: (0, 0)),
                pl.BlockSpec((c_pad, cb_pad), lambda i: (0, 0)),
            ],
            out_specs=[
                pl.BlockSpec((tm, cb_pad), lambda i: (i, 0)),
                pl.BlockSpec((1, 2, cb_pad), lambda i: (i, 0, 0)),
            ],
        ),
        compiler_params=pltpu.CompilerParams(dimension_semantics=("parallel",)),
    )(buf2d, scale.reshape(1, c_pad), bias.reshape(1, c_pad), w1p)


# -------- kernel B: BN + ReLU + 3x3 conv + strip concat (+ z stats) ---------

def _bn_relu_conv3x3_concat_kernel(y_ref, s_ref, b_ref, w_ref, xin_ref,
                                   xout_ref, zstat_ref, t_ref,
                                   *, h, w, g, off_local, padr):
    hw = h * w
    n9p = w_ref.shape[-1]

    # fused BN2 + ReLU (f32 element-wise math)
    a = jnp.maximum(y_ref[...].astype(jnp.float32) * s_ref[...] + b_ref[...],
                    0.0)                                       # (hw, cbp) f32
    # ONE MXU matmul over all 9 packed taps (N = 9*g padded to 128-mult)
    t = jnp.dot(a.astype(jnp.bfloat16), w_ref[...],
                preferred_element_type=jnp.float32)            # (hw, n9p) f32

    # shifted-tap buffer with zero halo rows.  Re-zero the halo every step
    # (a pl.when(program_id==0) init would be unsafe under megacore grid
    # sharding since each core has its own scratch; the cost is ~a dozen vst).
    zeros_halo = jnp.zeros((padr, n9p), jnp.float32)
    t_ref[pl.ds(0, padr), :] = zeros_halo
    t_ref[pl.ds(padr + hw, padr), :] = zeros_halo
    t_ref[pl.ds(padr, hw), :] = t

    # column index of every output pixel in the flattened (h*w) raster
    col = jax.lax.broadcasted_iota(jnp.int32, (hw, 1), 0) % w

    acc = jnp.zeros((hw, g), jnp.float32)
    for ky in range(3):
        for kx in range(3):
            tap = ky * 3 + kx
            shift = (ky - 1) * w + (kx - 1)
            sl = t_ref[pl.ds(padr + shift, hw), tap * g:(tap + 1) * g]
            if kx == 0:          # left neighbour invalid at column 0
                sl = jnp.where(col >= 1, sl, 0.0)
            elif kx == 2:        # right neighbour invalid at column w-1
                sl = jnp.where(col <= w - 2, sl, 0.0)
            acc = acc + sl
    accq = acc.astype(xout_ref.dtype)                          # bf16 storage

    # in-place "concat", restricted to the 128-lane strip holding the slice:
    # copy the strip through (preserves older channels in the strip), insert
    # the new growth channels.  The rest of the aliased buffer is untouched.
    xout_ref[...] = xin_ref[...]
    xout_ref[:, off_local:off_local + g] = accq

    # fused per-image statistics of the stored strip (lane-dense store);
    # the wrapper slices out the g new channels for the next layer's BN1.
    sf = xout_ref[...].astype(jnp.float32)
    zstat_ref[0, :, :] = jnp.concatenate(
        [jnp.sum(sf, axis=0, keepdims=True),
         jnp.sum(sf * sf, axis=0, keepdims=True)], axis=0)


def bn_relu_conv3x3_concat(y2d, scale, bias, w2p, buf2d, *, n, h, w, c_off, g):
    hw = h * w
    m, c_pad = buf2d.shape
    cb_pad = y2d.shape[1]
    n9p = w2p.shape[-1]
    strip_blk, strip_w, off_local = _strip_params(c_off, g)
    padr = _round_up(w + 1, 8)         # zero-halo rows, >= w + 1, 8-aligned
    kernel = functools.partial(_bn_relu_conv3x3_concat_kernel,
                               h=h, w=w, g=g, off_local=off_local, padr=padr)
    return pl.pallas_call(
        kernel,
        out_shape=(jax.ShapeDtypeStruct((m, c_pad), buf2d.dtype),
                   jax.ShapeDtypeStruct((n, 2, strip_w), jnp.float32)),
        grid_spec=pltpu.PrefetchScalarGridSpec(
            num_scalar_prefetch=0,
            grid=(n,),
            in_specs=[
                pl.BlockSpec((hw, cb_pad), lambda i: (i, 0)),
                pl.BlockSpec((1, cb_pad), lambda i: (0, 0)),
                pl.BlockSpec((1, cb_pad), lambda i: (0, 0)),
                pl.BlockSpec((cb_pad, n9p), lambda i: (0, 0)),
                # aliased input strip: only the lane block(s) we rewrite
                pl.BlockSpec((hw, strip_w), lambda i: (i, strip_blk)),
            ],
            out_specs=[
                # aliased output: same strip; the rest of buf is never DMA'd
                pl.BlockSpec((hw, strip_w), lambda i: (i, strip_blk)),
                pl.BlockSpec((1, 2, strip_w), lambda i: (i, 0, 0)),
            ],
            scratch_shapes=[pltpu.VMEM((hw + 2 * padr, n9p), jnp.float32)],
        ),
        input_output_aliases={4: 0},
        compiler_params=pltpu.CompilerParams(dimension_semantics=("parallel",)),
    )(y2d, scale.reshape(1, cb_pad), bias.reshape(1, cb_pad), w2p, buf2d)


# ------------------------------ DenseBlock forward ---------------------------

def dense_block_forward(x_nhwc, params_list):
    n, h, w, c0 = x_nhwc.shape
    m = n * h * w
    num_layers = len(params_list)
    g = params_list[0]["w2"].shape[-1]
    cb = params_list[0]["w1"].shape[1]
    c_final = c0 + num_layers * g
    c_pad = _round_up(c_final, LANES)
    cb_pad = _round_up(cb, LANES)
    n9p = _round_up(9 * g, LANES)

    # persistent channel-major activation buffer, stored in bf16
    x2d = x_nhwc.reshape(m, c0).astype(jnp.bfloat16)
    buf = jnp.zeros((m, c_pad), jnp.bfloat16).at[:, :c0].set(x2d)

    # running per-channel sums / sums-of-squares of the concatenated features
    xf = x2d.astype(jnp.float32)
    ch_sum = jnp.zeros((c_pad,), jnp.float32).at[:c0].set(jnp.sum(xf, axis=0))
    ch_sq = jnp.zeros((c_pad,), jnp.float32).at[:c0].set(jnp.sum(xf * xf, axis=0))

    for i, p in enumerate(params_list):
        c_in = c0 + i * g

        # ---- BN1 (batch stats from running sums), folded into scale/bias ----
        mean1 = ch_sum / m
        var1 = jnp.maximum(ch_sq / m - mean1 * mean1, 0.0)
        g1 = jnp.zeros((c_pad,), jnp.float32).at[:c_in].set(p["g1"])
        b1 = jnp.zeros((c_pad,), jnp.float32).at[:c_in].set(p["b1"])
        s1 = g1 / jnp.sqrt(var1 + EPS)
        o1 = b1 - mean1 * s1
        w1p = jnp.zeros((c_pad, cb_pad), jnp.bfloat16).at[:c_in, :cb].set(
            p["w1"].astype(jnp.bfloat16))

        y2d, ystat = bn_relu_conv1x1(buf, s1, o1, w1p)

        # ---- BN2 stats come fused out of kernel A (no extra HBM pass) ----
        mean2 = jnp.sum(ystat[:, 0, :], axis=0) / m
        var2 = jnp.maximum(jnp.sum(ystat[:, 1, :], axis=0) / m - mean2 * mean2,
                           0.0)
        g2 = jnp.zeros((cb_pad,), jnp.float32).at[:cb].set(p["g2"])
        b2 = jnp.zeros((cb_pad,), jnp.float32).at[:cb].set(p["b2"])
        s2 = g2 / jnp.sqrt(var2 + EPS)
        o2 = b2 - mean2 * s2

        # pack the 9 conv taps along the matmul N dimension (HWIO -> I,(KH*KW*O))
        w2_packed = jnp.transpose(p["w2"], (2, 0, 1, 3)).reshape(cb, 9 * g)
        w2p = jnp.zeros((cb_pad, n9p), jnp.bfloat16).at[:cb, :9 * g].set(
            w2_packed.astype(jnp.bfloat16))

        buf, zstat = bn_relu_conv3x3_concat(y2d, s2, o2, w2p, buf,
                                            n=n, h=h, w=w, c_off=c_in, g=g)

        # extend the running feature statistics with the new growth channels
        _, _, off_local = _strip_params(c_in, g)
        ch_sum = ch_sum.at[c_in:c_in + g].set(
            jnp.sum(zstat[:, 0, off_local:off_local + g], axis=0))
        ch_sq = ch_sq.at[c_in:c_in + g].set(
            jnp.sum(zstat[:, 1, off_local:off_local + g], axis=0))

    return buf[:, :c_final].astype(jnp.float32).reshape(n, h, w, c_final)


def init_dense_block_params(key, in_channels, num_layers,
                            expand_factor=4, growth_rate=32):
    params = []
    c = in_channels
    cb = expand_factor * growth_rate
    for _ in range(num_layers):
        key, k0, k1, k2, k3, k4, k5 = jax.random.split(key, 7)
        params.append(dict(
            g1=1.0 + 0.1 * jax.random.normal(k0, (c,), jnp.float32),
            b1=0.1 * jax.random.normal(k1, (c,), jnp.float32),
            w1=jax.random.normal(k2, (c, cb), jnp.float32) / jnp.sqrt(c),
            g2=1.0 + 0.1 * jax.random.normal(k3, (cb,), jnp.float32),
            b2=0.1 * jax.random.normal(k4, (cb,), jnp.float32),
            w2=jax.random.normal(k5, (3, 3, cb, growth_rate),
                                 jnp.float32) / jnp.sqrt(9.0 * cb),
        ))
        c += growth_rate
    return params


# ------------------------------ pure-JAX reference ---------------------------

def ref_forward(x, params_list):
    # Mirrors the kernels' precision: bf16 storage of all persistent
    # activations (input buffer, bottleneck y, growth z), bf16 matmul/conv
    # operands with f32 accumulation, f32 BN/ReLU math, batch statistics.
    x = x.astype(jnp.bfloat16).astype(jnp.float32)
    for p in params_list:
        mean = x.mean(axis=(0, 1, 2))
        var = x.var(axis=(0, 1, 2))
        s1 = p["g1"] / jnp.sqrt(var + EPS)
        b1 = p["b1"] - mean * s1
        a1 = jnp.maximum(x * s1 + b1, 0.0)
        y = jnp.einsum("nhwc,cd->nhwd", a1.astype(jnp.bfloat16),
                       p["w1"].astype(jnp.bfloat16),
                       preferred_element_type=jnp.float32)
        yq = y.astype(jnp.bfloat16).astype(jnp.float32)
        mean2 = yq.mean(axis=(0, 1, 2))
        var2 = yq.var(axis=(0, 1, 2))
        s2 = p["g2"] / jnp.sqrt(var2 + EPS)
        b2 = p["b2"] - mean2 * s2
        a2 = jnp.maximum(yq * s2 + b2, 0.0)
        z = jax.lax.conv_general_dilated(
            a2.astype(jnp.bfloat16), p["w2"].astype(jnp.bfloat16),
            window_strides=(1, 1), padding="SAME",
            dimension_numbers=("NHWC", "HWIO", "NHWC"),
            preferred_element_type=jnp.float32)
        zq = z.astype(jnp.bfloat16).astype(jnp.float32)
        x = jnp.concatenate([x, zq], axis=-1)
    return x


# ------------------------------------ main -----------------------------------

if __name__ == "__main__":
    # Small config: DenseBlock(in_channels=8, num_layers=2,
    #                          expand_factor=4, growth_rate=16)
    N, H, W = 2, 16, 16
    in_channels, num_layers, expand_factor, growth_rate = 8, 2, 4, 16

    key = jax.random.PRNGKey(0)
    key, kx = jax.random.split(key)
    x_nchw = jax.random.normal(kx, (N, in_channels, H, W), jnp.float32)
    x = jnp.transpose(x_nchw, (0, 2, 3, 1))  # NCHW -> NHWC

    params = init_dense_block_params(key, in_channels, num_layers,
                                     expand_factor, growth_rate)

    fwd = jax.jit(dense_block_forward)
    out = jax.block_until_ready(fwd(x, params))

    expected_channels = in_channels + num_layers * growth_rate
    assert out.shape == (N, H, W, expected_channels), out.shape

    ref = jax.block_until_ready(jax.jit(ref_forward)(x, params))
    max_err = float(jnp.max(jnp.abs(out - ref)))
    assert max_err < 5e-3, f"mismatch vs reference: {max_err}"

    print("KERNEL_OK")
</pallas_src>

<mosaic_0001>
module attributes {stable_mosaic.version = 11 : i64} {
  func.func @_bn_relu_conv1x1_kernel(%arg0: i32, %arg1: memref<512x128xbf16, #tpu.memory_space<vmem>>, %arg2: memref<1x128xf32, #tpu.memory_space<vmem>>, %arg3: memref<1x128xf32, #tpu.memory_space<vmem>>, %arg4: memref<128x128xbf16, #tpu.memory_space<vmem>>, %arg5: memref<512x128xbf16, #tpu.memory_space<vmem>>, %arg6: memref<1x2x128xf32, #tpu.memory_space<vmem>>) attributes {dimension_semantics = [#tpu.dimension_semantics<parallel>], iteration_bounds = array<i64: 1>, scalar_prefetch = 0 : i64, scratch_operands = 0 : i64, tpu.core_type = #tpu.core_type<tc>, window_params = [{transform_indices = @transform_0, window_bounds = array<i64: 512, 128>}, {pipeline_mode = #tpu.pipeline_mode<synchronous>, transform_indices = @transform_1, window_bounds = array<i64: 1, 128>}, {pipeline_mode = #tpu.pipeline_mode<synchronous>, transform_indices = @transform_2, window_bounds = array<i64: 1, 128>}, {pipeline_mode = #tpu.pipeline_mode<synchronous>, transform_indices = @transform_3, window_bounds = array<i64: 128, 128>}, {transform_indices = @transform_4, window_bounds = array<i64: 512, 128>}, {transform_indices = @transform_5, window_bounds = array<i64: 1, 2, 128>}]} {
    %c0 = arith.constant 0 : index
    %c0_0 = arith.constant 0 : index
    %0 = vector.load %arg1[%c0, %c0_0] : memref<512x128xbf16, #tpu.memory_space<vmem>>, vector<512x128xbf16>
    %1 = arith.extf %0 : vector<512x128xbf16> to vector<512x128xf32>
    %c0_1 = arith.constant 0 : index
    %c0_2 = arith.constant 0 : index
    %2 = vector.load %arg2[%c0_1, %c0_2] : memref<1x128xf32, #tpu.memory_space<vmem>>, vector<1x128xf32>
    %3 = vector.broadcast %2 : vector<1x128xf32> to vector<512x128xf32>
    %4 = arith.mulf %1, %3 : vector<512x128xf32>
    %c0_3 = arith.constant 0 : index
    %c0_4 = arith.constant 0 : index
    %5 = vector.load %arg3[%c0_3, %c0_4] : memref<1x128xf32, #tpu.memory_space<vmem>>, vector<1x128xf32>
    %6 = vector.broadcast %5 : vector<1x128xf32> to vector<512x128xf32>
    %7 = arith.addf %4, %6 : vector<512x128xf32>
    %cst = arith.constant 0.000000e+00 : f32
    %8 = vector.broadcast %cst : f32 to vector<512x128xf32>
    %9 = arith.maximumf %7, %8 : vector<512x128xf32>
    %10 = arith.truncf %9 : vector<512x128xf32> to vector<512x128xbf16>
    %c0_5 = arith.constant 0 : index
    %c0_6 = arith.constant 0 : index
    %11 = vector.load %arg4[%c0_5, %c0_6] : memref<128x128xbf16, #tpu.memory_space<vmem>>, vector<128x128xbf16>
    %cst_7 = arith.constant dense<0.000000e+00> : vector<512x128xf32>
    %12 = tpu.matmul %10, %11, %cst_7 {dimension_numbers = #tpu.dot_dimension_numbers<[1], [0], [0], [1], [0, 0, 1, 1], [], []>} : vector<512x128xbf16>, vector<128x128xbf16>, vector<512x128xf32> -> vector<512x128xf32>
    %13 = arith.truncf %12 : vector<512x128xf32> to vector<512x128xbf16>
    %c0_8 = arith.constant 0 : index
    %c0_9 = arith.constant 0 : index
    %14 = vector.load %arg5[%c0_8, %c0_9] : memref<512x128xbf16, #tpu.memory_space<vmem>>, vector<512x128xbf16>
    tpu.vector_store %arg5[%c0_8, %c0_9], %13 {strides = array<i32>} : memref<512x128xbf16, #tpu.memory_space<vmem>>, vector<512x128xbf16>,
    %15 = arith.extf %13 : vector<512x128xbf16> to vector<512x128xf32>
    %cst_10 = arith.constant dense<0.000000e+00> : vector<128xf32>
    %16 = vector.multi_reduction <add>, %15, %cst_10 [0] : vector<512x128xf32> to vector<128xf32>
    %17 = vector.shape_cast %16 : vector<128xf32> to vector<1x128xf32>
    %18 = arith.mulf %15, %15 : vector<512x128xf32>
    %cst_11 = arith.constant dense<0.000000e+00> : vector<128xf32>
    %19 = vector.multi_reduction <add>, %18, %cst_11 [0] : vector<512x128xf32> to vector<128xf32>
    %20 = vector.shape_cast %19 : vector<128xf32> to vector<1x128xf32>
    %21 = tpu.concatenate %17, %20 in 0 : vector<1x128xf32>, vector<1x128xf32> -> vector<2x128xf32>
    %c0_12 = arith.constant 0 : index
    %c0_13 = arith.constant 0 : index
    %c0_14 = arith.constant 0 : index
    %22 = vector.load %arg6[%c0_12, %c0_13, %c0_14] : memref<1x2x128xf32, #tpu.memory_space<vmem>>, vector<1x2x128xf32>
    %23 = vector.shape_cast %22 : vector<1x2x128xf32> to vector<2x128xf32>
    %24 = vector.shape_cast %21 : vector<2x128xf32> to vector<1x2x128xf32>
    tpu.vector_store %arg6[%c0_12, %c0_13, %c0_14], %24 {strides = array<i32>} : memref<1x2x128xf32, #tpu.memory_space<vmem>>, vector<1x2x128xf32>,
    return
  }
  func.func @transform_0(%arg0: i32) -> (i32, i32) {
    %c0_i32 = arith.constant 0 : i32
    %c0_i32_0 = arith.constant 0 : i32
    return %arg0, %c0_i32 : i32, i32
  }
  func.func @transform_1(%arg0: i32) -> (i32, i32) {
    %c0_i32 = arith.constant 0 : i32
    %c0_i32_0 = arith.constant 0 : i32
    %c0_i32_1 = arith.constant 0 : i32
    return %c0_i32, %c0_i32_0 : i32, i32
  }
  func.func @transform_2(%arg0: i32) -> (i32, i32) {
    %c0_i32 = arith.constant 0 : i32
    %c0_i32_0 = arith.constant 0 : i32
    %c0_i32_1 = arith.constant 0 : i32
    return %c0_i32, %c0_i32_0 : i32, i32
  }
  func.func @transform_3(%arg0: i32) -> (i32, i32) {
    %c0_i32 = arith.constant 0 : i32
    %c0_i32_0 = arith.constant 0 : i32
    %c0_i32_1 = arith.constant 0 : i32
    return %c0_i32, %c0_i32_0 : i32, i32
  }
  func.func @transform_4(%arg0: i32) -> (i32, i32) {
    %c0_i32 = arith.constant 0 : i32
    %c0_i32_0 = arith.constant 0 : i32
    return %arg0, %c0_i32 : i32, i32
  }
  func.func @transform_5(%arg0: i32) -> (i32, i32, i32) {
    %c0_i32 = arith.constant 0 : i32
    %c0_i32_0 = arith.constant 0 : i32
    %c0_i32_1 = arith.constant 0 : i32
    return %arg0, %c0_i32, %c0_i32_0 : i32, i32, i32
  }
}

module attributes {stable_mosaic.version = 11 : i64} {
  func.func @_bn_relu_conv3x3_concat_kernel(%arg0: i32, %arg1: memref<256x128xbf16, #tpu.memory_space<vmem>>, %arg2: memref<1x128xf32, #tpu.memory_space<vmem>>, %arg3: memref<1x128xf32, #tpu.memory_space<vmem>>, %arg4: memref<128x256xbf16, #tpu.memory_space<vmem>>, %arg5: memref<256x128xbf16, #tpu.memory_space<vmem>>, %arg6: memref<256x128xbf16, #tpu.memory_space<vmem>>, %arg7: memref<1x2x128xf32, #tpu.memory_space<vmem>>, %arg8: memref<304x256xf32, #tpu.memory_space<vmem>>) attributes {dimension_semantics = [#tpu.dimension_semantics<parallel>], iteration_bounds = array<i64: 2>, scalar_prefetch = 0 : i64, scratch_operands = 1 : i64, tpu.core_type = #tpu.core_type<tc>, window_params = [{transform_indices = @transform_0, window_bounds = array<i64: 256, 128>}, {pipeline_mode = #tpu.pipeline_mode<synchronous>, transform_indices = @transform_1, window_bounds = array<i64: 1, 128>}, {pipeline_mode = #tpu.pipeline_mode<synchronous>, transform_indices = @transform_2, window_bounds = array<i64: 1, 128>}, {pipeline_mode = #tpu.pipeline_mode<synchronous>, transform_indices = @transform_3, window_bounds = array<i64: 128, 256>}, {transform_indices = @transform_4, window_bounds = array<i64: 256, 128>}, {transform_indices = @transform_5, window_bounds = array<i64: 256, 128>}, {transform_indices = @transform_6, window_bounds = array<i64: 1, 2, 128>}]} {
    %c0 = arith.constant 0 : index
    %c0_0 = arith.constant 0 : index
    %0 = vector.load %arg1[%c0, %c0_0] : memref<256x128xbf16, #tpu.memory_space<vmem>>, vector<256x128xbf16>
    %1 = arith.extf %0 : vector<256x128xbf16> to vector<256x128xf32>
    %c0_1 = arith.constant 0 : index
    %c0_2 = arith.constant 0 : index
    %2 = vector.load %arg2[%c0_1, %c0_2] : memref<1x128xf32, #tpu.memory_space<vmem>>, vector<1x128xf32>
    %3 = vector.broadcast %2 : vector<1x128xf32> to vector<256x128xf32>
    %4 = arith.mulf %1, %3 : vector<256x128xf32>
    %c0_3 = arith.constant 0 : index
    %c0_4 = arith.constant 0 : index
    %5 = vector.load %arg3[%c0_3, %c0_4] : memref<1x128xf32, #tpu.memory_space<vmem>>, vector<1x128xf32>
    %6 = vector.broadcast %5 : vector<1x128xf32> to vector<256x128xf32>
    %7 = arith.addf %4, %6 : vector<256x128xf32>
    %cst = arith.constant 0.000000e+00 : f32
    %8 = vector.broadcast %cst : f32 to vector<256x128xf32>
    %9 = arith.maximumf %7, %8 : vector<256x128xf32>
    %10 = arith.truncf %9 : vector<256x128xf32> to vector<256x128xbf16>
    %c0_5 = arith.constant 0 : index
    %c0_6 = arith.constant 0 : index
    %11 = vector.load %arg4[%c0_5, %c0_6] : memref<128x256xbf16, #tpu.memory_space<vmem>>, vector<128x256xbf16>
    %cst_7 = arith.constant dense<0.000000e+00> : vector<256x256xf32>
    %12 = tpu.matmul %10, %11, %cst_7 {dimension_numbers = #tpu.dot_dimension_numbers<[1], [0], [0], [1], [0, 0, 1, 1], [], []>} : vector<256x128xbf16>, vector<128x256xbf16>, vector<256x256xf32> -> vector<256x256xf32>
    %cst_8 = arith.constant 0.000000e+00 : f32
    %13 = vector.broadcast %cst_8 : f32 to vector<24x256xf32>
    %c0_9 = arith.constant 0 : index
    %c0_10 = arith.constant 0 : index
    %14 = vector.load %arg8[%c0_9, %c0_10] : memref<304x256xf32, #tpu.memory_space<vmem>>, vector<24x256xf32>
    tpu.vector_store %arg8[%c0_9, %c0_10], %13 {strides = array<i32>} : memref<304x256xf32, #tpu.memory_space<vmem>>, vector<24x256xf32>,
    %c280 = arith.constant 280 : index
    %c0_11 = arith.constant 0 : index
    %15 = vector.load %arg8[%c280, %c0_11] : memref<304x256xf32, #tpu.memory_space<vmem>>, vector<24x256xf32>
    tpu.vector_store %arg8[%c280, %c0_11], %13 {strides = array<i32>} : memref<304x256xf32, #tpu.memory_space<vmem>>, vector<24x256xf32>,
    %c24 = arith.constant 24 : index
    %c0_12 = arith.constant 0 : index
    %16 = vector.load %arg8[%c24, %c0_12] : memref<304x256xf32, #tpu.memory_space<vmem>>, vector<256x256xf32>
    tpu.vector_store %arg8[%c24, %c0_12], %12 {strides = array<i32>} : memref<304x256xf32, #tpu.memory_space<vmem>>, vector<256x256xf32>,
    %17 = tpu.iota {dimensions = array<i32: 0>} : vector<256x1xi32>
    %c16_i32 = arith.constant 16 : i32
    %c0_i32 = arith.constant 0 : i32
    %18 = arith.cmpi eq, %c16_i32, %c0_i32 : i32
    %c1_i32 = arith.constant 1 : i32
    %19 = arith.select %18, %c1_i32, %c16_i32 : i32
    %20 = vector.broadcast %19 : i32 to vector<256x1xi32>
    %21 = arith.remsi %17, %20 : vector<256x1xi32>
    %c0_i32_13 = arith.constant 0 : i32
    %22 = vector.broadcast %c0_i32_13 : i32 to vector<256x1xi32>
    %23 = arith.cmpi ne, %21, %22 : vector<256x1xi32>
    %c0_i32_14 = arith.constant 0 : i32
    %24 = vector.broadcast %c0_i32_14 : i32 to vector<256x1xi32>
    %25 = arith.cmpi slt, %21, %24 : vector<256x1xi32>
    %c0_i32_15 = arith.constant 0 : i32
    %26 = arith.cmpi slt, %19, %c0_i32_15 : i32
    %27 = vector.broadcast %26 : i1 to vector<256x1xi1>
    %28 = vector.broadcast %27 : vector<256x1xi1> to vector<256x1xi1>
    %29 = arith.xori %25, %28 : vector<256x1xi1>
    %30 = arith.andi %29, %23 : vector<256x1xi1>
    %31 = vector.broadcast %19 : i32 to vector<256x1xi32>
    %32 = arith.addi %21, %31 : vector<256x1xi32>
    %33 = arith.select %30, %32, %21 : vector<256x1xi1>, vector<256x1xi32>
    %cst_16 = arith.constant 0.000000e+00 : f32
    %34 = vector.broadcast %cst_16 : f32 to vector<256x16xf32>
    %c7 = arith.constant 7 : index
    %c0_17 = arith.constant 0 : index
    %35 = vector.load %arg8[%c7, %c0_17] : memref<304x256xf32, #tpu.memory_space<vmem>>, vector<256x16xf32>
    %c1_i32_18 = arith.constant 1 : i32
    %36 = vector.broadcast %c1_i32_18 : i32 to vector<256x1xi32>
    %37 = arith.cmpi sge, %33, %36 : vector<256x1xi32>
    %cst_19 = arith.constant 0.000000e+00 : f32
    %38 = vector.shape_cast %37 : vector<256x1xi1> to vector<256x1xi1>
    %39 = vector.broadcast %38 : vector<256x1xi1> to vector<256x16xi1>
    %40 = vector.broadcast %cst_19 : f32 to vector<256x16xf32>
    %41 = arith.select %39, %35, %40 : vector<256x16xi1>, vector<256x16xf32>
    %42 = arith.addf %34, %41 : vector<256x16xf32>
    %c8 = arith.constant 8 : index
    %c16 = arith.constant 16 : index
    %43 = vector.load %arg8[%c8, %c16] : memref<304x256xf32, #tpu.memory_space<vmem>>, vector<256x16xf32>
    %44 = arith.addf %42, %43 : vector<256x16xf32>
    %c9 = arith.constant 9 : index
    %c32 = arith.constant 32 : index
    %45 = vector.load %arg8[%c9, %c32] : memref<304x256xf32, #tpu.memory_space<vmem>>, vector<256x16xf32>
    %c14_i32 = arith.constant 14 : i32
    %46 = vector.broadcast %c14_i32 : i32 to vector<256x1xi32>
    %47 = arith.cmpi sle, %33, %46 : vector<256x1xi32>
    %cst_20 = arith.constant 0.000000e+00 : f32
    %48 = vector.shape_cast %47 : vector<256x1xi1> to vector<256x1xi1>
    %49 = vector.broadcast %48 : vector<256x1xi1> to vector<256x16xi1>
    %50 = vector.broadcast %cst_20 : f32 to vector<256x16xf32>
    %51 = arith.select %49, %45, %50 : vector<256x16xi1>, vector<256x16xf32>
    %52 = arith.addf %44, %51 : vector<256x16xf32>
    %c23 = arith.constant 23 : index
    %c48 = arith.constant 48 : index
    %53 = vector.load %arg8[%c23, %c48] : memref<304x256xf32, #tpu.memory_space<vmem>>, vector<256x16xf32>
    %c1_i32_21 = arith.constant 1 : i32
    %54 = vector.broadcast %c1_i32_21 : i32 to vector<256x1xi32>
    %55 = arith.cmpi sge, %33, %54 : vector<256x1xi32>
    %cst_22 = arith.constant 0.000000e+00 : f32
    %56 = vector.shape_cast %55 : vector<256x1xi1> to vector<256x1xi1>
    %57 = vector.broadcast %56 : vector<256x1xi1> to vector<256x16xi1>
    %58 = vector.broadcast %cst_22 : f32 to vector<256x16xf32>
    %59 = arith.select %57, %53, %58 : vector<256x16xi1>, vector<256x16xf32>
    %60 = arith.addf %52, %59 : vector<256x16xf32>
    %c24_23 = arith.constant 24 : index
    %c64 = arith.constant 64 : index
    %61 = vector.load %arg8[%c24_23, %c64] : memref<304x256xf32, #tpu.memory_space<vmem>>, vector<256x16xf32>
    %62 = arith.addf %60, %61 : vector<256x16xf32>
    %c25 = arith.constant 25 : index
    %c80 = arith.constant 80 : index
    %63 = vector.load %arg8[%c25, %c80] : memref<304x256xf32, #tpu.memory_space<vmem>>, vector<256x16xf32>
    %c14_i32_24 = arith.constant 14 : i32
    %64 = vector.broadcast %c14_i32_24 : i32 to vector<256x1xi32>
    %65 = arith.cmpi sle, %33, %64 : vector<256x1xi32>
    %cst_25 = arith.constant 0.000000e+00 : f32
    %66 = vector.shape_cast %65 : vector<256x1xi1> to vector<256x1xi1>
    %67 = vector.broadcast %66 : vector<256x1xi1> to vector<256x16xi1>
    %68 = vector.broadcast %cst_25 : f32 to vector<256x16xf32>
    %69 = arith.select %67, %63, %68 : vector<256x16xi1>, vector<256x16xf32>
    %70 = arith.addf %62, %69 : vector<256x16xf32>
    %c39 = arith.constant 39 : index
    %c96 = arith.constant 96 : index
    %71 = vector.load %arg8[%c39, %c96] : memref<304x256xf32, #tpu.memory_space<vmem>>, vector<256x16xf32>
    %c1_i32_26 = arith.constant 1 : i32
    %72 = vector.broadcast %c1_i32_26 : i32 to vector<256x1xi32>
    %73 = arith.cmpi sge, %33, %72 : vector<256x1xi32>
    %cst_27 = arith.constant 0.000000e+00 : f32
    %74 = vector.shape_cast %73 : vector<256x1xi1> to vector<256x1xi1>
    %75 = vector.broadcast %74 : vector<256x1xi1> to vector<256x16xi1>
    %76 = vector.broadcast %cst_27 : f32 to vector<256x16xf32>
    %77 = arith.select %75, %71, %76 : vector<256x16xi1>, vector<256x16xf32>
    %78 = arith.addf %70, %77 : vector<256x16xf32>
    %c40 = arith.constant 40 : index
    %c112 = arith.constant 112 : index
    %79 = vector.load %arg8[%c40, %c112] : memref<304x256xf32, #tpu.memory_space<vmem>>, vector<256x16xf32>
    %80 = arith.addf %78, %79 : vector<256x16xf32>
    %c41 = arith.constant 41 : index
    %c128 = arith.constant 128 : index
    %81 = vector.load %arg8[%c41, %c128] : memref<304x256xf32, #tpu.memory_space<vmem>>, vector<256x16xf32>
    %c14_i32_28 = arith.constant 14 : i32
    %82 = vector.broadcast %c14_i32_28 : i32 to vector<256x1xi32>
    %83 = arith.cmpi sle, %33, %82 : vector<256x1xi32>
    %cst_29 = arith.constant 0.000000e+00 : f32
    %84 = vector.shape_cast %83 : vector<256x1xi1> to vector<256x1xi1>
    %85 = vector.broadcast %84 : vector<256x1xi1> to vector<256x16xi1>
    %86 = vector.broadcast %cst_29 : f32 to vector<256x16xf32>
    %87 = arith.select %85, %81, %86 : vector<256x16xi1>, vector<256x16xf32>
    %88 = arith.addf %80, %87 : vector<256x16xf32>
    %89 = arith.truncf %88 : vector<256x16xf32> to vector<256x16xbf16>
    %c0_30 = arith.constant 0 : index
    %c0_31 = arith.constant 0 : index
    %90 = vector.load %arg5[%c0_30, %c0_31] : memref<256x128xbf16, #tpu.memory_space<vmem>>, vector<256x128xbf16>
    %c0_32 = arith.constant 0 : index
    %c0_33 = arith.constant 0 : index
    %91 = vector.load %arg6[%c0_32, %c0_33] : memref<256x128xbf16, #tpu.memory_space<vmem>>, vector<256x128xbf16>
    tpu.vector_store %arg6[%c0_32, %c0_33], %90 {strides = array<i32>} : memref<256x128xbf16, #tpu.memory_space<vmem>>, vector<256x128xbf16>,
    %c0_34 = arith.constant 0 : index
    %c8_35 = arith.constant 8 : index
    %92 = vector.load %arg6[%c0_34, %c8_35] : memref<256x128xbf16, #tpu.memory_space<vmem>>, vector<256x16xbf16>
    tpu.vector_store %arg6[%c0_34, %c8_35], %89 {strides = array<i32>} : memref<256x128xbf16, #tpu.memory_space<vmem>>, vector<256x16xbf16>,
    %c0_36 = arith.constant 0 : index
    %c0_37 = arith.constant 0 : index
    %93 = vector.load %arg6[%c0_36, %c0_37] : memref<256x128xbf16, #tpu.memory_space<vmem>>, vector<256x128xbf16>
    %94 = arith.extf %93 : vector<256x128xbf16> to vector<256x128xf32>
    %cst_38 = arith.constant dense<0.000000e+00> : vector<128xf32>
    %95 = vector.multi_reduction <add>, %94, %cst_38 [0] : vector<256x128xf32> to vector<128xf32>
    %96 = vector.shape_cast %95 : vector<128xf32> to vector<1x128xf32>
    %97 = arith.mulf %94, %94 : vector<256x128xf32>
    %cst_39 = arith.constant dense<0.000000e+00> : vector<128xf32>
    %98 = vector.multi_reduction <add>, %97, %cst_39 [0] : vector<256x128xf32> to vector<128xf32>
    %99 = vector.shape_cast %98 : vector<128xf32> to vector<1x128xf32>
    %100 = tpu.concatenate %96, %99 in 0 : vector<1x128xf32>, vector<1x128xf32> -> vector<2x128xf32>
    %c0_40 = arith.constant 0 : index
    %c0_41 = arith.constant 0 : index
    %c0_42 = arith.constant 0 : index
    %101 = vector.load %arg7[%c0_40, %c0_41, %c0_42] : memref<1x2x128xf32, #tpu.memory_space<vmem>>, vector<1x2x128xf32>
    %102 = vector.shape_cast %101 : vector<1x2x128xf32> to vector<2x128xf32>
    %103 = vector.shape_cast %100 : vector<2x128xf32> to vector<1x2x128xf32>
    tpu.vector_store %arg7[%c0_40, %c0_41, %c0_42], %103 {strides = array<i32>} : memref<1x2x128xf32, #tpu.memory_space<vmem>>, vector<1x2x128xf32>,
    return
  }
  func.func @transform_0(%arg0: i32) -> (i32, i32) {
    %c0_i32 = arith.constant 0 : i32
    %c0_i32_0 = arith.constant 0 : i32
    return %arg0, %c0_i32 : i32, i32
  }
  func.func @transform_1(%arg0: i32) -> (i32, i32) {
    %c0_i32 = arith.constant 0 : i32
    %c0_i32_0 = arith.constant 0 : i32
    %c0_i32_1 = arith.constant 0 : i32
    return %c0_i32, %c0_i32_0 : i32, i32
  }
  func.func @transform_2(%arg0: i32) -> (i32, i32) {
    %c0_i32 = arith.constant 0 : i32
    %c0_i32_0 = arith.constant 0 : i32
    %c0_i32_1 = arith.constant 0 : i32
    return %c0_i32, %c0_i32_0 : i32, i32
  }
  func.func @transform_3(%arg0: i32) -> (i32, i32) {
    %c0_i32 = arith.constant 0 : i32
    %c0_i32_0 = arith.constant 0 : i32
    %c0_i32_1 = arith.constant 0 : i32
    return %c0_i32, %c0_i32_0 : i32, i32
  }
  func.func @transform_4(%arg0: i32) -> (i32, i32) {
    %c0_i32 = arith.constant 0 : i32
    %c0_i32_0 = arith.constant 0 : i32
    return %arg0, %c0_i32 : i32, i32
  }
  func.func @transform_5(%arg0: i32) -> (i32, i32) {
    %c0_i32 = arith.constant 0 : i32
    %c0_i32_0 = arith.constant 0 : i32
    return %arg0, %c0_i32 : i32, i32
  }
  func.func @transform_6(%arg0: i32) -> (i32, i32, i32) {
    %c0_i32 = arith.constant 0 : i32
    %c0_i32_0 = arith.constant 0 : i32
    %c0_i32_1 = arith.constant 0 : i32
    return %arg0, %c0_i32, %c0_i32_0 : i32, i32, i32
  }
}

module attributes {stable_mosaic.version = 11 : i64} {
  func.func @_bn_relu_conv3x3_concat_kernel(%arg0: i32, %arg1: memref<256x128xbf16, #tpu.memory_space<vmem>>, %arg2: memref<1x128xf32, #tpu.memory_space<vmem>>, %arg3: memref<1x128xf32, #tpu.memory_space<vmem>>, %arg4: memref<128x256xbf16, #tpu.memory_space<vmem>>, %arg5: memref<256x128xbf16, #tpu.memory_space<vmem>>, %arg6: memref<256x128xbf16, #tpu.memory_space<vmem>>, %arg7: memref<1x2x128xf32, #tpu.memory_space<vmem>>, %arg8: memref<304x256xf32, #tpu.memory_space<vmem>>) attributes {dimension_semantics = [#tpu.dimension_semantics<parallel>], iteration_bounds = array<i64: 2>, scalar_prefetch = 0 : i64, scratch_operands = 1 : i64, tpu.core_type = #tpu.core_type<tc>, window_params = [{transform_indices = @transform_0, window_bounds = array<i64: 256, 128>}, {pipeline_mode = #tpu.pipeline_mode<synchronous>, transform_indices = @transform_1, window_bounds = array<i64: 1, 128>}, {pipeline_mode = #tpu.pipeline_mode<synchronous>, transform_indices = @transform_2, window_bounds = array<i64: 1, 128>}, {pipeline_mode = #tpu.pipeline_mode<synchronous>, transform_indices = @transform_3, window_bounds = array<i64: 128, 256>}, {transform_indices = @transform_4, window_bounds = array<i64: 256, 128>}, {transform_indices = @transform_5, window_bounds = array<i64: 256, 128>}, {transform_indices = @transform_6, window_bounds = array<i64: 1, 2, 128>}]} {
    %c0 = arith.constant 0 : index
    %c0_0 = arith.constant 0 : index
    %0 = vector.load %arg1[%c0, %c0_0] : memref<256x128xbf16, #tpu.memory_space<vmem>>, vector<256x128xbf16>
    %1 = arith.extf %0 : vector<256x128xbf16> to vector<256x128xf32>
    %c0_1 = arith.constant 0 : index
    %c0_2 = arith.constant 0 : index
    %2 = vector.load %arg2[%c0_1, %c0_2] : memref<1x128xf32, #tpu.memory_space<vmem>>, vector<1x128xf32>
    %3 = vector.broadcast %2 : vector<1x128xf32> to vector<256x128xf32>
    %4 = arith.mulf %1, %3 : vector<256x128xf32>
    %c0_3 = arith.constant 0 : index
    %c0_4 = arith.constant 0 : index
    %5 = vector.load %arg3[%c0_3, %c0_4] : memref<1x128xf32, #tpu.memory_space<vmem>>, vector<1x128xf32>
    %6 = vector.broadcast %5 : vector<1x128xf32> to vector<256x128xf32>
    %7 = arith.addf %4, %6 : vector<256x128xf32>
    %cst = arith.constant 0.000000e+00 : f32
    %8 = vector.broadcast %cst : f32 to vector<256x128xf32>
    %9 = arith.maximumf %7, %8 : vector<256x128xf32>
    %10 = arith.truncf %9 : vector<256x128xf32> to vector<256x128xbf16>
    %c0_5 = arith.constant 0 : index
    %c0_6 = arith.constant 0 : index
    %11 = vector.load %arg4[%c0_5, %c0_6] : memref<128x256xbf16, #tpu.memory_space<vmem>>, vector<128x256xbf16>
    %cst_7 = arith.constant dense<0.000000e+00> : vector<256x256xf32>
    %12 = tpu.matmul %10, %11, %cst_7 {dimension_numbers = #tpu.dot_dimension_numbers<[1], [0], [0], [1], [0, 0, 1, 1], [], []>} : vector<256x128xbf16>, vector<128x256xbf16>, vector<256x256xf32> -> vector<256x256xf32>
    %cst_8 = arith.constant 0.000000e+00 : f32
    %13 = vector.broadcast %cst_8 : f32 to vector<24x256xf32>
    %c0_9 = arith.constant 0 : index
    %c0_10 = arith.constant 0 : index
    %14 = vector.load %arg8[%c0_9, %c0_10] : memref<304x256xf32, #tpu.memory_space<vmem>>, vector<24x256xf32>
    tpu.vector_store %arg8[%c0_9, %c0_10], %13 {strides = array<i32>} : memref<304x256xf32, #tpu.memory_space<vmem>>, vector<24x256xf32>,
    %c280 = arith.constant 280 : index
    %c0_11 = arith.constant 0 : index
    %15 = vector.load %arg8[%c280, %c0_11] : memref<304x256xf32, #tpu.memory_space<vmem>>, vector<24x256xf32>
    tpu.vector_store %arg8[%c280, %c0_11], %13 {strides = array<i32>} : memref<304x256xf32, #tpu.memory_space<vmem>>, vector<24x256xf32>,
    %c24 = arith.constant 24 : index
    %c0_12 = arith.constant 0 : index
    %16 = vector.load %arg8[%c24, %c0_12] : memref<304x256xf32, #tpu.memory_space<vmem>>, vector<256x256xf32>
    tpu.vector_store %arg8[%c24, %c0_12], %12 {strides = array<i32>} : memref<304x256xf32, #tpu.memory_space<vmem>>, vector<256x256xf32>,
    %17 = tpu.iota {dimensions = array<i32: 0>} : vector<256x1xi32>
    %c16_i32 = arith.constant 16 : i32
    %c0_i32 = arith.constant 0 : i32
    %18 = arith.cmpi eq, %c16_i32, %c0_i32 : i32
    %c1_i32 = arith.constant 1 : i32
    %19 = arith.select %18, %c1_i32, %c16_i32 : i32
    %20 = vector.broadcast %19 : i32 to vector<256x1xi32>
    %21 = arith.remsi %17, %20 : vector<256x1xi32>
    %c0_i32_13 = arith.constant 0 : i32
    %22 = vector.broadcast %c0_i32_13 : i32 to vector<256x1xi32>
    %23 = arith.cmpi ne, %21, %22 : vector<256x1xi32>
    %c0_i32_14 = arith.constant 0 : i32
    %24 = vector.broadcast %c0_i32_14 : i32 to vector<256x1xi32>
    %25 = arith.cmpi slt, %21, %24 : vector<256x1xi32>
    %c0_i32_15 = arith.constant 0 : i32
    %26 = arith.cmpi slt, %19, %c0_i32_15 : i32
    %27 = vector.broadcast %26 : i1 to vector<256x1xi1>
    %28 = vector.broadcast %27 : vector<256x1xi1> to vector<256x1xi1>
    %29 = arith.xori %25, %28 : vector<256x1xi1>
    %30 = arith.andi %29, %23 : vector<256x1xi1>
    %31 = vector.broadcast %19 : i32 to vector<256x1xi32>
    %32 = arith.addi %21, %31 : vector<256x1xi32>
    %33 = arith.select %30, %32, %21 : vector<256x1xi1>, vector<256x1xi32>
    %cst_16 = arith.constant 0.000000e+00 : f32
    %34 = vector.broadcast %cst_16 : f32 to vector<256x16xf32>
    %c7 = arith.constant 7 : index
    %c0_17 = arith.constant 0 : index
    %35 = vector.load %arg8[%c7, %c0_17] : memref<304x256xf32, #tpu.memory_space<vmem>>, vector<256x16xf32>
    %c1_i32_18 = arith.constant 1 : i32
    %36 = vector.broadcast %c1_i32_18 : i32 to vector<256x1xi32>
    %37 = arith.cmpi sge, %33, %36 : vector<256x1xi32>
    %cst_19 = arith.constant 0.000000e+00 : f32
    %38 = vector.shape_cast %37 : vector<256x1xi1> to vector<256x1xi1>
    %39 = vector.broadcast %38 : vector<256x1xi1> to vector<256x16xi1>
    %40 = vector.broadcast %cst_19 : f32 to vector<256x16xf32>
    %41 = arith.select %39, %35, %40 : vector<256x16xi1>, vector<256x16xf32>
    %42 = arith.addf %34, %41 : vector<256x16xf32>
    %c8 = arith.constant 8 : index
    %c16 = arith.constant 16 : index
    %43 = vector.load %arg8[%c8, %c16] : memref<304x256xf32, #tpu.memory_space<vmem>>, vector<256x16xf32>
    %44 = arith.addf %42, %43 : vector<256x16xf32>
    %c9 = arith.constant 9 : index
    %c32 = arith.constant 32 : index
    %45 = vector.load %arg8[%c9, %c32] : memref<304x256xf32, #tpu.memory_space<vmem>>, vector<256x16xf32>
    %c14_i32 = arith.constant 14 : i32
    %46 = vector.broadcast %c14_i32 : i32 to vector<256x1xi32>
    %47 = arith.cmpi sle, %33, %46 : vector<256x1xi32>
    %cst_20 = arith.constant 0.000000e+00 : f32
    %48 = vector.shape_cast %47 : vector<256x1xi1> to vector<256x1xi1>
    %49 = vector.broadcast %48 : vector<256x1xi1> to vector<256x16xi1>
    %50 = vector.broadcast %cst_20 : f32 to vector<256x16xf32>
    %51 = arith.select %49, %45, %50 : vector<256x16xi1>, vector<256x16xf32>
    %52 = arith.addf %44, %51 : vector<256x16xf32>
    %c23 = arith.constant 23 : index
    %c48 = arith.constant 48 : index
    %53 = vector.load %arg8[%c23, %c48] : memref<304x256xf32, #tpu.memory_space<vmem>>, vector<256x16xf32>
    %c1_i32_21 = arith.constant 1 : i32
    %54 = vector.broadcast %c1_i32_21 : i32 to vector<256x1xi32>
    %55 = arith.cmpi sge, %33, %54 : vector<256x1xi32>
    %cst_22 = arith.constant 0.000000e+00 : f32
    %56 = vector.shape_cast %55 : vector<256x1xi1> to vector<256x1xi1>
    %57 = vector.broadcast %56 : vector<256x1xi1> to vector<256x16xi1>
    %58 = vector.broadcast %cst_22 : f32 to vector<256x16xf32>
    %59 = arith.select %57, %53, %58 : vector<256x16xi1>, vector<256x16xf32>
    %60 = arith.addf %52, %59 : vector<256x16xf32>
    %c24_23 = arith.constant 24 : index
    %c64 = arith.constant 64 : index
    %61 = vector.load %arg8[%c24_23, %c64] : memref<304x256xf32, #tpu.memory_space<vmem>>, vector<256x16xf32>
    %62 = arith.addf %60, %61 : vector<256x16xf32>
    %c25 = arith.constant 25 : index
    %c80 = arith.constant 80 : index
    %63 = vector.load %arg8[%c25, %c80] : memref<304x256xf32, #tpu.memory_space<vmem>>, vector<256x16xf32>
    %c14_i32_24 = arith.constant 14 : i32
    %64 = vector.broadcast %c14_i32_24 : i32 to vector<256x1xi32>
    %65 = arith.cmpi sle, %33, %64 : vector<256x1xi32>
    %cst_25 = arith.constant 0.000000e+00 : f32
    %66 = vector.shape_cast %65 : vector<256x1xi1> to vector<256x1xi1>
    %67 = vector.broadcast %66 : vector<256x1xi1> to vector<256x16xi1>
    %68 = vector.broadcast %cst_25 : f32 to vector<256x16xf32>
    %69 = arith.select %67, %63, %68 : vector<256x16xi1>, vector<256x16xf32>
    %70 = arith.addf %62, %69 : vector<256x16xf32>
    %c39 = arith.constant 39 : index
    %c96 = arith.constant 96 : index
    %71 = vector.load %arg8[%c39, %c96] : memref<304x256xf32, #tpu.memory_space<vmem>>, vector<256x16xf32>
    %c1_i32_26 = arith.constant 1 : i32
    %72 = vector.broadcast %c1_i32_26 : i32 to vector<256x1xi32>
    %73 = arith.cmpi sge, %33, %72 : vector<256x1xi32>
    %cst_27 = arith.constant 0.000000e+00 : f32
    %74 = vector.shape_cast %73 : vector<256x1xi1> to vector<256x1xi1>
    %75 = vector.broadcast %74 : vector<256x1xi1> to vector<256x16xi1>
    %76 = vector.broadcast %cst_27 : f32 to vector<256x16xf32>
    %77 = arith.select %75, %71, %76 : vector<256x16xi1>, vector<256x16xf32>
    %78 = arith.addf %70, %77 : vector<256x16xf32>
    %c40 = arith.constant 40 : index
    %c112 = arith.constant 112 : index
    %79 = vector.load %arg8[%c40, %c112] : memref<304x256xf32, #tpu.memory_space<vmem>>, vector<256x16xf32>
    %80 = arith.addf %78, %79 : vector<256x16xf32>
    %c41 = arith.constant 41 : index
    %c128 = arith.constant 128 : index
    %81 = vector.load %arg8[%c41, %c128] : memref<304x256xf32, #tpu.memory_space<vmem>>, vector<256x16xf32>
    %c14_i32_28 = arith.constant 14 : i32
    %82 = vector.broadcast %c14_i32_28 : i32 to vector<256x1xi32>
    %83 = arith.cmpi sle, %33, %82 : vector<256x1xi32>
    %cst_29 = arith.constant 0.000000e+00 : f32
    %84 = vector.shape_cast %83 : vector<256x1xi1> to vector<256x1xi1>
    %85 = vector.broadcast %84 : vector<256x1xi1> to vector<256x16xi1>
    %86 = vector.broadcast %cst_29 : f32 to vector<256x16xf32>
    %87 = arith.select %85, %81, %86 : vector<256x16xi1>, vector<256x16xf32>
    %88 = arith.addf %80, %87 : vector<256x16xf32>
    %89 = arith.truncf %88 : vector<256x16xf32> to vector<256x16xbf16>
    %c0_30 = arith.constant 0 : index
    %c0_31 = arith.constant 0 : index
    %90 = vector.load %arg5[%c0_30, %c0_31] : memref<256x128xbf16, #tpu.memory_space<vmem>>, vector<256x128xbf16>
    %c0_32 = arith.constant 0 : index
    %c0_33 = arith.constant 0 : index
    %91 = vector.load %arg6[%c0_32, %c0_33] : memref<256x128xbf16, #tpu.memory_space<vmem>>, vector<256x128xbf16>
    tpu.vector_store %arg6[%c0_32, %c0_33], %90 {strides = array<i32>} : memref<256x128xbf16, #tpu.memory_space<vmem>>, vector<256x128xbf16>,
    %c0_34 = arith.constant 0 : index
    %c24_35 = arith.constant 24 : index
    %92 = vector.load %arg6[%c0_34, %c24_35] : memref<256x128xbf16, #tpu.memory_space<vmem>>, vector<256x16xbf16>
    tpu.vector_store %arg6[%c0_34, %c24_35], %89 {strides = array<i32>} : memref<256x128xbf16, #tpu.memory_space<vmem>>, vector<256x16xbf16>,
    %c0_36 = arith.constant 0 : index
    %c0_37 = arith.constant 0 : index
    %93 = vector.load %arg6[%c0_36, %c0_37] : memref<256x128xbf16, #tpu.memory_space<vmem>>, vector<256x128xbf16>
    %94 = arith.extf %93 : vector<256x128xbf16> to vector<256x128xf32>
    %cst_38 = arith.constant dense<0.000000e+00> : vector<128xf32>
    %95 = vector.multi_reduction <add>, %94, %cst_38 [0] : vector<256x128xf32> to vector<128xf32>
    %96 = vector.shape_cast %95 : vector<128xf32> to vector<1x128xf32>
    %97 = arith.mulf %94, %94 : vector<256x128xf32>
    %cst_39 = arith.constant dense<0.000000e+00> : vector<128xf32>
    %98 = vector.multi_reduction <add>, %97, %cst_39 [0] : vector<256x128xf32> to vector<128xf32>
    %99 = vector.shape_cast %98 : vector<128xf32> to vector<1x128xf32>
    %100 = tpu.concatenate %96, %99 in 0 : vector<1x128xf32>, vector<1x128xf32> -> vector<2x128xf32>
    %c0_40 = arith.constant 0 : index
    %c0_41 = arith.constant 0 : index
    %c0_42 = arith.constant 0 : index
    %101 = vector.load %arg7[%c0_40, %c0_41, %c0_42] : memref<1x2x128xf32, #tpu.memory_space<vmem>>, vector<1x2x128xf32>
    %102 = vector.shape_cast %101 : vector<1x2x128xf32> to vector<2x128xf32>
    %103 = vector.shape_cast %100 : vector<2x128xf32> to vector<1x2x128xf32>
    tpu.vector_store %arg7[%c0_40, %c0_41, %c0_42], %103 {strides = array<i32>} : memref<1x2x128xf32, #tpu.memory_space<vmem>>, vector<1x2x128xf32>,
    return
  }
  func.func @transform_0(%arg0: i32) -> (i32, i32) {
    %c0_i32 = arith.constant 0 : i32
    %c0_i32_0 = arith.constant 0 : i32
    return %arg0, %c0_i32 : i32, i32
  }
  func.func @transform_1(%arg0: i32) -> (i32, i32) {
    %c0_i32 = arith.constant 0 : i32
    %c0_i32_0 = arith.constant 0 : i32
    %c0_i32_1 = arith.constant 0 : i32
    return %c0_i32, %c0_i32_0 : i32, i32
  }
  func.func @transform_2(%arg0: i32) -> (i32, i32) {
    %c0_i32 = arith.constant 0 : i32
    %c0_i32_0 = arith.constant 0 : i32
    %c0_i32_1 = arith.constant 0 : i32
    return %c0_i32, %c0_i32_0 : i32, i32
  }
  func.func @transform_3(%arg0: i32) -> (i32, i32) {
    %c0_i32 = arith.constant 0 : i32
    %c0_i32_0 = arith.constant 0 : i32
    %c0_i32_1 = arith.constant 0 : i32
    return %c0_i32, %c0_i32_0 : i32, i32
  }
  func.func @transform_4(%arg0: i32) -> (i32, i32) {
    %c0_i32 = arith.constant 0 : i32
    %c0_i32_0 = arith.constant 0 : i32
    return %arg0, %c0_i32 : i32, i32
  }
  func.func @transform_5(%arg0: i32) -> (i32, i32) {
    %c0_i32 = arith.constant 0 : i32
    %c0_i32_0 = arith.constant 0 : i32
    return %arg0, %c0_i32 : i32, i32
  }
  func.func @transform_6(%arg0: i32) -> (i32, i32, i32) {
    %c0_i32 = arith.constant 0 : i32
    %c0_i32_0 = arith.constant 0 : i32
    %c0_i32_1 = arith.constant 0 : i32
    return %arg0, %c0_i32, %c0_i32_0 : i32, i32, i32
  }
}

</mosaic_0001>

<bundles_post_ra>
// kernel: dense_block_forward.4
= control target key start
LH: loop header
LB: loop body
LE: loop exit
PB: predicated region body
PF: predicated region fallthrough
CT: control target
= control target key end

     0   :  { %vm1325_vm0 = vcmask 1040384   ;;  %s2469_s3 = inlined_call_operand.vmem [shape: bf16[128,128], index: 3, kind: input, shape index: {}]   ;;  %s2470_s0 = inlined_call_operand.vmem [shape: bf16[512,128], index: 0, kind: input, shape index: {}]   ;;  %s2471_s1 = inlined_call_operand.vmem [shape: f32[1,128], index: 1, kind: input, shape index: {}]   ;;  %s2472_s2 = inlined_call_operand.vmem [shape: f32[1,128], index: 2, kind: input, shape index: {}]   ;;  %s2473_s4 = inlined_call_operand.vmem [shape: bf16[512,128], index: 4, kind: output, shape index: {0}]   ;;  %s2474_s5 = inlined_call_operand.vmem [shape: f32[1,2,128], index: 5, kind: output, shape index: {1}]  }
   0x1   :  { %v1960_v0 = vld [vmem:[%s2469_s3 + $0x38] sm:$0xff]   ;;  %v1961_v1 = vld [vmem:[%s2469_s3 + $0x30] sm:$0xff]   ;;  %v1962_v2 = vld [vmem:[%s2469_s3 + $0x28] sm:$0xff]  }
   0x2   :  { %1864 = vmatprep.subr.bf16.mxu0 %v1960_v0  ;;  %1944 = vmatprep.subr.bf16.mxu1 %v1960_v0  ;;  %v1963_v3 = vld [vmem:[%s2469_s3 + $0x20] sm:$0xff]   ;;  %v1762_v8 = vld [vmem:[%s2470_s0 + $0x8] sm:$0xff]   ;;  %v1763_v9 = vld [vmem:[%s2470_s0 + $0x10] sm:$0xff]  }
   0x3   :  { %1865 = vmatpush3.bf16.msra.mxu0 %v1960_v0  ;;  %1952 = vmatpush3.bf16.msra.mxu1 %v1960_v0  ;;  %v1475_v4 = vld [vmem:[%s2470_s0] sm:$0xff]   ;;  %v1964_v13 = vld [vmem:[%s2469_s3 + $0x18] sm:$0xff]   ;;  %v1480_v14 = vunpack.c.l.bf16 %v1762_v8  ;;  %v1481_v15 = vunpack.c.h.bf16 %v1762_v8  ;;  %v1484_v16 = vunpack.c.l.bf16 %v1763_v9  ;;  %v1485_v19 = vunpack.c.h.bf16 %v1763_v9  ;;  %v1965_v22 = vld [vmem:[%s2469_s3 + $0x10] sm:$0xff]  }
   0x4   :  { %1866 = vmatprep.subr.bf16.mxu0 %v1961_v1  ;;  %1945 = vmatprep.subr.bf16.mxu1 %v1961_v1  ;;  %v2016_v5 = vld [vmem:[%s2471_s1] ss:$0 sm:$0xff]  ;;  %v1476_v6 = vunpack.c.l.bf16 %v1475_v4  ;;  %v1477_v7 = vunpack.c.h.bf16 %v1475_v4  ;;  %v1764_v26 = vld [vmem:[%s2470_s0 + $0x18] sm:$0xff]   ;;  %v1966_v31 = vld [vmem:[%s2469_s3 + $0x8] sm:$0xff]  }
   0x5   :  { %v2027_v10 = vld [vmem:[%s2472_s2] ss:$0 sm:$0xff]  ;;  %v157_v23 = vmul.f32 %v1480_v14, %v2016_v5  ;;  %v158_v24 = vmul.f32 %v1481_v15, %v2016_v5  ;;  %v159_v25 = vmul.f32 %v1484_v16, %v2016_v5  ;;  %v160_v28 = vmul.f32 %v1485_v19, %v2016_v5  ;;  %v1766_v38 = vld [vmem:[%s2470_s0 + $0x28] sm:$0xff]   ;;  %v1767_v41 = vld [vmem:[%s2470_s0 + $0x30] sm:$0xff]  }
   0x6   :  { %v155_v11 = vmul.f32 %v1476_v6, %v2016_v5  ;;  %v156_v12 = vmul.f32 %v1477_v7, %v2016_v5  ;;  %v1765_v29 = vld [vmem:[%s2470_s0 + $0x20] sm:$0xff]   ;;  %v1488_v30 = vunpack.c.l.bf16 %v1764_v26  ;;  %v1489_v35 = vunpack.c.h.bf16 %v1764_v26  ;;  %v1768_v42 = vld [vmem:[%s2470_s0 + $0x38] sm:$0xff]   ;;  %v1770_v63 = vld [vmem:[%s2470_s0 + $0x48] sm:$0xff]  }
   0x7   :  { %1867 = vmatpush3.bf16.msra.mxu0 %v1961_v1  ;;  %1953 = vmatpush3.bf16.msra.mxu1 %v1961_v1  ;;  %v228_v32 = vadd.f32 %v2027_v10, %v157_v23  ;;  %v229_v33 = vadd.f32 %v2027_v10, %v158_v24  ;;  %v230_v34 = vadd.f32 %v2027_v10, %v159_v25  ;;  %v1492_v37 = vunpack.c.l.bf16 %v1765_v29  ;;  %v1967_v43 = vld [vmem:[%s2469_s3] sm:$0xff]   ;;  %v1771_v4 = vld [vmem:[%s2470_s0 + $0x50] sm:$0xff]   ;;  %v1772_v23 = vld [vmem:[%s2470_s0 + $0x58] sm:$0xff]  }
   0x8   :  { %1868 = vmatprep.subr.bf16.mxu0 %v1962_v2  ;;  %1946 = vmatprep.subr.bf16.mxu1 %v1962_v2  ;;  %v226_v17 = vadd.f32 %v2027_v10, %v155_v11  ;;  %v227_v18 = vadd.f32 %v2027_v10, %v156_v12  ;;  %v231_v36 = vadd.f32 %v2027_v10, %v160_v28  ;;  %v1493_v40 = vunpack.c.h.bf16 %v1765_v29  ;;  %v1769_v48 = vld [vmem:[%s2470_s0 + $0x40] sm:$0xff]  }
   0x9   :  { %v161_v39 = vmul.f32 %v1488_v30, %v2016_v5  ;;  %v292_v44 = vmax.f32 %v228_v32, 0.0  ;;  %v293_v45 = vmax.f32 %v229_v33, 0.0  ;;  %v294_v46 = vmax.f32 %v230_v34, 0.0 }
   0xa   :  { %v290_v20 = vmax.f32 %v226_v17, 0.0  ;;  %v291_v21 = vmax.f32 %v227_v18, 0.0  ;;  %v162_v47 = vmul.f32 %v1489_v35, %v2016_v5  ;;  %v295_v49 = vmax.f32 %v231_v36, 0.0 }
   0xb   :  { %1869 = vmatpush3.bf16.msra.mxu0 %v1962_v2  ;;  %1954 = vmatpush3.bf16.msra.mxu1 %v1962_v2  ;;  %v163_v50 = vmul.f32 %v1492_v37, %v2016_v5  ;;  %v1496_v51 = vunpack.c.l.bf16 %v1766_v38  ;;  %v1497_v52 = vunpack.c.h.bf16 %v1766_v38  ;;  %v1500_v53 = vunpack.c.l.bf16 %v1767_v41 }
   0xc   :  { %1870 = vmatprep.subr.bf16.mxu0 %v1963_v3  ;;  %1947 = vmatprep.subr.bf16.mxu1 %v1963_v3  ;;  %v354_v27 = vpack.c.bf16 %v291_v21, %v290_v20  ;;  %v1501_v54 = vunpack.c.h.bf16 %v1767_v41  ;;  %v1504_v55 = vunpack.c.l.bf16 %v1768_v42  ;;  %v1505_v56 = vunpack.c.h.bf16 %v1768_v42 }
   0xd   :  { %v164_v57 = vmul.f32 %v1493_v40, %v2016_v5  ;;  %v1508_v58 = vunpack.c.l.bf16 %v1769_v48  ;;  %v1509_v59 = vunpack.c.h.bf16 %v1769_v48  ;;  %v355_v60 = vpack.c.bf16 %v293_v45, %v292_v44  ;;  %v1777_v44 = vld [vmem:[%s2470_s0 + $0x80] sm:$0xff]  }
   0xe   :  { %1880 = vmatprep.mubr.bf16.mxu0 %v354_v27  ;;  %v232_v61 = vadd.f32 %v2027_v10, %v161_v39  ;;  %v233_v62 = vadd.f32 %v2027_v10, %v162_v47  ;;  %v356_v0 = vpack.c.bf16 %v295_v49, %v294_v46  ;;  %v234_v1 = vadd.f32 %v2027_v10, %v163_v50 }
   0xf   :  { %1871 = vmatpush3.bf16.msra.mxu0 %v1963_v3  ;;  %1955 = vmatpush3.bf16.msra.mxu1 %v1963_v3  ;;  %v165_v2 = vmul.f32 %v1496_v51, %v2016_v5  ;;  %v166_v3 = vmul.f32 %v1497_v52, %v2016_v5  ;;  %v167_v6 = vmul.f32 %v1500_v53, %v2016_v5  ;;  %v1512_v14 = vunpack.c.l.bf16 %v1770_v63  ;;  %v2120_v52 = vld [vmem:[%s2470_s0 + $0x60] sm:$0xff]  }
  0x10   :  { %1872 = vmatprep.subr.bf16.mxu0 %v1964_v13  ;;  %1948 = vmatprep.subr.bf16.mxu1 %v1964_v13  ;;  %v168_v7 = vmul.f32 %v1501_v54, %v2016_v5  ;;  %v169_v8 = vmul.f32 %v1504_v55, %v2016_v5  ;;  %v170_v9 = vmul.f32 %v1505_v56, %v2016_v5  ;;  %v296_v15 = vmax.f32 %v232_v61, 0.0 }
  0x11   :  { %v235_v11 = vadd.f32 %v2027_v10, %v164_v57  ;;  %v171_v12 = vmul.f32 %v1508_v58, %v2016_v5  ;;  %v297_v16 = vmax.f32 %v233_v62, 0.0  ;;  %v1513_v17 = vunpack.c.h.bf16 %v1770_v63 }
  0x12   :  { %v1516_v18 = vunpack.c.l.bf16 %v1771_v4  ;;  %v298_v19 = vmax.f32 %v234_v1, 0.0  ;;  %v236_v20 = vadd.f32 %v2027_v10, %v165_v2  ;;  %v237_v21 = vadd.f32 %v2027_v10, %v166_v3 }
  0x13   :  { %1873 = vmatpush3.bf16.msra.mxu0 %v1964_v13  ;;  %1956 = vmatpush3.bf16.msra.mxu1 %v1964_v13  ;;  %v172_v13 = vmul.f32 %v1509_v59, %v2016_v5  ;;  %v238_v24 = vadd.f32 %v2027_v10, %v167_v6  ;;  %v239_v25 = vadd.f32 %v2027_v10, %v168_v7  ;;  %v299_v28 = vmax.f32 %v235_v11, 0.0  ;;  %v1778_v59 = vld [vmem:[%s2470_s0 + $0x88] sm:$0xff]   ;;  %v1780_v11 = vld [vmem:[%s2470_s0 + $0x98] sm:$0xff]  }
  0x14   :  { %1874 = vmatprep.subr.bf16.mxu0 %v1965_v22  ;;  %1949 = vmatprep.subr.bf16.mxu1 %v1965_v22  ;;  %v240_v26 = vadd.f32 %v2027_v10, %v169_v8  ;;  %v241_v27 = vadd.f32 %v2027_v10, %v170_v9  ;;  %v242_v29 = vadd.f32 %v2027_v10, %v171_v12  ;;  %v1520_v35 = vunpack.c.l.bf16 %v1772_v23 }
  0x15   :  { %v243_v30 = vadd.f32 %v2027_v10, %v172_v13  ;;  %v357_v32 = vpack.c.bf16 %v297_v16, %v296_v15  ;;  %v174_v33 = vmul.f32 %v1513_v17, %v2016_v5  ;;  %v175_v34 = vmul.f32 %v1516_v18, %v2016_v5 }
  0x16   :  { %v300_v36 = vmax.f32 %v236_v20, 0.0  ;;  %v301_v37 = vmax.f32 %v237_v21, 0.0  ;;  %v1521_v39 = vunpack.c.h.bf16 %v1772_v23  ;;  %v302_v40 = vmax.f32 %v238_v24, 0.0  ;;  %v1781_v24 = vld [vmem:[%s2470_s0 + $0xa0] sm:$0xff]  }
  0x17   :  { %1875 = vmatpush3.bf16.msra.mxu0 %v1965_v22  ;;  %1957 = vmatpush3.bf16.msra.mxu1 %v1965_v22  ;;  %v1517_v22 = vunpack.c.h.bf16 %v1771_v4  ;;  %v303_v41 = vmax.f32 %v239_v25, 0.0  ;;  %v304_v42 = vmax.f32 %v240_v26, 0.0  ;;  %v358_v45 = vpack.c.bf16 %v299_v28, %v298_v19 }
  0x18   :  { %1876 = vmatprep.subr.bf16.mxu0 %v1966_v31  ;;  %1950 = vmatprep.subr.bf16.mxu1 %v1966_v31  ;;  %v306_v46 = vmax.f32 %v242_v29, 0.0  ;;  %v307_v47 = vmax.f32 %v243_v30, 0.0  ;;  %v245_v49 = vadd.f32 %v2027_v10, %v174_v33  ;;  %v2114_v50 = vadd.f32 %v2027_v10, %v175_v34  ;;  %v1782_v33 = vld [vmem:[%s2470_s0 + $0xa8] sm:$0xff]  }
  0x19   :  { %v176_v38 = vmul.f32 %v1517_v22, %v2016_v5  ;;  %v177_v51 = vmul.f32 %v1520_v35, %v2016_v5  ;;  %v178_v54 = vmul.f32 %v1521_v39, %v2016_v5  ;;  %v1540_v55 = vunpack.c.l.bf16 %v1777_v44 }
  0x1a   :  { %v359_v56 = vpack.c.bf16 %v301_v37, %v300_v36  ;;  %v360_v57 = vpack.c.bf16 %v303_v41, %v302_v40  ;;  %v1524_v62 = vunpack.c.l.bf16 %v2120_v52  ;;  %v1541_v63 = vunpack.c.h.bf16 %v1777_v44 }
  0x1b   :  { %1877 = vmatpush3.bf16.msra.mxu0 %v1966_v31  ;;  %1958 = vmatpush3.bf16.msra.mxu1 %v1966_v31  ;;  %v173_v31 = vmul.f32 %v1512_v14, %v2016_v5  ;;  %v2123_v53 = vadd.f32 %v2027_v10, %v176_v38  ;;  %v309_v1 = vmax.f32 %v245_v49, 0.0  ;;  %v310_v2 = vmax.f32 %v2114_v50, 0.0 }
  0x1c   :  { %1878 = vmatprep.subr.bf16.mxu0 %v1967_v43  ;;  %1951 = vmatprep.subr.bf16.mxu1 %v1967_v43  ;;  %v2139_v3 = vadd.f32 %v2027_v10, %v177_v51  ;;  %v187_v4 = vmul.f32 %v1540_v55, %v2016_v5  ;;  %v2144_v7 = vadd.f32 %v2027_v10, %v178_v54  ;;  %v1544_v9 = vunpack.c.l.bf16 %v1778_v59 }
  0x1d   :  { %v244_v48 = vadd.f32 %v2027_v10, %v173_v31  ;;  %v311_v6 = vmax.f32 %v2123_v53, 0.0  ;;  %v188_v8 = vmul.f32 %v1541_v63, %v2016_v5  ;;  %v1525_v12 = vunpack.c.h.bf16 %v2120_v52 }
  0x1e   :  { %v258_v13 = vadd.f32 %v2027_v10, %v187_v4  ;;  %v1545_v14 = vunpack.c.h.bf16 %v1778_v59  ;;  %v2153_v16 = vmul.f32 %v1524_v62, %v2016_v5  ;;  %v189_v18 = vmul.f32 %v1544_v9, %v2016_v5 }
  0x1f   :  { %1879 = vmatpush3.bf16.msra.mxu0 %v1967_v43  ;;  %1959 = vmatpush3.bf16.msra.mxu1 %v1967_v43  ;;  %v305_v43 = vmax.f32 %v241_v27, 0.0  ;;  %v308_v61 = vmax.f32 %v244_v48, 0.0  ;;  %v259_v17 = vadd.f32 %v2027_v10, %v188_v8  ;;  %v1552_v23 = vunpack.c.l.bf16 %v1780_v11 }
  0x20   :  { %v322_v20 = vmax.f32 %v258_v13, 0.0  ;;  %v190_v21 = vmul.f32 %v1545_v14, %v2016_v5  ;;  %v260_v27 = vadd.f32 %v2027_v10, %v189_v18  ;;  %v1553_v31 = vunpack.c.h.bf16 %v1780_v11  ;;  %v1785_v18 = vld [vmem:[%s2470_s0 + $0xc0] sm:$0xff]  }
  0x21   :  { %v2126_v58 = vpack.c.bf16 %v305_v43, %v304_v42  ;;  %v2162_v25 = vpack.c.bf16 %v309_v1, %v308_v61  ;;  %v323_v26 = vmax.f32 %v259_v17, 0.0  ;;  %v1556_v37 = vunpack.c.l.bf16 %v1781_v24  ;;  %v1784_v1 = vld [vmem:[%s2470_s0 + $0xb8] sm:$0xff]  }
  0x22   :  { %1881 = vmatmul.mubr.bf16.vlgmr.msra.gmra.mxu0 %v355_v60  ;;  %v2131_v60 = vpack.c.bf16 %v307_v47, %v306_v46  ;;  %v261_v29 = vadd.f32 %v2027_v10, %v190_v21  ;;  %v324_v35 = vmax.f32 %v260_v27, 0.0  ;;  %v194_v40 = vmul.f32 %v1553_v31, %v2016_v5  ;;  %v1783_v46 = vld [vmem:[%s2470_s0 + $0xb0] sm:$0xff]   ;;  %v1774_v47 = vld [vmem:[%s2470_s0 + $0x68] sm:$0xff]  }
  0x23   :  { %1884 = vmatprep.mubr.bf16.mxu0 %v356_v0  ;;  %v1779_v0 = vld [vmem:[%s2470_s0 + $0x90] sm:$0xff]   ;;  %v370_v34 = vpack.c.bf16 %v323_v26, %v322_v20  ;;  %v1557_v43 = vunpack.c.h.bf16 %v1781_v24  ;;  %v195_v44 = vmul.f32 %v1556_v37, %v2016_v5  ;;  %v1561_v54 = vunpack.c.h.bf16 %v1782_v33 }
  0x24   :  { %v1548_v15 = vunpack.c.l.bf16 %v1779_v0  ;;  %v1549_v19 = vunpack.c.h.bf16 %v1779_v0  ;;  %v325_v38 = vmax.f32 %v261_v29, 0.0  ;;  %v265_v49 = vadd.f32 %v2027_v10, %v194_v40  ;;  %v1787_v40 = vld [vmem:[%s2470_s0 + $0xd0] sm:$0xff]  }
  0x25   :  { %1912 = vmatprep.mubr.bf16.mxu1 %v370_v34  ;;  %v198_v62 = vmul.f32 %v1561_v54, %v2016_v5  ;;  %v1564_v63 = vunpack.c.l.bf16 %v1783_v46  ;;  %v1565_v0 = vunpack.c.h.bf16 %v1783_v46  ;;  %v312_v4 = vmax.f32 %v2139_v3, 0.0 }
  0x26   :  { %v191_v22 = vmul.f32 %v1548_v15, %v2016_v5  ;;  %v192_v28 = vmul.f32 %v1549_v19, %v2016_v5  ;;  %v371_v48 = vpack.c.bf16 %v325_v38, %v324_v35  ;;  %v329_v61 = vmax.f32 %v265_v49, 0.0 }
  0x27   :  { %v1528_v8 = vunpack.c.l.bf16 %v1774_v47  ;;  %v313_v13 = vmax.f32 %v2144_v7, 0.0  ;;  %v1529_v14 = vunpack.c.h.bf16 %v1774_v47  ;;  %v199_v15 = vmul.f32 %v1564_v63, %v2016_v5 }
  0x28   :  { %v262_v30 = vadd.f32 %v2027_v10, %v191_v22  ;;  %v263_v36 = vadd.f32 %v2027_v10, %v192_v28  ;;  %1913 = vmatmul.mubr.bf16.vlgmr.msra.gmra.mxu1 %v371_v48  ;;  %v200_v17 = vmul.f32 %v1565_v0, %v2016_v5  ;;  %v180_v3 = vmul.f32 %v1525_v12, %v2016_v5 }
  0x29   :  { %v1568_v19 = vunpack.c.l.bf16 %v1784_v1  ;;  %v1569_v20 = vunpack.c.h.bf16 %v1784_v1  ;;  %v270_v24 = vadd.f32 %v2027_v10, %v199_v15  ;;  %v1572_v27 = vunpack.c.l.bf16 %v1785_v18  ;;  %v1788_v15 = vld [vmem:[%s2470_s0 + $0xd8] sm:$0xff]  }
  0x2a   :  { %1885 = vmatmul.mubr.bf16.gmra.mxu0 %v357_v32  ;;  %v193_v32 = vmul.f32 %v1552_v23, %v2016_v5  ;;  %v326_v39 = vmax.f32 %v262_v30, 0.0  ;;  %v327_v42 = vmax.f32 %v263_v36, 0.0  ;;  %v269_v23 = vadd.f32 %v2027_v10, %v198_v62 }
  0x2b   :  { %1888 = vmatprep.mubr.bf16.mxu0 %v358_v45  ;;  %v1560_v45 = vunpack.c.l.bf16 %v1782_v33  ;;  %v1573_v52 = vunpack.c.h.bf16 %v1785_v18  ;;  %v364_v12 = vpack.c.bf16 %v311_v6, %v310_v2  ;;  %v250_v28 = vadd.f32 %v2027_v10, %v2153_v16  ;;  %v1776_v33 = vld [vmem:[%s2470_s0 + $0x78] sm:$0xff]   ;;  %v1786_v16 = vld [vmem:[%s2470_s0 + $0xc8] sm:$0xff]  }
  0x2c   :  { %v264_v41 = vadd.f32 %v2027_v10, %v193_v32  ;;  %v372_v55 = vpack.c.bf16 %v327_v42, %v326_v39  ;;  %v251_v31 = vadd.f32 %v2027_v10, %v180_v3  ;;  %v181_v32 = vmul.f32 %v1528_v8, %v2016_v5 }
  0x2d   :  { %v197_v59 = vmul.f32 %v1560_v45, %v2016_v5  ;;  %v201_v34 = vmul.f32 %v1568_v19, %v2016_v5  ;;  %v202_v50 = vmul.f32 %v1569_v20, %v2016_v5  ;;  %v365_v35 = vpack.c.bf16 %v313_v13, %v312_v4 }
  0x2e   :  { %v328_v51 = vmax.f32 %v264_v41, 0.0  ;;  %1916 = vmatprep.mubr.bf16.mxu1 %v372_v55  ;;  %v182_v53 = vmul.f32 %v1529_v14, %v2016_v5  ;;  %v333_v6 = vmax.f32 %v269_v23, 0.0  ;;  %v334_v36 = vmax.f32 %v270_v24, 0.0 }
  0x2f   :  { %v268_v22 = vadd.f32 %v2027_v10, %v197_v59  ;;  %v203_v38 = vmul.f32 %v1572_v27, %v2016_v5  ;;  %v204_v39 = vmul.f32 %v1573_v52, %v2016_v5  ;;  %v314_v41 = vmax.f32 %v250_v28, 0.0 }
  0x30   :  { %v373_v21 = vpack.c.bf16 %v329_v61, %v328_v51  ;;  %v315_v45 = vmax.f32 %v251_v31, 0.0  ;;  %v272_v46 = vadd.f32 %v2027_v10, %v201_v34  ;;  %v273_v47 = vadd.f32 %v2027_v10, %v202_v50 }
  0x31   :  { %v332_v2 = vmax.f32 %v268_v22, 0.0  ;;  %v1576_v48 = vunpack.c.l.bf16 %v1786_v16  ;;  %v1577_v51 = vunpack.c.h.bf16 %v1786_v16  ;;  %v1580_v54 = vunpack.c.l.bf16 %v1787_v40 }
  0x32   :  { %1889 = vmatmul.mubr.bf16.gmra.mxu0 %v359_v56  ;;  %v196_v56 = vmul.f32 %v1557_v43, %v2016_v5  ;;  %1917 = vmatmul.mubr.bf16.gmra.mxu1 %v373_v21  ;;  %v1581_v55 = vunpack.c.h.bf16 %v1787_v40  ;;  %v275_v59 = vadd.f32 %v2027_v10, %v204_v39  ;;  %v253_v61 = vadd.f32 %v2027_v10, %v182_v53  ;;  %v1789_v21 = vld [vmem:[%s2470_s0 + $0xe0] sm:$0xff]  }
  0x33   :  { %1892 = vmatprep.mubr.bf16.mxu0 %v360_v57  ;;  %v266_v57 = vadd.f32 %v2027_v10, %v195_v44  ;;  %v1536_v44 = vunpack.c.l.bf16 %v1776_v33  ;;  %v375_v49 = vpack.c.bf16 %v333_v6, %v332_v2  ;;  %v1537_v0 = vunpack.c.h.bf16 %v1776_v33 }
  0x34   :  { %v267_v9 = vadd.f32 %v2027_v10, %v196_v56  ;;  %v252_v56 = vadd.f32 %v2027_v10, %v181_v32  ;;  %v366_v1 = vpack.c.bf16 %v315_v45, %v314_v41  ;;  %v336_v4 = vmax.f32 %v272_v46, 0.0  ;;  %v1791_v41 = vld [vmem:[%s2470_s0 + $0xf0] sm:$0xff]  }
  0x35   :  { %v330_v11 = vmax.f32 %v266_v57, 0.0  ;;  %v274_v57 = vadd.f32 %v2027_v10, %v203_v38  ;;  %v337_v8 = vmax.f32 %v273_v47, 0.0  ;;  %v207_v13 = vmul.f32 %v1580_v54, %v2016_v5 }
  0x36   :  { %v331_v7 = vmax.f32 %v267_v9, 0.0  ;;  %v205_v9 = vmul.f32 %v1576_v48, %v2016_v5  ;;  %v208_v14 = vmul.f32 %v1581_v55, %v2016_v5  ;;  %v339_v3 = vmax.f32 %v275_v59, 0.0 }
  0x37   :  { %v338_v18 = vmax.f32 %v274_v57, 0.0  ;;  %v186_v20 = vmul.f32 %v1537_v0, %v2016_v5  ;;  %v377_v23 = vpack.c.bf16 %v337_v8, %v336_v4  ;;  %v278_v27 = vadd.f32 %v2027_v10, %v207_v13 }
  0x38   :  { %v374_v26 = vpack.c.bf16 %v331_v7, %v330_v11  ;;  %v206_v11 = vmul.f32 %v1577_v51, %v2016_v5  ;;  %v317_v7 = vmax.f32 %v253_v61, 0.0  ;;  %v276_v24 = vadd.f32 %v2027_v10, %v205_v9 }
  0x39   :  { %v279_v52 = vadd.f32 %v2027_v10, %v208_v14  ;;  %v378_v28 = vpack.c.bf16 %v339_v3, %v338_v18  ;;  %v257_v33 = vadd.f32 %v2027_v10, %v186_v20  ;;  %v342_v2 = vmax.f32 %v278_v27, 0.0 }
  0x3a   :  { %1893 = vmatmul.mubr.bf16.gmra.mxu0 %v2126_v58  ;;  %v1775_v58 = vld [vmem:[%s2470_s0 + $0x70] sm:$0xff]   ;;  %1920 = vmatprep.mubr.bf16.mxu1 %v374_v26  ;;  %v1584_v26 = vunpack.c.l.bf16 %v1788_v15  ;;  %v340_v50 = vmax.f32 %v276_v24, 0.0  ;;  %v1596_v51 = vunpack.c.l.bf16 %v1791_v41  ;;  %v1597_v54 = vunpack.c.h.bf16 %v1791_v41 }
  0x3b   :  { %1896 = vmatprep.mubr.bf16.mxu0 %v2131_v60  ;;  %v271_v60 = vadd.f32 %v2027_v10, %v200_v17  ;;  %v1532_v29 = vunpack.c.l.bf16 %v1775_v58  ;;  %v1533_v30 = vunpack.c.h.bf16 %v1775_v58  ;;  %1921 = vmatmul.mubr.bf16.gmra.mxu1 %v375_v49  ;;  %v185_v17 = vmul.f32 %v1536_v44, %v2016_v5 }
  0x3c   :  { %v316_v58 = vmax.f32 %v252_v56, 0.0  ;;  %v343_v6 = vmax.f32 %v279_v52, 0.0  ;;  %v321_v40 = vmax.f32 %v257_v33, 0.0  ;;  %v216_v0 = vmul.f32 %v1597_v54, %v2016_v5 }
  0x3d   :  { %v335_v37 = vmax.f32 %v271_v60, 0.0  ;;  %v183_v42 = vmul.f32 %v1532_v29, %v2016_v5  ;;  %v184_v43 = vmul.f32 %v1533_v30, %v2016_v5  ;;  %v277_v60 = vadd.f32 %v2027_v10, %v206_v11 }
  0x3e   :  { %v1588_v29 = vunpack.c.l.bf16 %v1789_v21  ;;  %v1589_v30 = vunpack.c.h.bf16 %v1789_v21  ;;  %v367_v31 = vpack.c.bf16 %v317_v7, %v316_v58  ;;  %v256_v32 = vadd.f32 %v2027_v10, %v185_v17 }
  0x3f   :  { %v254_v62 = vadd.f32 %v2027_v10, %v183_v42  ;;  %v255_v63 = vadd.f32 %v2027_v10, %v184_v43  ;;  %v341_v53 = vmax.f32 %v277_v60, 0.0  ;;  %v380_v45 = vpack.c.bf16 %v343_v6, %v342_v2 }
  0x40   :  { %v212_v38 = vmul.f32 %v1589_v30, %v2016_v5  ;;  %v320_v39 = vmax.f32 %v256_v32, 0.0  ;;  %v287_v17 = vadd.f32 %v2027_v10, %v216_v0 }
  0x41   :  { %v318_v19 = vmax.f32 %v254_v62, 0.0  ;;  %v319_v22 = vmax.f32 %v255_v63, 0.0  ;;  %v379_v44 = vpack.c.bf16 %v341_v53, %v340_v50  ;;  %v215_v63 = vmul.f32 %v1596_v51, %v2016_v5 }
  0x42   :  { %1897 = vmatmul.mubr.bf16.gmra.mxu0 %v2162_v25  ;;  %v376_v25 = vpack.c.bf16 %v335_v37, %v334_v36  ;;  %v1790_v36 = vld [vmem:[%s2470_s0 + $0xe8] sm:$0xff]   ;;  %v211_v37 = vmul.f32 %v1588_v29, %v2016_v5  ;;  %v283_v49 = vadd.f32 %v2027_v10, %v212_v38  ;;  %v369_v55 = vpack.c.bf16 %v321_v40, %v320_v39 }
  0x43   :  { %1900 = vmatprep.mubr.bf16.mxu0 %v364_v12  ;;  %v1585_v12 = vunpack.c.h.bf16 %v1788_v15  ;;  %v368_v34 = vpack.c.bf16 %v319_v22, %v318_v19  ;;  %v1592_v43 = vunpack.c.l.bf16 %v1790_v36  ;;  %v1593_v47 = vunpack.c.h.bf16 %v1790_v36 }
  0x44   :  { %1924 = vmatprep.mubr.bf16.mxu1 %v376_v25  ;;  %v282_v48 = vadd.f32 %v2027_v10, %v211_v37  ;;  %v347_v62 = vmax.f32 %v283_v49, 0.0  ;;  %v286_v15 = vadd.f32 %v2027_v10, %v215_v63  ;;  %v351_v20 = vmax.f32 %v287_v17, 0.0 }
  0x45   :  { %1925 = vmatmul.mubr.bf16.gmra.mxu1 %v377_v23  ;;  %v210_v16 = vmul.f32 %v1585_v12, %v2016_v5  ;;  %v213_v56 = vmul.f32 %v1592_v43, %v2016_v5  ;;  %v214_v59 = vmul.f32 %v1593_v47, %v2016_v5 }
  0x46   :  { %1928 = vmatprep.mubr.bf16.mxu1 %v378_v28  ;;  %v346_v61 = vmax.f32 %v282_v48, 0.0  ;;  %v350_v19 = vmax.f32 %v286_v15, 0.0 }
  0x47   :  { %v281_v46 = vadd.f32 %v2027_v10, %v210_v16  ;;  %v284_v4 = vadd.f32 %v2027_v10, %v213_v56  ;;  %v285_v9 = vadd.f32 %v2027_v10, %v214_v59 }
  0x48   :  { %v382_v14 = vpack.c.bf16 %v347_v62, %v346_v61  ;;  %v384_v24 = vpack.c.bf16 %v351_v20, %v350_v19 }
  0x49   :  { %v345_v57 = vmax.f32 %v281_v46, 0.0  ;;  %v348_v18 = vmax.f32 %v284_v4, 0.0  ;;  %v349_v3 = vmax.f32 %v285_v9, 0.0 }
  0x4a   :  { %1901 = vmatmul.mubr.bf16.gmra.mxu0 %v365_v35  ;;  %v209_v35 = vmul.f32 %v1584_v26, %v2016_v5 }
  0x4b   :  { %1904 = vmatprep.mubr.bf16.mxu0 %v366_v1  ;;  %v1792_v1 = vld [vmem:[%s2470_s0 + $0xf8] sm:$0xff]   ;;  %v383_v21 = vpack.c.bf16 %v349_v3, %v348_v18 }
  0x4c   :  { %v280_v42 = vadd.f32 %v2027_v10, %v209_v35  ;;  %v1600_v11 = vunpack.c.l.bf16 %v1792_v1  ;;  %v1601_v13 = vunpack.c.h.bf16 %v1792_v1 }
  0x4d   :  { %1929 = vmatmul.mubr.bf16.gmra.mxu1 %v379_v44 }
  0x4e   :  { %v344_v25 = vmax.f32 %v280_v42, 0.0  ;;  %1932 = vmatprep.mubr.bf16.mxu1 %v380_v45  ;;  %v217_v58 = vmul.f32 %v1600_v11, %v2016_v5  ;;  %v218_v7 = vmul.f32 %v1601_v13, %v2016_v5 }
  0x50   :  { %v381_v8 = vpack.c.bf16 %v345_v57, %v344_v25  ;;  %v288_v22 = vadd.f32 %v2027_v10, %v217_v58  ;;  %v289_v23 = vadd.f32 %v2027_v10, %v218_v7 }
  0x52   :  { %1905 = vmatmul.mubr.bf16.gmra.mxu0 %v367_v31  ;;  %v352_v26 = vmax.f32 %v288_v22, 0.0  ;;  %v353_v60 = vmax.f32 %v289_v23, 0.0 }
  0x53   :  { %1908 = vmatprep.mubr.bf16.mxu0 %v368_v34 }
  0x54   :  { %v385_v27 = vpack.c.bf16 %v353_v60, %v352_v26 }
  0x55   :  { %1933 = vmatmul.mubr.bf16.gmra.mxu1 %v381_v8 }
  0x56   :  { %1936 = vmatprep.mubr.bf16.mxu1 %v382_v14 }
  0x5a   :  { %1909 = vmatmul.mubr.bf16.gmra.mxu0 %v369_v55 }
  0x5d   :  { %1937 = vmatmul.mubr.bf16.gmra.mxu1 %v383_v21 }
  0x5e   :  { %1940 = vmatprep.mubr.bf16.mxu1 %v384_v24 }
  0x65   :  { %1941 = vmatmul.mubr.bf16.gmra.mxu1 %v385_v27 }
  0xe2   :  { %v1882_v52 = vpop.f32.mrf.mxu0 }
  0xe4   :  { %v484_v12 = vpop.f32.mrf.mxu0 }
  0xe6   :  { %v1883_v28 = vpop.f32.mrf.mxu0 }
  0xe7   :  { %v740_v29 = vpack.c.bf16 %v1883_v28, %v1882_v52 }
  0xe8   :  { %v487_v5 = vpop.f32.mrf.mxu0  ;;  %v1914_v63 = vpop.f32.mrf.mxu1 }
  0xe9   :  { %1793 = vst [vmem:[%s2473_s4 + $0x8] sm:$0xff] %v740_v29   ;;  %v739_v30 = vpack.c.bf16 %v487_v5, %v484_v12  ;;  %v1061_v32 = vunpack.c.l.bf16 %v740_v29  ;;  %v1062_v2 = vunpack.c.h.bf16 %v740_v29 }
  0xea   :  { %v1886_v31 = vpop.f32.mrf.mxu0  ;;  %v612_v11 = vpop.f32.mrf.mxu1 }
  0xeb   :  { %1606 = vst [vmem:[%s2473_s4] sm:$0xff] %v739_v30   ;;  %v1059_v10 = vunpack.c.l.bf16 %v739_v30  ;;  %v1060_v33 = vunpack.c.h.bf16 %v739_v30  ;;  %v1194_v16 = vmul.f32 %v1061_v32, %v1061_v32  ;;  %v1195_v43 = vmul.f32 %v1062_v2, %v1062_v2 }
  0xec   :  { %v500_v34 = vpop.f32.mrf.mxu0  ;;  %v1915_v58 = vpop.f32.mrf.mxu1 }
  0xed   :  { %v1123_v50 = vadd.f32 %v1060_v33, %v1059_v10  ;;  %v1192_v35 = vmul.f32 %v1059_v10, %v1059_v10  ;;  %v1193_v53 = vmul.f32 %v1060_v33, %v1060_v33  ;;  %v2308_v19 = vpack.c.bf16 %v1915_v58, %v1914_v63 }
  0xee   :  { %v1887_v6 = vpop.f32.mrf.mxu0  ;;  %v615_v24 = vpop.f32.mrf.mxu1 }
  0xef   :  { %v1124_v36 = vadd.f32 %v1123_v50, %v1061_v32  ;;  %v1256_v37 = vadd.f32 %v1193_v53, %v1192_v35  ;;  %v742_v38 = vpack.c.bf16 %v1887_v6, %v1886_v31  ;;  %1809 = vst [vmem:[%s2473_s4 + $0x88] sm:$0xff] %v2308_v19   ;;  %v2314_v60 = vpack.c.bf16 %v615_v24, %v612_v11 }
  0xf0   :  { %v503_v39 = vpop.f32.mrf.mxu0 }
  0xf1   :  { %v1257_v40 = vadd.f32 %v1256_v37, %v1194_v16  ;;  %1795 = vst [vmem:[%s2473_s4 + $0x18] sm:$0xff] %v742_v38   ;;  %v741_v41 = vpack.c.bf16 %v503_v39, %v500_v34  ;;  %v1125_v46 = vadd.f32 %v1124_v36, %v1062_v2  ;;  %v1065_v48 = vunpack.c.l.bf16 %v742_v38  ;;  %1808 = vst [vmem:[%s2473_s4 + $0x80] sm:$0xff] %v2314_v60  }
  0xf2   :  { %v1890_v42 = vpop.f32.mrf.mxu0  ;;  %v1066_v55 = vunpack.c.h.bf16 %v742_v38  ;;  %v1918_v5 = vpop.f32.mrf.mxu1 }
  0xf3   :  { %1794 = vst [vmem:[%s2473_s4 + $0x10] sm:$0xff] %v741_v41   ;;  %v1063_v44 = vunpack.c.l.bf16 %v741_v41  ;;  %v1064_v45 = vunpack.c.h.bf16 %v741_v41  ;;  %v1258_v54 = vadd.f32 %v1257_v40, %v1195_v43  ;;  %v1198_v0 = vmul.f32 %v1065_v48, %v1065_v48 }
  0xf4   :  { %v516_v47 = vpop.f32.mrf.mxu0  ;;  %v1199_v13 = vmul.f32 %v1066_v55, %v1066_v55  ;;  %v628_v34 = vpop.f32.mrf.mxu1 }
  0xf5   :  { %v1126_v49 = vadd.f32 %v1125_v46, %v1063_v44  ;;  %v1196_v51 = vmul.f32 %v1063_v44, %v1063_v44  ;;  %v1197_v57 = vmul.f32 %v1064_v45, %v1064_v45 }
  0xf6   :  { %v1891_v56 = vpop.f32.mrf.mxu0  ;;  %v1919_v36 = vpop.f32.mrf.mxu1 }
  0xf7   :  { %v1127_v25 = vadd.f32 %v1126_v49, %v1064_v45  ;;  %v1259_v59 = vadd.f32 %v1258_v54, %v1196_v51  ;;  %v744_v61 = vpack.c.bf16 %v1891_v56, %v1890_v42  ;;  %v2326_v38 = vpack.c.bf16 %v1919_v36, %v1918_v5 }
  0xf8   :  { %v519_v62 = vpop.f32.mrf.mxu0  ;;  %v631_v43 = vpop.f32.mrf.mxu1 }
  0xf9   :  { %v1128_v1 = vadd.f32 %v1127_v25, %v1065_v48  ;;  %v1260_v4 = vadd.f32 %v1259_v59, %v1197_v57  ;;  %1797 = vst [vmem:[%s2473_s4 + $0x28] sm:$0xff] %v744_v61   ;;  %v743_v8 = vpack.c.bf16 %v519_v62, %v516_v47  ;;  %v1069_v20 = vunpack.c.l.bf16 %v744_v61  ;;  %1811 = vst [vmem:[%s2473_s4 + $0x98] sm:$0xff] %v2326_v38  }
  0xfa   :  { %v1894_v9 = vpop.f32.mrf.mxu0  ;;  %v1070_v27 = vunpack.c.h.bf16 %v744_v61  ;;  %v2332_v45 = vpack.c.bf16 %v631_v43, %v628_v34 }
  0xfb   :  { %v1261_v14 = vadd.f32 %v1260_v4, %v1198_v0  ;;  %v1129_v15 = vadd.f32 %v1128_v1, %v1066_v55  ;;  %1796 = vst [vmem:[%s2473_s4 + $0x20] sm:$0xff] %v743_v8   ;;  %v1067_v17 = vunpack.c.l.bf16 %v743_v8  ;;  %v1068_v18 = vunpack.c.h.bf16 %v743_v8  ;;  %v1922_v54 = vpop.f32.mrf.mxu1 }
  0xfc   :  { %v532_v3 = vpop.f32.mrf.mxu0  ;;  %v1202_v31 = vmul.f32 %v1069_v20, %v1069_v20  ;;  %v1203_v35 = vmul.f32 %v1070_v27, %v1070_v27  ;;  %1810 = vst [vmem:[%s2473_s4 + $0x90] sm:$0xff] %v2332_v45  }
  0xfd   :  { %v1262_v7 = vadd.f32 %v1261_v14, %v1199_v13  ;;  %v1130_v21 = vadd.f32 %v1129_v15, %v1067_v17  ;;  %v1200_v22 = vmul.f32 %v1067_v17, %v1067_v17  ;;  %v1201_v12 = vmul.f32 %v1068_v18, %v1068_v18  ;;  %v644_v61 = vpop.f32.mrf.mxu1 }
  0xfe   :  { %v1895_v23 = vpop.f32.mrf.mxu0 }
  0xff   :  { %v746_v26 = vpack.c.bf16 %v1895_v23, %v1894_v9  ;;  %v1131_v52 = vadd.f32 %v1130_v21, %v1068_v18  ;;  %v1263_v28 = vadd.f32 %v1262_v7, %v1200_v22  ;;  %v1923_v9 = vpop.f32.mrf.mxu1 }
 0x100   :  { %v535_v29 = vpop.f32.mrf.mxu0  ;;  %v2344_v13 = vpack.c.bf16 %v1923_v9, %v1922_v54 }
 0x101   :  { %1799 = vst [vmem:[%s2473_s4 + $0x38] sm:$0xff] %v746_v26   ;;  %v745_v30 = vpack.c.bf16 %v535_v29, %v532_v3  ;;  %v1132_v32 = vadd.f32 %v1131_v52, %v1069_v20  ;;  %v1264_v10 = vadd.f32 %v1263_v28, %v1201_v12  ;;  %v1073_v39 = vunpack.c.l.bf16 %v746_v26  ;;  %v647_v3 = vpop.f32.mrf.mxu1 }
 0x102   :  { %v1898_v33 = vpop.f32.mrf.mxu0  ;;  %v1074_v46 = vunpack.c.h.bf16 %v746_v26  ;;  %1813 = vst [vmem:[%s2473_s4 + $0xa8] sm:$0xff] %v2344_v13   ;;  %v2350_v7 = vpack.c.bf16 %v647_v3, %v644_v61 }
 0x103   :  { %1798 = vst [vmem:[%s2473_s4 + $0x30] sm:$0xff] %v745_v30   ;;  %v1071_v50 = vunpack.c.l.bf16 %v745_v30  ;;  %v1265_v53 = vadd.f32 %v1264_v10, %v1202_v31  ;;  %v1072_v2 = vunpack.c.h.bf16 %v745_v30  ;;  %v1133_v6 = vadd.f32 %v1132_v32, %v1070_v27 }
 0x104   :  { %v548_v16 = vpop.f32.mrf.mxu0  ;;  %v1206_v56 = vmul.f32 %v1073_v39, %v1073_v39  ;;  %v1207_v63 = vmul.f32 %v1074_v46, %v1074_v46  ;;  %1812 = vst [vmem:[%s2473_s4 + $0xa0] sm:$0xff] %v2350_v7  }
 0x105   :  { %v1204_v37 = vmul.f32 %v1071_v50, %v1071_v50  ;;  %v1134_v40 = vadd.f32 %v1133_v6, %v1071_v50  ;;  %v1266_v41 = vadd.f32 %v1265_v53, %v1203_v35  ;;  %v1205_v48 = vmul.f32 %v1072_v2, %v1072_v2  ;;  %v1926_v26 = vpop.f32.mrf.mxu1 }
 0x106   :  { %v1899_v42 = vpop.f32.mrf.mxu0 }
 0x107   :  { %v748_v44 = vpack.c.bf16 %v1899_v42, %v1898_v33  ;;  %v1135_v47 = vadd.f32 %v1134_v40, %v1072_v2  ;;  %v1267_v49 = vadd.f32 %v1266_v41, %v1204_v37  ;;  %v660_v5 = vpop.f32.mrf.mxu1 }
 0x108   :  { %v551_v51 = vpop.f32.mrf.mxu0 }
 0x109   :  { %1801 = vst [vmem:[%s2473_s4 + $0x48] sm:$0xff] %v748_v44   ;;  %v747_v55 = vpack.c.bf16 %v551_v51, %v548_v16  ;;  %v1136_v25 = vadd.f32 %v1135_v47, %v1073_v39  ;;  %v1268_v57 = vadd.f32 %v1267_v49, %v1205_v48  ;;  %v1077_v14 = vunpack.c.l.bf16 %v748_v44  ;;  %v1927_v50 = vpop.f32.mrf.mxu1 }
 0x10a   :  { %v1902_v59 = vpop.f32.mrf.mxu0  ;;  %v1078_v20 = vunpack.c.h.bf16 %v748_v44  ;;  %v2362_v53 = vpack.c.bf16 %v1927_v50, %v1926_v26 }
 0x10b   :  { %1800 = vst [vmem:[%s2473_s4 + $0x40] sm:$0xff] %v747_v55   ;;  %v1075_v62 = vunpack.c.l.bf16 %v747_v55  ;;  %v1269_v0 = vadd.f32 %v1268_v57, %v1206_v56  ;;  %v1076_v1 = vunpack.c.h.bf16 %v747_v55  ;;  %v1137_v4 = vadd.f32 %v1136_v25, %v1074_v46  ;;  %v663_v37 = vpop.f32.mrf.mxu1 }
 0x10c   :  { %v564_v8 = vpop.f32.mrf.mxu0  ;;  %v1210_v52 = vmul.f32 %v1077_v14, %v1077_v14  ;;  %v1211_v31 = vmul.f32 %v1078_v20, %v1078_v20  ;;  %1815 = vst [vmem:[%s2473_s4 + $0xb8] sm:$0xff] %v2362_v53   ;;  %v2368_v40 = vpack.c.bf16 %v663_v37, %v660_v5 }
 0x10d   :  { %v1208_v11 = vmul.f32 %v1075_v62, %v1075_v62  ;;  %v1138_v15 = vadd.f32 %v1137_v4, %v1075_v62  ;;  %v1270_v17 = vadd.f32 %v1269_v0, %v1207_v63  ;;  %v1209_v22 = vmul.f32 %v1076_v1, %v1076_v1  ;;  %v1930_v47 = vpop.f32.mrf.mxu1 }
 0x10e   :  { %v1903_v18 = vpop.f32.mrf.mxu0  ;;  %1814 = vst [vmem:[%s2473_s4 + $0xb0] sm:$0xff] %v2368_v40  }
 0x10f   :  { %v750_v58 = vpack.c.bf16 %v1903_v18, %v1902_v59  ;;  %v1139_v21 = vadd.f32 %v1138_v15, %v1076_v1  ;;  %v1271_v23 = vadd.f32 %v1270_v17, %v1208_v11  ;;  %v676_v56 = vpop.f32.mrf.mxu1 }
 0x110   :  { %v567_v24 = vpop.f32.mrf.mxu0 }
 0x111   :  { %1803 = vst [vmem:[%s2473_s4 + $0x58] sm:$0xff] %v750_v58   ;;  %v749_v27 = vpack.c.bf16 %v567_v24, %v564_v8  ;;  %v1140_v12 = vadd.f32 %v1139_v21, %v1077_v14  ;;  %v1272_v28 = vadd.f32 %v1271_v23, %v1209_v22  ;;  %v1081_v2 = vunpack.c.l.bf16 %v750_v58  ;;  %v1931_v0 = vpop.f32.mrf.mxu1 }
 0x112   :  { %v1906_v29 = vpop.f32.mrf.mxu0  ;;  %v1082_v41 = vunpack.c.h.bf16 %v750_v58  ;;  %v2380_v4 = vpack.c.bf16 %v1931_v0, %v1930_v47  ;;  %v1094_v0 = vunpack.c.h.bf16 %v2308_v19 }
 0x113   :  { %1802 = vst [vmem:[%s2473_s4 + $0x50] sm:$0xff] %v749_v27   ;;  %v1079_v30 = vunpack.c.l.bf16 %v749_v27  ;;  %v1273_v32 = vadd.f32 %v1272_v28, %v1210_v52  ;;  %v1080_v10 = vunpack.c.h.bf16 %v749_v27  ;;  %v1141_v33 = vadd.f32 %v1140_v12, %v1078_v20  ;;  %v679_v15 = vpop.f32.mrf.mxu1 }
 0x114   :  { %v580_v34 = vpop.f32.mrf.mxu0  ;;  %v1214_v49 = vmul.f32 %v1081_v2, %v1081_v2  ;;  %v1215_v57 = vmul.f32 %v1082_v41, %v1082_v41  ;;  %1817 = vst [vmem:[%s2473_s4 + $0xc8] sm:$0xff] %v2380_v4   ;;  %v2386_v18 = vpack.c.bf16 %v679_v15, %v676_v56 }
 0x115   :  { %v1212_v35 = vmul.f32 %v1079_v30, %v1079_v30  ;;  %v1142_v6 = vadd.f32 %v1141_v33, %v1079_v30  ;;  %v1274_v16 = vadd.f32 %v1273_v32, %v1211_v31  ;;  %v1213_v43 = vmul.f32 %v1080_v10, %v1080_v10  ;;  %v1934_v23 = vpop.f32.mrf.mxu1 }
 0x116   :  { %v1907_v36 = vpop.f32.mrf.mxu0  ;;  %1816 = vst [vmem:[%s2473_s4 + $0xc0] sm:$0xff] %v2386_v18  }
 0x117   :  { %v752_v39 = vpack.c.bf16 %v1907_v36, %v1906_v29  ;;  %v1143_v42 = vadd.f32 %v1142_v6, %v1080_v10  ;;  %v1275_v44 = vadd.f32 %v1274_v16, %v1212_v35  ;;  %v692_v12 = vpop.f32.mrf.mxu1 }
 0x118   :  { %v583_v46 = vpop.f32.mrf.mxu0 }
 0x119   :  { %1805 = vst [vmem:[%s2473_s4 + $0x68] sm:$0xff] %v752_v39   ;;  %v751_v48 = vpack.c.bf16 %v583_v46, %v580_v34  ;;  %v1144_v51 = vadd.f32 %v1143_v42, %v1081_v2  ;;  %v1276_v54 = vadd.f32 %v1275_v44, %v1213_v43  ;;  %v1085_v8 = vunpack.c.l.bf16 %v752_v39  ;;  %v1935_v32 = vpop.f32.mrf.mxu1 }
 0x11a   :  { %v1910_v55 = vpop.f32.mrf.mxu0  ;;  %v1086_v3 = vunpack.c.h.bf16 %v752_v39  ;;  %v2398_v33 = vpack.c.bf16 %v1935_v32, %v1934_v23  ;;  %v1091_v46 = vunpack.c.l.bf16 %v2314_v60 }
 0x11b   :  { %1804 = vst [vmem:[%s2473_s4 + $0x60] sm:$0xff] %v751_v48   ;;  %v1083_v25 = vunpack.c.l.bf16 %v751_v48  ;;  %v1277_v59 = vadd.f32 %v1276_v54, %v1214_v49  ;;  %v1084_v61 = vunpack.c.h.bf16 %v751_v48  ;;  %v1145_v62 = vadd.f32 %v1144_v51, %v1082_v41  ;;  %v695_v2 = vpop.f32.mrf.mxu1 }
 0x11c   :  { %v596_v63 = vpop.f32.mrf.mxu0  ;;  %v1218_v26 = vmul.f32 %v1085_v8, %v1085_v8  ;;  %v1219_v29 = vmul.f32 %v1086_v3, %v1086_v3  ;;  %1819 = vst [vmem:[%s2473_s4 + $0xd8] sm:$0xff] %v2398_v33   ;;  %v2404_v6 = vpack.c.bf16 %v695_v2, %v692_v12  ;;  %v1092_v51 = vunpack.c.h.bf16 %v2314_v60 }
 0x11d   :  { %v1216_v1 = vmul.f32 %v1083_v25, %v1083_v25  ;;  %v1146_v9 = vadd.f32 %v1145_v62, %v1083_v25  ;;  %v1278_v11 = vadd.f32 %v1277_v59, %v1215_v57  ;;  %v1217_v20 = vmul.f32 %v1084_v61, %v1084_v61  ;;  %v1938_v41 = vpop.f32.mrf.mxu1 }
 0x11e   :  { %v1911_v14 = vpop.f32.mrf.mxu0  ;;  %1818 = vst [vmem:[%s2473_s4 + $0xd0] sm:$0xff] %v2404_v6   ;;  %v1093_v25 = vunpack.c.l.bf16 %v2308_v19  ;;  %v1224_v59 = vmul.f32 %v1091_v46, %v1091_v46  ;;  %v1100_v2 = vunpack.c.h.bf16 %v2350_v7 }
 0x11f   :  { %v754_v17 = vpack.c.bf16 %v1911_v14, %v1910_v55  ;;  %v1147_v58 = vadd.f32 %v1146_v9, %v1084_v61  ;;  %v1279_v21 = vadd.f32 %v1278_v11, %v1216_v1  ;;  %v708_v47 = vpop.f32.mrf.mxu1  ;;  %v1225_v1 = vmul.f32 %v1092_v51, %v1092_v51 }
 0x120   :  { %v599_v22 = vpop.f32.mrf.mxu0  ;;  %v1226_v11 = vmul.f32 %v1093_v25, %v1093_v25 }
 0x121   :  { %1807 = vst [vmem:[%s2473_s4 + $0x78] sm:$0xff] %v754_v17   ;;  %v753_v24 = vpack.c.bf16 %v599_v22, %v596_v63  ;;  %v1148_v27 = vadd.f32 %v1147_v58, %v1085_v8  ;;  %v1280_v52 = vadd.f32 %v1279_v21, %v1217_v20  ;;  %v1089_v34 = vunpack.c.l.bf16 %v754_v17  ;;  %v1939_v55 = vpop.f32.mrf.mxu1 }
 0x122   :  { %v1090_v16 = vunpack.c.h.bf16 %v754_v17  ;;  %v2412_v56 = vpack.c.bf16 %v1939_v55, %v1938_v41  ;;  %v1095_v17 = vunpack.c.l.bf16 %v2332_v45  ;;  %v1227_v58 = vmul.f32 %v1094_v0, %v1094_v0 }
 0x123   :  { %1806 = vst [vmem:[%s2473_s4 + $0x70] sm:$0xff] %v753_v24   ;;  %v1087_v28 = vunpack.c.l.bf16 %v753_v24  ;;  %v1281_v5 = vadd.f32 %v1280_v52, %v1218_v26  ;;  %v1088_v30 = vunpack.c.h.bf16 %v753_v24  ;;  %v1149_v31 = vadd.f32 %v1148_v27, %v1086_v3  ;;  %v711_v62 = vpop.f32.mrf.mxu1 }
 0x124   :  { %v1222_v42 = vmul.f32 %v1089_v34, %v1089_v34  ;;  %v1223_v48 = vmul.f32 %v1090_v16, %v1090_v16  ;;  %1821 = vst [vmem:[%s2473_s4 + $0xe8] sm:$0xff] %v2412_v56   ;;  %v2419_v63 = vpack.c.bf16 %v711_v62, %v708_v47  ;;  %v1096_v21 = vunpack.c.h.bf16 %v2332_v45 }
 0x125   :  { %v1220_v10 = vmul.f32 %v1087_v28, %v1087_v28  ;;  %v1150_v50 = vadd.f32 %v1149_v31, %v1087_v28  ;;  %v1282_v35 = vadd.f32 %v1281_v5, %v1219_v29  ;;  %v1221_v37 = vmul.f32 %v1088_v30, %v1088_v30  ;;  %v1942_v9 = vpop.f32.mrf.mxu1 }
 0x126   :  { %1820 = vst [vmem:[%s2473_s4 + $0xe0] sm:$0xff] %v2419_v63   ;;  %v1097_v24 = vunpack.c.l.bf16 %v2326_v38  ;;  %v1228_v27 = vmul.f32 %v1095_v17, %v1095_v17  ;;  %v1098_v29 = vunpack.c.h.bf16 %v2326_v38  ;;  %v1229_v5 = vmul.f32 %v1096_v21, %v1096_v21 }
 0x127   :  { %v1151_v36 = vadd.f32 %v1150_v50, %v1088_v30  ;;  %v1283_v39 = vadd.f32 %v1282_v35, %v1220_v10  ;;  %v724_v3 = vpop.f32.mrf.mxu1  ;;  %v1101_v38 = vunpack.c.l.bf16 %v2344_v13  ;;  %v1102_v41 = vunpack.c.h.bf16 %v2344_v13 }
 0x128   :  { %v1230_v31 = vmul.f32 %v1097_v24, %v1097_v24  ;;  %v1231_v50 = vmul.f32 %v1098_v29, %v1098_v29  ;;  %v1106_v13 = vunpack.c.h.bf16 %v2362_v53 }
 0x129   :  { %v1152_v43 = vadd.f32 %v1151_v36, %v1089_v34  ;;  %v1284_v44 = vadd.f32 %v1283_v39, %v1221_v37  ;;  %v1943_v22 = vpop.f32.mrf.mxu1  ;;  %v1099_v34 = vunpack.c.l.bf16 %v2350_v7  ;;  %v1104_v7 = vunpack.c.h.bf16 %v2368_v40 }
 0x12a   :  { %v2428_v23 = vpack.c.bf16 %v1943_v22, %v1942_v9 }
 0x12b   :  { %v1285_v49 = vadd.f32 %v1284_v44, %v1222_v42  ;;  %v1153_v54 = vadd.f32 %v1152_v43, %v1090_v16  ;;  %v727_v12 = vpop.f32.mrf.mxu1  ;;  %v1232_v37 = vmul.f32 %v1099_v34, %v1099_v34  ;;  %v1233_v43 = vmul.f32 %v1100_v2, %v1100_v2 }
 0x12c   :  { %1823 = vst [vmem:[%s2473_s4 + $0xf8] sm:$0xff] %v2428_v23   ;;  %v2435_v28 = vpack.c.bf16 %v727_v12, %v724_v3  ;;  %v1109_v3 = vunpack.c.l.bf16 %v2380_v4  ;;  %v1111_v12 = vunpack.c.l.bf16 %v2404_v6 }
 0x12d   :  { %v1154_v57 = vadd.f32 %v1153_v54, %v1091_v46  ;;  %v1286_v61 = vadd.f32 %v1285_v49, %v1223_v48  ;;  %v1234_v46 = vmul.f32 %v1101_v38, %v1101_v38  ;;  %v1103_v49 = vunpack.c.l.bf16 %v2368_v40 }
 0x12e   :  { %1822 = vst [vmem:[%s2473_s4 + $0xf0] sm:$0xff] %v2435_v28   ;;  %v1108_v40 = vunpack.c.h.bf16 %v2386_v18 }
 0x12f   :  { %v1155_v60 = vadd.f32 %v1154_v57, %v1092_v51  ;;  %v1287_v8 = vadd.f32 %v1286_v61, %v1224_v59  ;;  %v1235_v51 = vmul.f32 %v1102_v41, %v1102_v41  ;;  %v1236_v59 = vmul.f32 %v1103_v49, %v1103_v49 }
 0x130   :  { %v1241_v22 = vmul.f32 %v1108_v40, %v1108_v40 }
 0x131   :  { %v1156_v14 = vadd.f32 %v1155_v60, %v1093_v25  ;;  %v1288_v15 = vadd.f32 %v1287_v8, %v1225_v1  ;;  %v1105_v25 = vunpack.c.l.bf16 %v2362_v53  ;;  %v1110_v53 = vunpack.c.h.bf16 %v2380_v4 }
 0x132   :  { %v1114_v4 = vunpack.c.h.bf16 %v2398_v33 }
 0x133   :  { %v1289_v20 = vadd.f32 %v1288_v15, %v1226_v11  ;;  %v1157_v19 = vadd.f32 %v1156_v14, %v1094_v0  ;;  %v1237_v0 = vmul.f32 %v1104_v7, %v1104_v7  ;;  %v1238_v1 = vmul.f32 %v1105_v25, %v1105_v25 }
 0x134   :  { %v1107_v11 = vunpack.c.l.bf16 %v2386_v18  ;;  %v1239_v14 = vmul.f32 %v1106_v13, %v1106_v13  ;;  %v1112_v18 = vunpack.c.h.bf16 %v2404_v6  ;;  %v1116_v6 = vunpack.c.h.bf16 %v2419_v63 }
 0x135   :  { %v1158_v26 = vadd.f32 %v1157_v19, %v1095_v17  ;;  %v1290_v52 = vadd.f32 %v1289_v20, %v1227_v58 }
 0x136   :  { %v1240_v20 = vmul.f32 %v1107_v11, %v1107_v11 }
 0x137   :  { %v1159_v45 = vadd.f32 %v1158_v26, %v1096_v21  ;;  %v1291_v30 = vadd.f32 %v1290_v52, %v1228_v27  ;;  %v1242_v26 = vmul.f32 %v1109_v3, %v1109_v3 }
 0x139   :  { %v1160_v32 = vadd.f32 %v1159_v45, %v1097_v24  ;;  %v1292_v10 = vadd.f32 %v1291_v30, %v1229_v5  ;;  %v1113_v30 = vunpack.c.l.bf16 %v2398_v33  ;;  %v1118_v33 = vunpack.c.h.bf16 %v2412_v56 }
 0x13b   :  { %v1293_v35 = vadd.f32 %v1292_v10, %v1230_v31  ;;  %v1161_v16 = vadd.f32 %v1160_v32, %v1098_v29  ;;  %v1243_v29 = vmul.f32 %v1110_v53, %v1110_v53  ;;  %v1244_v32 = vmul.f32 %v1111_v12, %v1111_v12 }
 0x13d   :  { %v1162_v36 = vadd.f32 %v1161_v16, %v1099_v34  ;;  %v1294_v39 = vadd.f32 %v1293_v35, %v1231_v50  ;;  %v1245_v50 = vmul.f32 %v1112_v18, %v1112_v18 }
 0x13f   :  { %v1163_v42 = vadd.f32 %v1162_v36, %v1100_v2  ;;  %v1295_v44 = vadd.f32 %v1294_v39, %v1232_v37  ;;  %v1246_v2 = vmul.f32 %v1113_v30, %v1113_v30  ;;  %v1115_v36 = vunpack.c.l.bf16 %v2419_v63 }
 0x140   :  { %v1247_v37 = vmul.f32 %v1114_v4, %v1114_v4  ;;  %v1120_v63 = vunpack.c.h.bf16 %v2435_v28 }
 0x141   :  { %v1164_v47 = vadd.f32 %v1163_v42, %v1101_v38  ;;  %v1296_v48 = vadd.f32 %v1295_v44, %v1233_v43  ;;  %v1117_v42 = vunpack.c.l.bf16 %v2412_v56  ;;  %v1248_v44 = vmul.f32 %v1115_v36, %v1115_v36 }
 0x142   :  { %v1122_v56 = vunpack.c.h.bf16 %v2428_v23 }
 0x143   :  { %v1297_v54 = vadd.f32 %v1296_v48, %v1234_v46  ;;  %v1165_v55 = vadd.f32 %v1164_v47, %v1102_v41  ;;  %v1249_v48 = vmul.f32 %v1116_v6, %v1116_v6 }
 0x145   :  { %v1166_v57 = vadd.f32 %v1165_v55, %v1103_v49  ;;  %v1298_v61 = vadd.f32 %v1297_v54, %v1235_v51  ;;  %v1250_v51 = vmul.f32 %v1117_v42, %v1117_v42  ;;  %v1119_v55 = vunpack.c.l.bf16 %v2435_v28 }
 0x147   :  { %v1167_v62 = vadd.f32 %v1166_v57, %v1104_v7  ;;  %v1299_v60 = vadd.f32 %v1298_v61, %v1236_v59  ;;  %v1121_v61 = vunpack.c.l.bf16 %v2428_v23 }
 0x149   :  { %v1168_v8 = vadd.f32 %v1167_v62, %v1105_v25  ;;  %v1300_v9 = vadd.f32 %v1299_v60, %v1237_v0  ;;  %v1251_v25 = vmul.f32 %v1118_v33, %v1118_v33  ;;  %v1252_v62 = vmul.f32 %v1119_v55, %v1119_v55 }
 0x14b   :  { %v1301_v15 = vadd.f32 %v1300_v9, %v1238_v1  ;;  %v1169_v17 = vadd.f32 %v1168_v8, %v1106_v13  ;;  %v1253_v1 = vmul.f32 %v1120_v63, %v1120_v63  ;;  %v1254_v9 = vmul.f32 %v1121_v61, %v1121_v61 }
 0x14d   :  { %v1170_v58 = vadd.f32 %v1169_v17, %v1107_v11  ;;  %v1302_v21 = vadd.f32 %v1301_v15, %v1239_v14  ;;  %v1255_v15 = vmul.f32 %v1122_v56, %v1122_v56 }
 0x14f   :  { %v1171_v19 = vadd.f32 %v1170_v58, %v1108_v40  ;;  %v1303_v24 = vadd.f32 %v1302_v21, %v1240_v20 }
 0x151   :  { %v1172_v27 = vadd.f32 %v1171_v19, %v1109_v3  ;;  %v1304_v52 = vadd.f32 %v1303_v24, %v1241_v22 }
 0x153   :  { %v1305_v45 = vadd.f32 %v1304_v52, %v1242_v26  ;;  %v1173_v5 = vadd.f32 %v1172_v27, %v1110_v53 }
 0x155   :  { %v1174_v31 = vadd.f32 %v1173_v5, %v1111_v12  ;;  %v1306_v10 = vadd.f32 %v1305_v45, %v1243_v29 }
 0x157   :  { %v1175_v34 = vadd.f32 %v1174_v31, %v1112_v18  ;;  %v1307_v35 = vadd.f32 %v1306_v10, %v1244_v32 }
 0x159   :  { %v1176_v16 = vadd.f32 %v1175_v34, %v1113_v30  ;;  %v1308_v38 = vadd.f32 %v1307_v35, %v1245_v50 }
 0x15b   :  { %v1309_v39 = vadd.f32 %v1308_v38, %v1246_v2  ;;  %v1177_v41 = vadd.f32 %v1176_v16, %v1114_v4 }
 0x15d   :  { %v1178_v43 = vadd.f32 %v1177_v41, %v1115_v36  ;;  %v1310_v46 = vadd.f32 %v1309_v39, %v1247_v37 }
 0x15f   :  { %v1179_v47 = vadd.f32 %v1178_v43, %v1116_v6  ;;  %v1311_v49 = vadd.f32 %v1310_v46, %v1248_v44 }
 0x161   :  { %v1180_v54 = vadd.f32 %v1179_v47, %v1117_v42  ;;  %v1312_v7 = vadd.f32 %v1311_v49, %v1249_v48 }
 0x163   :  { %v1313_v57 = vadd.f32 %v1312_v7, %v1250_v51  ;;  %v1181_v59 = vadd.f32 %v1180_v54, %v1118_v33 }
 0x165   :  { %v1182_v13 = vadd.f32 %v1181_v59, %v1119_v55  ;;  %v1314_v0 = vadd.f32 %v1313_v57, %v1251_v25 }
 0x167   :  { %v1183_v60 = vadd.f32 %v1182_v13, %v1120_v63  ;;  %v1315_v8 = vadd.f32 %v1314_v0, %v1252_v62 }
 0x169   :  { %v1184_v11 = vadd.f32 %v1183_v60, %v1121_v61  ;;  %v1316_v14 = vadd.f32 %v1315_v8, %v1253_v1 }
 0x16b   :  { %v1185_v40 = vadd.f32 %v1184_v11, %v1122_v56  ;;  %v1317_v17 = vadd.f32 %v1316_v14, %v1254_v9 }
 0x16d   :  { %v1186_v3 = vrot.slane %v1185_v40, 4  ;;  %v1318_v58 = vadd.f32 %v1317_v17, %v1255_v15 }
 0x16f   :  { %v1187_v28 = vadd.f32 %v1186_v3, %v1185_v40  ;;  %v1319_v20 = vrot.slane %v1318_v58, 4 }
 0x171   :  { %v1188_v21 = vrot.slane %v1187_v28, 2  ;;  %v1320_v53 = vadd.f32 %v1319_v20, %v1318_v58 }
 0x173   :  { %v1189_v19 = vadd.f32 %v1188_v21, %v1187_v28  ;;  %v1321_v22 = vrot.slane %v1320_v53, 2 }
 0x175   :  { %v1190_v24 = vrot.slane %v1189_v19, 1  ;;  %v1322_v26 = vadd.f32 %v1321_v22, %v1320_v53 }
 0x177   :  { %v1323_v23 = vrot.slane %v1322_v26, 1  ;;  %v1191_v27 = vadd.f32 %v1190_v24, %v1189_v19 }
 0x179   :  { %v1324_v52 = vadd.f32 %v1323_v23, %v1322_v26 }
 0x17b   :  { %v1326_v12 = vsel %vm1325_vm0, %v1191_v27, %v1324_v52 }
 0x17c   :  { %1327 = vst [vmem:[%s2474_s5] sm:$0x3] %v1326_v12 }

// kernel: dense_block_forward.5
= control target key start
LH: loop header
LB: loop body
LE: loop exit
PB: predicated region body
PF: predicated region fallthrough
CT: control target
= control target key end

     0   :  { %s4002_s21 = smov 0   ;;  %s6142_s0 = inlined_call_operand.vmem [shape: bf16[512,128], index: 0, kind: input, shape index: {}]   ;;  %s6143_s1 = inlined_call_operand.vmem [shape: f32[1,128], index: 1, kind: input, shape index: {}]   ;;  %s6144_s2 = inlined_call_operand.vmem [shape: f32[1,128], index: 2, kind: input, shape index: {}]   ;;  %s6145_s3 = inlined_call_operand.vmem [shape: bf16[128,256], index: 3, kind: input, shape index: {}]   ;;  %s6146_s4 = inlined_call_operand.vmem [shape: bf16[512,128], index: 4, kind: input, shape index: {}, may-alias: {4,5}]   ;;  %s6147_s5 = inlined_call_operand.vmem [shape: bf16[512,128], index: 5, kind: output, shape index: {0}, may-alias: {4,5}]   ;;  %s6148_s6 = inlined_call_operand.vmem [shape: f32[2,2,128], index: 6, kind: output, shape index: {1}]  }
   0x1 LB: > { %s4008_s22 = sadd.s32 4294967295, %s3955_s21   ;;  %p3612_p0 = scmp.ge.s32.totalorder %s3955_s21, 1  ;;  %s3955_s21 = sphi %s4002_s21, %s17_s21  }
   0x2   : > { %p227_p1 = scmp.lt.s32.totalorder %s3955_s21, 3 }
   0x4   : > { %p228_p2 = pnand %p3612_p0, %p227_p1 }
   0x6   : > { %231 = sbr.rel (%p228_p2) target bundleno = 942 (0x3ae), region = 40 }
   0xb   : > { %v3906_v0 = vld [vmem:[%s6145_s3 + $0x74] ss:$8 sps:$4 sm:$0xff]   ;;  %s3613_s25 = sshll.u32 %s4008_s22, 5  ;;  %v3908_v1 = vld [vmem:[%s6145_s3 + $0x70] ss:$8 sps:$4 sm:$0xff]   ;;  %v3957_v2 = vmov 0  }
   0xc   : > { %607 = vmatprep.mubr.bf16.mxu0 %v3957_v2  ;;  %687 = vmatprep.mubr.bf16.mxu1 %v3957_v2  ;;  %p267_p3 = scmp.lt.s32.totalorder %s3613_s25, 63  ;;  %v3909_v3 = vld [vmem:[%s6145_s3 + $0x64] ss:$8 sps:$4 sm:$0xff]   ;;  %v3911_v4 = vld [vmem:[%s6145_s3 + $0x60] ss:$8 sps:$4 sm:$0xff]   ;;  %s3959_s27 = smov 112  }
   0xd   : > { %575 = vmatprep.subr.bf16.mxu0 %v3906_v0  ;;  %3862 = vmatprep.subr.bf16.mxu1 %v3906_v0  ;;  %v3912_v5 = vld [vmem:[%s6145_s3 + $0x54] ss:$8 sps:$4 sm:$0xff]   ;;  %v3914_v6 = vld [vmem:[%s6145_s3 + $0x50] ss:$8 sps:$4 sm:$0xff]   ;;  %v3915_v7 = vld [vmem:[%s6145_s3 + $0x44] ss:$8 sps:$4 sm:$0xff]  }
   0xe   : > { %576 = vmatpush1.bf16.msra.mxu0 %v3908_v1  ;;  %3870 = vmatpush1.bf16.msra.mxu1 %v3908_v1  ;;  %s6674_s25 = smov (!%p267_p3, %s3613_s25), 63  ;;  %v3917_v9 = vld [vmem:[%s6145_s3 + $0x40] ss:$8 sps:$4 sm:$0xff]   ;;  %v3918_v10 = vld [vmem:[%s6145_s3 + $0x34] ss:$8 sps:$4 sm:$0xff]   ;;  %vm1815_vm0 = vcmask 1046528  }
   0xf   : > { %577 = vmatprep.subr.bf16.mxu0 %v3909_v3  ;;  %3863 = vmatprep.subr.bf16.mxu1 %v3909_v3  ;;  %s4030_s10 = sshll.u32 %s6674_s25, 2  ;;  %v4054_v13 = vld [vmem:[%s6143_s1] ss:$0 sm:$0xff]  ;;  %v3920_v14 = vld [vmem:[%s6145_s3 + $0x30] ss:$8 sps:$4 sm:$0xff]   ;;  %s3960_s28 = smov 96  }
  0x10   : > { %s4039_s15 = scalar_lea.vmem %s6142_s0, %s4030_s10  ;;  %s4063_s30 = scalar_lea.vmem %s6146_s4, %s4030_s10  ;;  %v3921_v15 = vld [vmem:[%s6145_s3 + $0x24] ss:$8 sps:$4 sm:$0xff]   ;;  %v3923_v16 = vld [vmem:[%s6145_s3 + $0x20] ss:$8 sps:$4 sm:$0xff]   ;;  %v4081_v20 = vld [vmem:[%s6145_s3 + $0x14] ss:$8 sps:$4 sm:$0xff]  }
  0x11   : > { %v3705_v8 = vld [vmem:[%s4039_s15] sm:$0xff]   ;;  %v3066_v23 = vld [vmem:[%s4063_s30 + $0x8] sm:$0xf]  ;;  %v3067_v24 = vld [vmem:[%s4063_s30 + $0xc] sm:$0xf]  ;;  %s4111_s19 = scalar_lea.vmem %s6147_s5, %s4030_s10  ;;  %vm1423_vm1 = vcmask 1040384  }
  0x12   : > { %578 = vmatpush1.bf16.msra.mxu0 %v3911_v4  ;;  %3871 = vmatpush1.bf16.msra.mxu1 %v3911_v4  ;;  %v3706_v11 = vunpack.c.l.bf16 %v3705_v8  ;;  %v3707_v12 = vunpack.c.h.bf16 %v3705_v8  ;;  %v4076_v19 = vld [vmem:[%s6144_s2] ss:$0 sm:$0xff]  ;;  %v3065_v22 = vld [vmem:[%s4063_s30 + $0x4] sm:$0xf]  ;;  %v3068_v25 = vld [vmem:[%s4063_s30 + $0x10] sm:$0xf] }
  0x13   : > { %579 = vmatprep.subr.bf16.mxu0 %v3912_v5  ;;  %3864 = vmatprep.subr.bf16.mxu1 %v3912_v5  ;;  %v3064_v21 = vld [vmem:[%s4063_s30] sm:$0xf]  ;;  %v3069_v26 = vld [vmem:[%s4063_s30 + $0x14] sm:$0xf]  ;;  %v3070_v27 = vld [vmem:[%s4063_s30 + $0x18] sm:$0xf] }
  0x14   : > { %v360_v17 = vmul.f32 %v3706_v11, %v4054_v13  ;;  %v361_v18 = vmul.f32 %v3707_v12, %v4054_v13  ;;  %v3071_v28 = vld [vmem:[%s4063_s30 + $0x1c] sm:$0xf]  ;;  %v3072_v29 = vld [vmem:[%s4063_s30 + $0x20] sm:$0xf]  ;;  %v3073_v30 = vld [vmem:[%s4063_s30 + $0x24] sm:$0xf] }
  0x15   : > { %v3074_v31 = vld [vmem:[%s4063_s30 + $0x28] sm:$0xf]  ;;  %v3075_v32 = vld [vmem:[%s4063_s30 + $0x2c] sm:$0xf]  ;;  %v3076_v33 = vld [vmem:[%s4063_s30 + $0x30] sm:$0xf] }
  0x16   : > { %580 = vmatpush1.bf16.msra.mxu0 %v3914_v6  ;;  %3872 = vmatpush1.bf16.msra.mxu1 %v3914_v6  ;;  %v3077_v34 = vld [vmem:[%s4063_s30 + $0x34] sm:$0xf]  ;;  %v3078_v35 = vld [vmem:[%s4063_s30 + $0x38] sm:$0xf]  ;;  %v3079_v36 = vld [vmem:[%s4063_s30 + $0x3c] sm:$0xf]  ;;  %v4117_v48 = vadd.f32 %v4076_v19, %v360_v17  ;;  %v4120_v49 = vadd.f32 %v4076_v19, %v361_v18 }
  0x17   : > { %581 = vmatprep.subr.bf16.mxu0 %v3915_v7  ;;  %3865 = vmatprep.subr.bf16.mxu1 %v3915_v7  ;;  %v3080_v37 = vld [vmem:[%s4063_s30 + $0x40] sm:$0xf]  ;;  %v3081_v38 = vld [vmem:[%s4063_s30 + $0x44] sm:$0xf]  ;;  %v3082_v39 = vld [vmem:[%s4063_s30 + $0x48] sm:$0xf] }
  0x18   : > { %v3083_v40 = vld [vmem:[%s4063_s30 + $0x4c] sm:$0xf]  ;;  %v3084_v41 = vld [vmem:[%s4063_s30 + $0x50] sm:$0xf]  ;;  %v3085_v42 = vld [vmem:[%s4063_s30 + $0x54] sm:$0xf] }
  0x19   : > { %v3086_v43 = vld [vmem:[%s4063_s30 + $0x58] sm:$0xf]  ;;  %v3087_v44 = vld [vmem:[%s4063_s30 + $0x5c] sm:$0xf]  ;;  %v3088_v45 = vld [vmem:[%s4063_s30 + $0x60] sm:$0xf] }
  0x1a   : > { %582 = vmatpush1.bf16.msra.mxu0 %v3917_v9  ;;  %3873 = vmatpush1.bf16.msra.mxu1 %v3917_v9  ;;  %v3089_v46 = vld [vmem:[%s4063_s30 + $0x64] sm:$0xf]  ;;  %v3090_v47 = vld [vmem:[%s4063_s30 + $0x68] sm:$0xf]  ;;  %v3091_v50 = vld [vmem:[%s4063_s30 + $0x6c] sm:$0xf] }
  0x1b   : > { %583 = vmatprep.subr.bf16.mxu0 %v3918_v10  ;;  %3866 = vmatprep.subr.bf16.mxu1 %v3918_v10  ;;  %v3092_v51 = vld [vmem:[%s4063_s30 + $0x70] sm:$0xf]  ;;  %v3093_v52 = vld [vmem:[%s4063_s30 + $0x74] sm:$0xf]  ;;  %v3094_v53 = vld [vmem:[%s4063_s30 + $0x78] sm:$0xf] }
  0x1c   : > { %v3095_v54 = vld [vmem:[%s4063_s30 + $0x7c] sm:$0xf]  ;;  %v3839_v55 = vld [vmem:[%s4039_s15 + $0x40] sm:$0xff]   ;;  %v3926_v56 = vld [vmem:[%s6145_s3 + $0x10] ss:$8 sps:$4 sm:$0xff]   ;;  %v431_v3 = vmax.f32 %v4117_v48, 0.0 }
  0x1d   : > { %3096 = vst [vmem:[%s4111_s19] sm:$0xf] %v3064_v21  ;;  %3097 = vst [vmem:[%s4111_s19 + $0x4] sm:$0xf] %v3065_v22  ;;  %v3738_v57 = vunpack.c.l.bf16 %v3839_v55  ;;  %v3739_v58 = vunpack.c.h.bf16 %v3839_v55  ;;  %v3832_v59 = vld [vmem:[%s4039_s15 + $0x8] sm:$0xff]   ;;  %v432_v4 = vmax.f32 %v4120_v49, 0.0  ;;  %v3833_v7 = vld [vmem:[%s4039_s15 + $0x10] sm:$0xff]  }
  0x1e   : > { %584 = vmatpush1.bf16.msra.mxu0 %v3920_v14  ;;  %3874 = vmatpush1.bf16.msra.mxu1 %v3920_v14  ;;  %3098 = vst [vmem:[%s4111_s19 + $0x8] sm:$0xf] %v3066_v23  ;;  %3099 = vst [vmem:[%s4111_s19 + $0xc] sm:$0xf] %v3067_v24  ;;  %v3840_v60 = vld [vmem:[%s4039_s15 + $0x48] sm:$0xff]   ;;  %v3710_v62 = vunpack.c.l.bf16 %v3832_v59  ;;  %v3711_v63 = vunpack.c.h.bf16 %v3832_v59  ;;  %v3715_v21 = vunpack.c.h.bf16 %v3833_v7  ;;  %v3841_v22 = vld [vmem:[%s4039_s15 + $0x50] sm:$0xff]  }
  0x1f   : > { %585 = vmatprep.subr.bf16.mxu0 %v3921_v15  ;;  %3867 = vmatprep.subr.bf16.mxu1 %v3921_v15  ;;  %3100 = vst [vmem:[%s4111_s19 + $0x10] sm:$0xf] %v3068_v25  ;;  %3101 = vst [vmem:[%s4111_s19 + $0x14] sm:$0xf] %v3069_v26  ;;  %v3927_v61 = vld [vmem:[%s6145_s3 + $0x4] ss:$8 sps:$4 sm:$0xff]   ;;  %v3742_v0 = vunpack.c.l.bf16 %v3840_v60  ;;  %v3743_v1 = vunpack.c.h.bf16 %v3840_v60  ;;  %v376_v5 = vmul.f32 %v3738_v57, %v4054_v13 }
  0x20   : > { %3102 = vst [vmem:[%s4111_s19 + $0x18] sm:$0xf] %v3070_v27  ;;  %3103 = vst [vmem:[%s4111_s19 + $0x1c] sm:$0xf] %v3071_v28  ;;  %v377_v6 = vmul.f32 %v3739_v58, %v4054_v13  ;;  %v362_v8 = vmul.f32 %v3710_v62, %v4054_v13  ;;  %v363_v9 = vmul.f32 %v3711_v63, %v4054_v13  ;;  %v3929_v12 = vld [vmem:[%s6145_s3] ss:$8 sps:$4 sm:$0xff]   ;;  %v3746_v28 = vunpack.c.l.bf16 %v3841_v22 }
  0x21   : > { %3104 = vst [vmem:[%s4111_s19 + $0x20] sm:$0xf] %v3072_v29  ;;  %3105 = vst [vmem:[%s4111_s19 + $0x24] sm:$0xf] %v3073_v30  ;;  %v378_v10 = vmul.f32 %v3742_v0, %v4054_v13  ;;  %v379_v11 = vmul.f32 %v3743_v1, %v4054_v13  ;;  %v415_v14 = vadd.f32 %v4076_v19, %v376_v5  ;;  %v3842_v49 = vld [vmem:[%s4039_s15 + $0x58] sm:$0xff]   ;;  %v3843_v57 = vld [vmem:[%s4039_s15 + $0x60] sm:$0xff]  }
  0x22   : > { %586 = vmatpush1.bf16.msra.mxu0 %v3923_v16  ;;  %3875 = vmatpush1.bf16.msra.mxu1 %v3923_v16  ;;  %3106 = vst [vmem:[%s4111_s19 + $0x28] sm:$0xf] %v3074_v31  ;;  %3107 = vst [vmem:[%s4111_s19 + $0x2c] sm:$0xf] %v3075_v32  ;;  %v416_v15 = vadd.f32 %v4076_v19, %v377_v6  ;;  %v3714_v16 = vunpack.c.l.bf16 %v3833_v7  ;;  %v463_v23 = vpack.c.bf16 %v432_v4, %v431_v3  ;;  %v3834_v32 = vld [vmem:[%s4039_s15 + $0x18] sm:$0xff]   ;;  %s3962_s29 = smov 80  }
  0x23   : > { %3108 = vst [vmem:[%s4111_s19 + $0x30] sm:$0xf] %v3076_v33  ;;  %3109 = vst [vmem:[%s4111_s19 + $0x34] sm:$0xf] %v3077_v34  ;;  %587 = vmatprep.subr.bf16.mxu0 %v4081_v20  ;;  %3868 = vmatprep.subr.bf16.mxu1 %v4081_v20  ;;  %v447_v17 = vmax.f32 %v415_v14, 0.0  ;;  %v401_v20 = vadd.f32 %v4076_v19, %v362_v8  ;;  %v402_v24 = vadd.f32 %v4076_v19, %v363_v9  ;;  %s3963_s30 = smov 48  }
  0x24   : > { %3110 = vst [vmem:[%s4111_s19 + $0x38] sm:$0xf] %v3078_v35  ;;  %3111 = vst [vmem:[%s4111_s19 + $0x3c] sm:$0xf] %v3079_v36  ;;  %v448_v18 = vmax.f32 %v416_v15, 0.0  ;;  %v417_v25 = vadd.f32 %v4076_v19, %v378_v10  ;;  %v418_v26 = vadd.f32 %v4076_v19, %v379_v11  ;;  %v364_v30 = vmul.f32 %v3714_v16, %v4054_v13  ;;  %v3836_v11 = vld [vmem:[%s4039_s15 + $0x28] sm:$0xff]  }
  0x25   : > { %3112 = vst [vmem:[%s4111_s19 + $0x40] sm:$0xf] %v3080_v37  ;;  %3113 = vst [vmem:[%s4111_s19 + $0x44] sm:$0xf] %v3081_v38  ;;  %v433_v29 = vmax.f32 %v401_v20, 0.0  ;;  %v365_v31 = vmul.f32 %v3715_v21, %v4054_v13  ;;  %v3747_v33 = vunpack.c.h.bf16 %v3841_v22  ;;  %v434_v34 = vmax.f32 %v402_v24, 0.0 }
  0x26   : > { %3114 = vst [vmem:[%s4111_s19 + $0x48] sm:$0xf] %v3082_v39  ;;  %3115 = vst [vmem:[%s4111_s19 + $0x4c] sm:$0xf] %v3083_v40  ;;  %588 = vmatpush1.bf16.msra.mxu0 %v3926_v56  ;;  %3876 = vmatpush1.bf16.msra.mxu1 %v3926_v56  ;;  %v471_v27 = vpack.c.bf16 %v448_v18, %v447_v17  ;;  %v449_v35 = vmax.f32 %v417_v25, 0.0  ;;  %v450_v36 = vmax.f32 %v418_v26, 0.0  ;;  %v3718_v39 = vunpack.c.l.bf16 %v3834_v32 }
  0x27   : > { %3116 = vst [vmem:[%s4111_s19 + $0x50] sm:$0xf] %v3084_v41  ;;  %3117 = vst [vmem:[%s4111_s19 + $0x54] sm:$0xf] %v3085_v42  ;;  %589 = vmatprep.subr.bf16.mxu0 %v3927_v61  ;;  %3869 = vmatprep.subr.bf16.mxu1 %v3927_v61  ;;  %v380_v37 = vmul.f32 %v3746_v28, %v4054_v13  ;;  %v381_v38 = vmul.f32 %v3747_v33, %v4054_v13  ;;  %v3719_v40 = vunpack.c.h.bf16 %v3834_v32  ;;  %v3844_v17 = vld [vmem:[%s4039_s15 + $0x68] sm:$0xff]   ;;  %v3837_v33 = vld [vmem:[%s4039_s15 + $0x30] sm:$0xff]  }
  0x28   : > { %3118 = vst [vmem:[%s4111_s19 + $0x58] sm:$0xf] %v3086_v43  ;;  %3119 = vst [vmem:[%s4111_s19 + $0x5c] sm:$0xf] %v3087_v44  ;;  %v403_v41 = vadd.f32 %v4076_v19, %v364_v30  ;;  %v404_v42 = vadd.f32 %v4076_v19, %v365_v31  ;;  %v464_v43 = vpack.c.bf16 %v434_v34, %v433_v29  ;;  %v3750_v55 = vunpack.c.l.bf16 %v3842_v49  ;;  %s3964_s7 = smov 32   ;;  %s3965_s8 = smov 16  }
  0x29   : > { %3120 = vst [vmem:[%s4111_s19 + $0x60] sm:$0xf] %v3088_v45  ;;  %3121 = vst [vmem:[%s4111_s19 + $0x64] sm:$0xf] %v3089_v46  ;;  %v472_v44 = vpack.c.bf16 %v450_v36, %v449_v35  ;;  %v419_v45 = vadd.f32 %v4076_v19, %v380_v37  ;;  %v420_v46 = vadd.f32 %v4076_v19, %v381_v38  ;;  %v3751_v56 = vunpack.c.h.bf16 %v3842_v49  ;;  %v3845_v38 = vld [vmem:[%s4039_s15 + $0x70] sm:$0xff]   ;;  %s3966_s9 = smov 8  }
  0x2a   : > { %3122 = vst [vmem:[%s4111_s19 + $0x68] sm:$0xf] %v3090_v47  ;;  %3123 = vst [vmem:[%s4111_s19 + $0x6c] sm:$0xf] %v3091_v50  ;;  %590 = vmatpush1.bf16.msra.mxu0 %v3929_v12  ;;  %3877 = vmatpush1.bf16.msra.mxu1 %v3929_v12  ;;  %v366_v47 = vmul.f32 %v3718_v39, %v4054_v13  ;;  %v367_v48 = vmul.f32 %v3719_v40, %v4054_v13  ;;  %v435_v50 = vmax.f32 %v403_v41, 0.0  ;;  %p284_p4 = scmp.lt.s32.totalorder %s4008_s22, 1 }
  0x2b   : > { %3124 = vst [vmem:[%s4111_s19 + $0x70] sm:$0xf] %v3092_v51  ;;  %3125 = vst [vmem:[%s4111_s19 + $0x74] sm:$0xf] %v3093_v52  ;;  %v436_v51 = vmax.f32 %v404_v42, 0.0  ;;  %v451_v52 = vmax.f32 %v419_v45, 0.0  ;;  %v382_v62 = vmul.f32 %v3750_v55, %v4054_v13  ;;  %v383_v63 = vmul.f32 %v3751_v56, %v4054_v13 }
  0x2c   : > { %3126 = vst [vmem:[%s4111_s19 + $0x78] sm:$0xf] %v3094_v53  ;;  %3127 = vst [vmem:[%s4111_s19 + $0x7c] sm:$0xf] %v3095_v54  ;;  %v452_v53 = vmax.f32 %v420_v46, 0.0  ;;  %v3835_v54 = vld [vmem:[%s4039_s15 + $0x20] sm:$0xff]   ;;  %v405_v58 = vadd.f32 %v4076_v19, %v366_v47  ;;  %v406_v59 = vadd.f32 %v4076_v19, %v367_v48  ;;  %v3754_v3 = vunpack.c.l.bf16 %v3843_v57 }
  0x2d   : > { %608 = vmatmul.mubr.bf16.vlgmr.msra.gmra.mxu0 %v463_v23  ;;  %688 = vmatmul.mubr.bf16.vlgmr.msra.gmra.mxu1 %v471_v27  ;;  %v3722_v60 = vunpack.c.l.bf16 %v3835_v54  ;;  %v3723_v61 = vunpack.c.h.bf16 %v3835_v54  ;;  %v465_v0 = vpack.c.bf16 %v436_v51, %v435_v50  ;;  %v3755_v4 = vunpack.c.h.bf16 %v3843_v57  ;;  %s6676_s22 = smov (!%p284_p4, %s4008_s22), 1 }
  0x2e   : > { %617 = vmatprep.mubr.bf16.mxu0 %v3957_v2  ;;  %697 = vmatprep.mubr.bf16.mxu1 %v3957_v2  ;;  %v473_v1 = vpack.c.bf16 %v452_v53, %v451_v52  ;;  %v421_v5 = vadd.f32 %v4076_v19, %v382_v62  ;;  %v422_v6 = vadd.f32 %v4076_v19, %v383_v63  ;;  %v437_v7 = vmax.f32 %v405_v58, 0.0  ;;  %v3838_v53 = vld [vmem:[%s4039_s15 + $0x38] sm:$0xff]   ;;  %s3619_s11 = sshll.u32 %s6676_s22, 1 }
  0x2f   : > { %v438_v8 = vmax.f32 %v406_v59, 0.0  ;;  %v368_v9 = vmul.f32 %v3722_v60, %v4054_v13  ;;  %v369_v10 = vmul.f32 %v3723_v61, %v4054_v13  ;;  %v384_v15 = vmul.f32 %v3754_v3, %v4054_v13  ;;  %s287_s14 = scalar_lea.vmem %s6148_s6, %s3619_s11 }
  0x30   : > { %v453_v12 = vmax.f32 %v421_v5, 0.0  ;;  %v454_v14 = vmax.f32 %v422_v6, 0.0  ;;  %v385_v16 = vmul.f32 %v3755_v4, %v4054_v13  ;;  %v3726_v18 = vunpack.c.l.bf16 %v3836_v11 }
  0x31   : > { %v3727_v20 = vunpack.c.h.bf16 %v3836_v11  ;;  %v466_v21 = vpack.c.bf16 %v438_v8, %v437_v7  ;;  %v407_v22 = vadd.f32 %v4076_v19, %v368_v9  ;;  %v408_v23 = vadd.f32 %v4076_v19, %v369_v10 }
  0x32   : > { %v3758_v24 = vunpack.c.l.bf16 %v3844_v17  ;;  %v474_v25 = vpack.c.bf16 %v454_v14, %v453_v12  ;;  %v423_v26 = vadd.f32 %v4076_v19, %v384_v15  ;;  %v424_v27 = vadd.f32 %v4076_v19, %v385_v16 }
  0x33   : > { %v3759_v28 = vunpack.c.h.bf16 %v3844_v17  ;;  %v370_v29 = vmul.f32 %v3726_v18, %v4054_v13  ;;  %v439_v30 = vmax.f32 %v407_v22, 0.0  ;;  %v440_v31 = vmax.f32 %v408_v23, 0.0 }
  0x34   : > { %v371_v32 = vmul.f32 %v3727_v20, %v4054_v13  ;;  %v455_v34 = vmax.f32 %v423_v26, 0.0  ;;  %v456_v35 = vmax.f32 %v424_v27, 0.0  ;;  %v386_v36 = vmul.f32 %v3758_v24, %v4054_v13 }
  0x35   : > { %618 = vmatmul.mubr.bf16.gmra.mxu0 %v464_v43  ;;  %698 = vmatmul.mubr.bf16.gmra.mxu1 %v472_v44  ;;  %v387_v37 = vmul.f32 %v3759_v28, %v4054_v13  ;;  %v409_v39 = vadd.f32 %v4076_v19, %v370_v29  ;;  %v3730_v40 = vunpack.c.l.bf16 %v3837_v33  ;;  %v467_v41 = vpack.c.bf16 %v440_v31, %v439_v30 }
  0x36   : > { %627 = vmatprep.mubr.bf16.mxu0 %v3957_v2  ;;  %707 = vmatprep.mubr.bf16.mxu1 %v3957_v2  ;;  %v410_v42 = vadd.f32 %v4076_v19, %v371_v32  ;;  %v3731_v43 = vunpack.c.h.bf16 %v3837_v33  ;;  %v3762_v44 = vunpack.c.l.bf16 %v3845_v38  ;;  %v475_v45 = vpack.c.bf16 %v456_v35, %v455_v34 }
  0x37   : > { %v425_v46 = vadd.f32 %v4076_v19, %v386_v36  ;;  %v426_v47 = vadd.f32 %v4076_v19, %v387_v37  ;;  %v3763_v48 = vunpack.c.h.bf16 %v3845_v38  ;;  %v441_v49 = vmax.f32 %v409_v39, 0.0 }
  0x38   : > { %v442_v50 = vmax.f32 %v410_v42, 0.0  ;;  %v372_v51 = vmul.f32 %v3730_v40, %v4054_v13  ;;  %v373_v52 = vmul.f32 %v3731_v43, %v4054_v13  ;;  %v388_v56 = vmul.f32 %v3762_v44, %v4054_v13 }
  0x39   : > { %v457_v54 = vmax.f32 %v425_v46, 0.0  ;;  %v458_v55 = vmax.f32 %v426_v47, 0.0  ;;  %v389_v57 = vmul.f32 %v3763_v48, %v4054_v13  ;;  %v3734_v60 = vunpack.c.l.bf16 %v3838_v53 }
  0x3a   : > { %v411_v58 = vadd.f32 %v4076_v19, %v372_v51  ;;  %v412_v59 = vadd.f32 %v4076_v19, %v373_v52  ;;  %v3735_v61 = vunpack.c.h.bf16 %v3838_v53  ;;  %v468_v62 = vpack.c.bf16 %v442_v50, %v441_v49 }
  0x3b   : > { %v476_v63 = vpack.c.bf16 %v458_v55, %v457_v54  ;;  %v374_v4 = vmul.f32 %v3734_v60, %v4054_v13  ;;  %v3958_v16 = vmov 0.0  }
  0x3c   : > { %v443_v3 = vmax.f32 %v411_v58, 0.0  ;;  %v444_v5 = vmax.f32 %v412_v59, 0.0  ;;  %v375_v6 = vmul.f32 %v3735_v61, %v4054_v13  ;;  %770 = vst [vmem:[#allocation2 + $0x240] sm:$0xff] %v3958_v16  ;;  %772 = vst [vmem:[#allocation2 + $0xb8] sm:$0xff] %v3958_v16  ;;  %3897 = vrot.lane.b32.xlu0 %v3958_v16, %s3959_s27 }
  0x3d   : > { %628 = vmatmul.mubr.bf16.gmra.mxu0 %v465_v0  ;;  %708 = vmatmul.mubr.bf16.gmra.mxu1 %v473_v1  ;;  %v427_v0 = vadd.f32 %v4076_v19, %v388_v56  ;;  %v428_v1 = vadd.f32 %v4076_v19, %v389_v57  ;;  %v413_v10 = vadd.f32 %v4076_v19, %v374_v4 }
  0x3e   : > { %637 = vmatprep.mubr.bf16.mxu0 %v3957_v2  ;;  %717 = vmatprep.mubr.bf16.mxu1 %v3957_v2  ;;  %v469_v9 = vpack.c.bf16 %v444_v5, %v443_v3  ;;  %v414_v11 = vadd.f32 %v4076_v19, %v375_v6  ;;  %768 = vst [vmem:[#allocation2 + $0x98] sm:$0xff] %v3958_v16  ;;  %774 = vst [vmem:[#allocation2 + $0x40] sm:$0xff] %v3958_v16 }
  0x3f   : > { %v459_v7 = vmax.f32 %v427_v0, 0.0  ;;  %v460_v8 = vmax.f32 %v428_v1, 0.0  ;;  %v445_v14 = vmax.f32 %v413_v10, 0.0  ;;  %776 = vst [vmem:[#allocation2 + $0xa8] sm:$0xff] %v3958_v16  ;;  %779 = vst [vmem:[#allocation2 + $0xd8] sm:$0xff] %v3958_v16 }
  0x40   : > { %v446_v15 = vmax.f32 %v414_v11, 0.0 }
  0x41   : > { %v477_v12 = vpack.c.bf16 %v460_v8, %v459_v7 }
  0x42   : > { %v470_v17 = vpack.c.bf16 %v446_v15, %v445_v14 }
  0x43   : > { %v1715_v18 = vld [vmem:[#allocation2 + $0x240] sm:$0xfe]  ;;  %v2041_v38 = vld [vmem:[#allocation2 + $0xb8] sm:$0x80] }
  0x44   : > { %v1816_v20 = vrot.slane %v1715_v18, 1  ;;  %v2047_v44 = vrot.slane %v2041_v38, 7 }
  0x45   : > { %638 = vmatmul.mubr.bf16.gmra.mxu0 %v466_v21  ;;  %718 = vmatmul.mubr.bf16.gmra.mxu1 %v474_v25  ;;  %v1817_v21 = vrot.slane %v3958_v16, 1 }
  0x46   : > { %647 = vmatprep.mubr.bf16.mxu0 %v3957_v2  ;;  %727 = vmatprep.mubr.bf16.mxu1 %v3957_v2 }
  0x47   : > { %v1818_v22 = vsel %vm1815_vm0, %v1816_v20, %v1817_v21 }
  0x48   : > { %1881 = vrot.lane.b32.xlu1 %v1818_v22, %s3960_s28 }
  0x4d   : > { %648 = vmatmul.mubr.bf16.gmra.mxu0 %v467_v41  ;;  %728 = vmatmul.mubr.bf16.gmra.mxu1 %v475_v45 }
  0x4e   : > { %657 = vmatprep.mubr.bf16.mxu0 %v3957_v2  ;;  %737 = vmatprep.mubr.bf16.mxu1 %v3957_v2 }
  0x55   : > { %658 = vmatmul.mubr.bf16.gmra.mxu0 %v468_v62  ;;  %738 = vmatmul.mubr.bf16.gmra.mxu1 %v476_v63 }
  0x56   : > { %667 = vmatprep.mubr.bf16.mxu0 %v3957_v2  ;;  %747 = vmatprep.mubr.bf16.mxu1 %v3957_v2 }
  0x5d   : > { %668 = vmatmul.mubr.bf16.gmra.mxu0 %v469_v9  ;;  %748 = vmatmul.mubr.bf16.gmra.mxu1 %v477_v12 }
  0x5e   : > { %677 = vmatprep.mubr.bf16.mxu0 %v3957_v2  ;;  %757 = vmatprep.mubr.bf16.mxu1 %v3957_v2  ;;  %v3846_v2 = vld [vmem:[%s4039_s15 + $0x78] sm:$0xff]   ;;  %s3961_s15 = smov 64  }
  0x5f   : > { %v3766_v23 = vunpack.c.l.bf16 %v3846_v2  ;;  %v3767_v24 = vunpack.c.h.bf16 %v3846_v2 }
  0x61   : > { %v390_v25 = vmul.f32 %v3766_v23, %v4054_v13  ;;  %v391_v26 = vmul.f32 %v3767_v24, %v4054_v13 }
  0x63   : > { %v429_v27 = vadd.f32 %v4076_v19, %v390_v25  ;;  %v430_v28 = vadd.f32 %v4076_v19, %v391_v26 }
  0x65   : > { %678 = vmatmul.mubr.bf16.gmra.mxu0 %v470_v17  ;;  %v461_v29 = vmax.f32 %v429_v27, 0.0  ;;  %v462_v30 = vmax.f32 %v430_v28, 0.0 }
  0x67   : > { %v478_v31 = vpack.c.bf16 %v462_v30, %v461_v29 }
  0x69   : > { %758 = vmatmul.mubr.bf16.gmra.mxu1 %v478_v31 }
  0xed   : > { %v609_v32 = vpop.f32.mrf.mxu0  ;;  %v4264_v33 = vpop.f32.mrf.mxu1 }
  0xee   : > { %780 = vst [vmem:[#allocation2 + $0x158] sm:$0xff] %v609_v32  ;;  %812 = vst [vmem:[#allocation2 + $0xe8] sm:$0xff] %v4264_v33  ;;  %1623 = vrot.lane.b32.xlu1 %v4264_v33, %s3959_s27  ;;  %1591 = vrot.lane.b32.xlu0 %v609_v32, %s3959_s27  ;;  %v1819_v13 = vrot.slane %v609_v32, 1  ;;  %v4283_v43 = vrot.slane %v609_v32, 7  ;;  %v6150_v3 = vrot.slane %v4264_v33, 1  ;;  %v6149_v4 = vrot.slane %v4264_v33, 7 }
  0xef   : > { %v611_v34 = vpop.f32.mrf.mxu0  ;;  %v691_v35 = vpop.f32.mrf.mxu1 }
  0xf0   : > { %813 = vst [vmem:[#allocation2 + $0x238] sm:$0xff] %v691_v35  ;;  %v1820_v19 = vsel %vm1815_vm0, %v1817_v21, %v1819_v13  ;;  %6200 = vst [vmem:[#allocation3_spill] sm:$0xff] %v4283_v43  ;;  %v2048_v48 = vsel %vm1423_vm1, %v2047_v44, %v4283_v43 }
  0xf1   : > { %v4271_v36 = vpop.f32.mrf.mxu0  ;;  %v4273_v37 = vpop.f32.mrf.mxu1 }
  0xf2   : > { %782 = vst [vmem:[#allocation2 + $0x200] sm:$0xff] %v4271_v36  ;;  %814 = vst [vmem:[#allocation2 + $0x198] sm:$0xff] %v4273_v37  ;;  %2217 = vrot.lane.b32.xlu1 %v609_v32, %s3961_s15  ;;  %1883 = vrot.lane.b32.xlu0 %v1820_v19, %s3960_s28  ;;  %v1821_v54 = vrot.slane %v4271_v36, 1  ;;  %v1431_v55 = vrot.slane %v4271_v36, 7  ;;  %v1853_v61 = vrot.slane %v4273_v37, 1  ;;  %v1463_v62 = vrot.slane %v4273_v37, 7 }
  0xf3   : > { %v615_v39 = vpop.f32.mrf.mxu0  ;;  %v695_v40 = vpop.f32.mrf.mxu1 }
  0xf4   : > { %815 = vst [vmem:[#allocation2 + $0x80] sm:$0xff] %v695_v40  ;;  %v1822_v59 = vsel %vm1815_vm0, %v1819_v13, %v1821_v54  ;;  %v4318_v60 = vsel %vm1423_vm1, %v4283_v43, %v1431_v55  ;;  %v1854_v7 = vsel %vm1815_vm0, %v6150_v3, %v1853_v61  ;;  %v4340_v8 = vsel %vm1423_vm1, %v6149_v4, %v1463_v62 }
  0xf5   : > { %v4279_v41 = vpop.f32.mrf.mxu0  ;;  %v4281_v42 = vpop.f32.mrf.mxu1  ;;  %6201 = vst [vmem:[#allocation4_spill] sm:$0xff] %v4318_v60  ;;  %v2345_v0 = vld [vmem:[#allocation2 + $0x158] sm:$0xfe]  ;;  %6202 = vst [vmem:[#allocation5_spill] sm:$0xff] %v4340_v8 }
  0xf6   : > { %816 = vst [vmem:[#allocation2 + $0x1e8] sm:$0xff] %v4281_v42  ;;  %2249 = vrot.lane.b32.xlu1 %v4264_v33, %s3961_s15  ;;  %1625 = vrot.lane.b32.xlu0 %v4273_v37, %s3959_s27  ;;  %v2349_v9 = vrot.slane %v2345_v0, 1  ;;  %v1823_v10 = vrot.slane %v4279_v41, 1  ;;  %v1855_v18 = vrot.slane %v4281_v42, 1  ;;  %v1433_v44 = vrot.slane %v4279_v41, 7 }
  0xf7   : > { %v621_v45 = vpop.f32.mrf.mxu0  ;;  %v701_v46 = vpop.f32.mrf.mxu1 }
  0xf8   : > { %785 = vst [vmem:[#allocation2 + $0x30] sm:$0xff] %v621_v45  ;;  %817 = vst [vmem:[#allocation2] sm:$0xff] %v701_v46  ;;  %v2350_v16 = vsel %vm1815_vm0, %v2349_v9, %v1821_v54  ;;  %v1824_v17 = vsel %vm1815_vm0, %v1821_v54, %v1823_v10  ;;  %v1856_v23 = vsel %vm1815_vm0, %v1853_v61, %v1855_v18  ;;  %v1465_v54 = vrot.slane %v4281_v42, 7 }
  0xf9   : > { %v4290_v47 = vpop.f32.mrf.mxu0  ;;  %v4294_v49 = vpop.f32.mrf.mxu1 }
  0xfa   : > { %2055 = vrot.lane.b32.xlu1 %v2048_v48, %s3962_s29  ;;  %2219 = vrot.lane.b32.xlu0 %v4271_v36, %s3961_s15  ;;  %818 = vst [vmem:[#allocation2 + $0xa0] sm:$0xff] %v4294_v49  ;;  %v1435_v61 = vrot.slane %v4290_v47, 7 }
  0xfb   : > { %v625_v50 = vpop.f32.mrf.mxu0  ;;  %v705_v51 = vpop.f32.mrf.mxu1 }
  0xfc   : > { %787 = vst [vmem:[#allocation2 + $0x1f0] sm:$0xff] %v625_v50  ;;  %819 = vst [vmem:[#allocation2 + $0x88] sm:$0xff] %v705_v51  ;;  %v4408_v51 = vsel %vm1423_vm1, %v1431_v55, %v1433_v44 }
  0xfd   : > { %v4300_v52 = vpop.f32.mrf.mxu0  ;;  %v4302_v53 = vpop.f32.mrf.mxu1  ;;  %6203 = vst [vmem:[#allocation6_spill] sm:$0xff] %v4408_v51 }
  0xfe   : > { %2251 = vrot.lane.b32.xlu0 %v4273_v37, %s3961_s15  ;;  %1593 = vrot.lane.b32.xlu1 %v4271_v36, %s3959_s27  ;;  %820 = vst [vmem:[#allocation2 + $0x1d8] sm:$0xff] %v4302_v53  ;;  %v4420_v36 = vsel %vm1423_vm1, %v1463_v62, %v1465_v54  ;;  %v4431_v37 = vsel %vm1423_vm1, %v1433_v44, %v1435_v61  ;;  %v1825_v62 = vrot.slane %v4290_v47, 1 }
  0xff   : > { %v631_v56 = vpop.f32.mrf.mxu0  ;;  %v711_v57 = vpop.f32.mrf.mxu1  ;;  %6204 = vst [vmem:[#allocation7_spill] sm:$0xff] %v4420_v36 }
 0x100   : > { %789 = vst [vmem:[#allocation2 + $0x60] sm:$0xff] %v631_v56  ;;  %821 = vst [vmem:[#allocation2 + $0x1c0] sm:$0xff] %v711_v57  ;;  %v2517_v56 = vld [vmem:[#allocation2 + $0x200] sm:$0x80] }
 0x101   : > { %v4311_v58 = vpop.f32.mrf.mxu0  ;;  %v4322_v63 = vpop.f32.mrf.mxu1  ;;  %v2523_v55 = vrot.slane %v2517_v56, 7 }
 0x102   : > { %1885 = vrot.lane.b32.xlu1 %v1822_v59, %s3960_s28  ;;  %2057 = vrot.lane.b32.xlu0 %v4318_v60, %s3962_s29  ;;  %822 = vst [vmem:[#allocation2 + $0x1e0] sm:$0xff] %v4322_v63 }
 0x103   : > { %v635_v1 = vpop.f32.mrf.mxu0  ;;  %v715_v5 = vpop.f32.mrf.mxu1 }
 0x104   : > { %791 = vst [vmem:[#allocation2 + $0x150] sm:$0xff] %v635_v1  ;;  %823 = vst [vmem:[#allocation2 + $0x1d0] sm:$0xff] %v715_v5  ;;  %v2524_v5 = vsel %vm1423_vm1, %v2523_v55, %v1433_v44  ;;  %v1471_v44 = vrot.slane %v4322_v63, 7 }
 0x105   : > { %v4330_v6 = vpop.f32.mrf.mxu0  ;;  %v4343_v11 = vpop.f32.mrf.mxu1 }
 0x106   : > { %1917 = vrot.lane.b32.xlu1 %v1854_v7, %s3960_s28  ;;  %2089 = vrot.lane.b32.xlu0 %v4340_v8, %s3962_s29  ;;  %v1863_v55 = vrot.slane %v4343_v11, 1 }
 0x107   : > { %v641_v12 = vpop.f32.mrf.mxu0  ;;  %v721_v14 = vpop.f32.mrf.mxu1 }
 0x108   : > { %793 = vst [vmem:[#allocation2 + $0x190] sm:$0xff] %v641_v12  ;;  %825 = vst [vmem:[#allocation2 + $0x138] sm:$0xff] %v721_v14  ;;  %v1826_v12 = vsel %vm1815_vm0, %v1823_v10, %v1825_v62  ;;  %v1859_v10 = vrot.slane %v4302_v53, 1 }
 0x109   : > { %v4348_v15 = vpop.f32.mrf.mxu0  ;;  %v4355_v20 = vpop.f32.mrf.mxu1 }
 0x10a   : > { %2357 = vrot.lane.b32.xlu1 %v2350_v16, %s3963_s30  ;;  %1887 = vrot.lane.b32.xlu0 %v1824_v17, %s3960_s28  ;;  %v1857_v16 = vrot.slane %v4294_v49, 1  ;;  %v1475_v4 = vrot.slane %v4355_v20, 7 }
 0x10b   : > { %v645_v21 = vpop.f32.mrf.mxu0  ;;  %v725_v22 = vpop.f32.mrf.mxu1 }
 0x10c   : > { %795 = vst [vmem:[#allocation2 + $0x178] sm:$0xff] %v645_v21  ;;  %827 = vst [vmem:[#allocation2 + $0x100] sm:$0xff] %v725_v22  ;;  %v1858_v21 = vsel %vm1815_vm0, %v1855_v18, %v1857_v16 }
 0x10d   : > { %v4359_v2 = vpop.f32.mrf.mxu0  ;;  %v4364_v24 = vpop.f32.mrf.mxu1 }
 0x10e   : > { %2389 = vrot.lane.b32.xlu1 %v1854_v7, %s3963_s30  ;;  %1919 = vrot.lane.b32.xlu0 %v1856_v23, %s3960_s28  ;;  %v1467_v7 = vrot.slane %v4294_v49, 7 }
 0x10f   : > { %v651_v25 = vpop.f32.mrf.mxu0  ;;  %v731_v26 = vpop.f32.mrf.mxu1 }
 0x110   : > { %797 = vst [vmem:[#allocation2 + $0x50] sm:$0xff] %v651_v25  ;;  %829 = vst [vmem:[#allocation2 + $0x250] sm:$0xff] %v731_v26  ;;  %v4442_v14 = vsel %vm1423_vm1, %v1465_v54, %v1467_v7  ;;  %v1437_v26 = vrot.slane %v4300_v52, 7  ;;  %v1831_v54 = vrot.slane %v4330_v6, 1 }
 0x111   : > { %v4368_v27 = vpop.f32.mrf.mxu0  ;;  %v4370_v28 = vpop.f32.mrf.mxu1  ;;  %6205 = vst [vmem:[#allocation8_spill] sm:$0xff] %v4442_v14 }
 0x112   : > { %1595 = vrot.lane.b32.xlu1 %v4279_v41, %s3959_s27  ;;  %2359 = vrot.lane.b32.xlu0 %v1824_v17, %s3963_s30  ;;  %830 = vst [vmem:[#allocation2 + $0x1a8] sm:$0xff] %v4370_v28  ;;  %v1827_v17 = vrot.slane %v4300_v52, 1 }
 0x113   : > { %v655_v29 = vpop.f32.mrf.mxu0  ;;  %v735_v30 = vpop.f32.mrf.mxu1 }
 0x114   : > { %799 = vst [vmem:[#allocation2 + $0x170] sm:$0xff] %v655_v29  ;;  %831 = vst [vmem:[#allocation2 + $0x110] sm:$0xff] %v735_v30  ;;  %v1828_v22 = vsel %vm1815_vm0, %v1825_v62, %v1827_v17  ;;  %v4484_v29 = vsel %vm1423_vm1, %v1435_v61, %v1437_v26  ;;  %v1469_v30 = vrot.slane %v4302_v53, 7  ;;  %v4518_v61 = vpop.permute.xlu1 %1881 }
 0x115   : > { %v4376_v31 = vpop.f32.mrf.mxu0  ;;  %v4378_v32 = vpop.f32.mrf.mxu1 }
 0x116   : > { %1627 = vrot.lane.b32.xlu1 %v4281_v42, %s3959_s27  ;;  %2391 = vrot.lane.b32.xlu0 %v1856_v23, %s3963_s30  ;;  %832 = vst [vmem:[#allocation2 + $0x48] sm:$0xff] %v4378_v32 }
 0x117   : > { %v661_v13 = vpop.f32.mrf.mxu0  ;;  %v741_v34 = vpop.f32.mrf.mxu1 }
 0x118   : > { %801 = vst [vmem:[#allocation2 + $0xb0] sm:$0xff] %v661_v13  ;;  %833 = vst [vmem:[#allocation2 + $0x90] sm:$0xff] %v741_v34  ;;  %v1439_v13 = vrot.slane %v4311_v58, 7  ;;  %v4493_v34 = vsel %vm1423_vm1, %v1467_v7, %v1469_v30 }
 0x119   : > { %v4384_v35 = vpop.f32.mrf.mxu0  ;;  %v4386_v19 = vpop.f32.mrf.mxu1  ;;  %6206 = vst [vmem:[#allocation9_spill] sm:$0xff] %v4493_v34 }
 0x11a   : > { %2221 = vrot.lane.b32.xlu1 %v4279_v41, %s3961_s15  ;;  %1597 = vrot.lane.b32.xlu0 %v4290_v47, %s3959_s27  ;;  %834 = vst [vmem:[#allocation2 + $0x160] sm:$0xff] %v4386_v19 }
 0x11b   : > { %v665_v38 = vpop.f32.mrf.mxu0  ;;  %v745_v39 = vpop.f32.mrf.mxu1 }
 0x11c   : > { %803 = vst [vmem:[#allocation2 + $0x168] sm:$0xff] %v665_v38  ;;  %835 = vst [vmem:[#allocation2 + $0x18] sm:$0xff] %v745_v39  ;;  %v4496_v38 = vsel %vm1423_vm1, %v1437_v26, %v1439_v13  ;;  %v1829_v39 = vrot.slane %v4311_v58, 1 }
 0x11d   : > { %v4393_v40 = vpop.f32.mrf.mxu0  ;;  %v4396_v45 = vpop.f32.mrf.mxu1 }
 0x11e   : > { %2253 = vrot.lane.b32.xlu1 %v4281_v42, %s3961_s15  ;;  %1629 = vrot.lane.b32.xlu0 %v4294_v49, %s3959_s27  ;;  %836 = vst [vmem:[#allocation2 + $0x1b8] sm:$0xff] %v4396_v45 }
 0x11f   : > { %v671_v46 = vpop.f32.mrf.mxu0  ;;  %v751_v48 = vpop.f32.mrf.mxu1 }
 0x120   : > { %805 = vst [vmem:[#allocation2 + $0x1b0] sm:$0xff] %v671_v46  ;;  %837 = vst [vmem:[#allocation2 + $0x120] sm:$0xff] %v751_v48  ;;  %v4506_v46 = vsel %vm1423_vm1, %v1469_v30, %v1471_v44  ;;  %v1861_v48 = vrot.slane %v4322_v63, 1 }
 0x121   : > { %v4403_v50 = vpop.f32.mrf.mxu0  ;;  %v4461_v42 = vpop.f32.mrf.mxu1  ;;  %6207 = vst [vmem:[#allocation10_spill] sm:$0xff] %v4506_v46 }
 0x122   : > { %2059 = vrot.lane.b32.xlu1 %v4408_v51, %s3962_s29  ;;  %2223 = vrot.lane.b32.xlu0 %v4290_v47, %s3961_s15  ;;  %838 = vst [vmem:[#allocation2 + $0x38] sm:$0xff] %v4461_v42  ;;  %v1862_v56 = vsel %vm1815_vm0, %v1859_v10, %v1861_v48  ;;  %v4896_v51 = vrot.slane %v4461_v42, 1 }
 0x123   : > { %v675_v57 = vpop.f32.mrf.mxu0  ;;  %v755_v18 = vpop.f32.mrf.mxu1 }
 0x124   : > { %807 = vst [vmem:[#allocation2 + $0xd0] sm:$0xff] %v675_v57  ;;  %839 = vst [vmem:[#allocation2 + $0x148] sm:$0xff] %v755_v18  ;;  %v1832_v57 = vsel %vm1815_vm0, %v1829_v39, %v1831_v54 }
 0x125   : > { %v4415_v59 = vpop.f32.mrf.mxu0  ;;  %6293 = vst [vmem:[#allocation96_spill] sm:$0xff] %v4896_v51 }
 0x126   : > { %2091 = vrot.lane.b32.xlu1 %v4420_v36, %s3962_s29  ;;  %2255 = vrot.lane.b32.xlu0 %v4294_v49, %s3961_s15  ;;  %v1860_v49 = vsel %vm1815_vm0, %v1857_v16, %v1859_v10 }
 0x127   : > { %v681_v0 = vpop.f32.mrf.mxu0 }
 0x128   : > { %809 = vst [vmem:[#allocation2 + $0x180] sm:$0xff] %v681_v0  ;;  %v1864_v0 = vsel %vm1815_vm0, %v1861_v48, %v1863_v55  ;;  %v1443_v48 = vrot.slane %v4348_v15, 7 }
 0x129   : > { %v4427_v1 = vpop.f32.mrf.mxu0  ;;  %v4471_v23 = vpop.f32.mrf.mxu1 }
 0x12a   : > { %2531 = vrot.lane.b32.xlu1 %v2524_v5, %s3964_s7  ;;  %2061 = vrot.lane.b32.xlu0 %v4431_v37, %s3962_s29  ;;  %840 = vst [vmem:[#allocation2 + $0x108] sm:$0xff] %v4471_v23 }
 0x12b   : > { %v685_v9 = vpop.f32.mrf.mxu0  ;;  %v761_v25 = vpop.f32.mrf.mxu1 }
 0x12c   : > { %811 = vst [vmem:[#allocation2 + $0xf8] sm:$0xff] %v685_v9  ;;  %841 = vst [vmem:[#allocation2 + $0xe0] sm:$0xff] %v761_v25  ;;  %v1441_v25 = vrot.slane %v4330_v6, 7 }
 0x12d   : > { %v4529_v7 = vpop.f32.mrf.mxu1 }
 0x12e   : > { %1889 = vrot.lane.b32.xlu1 %v1826_v12, %s3960_s28  ;;  %2093 = vrot.lane.b32.xlu0 %v4442_v14, %s3962_s29  ;;  %6210 = vst [vmem:[#allocation13_spill] sm:$0xff] %v4529_v7  ;;  %842 = vst [vmem:[#allocation2 + $0x228] sm:$0xff] %v4529_v7 }
 0x12f   : > { %v765_v16 = vpop.f32.mrf.mxu1 }
 0x130   : > { %843 = vst [vmem:[#allocation2 + $0x210] sm:$0xff] %v765_v16  ;;  %v1833_v16 = vrot.slane %v4348_v15, 1 }
 0x132   : > { %1921 = vrot.lane.b32.xlu1 %v1858_v21, %s3960_s28  ;;  %1891 = vrot.lane.b32.xlu0 %v1828_v22, %s3960_s28 }
 0x136   : > { %2361 = vrot.lane.b32.xlu1 %v1826_v12, %s3963_s30  ;;  %1923 = vrot.lane.b32.xlu0 %v1860_v49, %s3960_s28 }
 0x13a   : > { %2393 = vrot.lane.b32.xlu1 %v1858_v21, %s3963_s30  ;;  %2363 = vrot.lane.b32.xlu0 %v1828_v22, %s3963_s30 }
 0x13e   : > { %1599 = vrot.lane.b32.xlu1 %v4300_v52, %s3959_s27  ;;  %2395 = vrot.lane.b32.xlu0 %v1860_v49, %s3963_s30 }
 0x142   : > { %1631 = vrot.lane.b32.xlu1 %v4302_v53, %s3959_s27  ;;  %1601 = vrot.lane.b32.xlu0 %v4311_v58, %s3959_s27 }
 0x146   : > { %2225 = vrot.lane.b32.xlu1 %v4300_v52, %s3961_s15  ;;  %1633 = vrot.lane.b32.xlu0 %v4322_v63, %s3959_s27 }
 0x14a   : > { %2257 = vrot.lane.b32.xlu1 %v4302_v53, %s3961_s15  ;;  %2227 = vrot.lane.b32.xlu0 %v4311_v58, %s3961_s15  ;;  %v1830_v53 = vsel %vm1815_vm0, %v1827_v17, %v1829_v39  ;;  %v4571_v39 = vsel %vm1423_vm1, %v1439_v13, %v1441_v25  ;;  %v4587_v13 = vsel %vm1423_vm1, %v1441_v25, %v1443_v48  ;;  %v1865_v25 = vrot.slane %v4355_v20, 1 }
 0x14e   : > { %2063 = vrot.lane.b32.xlu1 %v4484_v29, %s3962_s29  ;;  %2259 = vrot.lane.b32.xlu0 %v4322_v63, %s3961_s15  ;;  %v4520_v63 = vpop.permute.xlu0 %3897 }
 0x152   : > { %2095 = vrot.lane.b32.xlu1 %v4493_v34, %s3962_s29  ;;  %2065 = vrot.lane.b32.xlu0 %v4496_v38, %s3962_s29 }
 0x156   : > { %1893 = vrot.lane.b32.xlu1 %v1830_v53, %s3960_s28  ;;  %2097 = vrot.lane.b32.xlu0 %v4506_v46, %s3962_s29 }
 0x15a   : > { %1925 = vrot.lane.b32.xlu1 %v1862_v56, %s3960_s28  ;;  %1895 = vrot.lane.b32.xlu0 %v1832_v57, %s3960_s28 }
 0x15e   : > { %2365 = vrot.lane.b32.xlu1 %v1830_v53, %s3963_s30  ;;  %1927 = vrot.lane.b32.xlu0 %v1864_v0, %s3960_s28  ;;  %v1473_v53 = vrot.slane %v4343_v11, 7 }
 0x160   : > { %v4525_v5 = vpop.permute.xlu1 %1623  ;;  %v4527_v62 = vpop.permute.xlu0 %1591 }
 0x161   : > { %6208 = vst [vmem:[#allocation11_spill] sm:$0xff] %v4525_v5  ;;  %6209 = vst [vmem:[#allocation12_spill] sm:$0xff] %v4527_v62  ;;  %v1843_v62 = vrot.slane %v4393_v40, 1 }
 0x162   : > { %2397 = vrot.lane.b32.xlu1 %v1862_v56, %s3963_s30  ;;  %2367 = vrot.lane.b32.xlu0 %v1832_v57, %s3963_s30 }
 0x164   : > { %v4534_v9 = vpop.permute.xlu1 %2217  ;;  %v4536_v12 = vpop.permute.xlu0 %1883 }
 0x165   : > { %6211 = vst [vmem:[#allocation14_spill] sm:$0xff] %v4534_v9  ;;  %6212 = vst [vmem:[#allocation15_spill] sm:$0xff] %v4536_v12  ;;  %v1477_v9 = vrot.slane %v4364_v24, 7 }
 0x166   : > { %1603 = vrot.lane.b32.xlu1 %v4330_v6, %s3959_s27  ;;  %2399 = vrot.lane.b32.xlu0 %v1864_v0, %s3963_s30  ;;  %v4584_v0 = vsel %vm1423_vm1, %v1471_v44, %v1473_v53  ;;  %v1834_v44 = vsel %vm1815_vm0, %v1831_v54, %v1833_v16 }
 0x167   : > { %6223 = vst [vmem:[#allocation26_spill] sm:$0xff] %v4584_v0 }
 0x168   : > { %v4541_v17 = vpop.permute.xlu1 %2249  ;;  %v4543_v21 = vpop.permute.xlu0 %1625 }
 0x169   : > { %6213 = vst [vmem:[#allocation16_spill] sm:$0xff] %v4541_v17  ;;  %6214 = vst [vmem:[#allocation17_spill] sm:$0xff] %v4543_v21  ;;  %v4613_v17 = vsel %vm1815_vm0, %v1863_v55, %v1865_v25 }
 0x16a   : > { %1635 = vrot.lane.b32.xlu1 %v4343_v11, %s3959_s27  ;;  %1605 = vrot.lane.b32.xlu0 %v4348_v15, %s3959_s27 }
 0x16c   : > { %v4549_v22 = vpop.permute.xlu1 %2055  ;;  %v4551_v10 = vpop.permute.xlu0 %2219 }
 0x16d   : > { %6215 = vst [vmem:[#allocation18_spill] sm:$0xff] %v4549_v22  ;;  %6216 = vst [vmem:[#allocation19_spill] sm:$0xff] %v4551_v10 }
 0x16e   : > { %2229 = vrot.lane.b32.xlu1 %v4330_v6, %s3961_s15  ;;  %1637 = vrot.lane.b32.xlu0 %v4355_v20, %s3959_s27 }
 0x170   : > { %v4557_v49 = vpop.permute.xlu0 %2251  ;;  %v4559_v18 = vpop.permute.xlu1 %1593 }
 0x171   : > { %6217 = vst [vmem:[#allocation20_spill] sm:$0xff] %v4557_v49  ;;  %6218 = vst [vmem:[#allocation21_spill] sm:$0xff] %v4559_v18  ;;  %v4601_v49 = vsel %vm1423_vm1, %v1473_v53, %v1475_v4  ;;  %v1867_v53 = vrot.slane %v4364_v24, 1 }
 0x172   : > { %2261 = vrot.lane.b32.xlu1 %v4343_v11, %s3961_s15  ;;  %2231 = vrot.lane.b32.xlu0 %v4348_v15, %s3961_s15  ;;  %6226 = vst [vmem:[#allocation29_spill] sm:$0xff] %v4601_v49 }
 0x174   : > { %v4566_v26 = vpop.permute.xlu1 %1885  ;;  %v4568_v30 = vpop.permute.xlu0 %2057 }
 0x175   : > { %6219 = vst [vmem:[#allocation22_spill] sm:$0xff] %v4566_v26  ;;  %6220 = vst [vmem:[#allocation23_spill] sm:$0xff] %v4568_v30  ;;  %v1839_v26 = vrot.slane %v4376_v31, 1 }
 0x176   : > { %2067 = vrot.lane.b32.xlu1 %v4571_v39, %s3962_s29  ;;  %2263 = vrot.lane.b32.xlu0 %v4355_v20, %s3961_s15 }
 0x178   : > { %v4579_v56 = vpop.permute.xlu1 %1917  ;;  %v4581_v57 = vpop.permute.xlu0 %2089 }
 0x179   : > { %6221 = vst [vmem:[#allocation24_spill] sm:$0xff] %v4579_v56  ;;  %6222 = vst [vmem:[#allocation25_spill] sm:$0xff] %v4581_v57  ;;  %v1835_v56 = vrot.slane %v4359_v2, 1 }
 0x17a   : > { %2099 = vrot.lane.b32.xlu1 %v4584_v0, %s3962_s29  ;;  %2069 = vrot.lane.b32.xlu0 %v4587_v13, %s3962_s29 }
 0x17b   : > { %v1836_v54 = vsel %vm1815_vm0, %v1833_v16, %v1835_v56 }
 0x17c   : > { %v4595_v3 = vpop.permute.xlu1 %2357  ;;  %v4597_v21 = vpop.permute.xlu0 %1887 }
 0x17d   : > { %6224 = vst [vmem:[#allocation27_spill] sm:$0xff] %v4595_v3  ;;  %6225 = vst [vmem:[#allocation28_spill] sm:$0xff] %v4597_v21 }
 0x17e   : > { %1897 = vrot.lane.b32.xlu1 %v1834_v44, %s3960_s28  ;;  %2101 = vrot.lane.b32.xlu0 %v4601_v49, %s3962_s29 }
 0x180   : > { %v4608_v5 = vpop.permute.xlu1 %2389  ;;  %v4610_v57 = vpop.permute.xlu0 %1919 }
 0x181   : > { %6227 = vst [vmem:[#allocation30_spill] sm:$0xff] %v4608_v5  ;;  %6228 = vst [vmem:[#allocation31_spill] sm:$0xff] %v4610_v57  ;;  %v4625_v5 = vsel %vm1815_vm0, %v1865_v25, %v1867_v53 }
 0x182   : > { %1929 = vrot.lane.b32.xlu1 %v4613_v17, %s3960_s28  ;;  %1899 = vrot.lane.b32.xlu0 %v1836_v54, %s3960_s28 }
 0x184   : > { %v4620_v3 = vpop.permute.xlu1 %1595  ;;  %v4622_v10 = vpop.permute.xlu0 %2359 }
 0x185   : > { %6229 = vst [vmem:[#allocation32_spill] sm:$0xff] %v4620_v3  ;;  %6230 = vst [vmem:[#allocation33_spill] sm:$0xff] %v4622_v10 }
 0x186   : > { %2369 = vrot.lane.b32.xlu1 %v1834_v44, %s3963_s30  ;;  %1931 = vrot.lane.b32.xlu0 %v4625_v5, %s3960_s28 }
 0x188   : > { %v4630_v55 = vpop.permute.xlu1 %1627  ;;  %v4632_v16 = vpop.permute.xlu0 %2391 }
 0x189   : > { %6231 = vst [vmem:[#allocation34_spill] sm:$0xff] %v4630_v55  ;;  %6232 = vst [vmem:[#allocation35_spill] sm:$0xff] %v4632_v16  ;;  %v1445_v16 = vrot.slane %v4359_v2, 7 }
 0x18a   : > { %1607 = vrot.lane.b32.xlu1 %v4359_v2, %s3959_s27  ;;  %2371 = vrot.lane.b32.xlu0 %v1836_v54, %s3963_s30 }
 0x18c   : > { %v4637_v57 = vpop.permute.xlu1 %2221  ;;  %v4639_v10 = vpop.permute.xlu0 %1597 }
 0x18d   : > { %6233 = vst [vmem:[#allocation36_spill] sm:$0xff] %v4637_v57  ;;  %6234 = vst [vmem:[#allocation37_spill] sm:$0xff] %v4639_v10  ;;  %v4667_v57 = vsel %vm1423_vm1, %v1443_v48, %v1445_v16  ;;  %v1447_v10 = vrot.slane %v4368_v27, 7 }
 0x18e   : > { %1639 = vrot.lane.b32.xlu1 %v4364_v24, %s3959_s27  ;;  %1609 = vrot.lane.b32.xlu0 %v4368_v27, %s3959_s27 }
 0x18f   : > { %v4683_v48 = vsel %vm1423_vm1, %v1445_v16, %v1447_v10  ;;  %v1869_v16 = vrot.slane %v4370_v28, 1 }
 0x190   : > { %v4645_v44 = vpop.permute.xlu1 %2253  ;;  %v4647_v25 = vpop.permute.xlu0 %1629 }
 0x191   : > { %6235 = vst [vmem:[#allocation38_spill] sm:$0xff] %v4645_v44  ;;  %6236 = vst [vmem:[#allocation39_spill] sm:$0xff] %v4647_v25 }
 0x192   : > { %2233 = vrot.lane.b32.xlu1 %v4359_v2, %s3961_s15  ;;  %1641 = vrot.lane.b32.xlu0 %v4370_v28, %s3959_s27 }
 0x194   : > { %v4653_v54 = vpop.permute.xlu1 %2059  ;;  %v4655_v55 = vpop.permute.xlu0 %2223 }
 0x195   : > { %6237 = vst [vmem:[#allocation40_spill] sm:$0xff] %v4653_v54  ;;  %6238 = vst [vmem:[#allocation41_spill] sm:$0xff] %v4655_v55  ;;  %v1479_v54 = vrot.slane %v4370_v28, 7 }
 0x196   : > { %2265 = vrot.lane.b32.xlu1 %v4364_v24, %s3961_s15  ;;  %2235 = vrot.lane.b32.xlu0 %v4368_v27, %s3961_s15 }
 0x198   : > { %v4662_v44 = vpop.permute.xlu1 %2091  ;;  %v4664_v25 = vpop.permute.xlu0 %2255 }
 0x199   : > { %6239 = vst [vmem:[#allocation42_spill] sm:$0xff] %v4662_v44  ;;  %6240 = vst [vmem:[#allocation43_spill] sm:$0xff] %v4664_v25  ;;  %v4680_v44 = vsel %vm1423_vm1, %v1475_v4, %v1477_v9  ;;  %v1837_v25 = vrot.slane %v4368_v27, 1 }
 0x19a   : > { %2071 = vrot.lane.b32.xlu1 %v4667_v57, %s3962_s29  ;;  %2267 = vrot.lane.b32.xlu0 %v4370_v28, %s3961_s15  ;;  %6243 = vst [vmem:[#allocation46_spill] sm:$0xff] %v4680_v44 }
 0x19b   : > { %v1838_v4 = vsel %vm1815_vm0, %v1835_v56, %v1837_v25  ;;  %v1840_v56 = vsel %vm1815_vm0, %v1837_v25, %v1839_v26 }
 0x19c   : > { %v4675_v55 = vpop.permute.xlu1 %2531  ;;  %v4677_v30 = vpop.permute.xlu0 %2061 }
 0x19d   : > { %6241 = vst [vmem:[#allocation44_spill] sm:$0xff] %v4675_v55  ;;  %6242 = vst [vmem:[#allocation45_spill] sm:$0xff] %v4677_v30  ;;  %v4697_v30 = vsel %vm1423_vm1, %v1477_v9, %v1479_v54  ;;  %v1871_v9 = vrot.slane %v4378_v32, 1 }
 0x19e   : > { %2103 = vrot.lane.b32.xlu1 %v4680_v44, %s3962_s29  ;;  %2073 = vrot.lane.b32.xlu0 %v4683_v48, %s3962_s29  ;;  %6246 = vst [vmem:[#allocation49_spill] sm:$0xff] %v4697_v30 }
 0x1a0   : > { %v4691_v3 = vpop.permute.xlu1 %1889  ;;  %v4693_v55 = vpop.permute.xlu0 %2093 }
 0x1a1   : > { %6244 = vst [vmem:[#allocation47_spill] sm:$0xff] %v4691_v3  ;;  %6245 = vst [vmem:[#allocation48_spill] sm:$0xff] %v4693_v55  ;;  %v4709_v55 = vsel %vm1815_vm0, %v1867_v53, %v1869_v16 }
 0x1a2   : > { %1901 = vrot.lane.b32.xlu1 %v1838_v4, %s3960_s28  ;;  %2105 = vrot.lane.b32.xlu0 %v4697_v30, %s3962_s29 }
 0x1a4   : > { %v4704_v18 = vpop.permute.xlu1 %1921  ;;  %v4706_v60 = vpop.permute.xlu0 %1891 }
 0x1a5   : > { %6247 = vst [vmem:[#allocation50_spill] sm:$0xff] %v4704_v18  ;;  %6248 = vst [vmem:[#allocation51_spill] sm:$0xff] %v4706_v60  ;;  %v4721_v18 = vsel %vm1815_vm0, %v1869_v16, %v1871_v9 }
 0x1a6   : > { %1933 = vrot.lane.b32.xlu1 %v4709_v55, %s3960_s28  ;;  %1903 = vrot.lane.b32.xlu0 %v1840_v56, %s3960_s28 }
 0x1a8   : > { %v4716_v28 = vpop.permute.xlu1 %2361  ;;  %v4718_v3 = vpop.permute.xlu0 %1923 }
 0x1a9   : > { %6249 = vst [vmem:[#allocation52_spill] sm:$0xff] %v4716_v28  ;;  %6250 = vst [vmem:[#allocation53_spill] sm:$0xff] %v4718_v3 }
 0x1aa   : > { %2373 = vrot.lane.b32.xlu1 %v1838_v4, %s3963_s30  ;;  %1935 = vrot.lane.b32.xlu0 %v4721_v18, %s3960_s28 }
 0x1ac   : > { %v4726_v53 = vpop.permute.xlu1 %2393  ;;  %v4728_v25 = vpop.permute.xlu0 %2363 }
 0x1ad   : > { %6251 = vst [vmem:[#allocation54_spill] sm:$0xff] %v4726_v53  ;;  %6252 = vst [vmem:[#allocation55_spill] sm:$0xff] %v4728_v25 }
 0x1ae   : > { %1611 = vrot.lane.b32.xlu1 %v4376_v31, %s3959_s27  ;;  %2375 = vrot.lane.b32.xlu0 %v1840_v56, %s3963_s30 }
 0x1b0   : > { %v4733_v28 = vpop.permute.xlu1 %1599  ;;  %v4735_v3 = vpop.permute.xlu0 %2395 }
 0x1b1   : > { %6253 = vst [vmem:[#allocation56_spill] sm:$0xff] %v4733_v28  ;;  %6254 = vst [vmem:[#allocation57_spill] sm:$0xff] %v4735_v3  ;;  %v1449_v3 = vrot.slane %v4376_v31, 7  ;;  %v1481_v28 = vrot.slane %v4378_v32, 7 }
 0x1b2   : > { %1643 = vrot.lane.b32.xlu1 %v4378_v32, %s3959_s27  ;;  %1613 = vrot.lane.b32.xlu0 %v4384_v35, %s3959_s27 }
 0x1b4   : > { %v4741_v4 = vpop.permute.xlu1 %1631  ;;  %v4743_v16 = vpop.permute.xlu0 %1601 }
 0x1b5   : > { %6255 = vst [vmem:[#allocation58_spill] sm:$0xff] %v4741_v4  ;;  %6256 = vst [vmem:[#allocation59_spill] sm:$0xff] %v4743_v16  ;;  %v4763_v16 = vsel %vm1423_vm1, %v1447_v10, %v1449_v3 }
 0x1b6   : > { %2237 = vrot.lane.b32.xlu1 %v4376_v31, %s3961_s15  ;;  %1645 = vrot.lane.b32.xlu0 %v4386_v19, %s3959_s27  ;;  %6261 = vst [vmem:[#allocation64_spill] sm:$0xff] %v4763_v16 }
 0x1b8   : > { %v4749_v56 = vpop.permute.xlu1 %2225  ;;  %v4751_v53 = vpop.permute.xlu0 %1633 }
 0x1b9   : > { %6257 = vst [vmem:[#allocation60_spill] sm:$0xff] %v4749_v56  ;;  %6258 = vst [vmem:[#allocation61_spill] sm:$0xff] %v4751_v53  ;;  %v1451_v56 = vrot.slane %v4384_v35, 7 }
 0x1ba   : > { %2269 = vrot.lane.b32.xlu1 %v4378_v32, %s3961_s15  ;;  %2239 = vrot.lane.b32.xlu0 %v4384_v35, %s3961_s15  ;;  %v1841_v32 = vrot.slane %v4384_v35, 1 }
 0x1bb   : > { %v4779_v10 = vsel %vm1423_vm1, %v1449_v3, %v1451_v56  ;;  %v1873_v3 = vrot.slane %v4386_v19, 1 }
 0x1bc   : > { %v4758_v4 = vpop.permute.xlu1 %2257  ;;  %v4760_v25 = vpop.permute.xlu0 %2227  ;;  %6265 = vst [vmem:[#allocation68_spill] sm:$0xff] %v4779_v10 }
 0x1bd   : > { %6259 = vst [vmem:[#allocation62_spill] sm:$0xff] %v4758_v4  ;;  %6260 = vst [vmem:[#allocation63_spill] sm:$0xff] %v4760_v25  ;;  %v4776_v4 = vsel %vm1423_vm1, %v1479_v54, %v1481_v28  ;;  %v1483_v25 = vrot.slane %v4386_v19, 7  ;;  %v1842_v54 = vsel %vm1815_vm0, %v1839_v26, %v1841_v32  ;;  %v1844_v26 = vsel %vm1815_vm0, %v1841_v32, %v1843_v62 }
 0x1be   : > { %2075 = vrot.lane.b32.xlu1 %v4763_v16, %s3962_s29  ;;  %2271 = vrot.lane.b32.xlu0 %v4386_v19, %s3961_s15  ;;  %6264 = vst [vmem:[#allocation67_spill] sm:$0xff] %v4776_v4 }
 0x1c0   : > { %v4771_v53 = vpop.permute.xlu1 %2063  ;;  %v4773_v60 = vpop.permute.xlu0 %2259 }
 0x1c1   : > { %6262 = vst [vmem:[#allocation65_spill] sm:$0xff] %v4771_v53  ;;  %6263 = vst [vmem:[#allocation66_spill] sm:$0xff] %v4773_v60  ;;  %v4793_v60 = vsel %vm1423_vm1, %v1481_v28, %v1483_v25  ;;  %v1875_v28 = vrot.slane %v4396_v45, 1 }
 0x1c2   : > { %2107 = vrot.lane.b32.xlu1 %v4776_v4, %s3962_s29  ;;  %2077 = vrot.lane.b32.xlu0 %v4779_v10, %s3962_s29  ;;  %6268 = vst [vmem:[#allocation71_spill] sm:$0xff] %v4793_v60 }
 0x1c4   : > { %v4787_v21 = vpop.permute.xlu1 %2095  ;;  %v4789_v53 = vpop.permute.xlu0 %2065 }
 0x1c5   : > { %6266 = vst [vmem:[#allocation69_spill] sm:$0xff] %v4787_v21  ;;  %6267 = vst [vmem:[#allocation70_spill] sm:$0xff] %v4789_v53  ;;  %v4805_v21 = vsel %vm1815_vm0, %v1871_v9, %v1873_v3 }
 0x1c6   : > { %1905 = vrot.lane.b32.xlu1 %v1842_v54, %s3960_s28  ;;  %2109 = vrot.lane.b32.xlu0 %v4793_v60, %s3962_s29  ;;  %6271 = vst [vmem:[#allocation74_spill] sm:$0xff] %v4805_v21 }
 0x1c8   : > { %v4800_v12 = vpop.permute.xlu1 %1893  ;;  %v4802_v22 = vpop.permute.xlu0 %2097 }
 0x1c9   : > { %6269 = vst [vmem:[#allocation72_spill] sm:$0xff] %v4800_v12  ;;  %6270 = vst [vmem:[#allocation73_spill] sm:$0xff] %v4802_v22  ;;  %v4817_v12 = vsel %vm1815_vm0, %v1873_v3, %v1875_v28 }
 0x1ca   : > { %1937 = vrot.lane.b32.xlu1 %v4805_v21, %s3960_s28  ;;  %1907 = vrot.lane.b32.xlu0 %v1844_v26, %s3960_s28  ;;  %v1847_v21 = vrot.slane %v4415_v59, 1 }
 0x1cc   : > { %v4812_v19 = vpop.permute.xlu1 %1925  ;;  %v4814_v53 = vpop.permute.xlu0 %1895 }
 0x1cd   : > { %6272 = vst [vmem:[#allocation75_spill] sm:$0xff] %v4812_v19  ;;  %6273 = vst [vmem:[#allocation76_spill] sm:$0xff] %v4814_v53 }
 0x1ce   : > { %2377 = vrot.lane.b32.xlu1 %v1842_v54, %s3963_s30  ;;  %1939 = vrot.lane.b32.xlu0 %v4817_v12, %s3960_s28 }
 0x1d0   : > { %v4822_v9 = vpop.permute.xlu1 %2365  ;;  %v4824_v32 = vpop.permute.xlu0 %1927 }
 0x1d1   : > { %6274 = vst [vmem:[#allocation77_spill] sm:$0xff] %v4822_v9  ;;  %6275 = vst [vmem:[#allocation78_spill] sm:$0xff] %v4824_v32 }
 0x1d2   : > { %1615 = vrot.lane.b32.xlu1 %v4393_v40, %s3959_s27  ;;  %2379 = vrot.lane.b32.xlu0 %v1844_v26, %s3963_s30 }
 0x1d4   : > { %v4829_v19 = vpop.permute.xlu1 %2397  ;;  %v4831_v22 = vpop.permute.xlu0 %2367 }
 0x1d5   : > { %6276 = vst [vmem:[#allocation79_spill] sm:$0xff] %v4829_v19  ;;  %6277 = vst [vmem:[#allocation80_spill] sm:$0xff] %v4831_v22  ;;  %v1453_v19 = vrot.slane %v4393_v40, 7  ;;  %v4862_v22 = vrot.slane %v4396_v45, 7 }
 0x1d6   : > { %1647 = vrot.lane.b32.xlu1 %v4396_v45, %s3959_s27  ;;  %1617 = vrot.lane.b32.xlu0 %v4403_v50, %s3959_s27 }
 0x1d7   : > { %v4859_v9 = vsel %vm1423_vm1, %v1451_v56, %v1453_v19  ;;  %6285 = vst [vmem:[#allocation88_spill] sm:$0xff] %v4862_v22 }
 0x1d8   : > { %v4837_v54 = vpop.permute.xlu1 %1603  ;;  %v4839_v3 = vpop.permute.xlu0 %2399  ;;  %6284 = vst [vmem:[#allocation87_spill] sm:$0xff] %v4859_v9 }
 0x1d9   : > { %6278 = vst [vmem:[#allocation81_spill] sm:$0xff] %v4837_v54  ;;  %6279 = vst [vmem:[#allocation82_spill] sm:$0xff] %v4839_v3 }
 0x1da   : > { %2241 = vrot.lane.b32.xlu1 %v4393_v40, %s3961_s15  ;;  %1649 = vrot.lane.b32.xlu0 %v4461_v42, %s3959_s27 }
 0x1dc   : > { %v4845_v26 = vpop.permute.xlu1 %1635  ;;  %v4847_v32 = vpop.permute.xlu0 %1605 }
 0x1dd   : > { %6280 = vst [vmem:[#allocation83_spill] sm:$0xff] %v4845_v26  ;;  %6281 = vst [vmem:[#allocation84_spill] sm:$0xff] %v4847_v32  ;;  %v1455_v26 = vrot.slane %v4403_v50, 7 }
 0x1de   : > { %2273 = vrot.lane.b32.xlu1 %v4396_v45, %s3961_s15  ;;  %2243 = vrot.lane.b32.xlu0 %v4403_v50, %s3961_s15  ;;  %v1845_v45 = vrot.slane %v4403_v50, 1 }
 0x1df   : > { %v4878_v56 = vsel %vm1423_vm1, %v1453_v19, %v1455_v26 }
 0x1e0   : > { %v4854_v54 = vpop.permute.xlu1 %2229  ;;  %v4856_v3 = vpop.permute.xlu0 %1637  ;;  %6289 = vst [vmem:[#allocation92_spill] sm:$0xff] %v4878_v56 }
 0x1e1   : > { %6282 = vst [vmem:[#allocation85_spill] sm:$0xff] %v4854_v54  ;;  %6283 = vst [vmem:[#allocation86_spill] sm:$0xff] %v4856_v3  ;;  %v4875_v3 = vsel %vm1423_vm1, %v1483_v25, %v4862_v22  ;;  %v2049_v54 = vrot.slane %v4461_v42, 7  ;;  %v1846_v25 = vsel %vm1815_vm0, %v1843_v62, %v1845_v45  ;;  %v4908_v62 = vsel %vm1815_vm0, %v1875_v28, %v4896_v51 }
 0x1e2   : > { %2079 = vrot.lane.b32.xlu1 %v4859_v9, %s3962_s29  ;;  %2275 = vrot.lane.b32.xlu0 %v4461_v42, %s3961_s15  ;;  %6288 = vst [vmem:[#allocation91_spill] sm:$0xff] %v4875_v3  ;;  %6296 = vst [vmem:[#allocation99_spill] sm:$0xff] %v4908_v62 }
 0x1e3   : > { %v4893_v19 = vsel %vm1423_vm1, %v4862_v22, %v2049_v54  ;;  %v1848_v22 = vsel %vm1815_vm0, %v1845_v45, %v1847_v21 }
 0x1e4   : > { %v4869_v32 = vpop.permute.xlu1 %2261  ;;  %v4871_v53 = vpop.permute.xlu0 %2231  ;;  %6292 = vst [vmem:[#allocation95_spill] sm:$0xff] %v4893_v19 }
 0x1e5   : > { %6286 = vst [vmem:[#allocation89_spill] sm:$0xff] %v4869_v32  ;;  %6287 = vst [vmem:[#allocation90_spill] sm:$0xff] %v4871_v53 }
 0x1e6   : > { %2111 = vrot.lane.b32.xlu1 %v4875_v3, %s3962_s29  ;;  %2081 = vrot.lane.b32.xlu0 %v4878_v56, %s3962_s29  ;;  %v1716_v3 = vld [vmem:[#allocation2 + $0x108] sm:$0x1] }
 0x1e7   : > { %v1879_v42 = vrot.slane %v1716_v3, 1 }
 0x1e8   : > { %v4886_v32 = vpop.permute.xlu1 %2067  ;;  %v4888_v53 = vpop.permute.xlu0 %2263 }
 0x1e9   : > { %6290 = vst [vmem:[#allocation93_spill] sm:$0xff] %v4886_v32  ;;  %6291 = vst [vmem:[#allocation94_spill] sm:$0xff] %v4888_v53 }
 0x1ea   : > { %1909 = vrot.lane.b32.xlu1 %v1846_v25, %s3960_s28  ;;  %2113 = vrot.lane.b32.xlu0 %v4893_v19, %s3962_s29 }
 0x1ec   : > { %v4902_v32 = vpop.permute.xlu1 %2099  ;;  %v4904_v53 = vpop.permute.xlu0 %2069 }
 0x1ed   : > { %6294 = vst [vmem:[#allocation97_spill] sm:$0xff] %v4902_v32  ;;  %6295 = vst [vmem:[#allocation98_spill] sm:$0xff] %v4904_v53  ;;  %v1880_v32 = vsel %vm1815_vm0, %v4896_v51, %v1879_v42  ;;  %v1457_v42 = vrot.slane %v4415_v59, 7  ;;  %v1459_v53 = vrot.slane %v4427_v1, 7  ;;  %v6316_v51 = vrot.slane %v4264_v33, 7 }
 0x1ee   : > { %1941 = vrot.lane.b32.xlu1 %v4908_v62, %s3960_s28  ;;  %1911 = vrot.lane.b32.xlu0 %v1848_v22, %s3960_s28 }
 0x1f0   : > { %v4914_v43 = vpop.permute.xlu1 %1897  ;;  %v4916_v19 = vpop.permute.xlu0 %2101 }
 0x1f1   : > { %6297 = vst [vmem:[#allocation100_spill] sm:$0xff] %v4914_v43  ;;  %6298 = vst [vmem:[#allocation101_spill] sm:$0xff] %v4916_v19  ;;  %v4954_v19 = vsel %vm1423_vm1, %v1455_v26, %v1457_v42 }
 0x1f2   : > { %2381 = vrot.lane.b32.xlu1 %v1846_v25, %s3963_s30  ;;  %1943 = vrot.lane.b32.xlu0 %v1880_v32, %s3960_s28  ;;  %6307 = vst [vmem:[#allocation110_spill] sm:$0xff] %v4954_v19 }
 0x1f4   : > { %v4922_v28 = vpop.permute.xlu1 %1929  ;;  %v4924_v45 = vpop.permute.xlu0 %1899 }
 0x1f5   : > { %6299 = vst [vmem:[#allocation102_spill] sm:$0xff] %v4922_v28  ;;  %6300 = vst [vmem:[#allocation103_spill] sm:$0xff] %v4924_v45  ;;  %v4951_v28 = vrot.slane %v4471_v23, 7  ;;  %v2043_v45 = vld [vmem:[#allocation2 + $0x228] sm:$0x7f] }
 0x1f6   : > { %1619 = vrot.lane.b32.xlu1 %v4415_v59, %s3959_s27  ;;  %2383 = vrot.lane.b32.xlu0 %v1848_v22, %s3963_s30 }
 0x1f8   : > { %v4929_v3 = vpop.permute.xlu1 %2369  ;;  %v4931_v43 = vpop.permute.xlu0 %1931 }
 0x1f9   : > { %6301 = vst [vmem:[#allocation104_spill] sm:$0xff] %v4929_v3  ;;  %6302 = vst [vmem:[#allocation105_spill] sm:$0xff] %v4931_v43 }
 0x1fa   : > { %2245 = vrot.lane.b32.xlu1 %v4415_v59, %s3961_s15  ;;  %1621 = vrot.lane.b32.xlu0 %v4427_v1, %s3959_s27 }
 0x1fc   : > { %v4937_v32 = vpop.permute.xlu1 %1607  ;;  %v4939_v25 = vpop.permute.xlu0 %2371 }
 0x1fd   : > { %6303 = vst [vmem:[#allocation106_spill] sm:$0xff] %v4937_v32  ;;  %6304 = vst [vmem:[#allocation107_spill] sm:$0xff] %v4939_v25  ;;  %v1849_v32 = vrot.slane %v4427_v1, 1 }
 0x1fe   : > { %2277 = vrot.lane.b32.xlu1 %v4471_v23, %s3961_s15  ;;  %2247 = vrot.lane.b32.xlu0 %v4427_v1, %s3961_s15 }
 0x200   : > { %v4946_v22 = vpop.permute.xlu1 %1639  ;;  %v4948_v43 = vpop.permute.xlu0 %1609 }
 0x201   : > { %6305 = vst [vmem:[#allocation108_spill] sm:$0xff] %v4946_v22  ;;  %6306 = vst [vmem:[#allocation109_spill] sm:$0xff] %v4948_v43  ;;  %v4967_v22 = vsel %vm1423_vm1, %v2049_v54, %v4951_v28  ;;  %v6311_v43 = vrot.slane %v4264_v33, 1  ;;  %v4982_v54 = vsel %vm1423_vm1, %v1457_v42, %v1459_v53 }
 0x202   : > { %2083 = vrot.lane.b32.xlu1 %v4954_v19, %s3962_s29  ;;  %2279 = vrot.lane.b32.xlu0 %v4529_v7, %s3961_s15  ;;  %6310 = vst [vmem:[#allocation113_spill] sm:$0xff] %v4967_v22  ;;  %6314 = vst [vmem:[#allocation116_spill] sm:$0xff] %v4982_v54  ;;  %v2053_v7 = vrot.slane %v2043_v45, 7 }
 0x203   : > { %v1852_v26 = vsel %vm1815_vm0, %v1849_v32, %v6311_v43 }
 0x204   : > { %v4961_v3 = vpop.permute.xlu1 %2233  ;;  %v4963_v25 = vpop.permute.xlu0 %1641 }
 0x205   : > { %6308 = vst [vmem:[#allocation111_spill] sm:$0xff] %v4961_v3  ;;  %6309 = vst [vmem:[#allocation112_spill] sm:$0xff] %v4963_v25  ;;  %v1850_v25 = vsel %vm1815_vm0, %v1847_v21, %v1849_v32  ;;  %v2054_v21 = vsel %vm1423_vm1, %v4951_v28, %v2053_v7 }
 0x206   : > { %2115 = vrot.lane.b32.xlu1 %v4967_v22, %s3962_s29  ;;  %1915 = vrot.lane.b32.xlu0 %v1852_v26, %s3960_s28 }
 0x208   : > { %v4976_v62 = vpop.permute.xlu1 %2265  ;;  %v4978_v3 = vpop.permute.xlu0 %2235 }
 0x209   : > { %6312 = vst [vmem:[#allocation114_spill] sm:$0xff] %v4976_v62  ;;  %6313 = vst [vmem:[#allocation115_spill] sm:$0xff] %v4978_v3  ;;  %v4994_v62 = vsel %vm1423_vm1, %v1459_v53, %v6316_v51 }
 0x20a   : > { %1913 = vrot.lane.b32.xlu1 %v1850_v25, %s3960_s28  ;;  %2085 = vrot.lane.b32.xlu0 %v4982_v54, %s3962_s29  ;;  %6317 = vst [vmem:[#allocation118_spill] sm:$0xff] %v4994_v62 }
 0x20c   : > { %v4987_v43 = vpop.permute.xlu1 %2071  ;;  %v4989_v22 = vpop.permute.xlu0 %2267 }
 0x20d   : > { %6315 = vst [vmem:[#allocation117_spill] sm:$0xff] %v4989_v22  ;;  %v3930_v22 = vld [vmem:[#allocation2 + $0xe8] sm:$0xff] }
 0x20e   : > { %2087 = vrot.lane.b32.xlu1 %v4994_v62, %s3962_s29  ;;  %2117 = vrot.lane.b32.xlu0 %v2054_v21, %s3962_s29 }
 0x210   : > { %v5001_v45 = vpop.permute.xlu1 %2103  ;;  %v5003_v32 = vpop.permute.xlu0 %2073 }
 0x211   : > { %6318 = vst [vmem:[#allocation119_spill] sm:$0xff] %v5001_v45 }
 0x212   : > { %2385 = vrot.lane.b32.xlu1 %v1850_v25, %s3963_s30  ;;  %2387 = vrot.lane.b32.xlu0 %v1852_v26, %s3963_s30 }
 0x214   : > { %v5007_v33 = vpop.permute.xlu1 %1901  ;;  %v5009_v51 = vpop.permute.xlu0 %2105 }
 0x215   : > { %6319 = vst [vmem:[#allocation120_spill] sm:$0xff] %v5009_v51  ;;  %v3931_v51 = vld [vmem:[#allocation2 + $0x198] sm:$0xff] }
 0x216   : > { %2535 = vrot.lane.b32.xlu1 %v4484_v29, %s3964_s7  ;;  %2533 = vrot.lane.b32.xlu0 %v4431_v37, %s3964_s7 }
 0x218   : > { %v5015_v7 = vpop.permute.xlu1 %1933  ;;  %v5017_v53 = vpop.permute.xlu0 %1903 }
 0x219   : > { %6320 = vst [vmem:[#allocation121_spill] sm:$0xff] %v5015_v7  ;;  %6321 = vst [vmem:[#allocation122_spill] sm:$0xff] %v5017_v53 }
 0x21a   : > { %2693 = vrot.lane.b32.xlu1 %v4279_v41, %s3965_s8  ;;  %2537 = vrot.lane.b32.xlu0 %v4496_v38, %s3964_s7 }
 0x21c   : > { %v5023_v25 = vpop.permute.xlu1 %2373  ;;  %v5025_v42 = vpop.permute.xlu0 %1935 }
 0x21d   : > { %6322 = vst [vmem:[#allocation123_spill] sm:$0xff] %v5023_v25  ;;  %6323 = vst [vmem:[#allocation124_spill] sm:$0xff] %v5025_v42  ;;  %v6438_v25 = vld [vmem:[#allocation65_spill] sm:$0xff] }
 0x21e   : > { %2697 = vrot.lane.b32.xlu1 %v4300_v52, %s3965_s8  ;;  %2695 = vrot.lane.b32.xlu0 %v4290_v47, %s3965_s8 }
 0x220   : > { %v5031_v26 = vpop.permute.xlu1 %1611  ;;  %v5033_v21 = vpop.permute.xlu0 %2375 }
 0x221   : > { %6324 = vst [vmem:[#allocation125_spill] sm:$0xff] %v5031_v26  ;;  %6325 = vst [vmem:[#allocation126_spill] sm:$0xff] %v5033_v21  ;;  %v6434_v21 = vld [vmem:[#allocation40_spill] sm:$0xff] }
 0x222   : > { %2539 = vrot.lane.b32.xlu1 %v4571_v39, %s3964_s7  ;;  %2699 = vrot.lane.b32.xlu0 %v4311_v58, %s3965_s8 }
 0x224   : > { %v5039_v41 = vpop.permute.xlu1 %1643  ;;  %v5041_v7 = vpop.permute.xlu0 %1613 }
 0x225   : > { %6326 = vst [vmem:[#allocation127_spill] sm:$0xff] %v5039_v41  ;;  %6327 = vst [vmem:[#allocation128_spill] sm:$0xff] %v5041_v7  ;;  %v3938_v7 = vld [vmem:[#allocation2 + $0x48] sm:$0xff] }
 0x226   : > { %2701 = vrot.lane.b32.xlu1 %v4330_v6, %s3965_s8  ;;  %2541 = vrot.lane.b32.xlu0 %v4587_v13, %s3964_s7 }
 0x228   : > { %v5047_v47 = vpop.permute.xlu1 %2237  ;;  %v5049_v52 = vpop.permute.xlu0 %1645 }
 0x229   : > { %6328 = vst [vmem:[#allocation129_spill] sm:$0xff] %v5047_v47  ;;  %6329 = vst [vmem:[#allocation130_spill] sm:$0xff] %v5049_v52 }
 0x22a   : > { %2543 = vrot.lane.b32.xlu1 %v4667_v57, %s3964_s7  ;;  %2703 = vrot.lane.b32.xlu0 %v4348_v15, %s3965_s8 }
 0x22c   : > { %v5055_v58 = vpop.permute.xlu1 %2269  ;;  %v5057_v41 = vpop.permute.xlu0 %2239 }
 0x22d   : > { %6330 = vst [vmem:[#allocation131_spill] sm:$0xff] %v5055_v58  ;;  %6331 = vst [vmem:[#allocation132_spill] sm:$0xff] %v5057_v41  ;;  %v6398_v41 = vld [vmem:[#allocation3_spill] sm:$0xff] }
 0x22e   : > { %2705 = vrot.lane.b32.xlu1 %v4359_v2, %s3965_s8  ;;  %2545 = vrot.lane.b32.xlu0 %v4683_v48, %s3964_s7 }
 0x230   : > { %v5063_v6 = vpop.permute.xlu1 %2075  ;;  %v5065_v42 = vpop.permute.xlu0 %2271 }
 0x231   : > { %6332 = vst [vmem:[#allocation133_spill] sm:$0xff] %v5063_v6  ;;  %6333 = vst [vmem:[#allocation134_spill] sm:$0xff] %v5065_v42 }
 0x232   : > { %2547 = vrot.lane.b32.xlu1 %v4763_v16, %s3964_s7  ;;  %2707 = vrot.lane.b32.xlu0 %v4368_v27, %s3965_s8  ;;  %v3940_v16 = vld [vmem:[#allocation2 + $0x1b8] sm:$0xff] }
 0x234   : > { %v5071_v15 = vpop.permute.xlu1 %2107  ;;  %v5073_v52 = vpop.permute.xlu0 %2077 }
 0x235   : > { %6334 = vst [vmem:[#allocation135_spill] sm:$0xff] %v5071_v15  ;;  %6335 = vst [vmem:[#allocation136_spill] sm:$0xff] %v5073_v52  ;;  %v5385_v52 = vld [vmem:[#allocation2 + $0x168] sm:$0xff] }
 0x236   : > { %2709 = vrot.lane.b32.xlu1 %v4376_v31, %s3965_s8  ;;  %2549 = vrot.lane.b32.xlu0 %v4779_v10, %s3964_s7  ;;  %6419 = vst [vmem:[#allocation187_spill] sm:$0xff] %v5385_v52 }
 0x238   : > { %v5079_v2 = vpop.permute.xlu1 %1905  ;;  %v5081_v58 = vpop.permute.xlu0 %2109 }
 0x239   : > { %6336 = vst [vmem:[#allocation137_spill] sm:$0xff] %v5079_v2  ;;  %6337 = vst [vmem:[#allocation138_spill] sm:$0xff] %v5081_v58 }
 0x23a   : > { %2551 = vrot.lane.b32.xlu1 %v4859_v9, %s3964_s7  ;;  %2711 = vrot.lane.b32.xlu0 %v4384_v35, %s3965_s8 }
 0x23c   : > { %v5087_v27 = vpop.permute.xlu1 %1937  ;;  %v5089_v42 = vpop.permute.xlu0 %1907 }
 0x23d   : > { %6338 = vst [vmem:[#allocation139_spill] sm:$0xff] %v5087_v27  ;;  %6339 = vst [vmem:[#allocation140_spill] sm:$0xff] %v5089_v42  ;;  %v5309_v42 = vld [vmem:[#allocation2 + $0x238] sm:$0xff] }
 0x23e   : > { %2713 = vrot.lane.b32.xlu1 %v4393_v40, %s3965_s8  ;;  %2553 = vrot.lane.b32.xlu0 %v4878_v56, %s3964_s7  ;;  %6400 = vst [vmem:[#allocation3_spill] sm:$0xff] %v5309_v42  ;;  %v6416_v42 = vrot.slane %v4471_v23, 1 }
 0x240   : > { %v5095_v31 = vpop.permute.xlu1 %2377  ;;  %v5097_v15 = vpop.permute.xlu0 %1939 }
 0x241   : > { %6340 = vst [vmem:[#allocation141_spill] sm:$0xff] %v5095_v31  ;;  %6341 = vst [vmem:[#allocation142_spill] sm:$0xff] %v5097_v15 }
 0x242   : > { %2555 = vrot.lane.b32.xlu1 %v4954_v19, %s3964_s7  ;;  %2715 = vrot.lane.b32.xlu0 %v4403_v50, %s3965_s8 }
 0x244   : > { %v5103_v35 = vpop.permute.xlu1 %1615  ;;  %v5105_v27 = vpop.permute.xlu0 %2379 }
 0x245   : > { %6342 = vst [vmem:[#allocation143_spill] sm:$0xff] %v5103_v35  ;;  %6343 = vst [vmem:[#allocation144_spill] sm:$0xff] %v5105_v27 }
 0x246   : > { %2717 = vrot.lane.b32.xlu1 %v4415_v59, %s3965_s8  ;;  %2557 = vrot.lane.b32.xlu0 %v4982_v54, %s3964_s7 }
 0x248   : > { %v5111_v40 = vpop.permute.xlu1 %1647  ;;  %v5113_v58 = vpop.permute.xlu0 %1617 }
 0x249   : > { %6344 = vst [vmem:[#allocation145_spill] sm:$0xff] %v5111_v40  ;;  %6345 = vst [vmem:[#allocation146_spill] sm:$0xff] %v5113_v58 }
 0x24a   : > { %2559 = vrot.lane.b32.xlu1 %v4994_v62, %s3964_s7  ;;  %2719 = vrot.lane.b32.xlu0 %v4427_v1, %s3965_s8 }
 0x24c   : > { %v5119_v50 = vpop.permute.xlu1 %2241  ;;  %v5121_v15 = vpop.permute.xlu0 %1649 }
 0x24d   : > { %6346 = vst [vmem:[#allocation147_spill] sm:$0xff] %v5119_v50  ;;  %6347 = vst [vmem:[#allocation148_spill] sm:$0xff] %v5121_v15  ;;  %v3932_v15 = vld [vmem:[#allocation2 + $0x1e8] sm:$0xff] }
 0x24e   : > { %2721 = vrot.lane.b32.xlu1 %v3930_v22, %s3965_s8  ;;  %2561 = vrot.lane.b32.xlu0 %v4340_v8, %s3964_s7  ;;  %v6528_v50 = vld [vmem:[#allocation68_spill] sm:$0xff] }
 0x250   : > { %v5126_v59 = vpop.permute.xlu1 %2273  ;;  %v5128_v40 = vpop.permute.xlu0 %2243 }
 0x251   : > { %6348 = vst [vmem:[#allocation149_spill] sm:$0xff] %v5126_v59  ;;  %6349 = vst [vmem:[#allocation150_spill] sm:$0xff] %v5128_v40 }
 0x252   : > { %2563 = vrot.lane.b32.xlu1 %v4420_v36, %s3964_s7  ;;  %2723 = vrot.lane.b32.xlu0 %v3931_v51, %s3965_s8  ;;  %v3933_v36 = vld [vmem:[#allocation2 + $0xa0] sm:$0xff] }
 0x254   : > { %v5133_v1 = vpop.permute.xlu1 %2079  ;;  %v5135_v45 = vpop.permute.xlu0 %2275 }
 0x255   : > { %6350 = vst [vmem:[#allocation151_spill] sm:$0xff] %v5133_v1  ;;  %6351 = vst [vmem:[#allocation152_spill] sm:$0xff] %v5135_v45  ;;  %v3934_v45 = vld [vmem:[#allocation2 + $0x1d8] sm:$0xff]  ;;  %v6417_v1 = vld [vmem:[#allocation96_spill] sm:$0xff] }
 0x256   : > { %2725 = vrot.lane.b32.xlu1 %v3932_v15, %s3965_s8  ;;  %2565 = vrot.lane.b32.xlu0 %v4442_v14, %s3964_s7  ;;  %v2352_v31 = vsel %vm1815_vm0, %v6417_v1, %v6416_v42  ;;  %v6421_v42 = vld [vmem:[#allocation95_spill] sm:$0xff] }
 0x258   : > { %v5140_v22 = vpop.permute.xlu1 %2111  ;;  %v5142_v59 = vpop.permute.xlu0 %2081 }
 0x259   : > { %6352 = vst [vmem:[#allocation153_spill] sm:$0xff] %v5140_v22  ;;  %6353 = vst [vmem:[#allocation154_spill] sm:$0xff] %v5142_v59  ;;  %v2827_v59 = vld [vmem:[#allocation2 + $0x50] sm:$0xff] }
 0x25a   : > { %2567 = vrot.lane.b32.xlu1 %v4493_v34, %s3964_s7  ;;  %2727 = vrot.lane.b32.xlu0 %v3933_v36, %s3965_s8  ;;  %v3935_v34 = vld [vmem:[#allocation2 + $0x1e0] sm:$0xff]  ;;  %v2898_v27 = vrot.slane %v2827_v59, 1 }
 0x25c   : > { %v5147_v51 = vpop.permute.xlu1 %1909  ;;  %v5149_v8 = vpop.permute.xlu0 %2113 }
 0x25d   : > { %6354 = vst [vmem:[#allocation155_spill] sm:$0xff] %v5147_v51  ;;  %6355 = vst [vmem:[#allocation156_spill] sm:$0xff] %v5149_v8  ;;  %v2826_v51 = vld [vmem:[#allocation2 + $0x178] sm:$0xff] }
 0x25e   : > { %2729 = vrot.lane.b32.xlu1 %v3934_v45, %s3965_s8  ;;  %2569 = vrot.lane.b32.xlu0 %v4506_v46, %s3964_s7  ;;  %v2896_v10 = vrot.slane %v2826_v51, 1 }
 0x260   : > { %v5154_v15 = vpop.permute.xlu1 %1941  ;;  %v5156_v22 = vpop.permute.xlu0 %1911 }
 0x261   : > { %6356 = vst [vmem:[#allocation157_spill] sm:$0xff] %v5154_v15  ;;  %6357 = vst [vmem:[#allocation158_spill] sm:$0xff] %v5156_v22 }
 0x262   : > { %2571 = vrot.lane.b32.xlu1 %v4584_v0, %s3964_s7  ;;  %2731 = vrot.lane.b32.xlu0 %v3935_v34, %s3965_s8  ;;  %v844_v34 = vlaneseq }
 0x264   : > { %v5161_v36 = vpop.permute.xlu1 %2381  ;;  %v5163_v14 = vpop.permute.xlu0 %1943 }
 0x265   : > { %6358 = vst [vmem:[#allocation159_spill] sm:$0xff] %v5161_v36  ;;  %6359 = vst [vmem:[#allocation160_spill] sm:$0xff] %v5163_v14 }
 0x266   : > { %2403 = vrot.lane.b32.xlu1 %v4625_v5, %s3963_s30  ;;  %2573 = vrot.lane.b32.xlu0 %v4601_v49, %s3964_s7  ;;  %v5185_v5 = vshrl.u32 %v844_v34, 7  ;;  %v1261_v49 = vld [vmem:[#allocation2 + $0x98] sm:$0x80] }
 0x267   : > { %v1424_v46 = vrot.slane %v1261_v49, 7 }
 0x268   : > { %v5169_v45 = vpop.permute.xlu1 %1619  ;;  %v5171_v15 = vpop.permute.xlu0 %2383  ;;  %6364 = vst [vmem:[#allocation165_spill] sm:$0xff] %v5185_v5  ;;  %v853_v54 = vadd.s32 64, %v5185_v5  ;;  %v5232_v58 = vadd.s32 136, %v5185_v5  ;;  %v5263_v22 = vadd.s32 144, %v5185_v5  ;;  %v5414_v47 = vadd.s32 88, %v5185_v5 }
 0x269   : > { %6360 = vst [vmem:[#allocation161_spill] sm:$0xff] %v5169_v45  ;;  %6361 = vst [vmem:[#allocation162_spill] sm:$0xff] %v5171_v15 }
 0x26a   : > { %2733 = vrot.lane.b32.xlu1 %v4343_v11, %s3965_s8  ;;  %2401 = vrot.lane.b32.xlu0 %v4613_v17, %s3963_s30  ;;  %v881_v17 = vand.u32 15, %v5185_v5  ;;  %6374 = vst [vmem:[#allocation173_spill] sm:$0xff] %v5232_v58  ;;  %6385 = vst [vmem:[#allocation178_spill] sm:$0xff] %v5263_v22  ;;  %v5284_v22 = vld [vmem:[#allocation2 + $0x190] sm:$0xff] }
 0x26b   : > { %v2828_v58 = vld [vmem:[#allocation2 + $0x170] sm:$0xff] }
 0x26c   : > { %v5177_v8 = vpop.permute.xlu1 %2245  ;;  %v5179_v14 = vpop.permute.xlu0 %1621  ;;  %vm5213_vm2 = vcmp.ge.s32.totalorder %v881_v17, 1  ;;  %v5227_v17 = vadd.s32 120, %v5185_v5 }
 0x26d   : > { %6362 = vst [vmem:[#allocation163_spill] sm:$0xff] %v5177_v8  ;;  %6363 = vst [vmem:[#allocation164_spill] sm:$0xff] %v5179_v14  ;;  %v848_v14 = vadd.s32 24, %v5185_v5 }
 0x26e   : > { %2575 = vrot.lane.b32.xlu1 %v4680_v44, %s3964_s7  ;;  %2735 = vrot.lane.b32.xlu0 %v4355_v20, %s3965_s8  ;;  %v847_v44 = vadd.s32 16, %v5185_v5  ;;  %v849_v20 = vadd.s32 32, %v5185_v5  ;;  %6373 = vst [vmem:[#allocation172_spill] sm:$0xff] %v5227_v17 }
 0x270   : > { %v5187_v0 = vpop.permute.xlu1 %2277  ;;  %v5189_v11 = vpop.permute.xlu0 %2247  ;;  %v895_v8 = vand.u32 15, %v847_v44  ;;  %v909_v45 = vand.u32 15, %v849_v20  ;;  %v3937_v44 = vld [vmem:[#allocation2 + $0x1a8] sm:$0xff]  ;;  %v902_v20 = vand.u32 15, %v848_v14 }
 0x271   : > { %6365 = vst [vmem:[#allocation166_spill] sm:$0xff] %v5187_v0  ;;  %6366 = vst [vmem:[#allocation167_spill] sm:$0xff] %v5189_v11  ;;  %v5202_v0 = vld [vmem:[#allocation2 + $0x240] sm:$0xff] }
 0x272   : > { %2407 = vrot.lane.b32.xlu1 %v4721_v18, %s3963_s30  ;;  %2577 = vrot.lane.b32.xlu0 %v4697_v30, %s3964_s7  ;;  %v5205_v11 = vrot.slane %v5202_v0, 7  ;;  %v851_v18 = vadd.s32 48, %v5185_v5  ;;  %v846_v30 = vadd.s32 8, %v5185_v5  ;;  %vm5240_vm3 = vcmp.ge.s32.totalorder %v895_v8, 1 }
 0x273   : > { %vm5244_vm4 = vcmp.ge.s32.totalorder %v909_v45, 1  ;;  %vm5275_vm7 = vcmp.le.s32.totalorder %v902_v20, 14  ;;  %v2824_v45 = vld [vmem:[#allocation2 + $0x150] sm:$0xff] }
 0x274   : > { %v5198_v34 = vpop.permute.xlu1 %2083  ;;  %v5200_v62 = vpop.permute.xlu0 %2279  ;;  %v2821_v20 = vld [vmem:[#allocation2 + $0x30] sm:$0xfe] }
 0x275   : > { %6367 = vst [vmem:[#allocation168_spill] sm:$0xff] %v5198_v34  ;;  %6368 = vst [vmem:[#allocation169_spill] sm:$0xff] %v5200_v62  ;;  %v1426_v62 = vsel %vm1423_vm1, %v1424_v46, %v5205_v11  ;;  %v888_v46 = vand.u32 15, %v846_v30 }
 0x276   : > { %2737 = vrot.lane.b32.xlu1 %v4364_v24, %s3965_s8  ;;  %2405 = vrot.lane.b32.xlu0 %v4709_v55, %s3963_s30  ;;  %v923_v24 = vand.u32 15, %v851_v18  ;;  %v855_v55 = vadd.s32 80, %v5185_v5  ;;  %v1521_v15 = vsel %vm5213_vm2, %v1426_v62, 0.0  ;;  %v937_v18 = vand.u32 15, %v853_v54 }
 0x277   : > { %v5249_v62 = vadd.s32 160, %v5185_v5  ;;  %v3945_v54 = vadd.low.f32.bf16 %v1521_v15, %v4520_v63  ;;  %vm5265_vm6 = vcmp.le.s32.totalorder %v888_v46, 14  ;;  %v2822_v15 = vld [vmem:[#allocation2 + $0x1f0] sm:$0xff] }
 0x278   : > { %v5221_v19 = vpop.permute.xlu1 %2115  ;;  %v5223_v40 = vpop.permute.xlu0 %1915  ;;  %vm5257_vm5 = vcmp.ge.s32.totalorder %v923_v24, 1  ;;  %v2823_v24 = vld [vmem:[#allocation2 + $0x60] sm:$0xff]  ;;  %vm5279_vm8 = vcmp.ge.s32.totalorder %v937_v18, 1 }
 0x279   : > { %6371 = vst [vmem:[#allocation170_spill] sm:$0xff] %v5221_v19  ;;  %6372 = vst [vmem:[#allocation171_spill] sm:$0xff] %v5223_v40  ;;  %v5238_v19 = vadd.s32 104, %v5185_v5  ;;  %v5292_v18 = vadd.f32 %v3945_v54, %v4518_v61  ;;  %v2890_v35 = vrot.slane %v2823_v24, 1  ;;  %v6399_v61 = vld [vmem:[#allocation74_spill] sm:$0xff]  ;;  %v2892_v54 = vrot.slane %v2824_v45, 1 }
 0x27a   : > { %2579 = vrot.lane.b32.xlu1 %v4776_v4, %s3964_s7  ;;  %2739 = vrot.lane.b32.xlu0 %v3937_v44, %s3965_s8  ;;  %6380 = vst [vmem:[#allocation175_spill] sm:$0xff] %v5249_v62  ;;  %v850_v4 = vadd.s32 40, %v5185_v5  ;;  %v951_v44 = vand.u32 15, %v855_v55  ;;  %v6388_v55 = vmov 0  ;;  %v2887_v24 = vrot.slane %v2821_v20, 1  ;;  %v6405_v20 = vld [vmem:[#allocation6_spill] sm:$0xff] }
 0x27b   : > { %6375 = vst [vmem:[#allocation174_spill] sm:$0xff] %v5238_v19  ;;  %v6389_v55 = vsel %vm5275_vm7, 4294967295, %v6388_v55  ;;  %v2900_v45 = vrot.slane %v2828_v58, 1  ;;  %v1525_v59 = vsel %vm5244_vm4, %v6405_v20, 0.0  ;;  %v6406_v58 = vmov 0 }
 0x27c   : > { %v5252_v56 = vpop.permute.xlu1 %1913  ;;  %v5254_v14 = vpop.permute.xlu0 %2085  ;;  %6390 = vst [vmem:[#allocation179_spill] sm:$0xff] %v6389_v55  ;;  %v916_v36 = vand.u32 15, %v850_v4  ;;  %vm5294_vm9 = vcmp.ge.s32.totalorder %v951_v44, 1  ;;  %v5298_v4 = vld [vmem:[#allocation2 + $0xb0] sm:$0xff]  ;;  %v2894_v44 = vrot.slane %v5284_v22, 1  ;;  %v5380_v2 = vsel %vm1815_vm0, %v2890_v35, %v2892_v54  ;;  %v6423_v22 = vld [vmem:[#allocation15_spill] sm:$0xff] }
 0x27d   : > { %6381 = vst [vmem:[#allocation176_spill] sm:$0xff] %v5252_v56  ;;  %6382 = vst [vmem:[#allocation177_spill] sm:$0xff] %v5254_v14  ;;  %v857_v14 = vadd.s32 96, %v5185_v5  ;;  %v2888_v56 = vrot.slane %v2822_v15, 1  ;;  %v3946_v15 = vadd.high.f32.bf16 %v5205_v11, %v4520_v63  ;;  %v2159_v40 = vsel %vm5279_vm8, %v4987_v43, 0.0  ;;  %v6475_v43 = vld [vmem:[#allocation107_spill] sm:$0xff] }
 0x27e   : > { %2411 = vrot.lane.b32.xlu1 %v4817_v12, %s3963_s30  ;;  %2581 = vrot.lane.b32.xlu0 %v4793_v60, %s3964_s7  ;;  %v852_v12 = vadd.s32 56, %v5185_v5  ;;  %6397 = vst [vmem:[#allocation182_spill] sm:$0xff] %v5298_v4  ;;  %vm5311_vm10 = vcmp.le.s32.totalorder %v916_v36, 14  ;;  %v5340_v20 = vsel %vm1815_vm0, %v2892_v54, %v2894_v44  ;;  %6418 = vst [vmem:[#allocation96_spill] sm:$0xff] %v5380_v2 }
 0x27f   : > { %v5327_v36 = vsel %vm1815_vm0, %v2888_v56, %v2890_v35  ;;  %6410 = vst [vmem:[#allocation184_spill] sm:$0xff] %v5340_v20  ;;  %v2346_v35 = vld [vmem:[#allocation2 + $0x40] sm:$0x1]  ;;  %v5397_v1 = vsel %vm1815_vm0, %v2894_v44, %v2896_v10 }
 0x280   : > { %v5287_v34 = vpop.permute.xlu1 %2087  ;;  %v5289_v60 = vpop.permute.xlu0 %2117  ;;  %v6463_v20 = vld [vmem:[#allocation63_spill] sm:$0xff] }
 0x281   : > { %6393 = vst [vmem:[#allocation180_spill] sm:$0xff] %v5287_v34  ;;  %6394 = vst [vmem:[#allocation181_spill] sm:$0xff] %v5289_v60  ;;  %v1430_v34 = vsel %vm1423_vm1, %v5205_v11, %v6398_v41  ;;  %v965_v60 = vand.u32 15, %v857_v14  ;;  %v930_v14 = vand.u32 15, %v852_v12  ;;  %v5350_v12 = vsel %vm1815_vm0, %v2887_v24, %v2888_v56 }
 0x282   : > { %2741 = vrot.lane.b32.xlu1 %v3938_v7, %s3965_s8  ;;  %2409 = vrot.lane.b32.xlu0 %v6399_v61, %s3963_s30  ;;  %v1523_v63 = vsel %vm5240_vm3, %v1430_v34, 0.0  ;;  %v6409_v61 = vld [vmem:[#allocation91_spill] sm:$0xff]  ;;  %v6414_v56 = vrot.slane %v5298_v4, 1 }
 0x283   : > { %vm5332_vm11 = vcmp.ge.s32.totalorder %v965_v60, 1  ;;  %v3939_v34 = vld [vmem:[#allocation2 + $0x160] sm:$0xff]  ;;  %v5347_v60 = vadd.s32 112, %v5185_v5  ;;  %vm5355_vm12 = vcmp.le.s32.totalorder %v930_v14, 14  ;;  %v5407_v14 = vsel %vm1815_vm0, %v2898_v27, %v2900_v45 }
 0x284   : > { %v5315_v7 = vpop.permute.xlu1 %2385  ;;  %v5317_v17 = vpop.permute.xlu0 %2387  ;;  %v6407_v58 = vsel %vm5332_vm11, 4294967295, %v6406_v58  ;;  %v5370_v24 = vsel %vm1815_vm0, %v2900_v45, %v6414_v56  ;;  %v6420_v56 = vld [vmem:[#allocation18_spill] sm:$0xff]  ;;  %6424 = vst [vmem:[#allocation95_spill] sm:$0xff] %v5407_v14  ;;  %v6427_v14 = vld [vmem:[#allocation13_spill] sm:$0xff] }
 0x285   : > { %6403 = vst [vmem:[#allocation74_spill] sm:$0xff] %v5315_v7  ;;  %6404 = vst [vmem:[#allocation183_spill] sm:$0xff] %v5317_v17  ;;  %v854_v17 = vadd.s32 72, %v5185_v5  ;;  %v2151_v4 = vsel %vm5213_vm2, %v6420_v56, 0.0  ;;  %v1978_v56 = vsel %vm5265_vm6, %v6423_v22, 0.0  ;;  %v2525_v26 = vrot.slane %v6427_v14, 7 }
 0x286   : > { %6408 = vst [vmem:[#allocation6_spill] sm:$0xff] %v6407_v58  ;;  %2583 = vrot.lane.b32.xlu1 %v6409_v61, %s3964_s7  ;;  %2743 = vrot.lane.b32.xlu0 %v3939_v34, %s3965_s8  ;;  %v5353_v61 = vsel %vm1815_vm0, %v2896_v10, %v2898_v27  ;;  %6415 = vst [vmem:[#allocation186_spill] sm:$0xff] %v5370_v24  ;;  %v2183_v9 = vadd.f32 %v2151_v4, %v5292_v18  ;;  %v6426_v27 = vld [vmem:[#allocation28_spill] sm:$0xff]  ;;  %v2355_v24 = vrot.slane %v2346_v35, 1  ;;  %v6430_v22 = vld [vmem:[#allocation99_spill] sm:$0xff] }
 0x287   : > { %6411 = vst [vmem:[#allocation185_spill] sm:$0xff] %v5353_v61  ;;  %6422 = vst [vmem:[#allocation18_spill] sm:$0xff] %v5397_v1  ;;  %v944_v44 = vand.u32 15, %v854_v17  ;;  %v1980_v45 = vsel %vm5275_vm7, %v6426_v27, 0.0  ;;  %v6428_v17 = vld [vmem:[#allocation4_spill] sm:$0xff]  ;;  %v5432_v18 = vld [vmem:[#allocation2 + $0x1b0] sm:$0xff] }
 0x288   : > { %v5360_v51 = vpop.permute.xlu1 %2535  ;;  %v5362_v7 = vpop.permute.xlu0 %2533  ;;  %6431 = vst [vmem:[#allocation15_spill] sm:$0xff] %v5432_v18  ;;  %v6432_v4 = vld [vmem:[#allocation22_spill] sm:$0xff]  ;;  %v6433_v27 = vld [vmem:[#allocation32_spill] sm:$0xff]  ;;  %v6435_v35 = vld [vmem:[#allocation51_spill] sm:$0xff] }
 0x289   : > { %v1687_v58 = vadd.f32 %v6433_v27, %v1525_v59  ;;  %v6439_v27 = vld [vmem:[#allocation14_spill] sm:$0xff]  ;;  %vm5455_vm13 = vcmp.le.s32.totalorder %v944_v44, 14  ;;  %v2528_v44 = vsel %vm1423_vm1, %v2525_v26, %v5205_v11  ;;  %v6458_v18 = vld [vmem:[#allocation93_spill] sm:$0xff]  ;;  %v6487_v8 = vld [vmem:[#allocation96_spill] sm:$0xff] }
 0x28a   : > { %2415 = vrot.lane.b32.xlu1 %v2352_v31, %s3963_s30  ;;  %2585 = vrot.lane.b32.xlu0 %v6421_v42, %s3964_s7  ;;  %v6425_v42 = vld [vmem:[#allocation12_spill] sm:$0xff]  ;;  %v2353_v31 = vrot.slane %v6427_v14, 1  ;;  %v1982_v14 = vsel %vm5311_vm10, %v6435_v35, 0.0  ;;  %v2313_v5 = vadd.f32 %v6439_v27, %v2183_v9  ;;  %v3941_v9 = vld [vmem:[#allocation2 + $0x38] sm:$0xff]  ;;  %v6457_v35 = vld [vmem:[#allocation55_spill] sm:$0xff]  ;;  %v2157_v49 = vsel %vm5257_vm5, %v6458_v18, 0.0 }
 0x28b   : > { %v1685_v10 = vadd.f32 %v6425_v42, %v1523_v63  ;;  %v2010_v63 = vadd.f32 %v3946_v15, %v1978_v56  ;;  %v6429_v42 = vld [vmem:[#allocation21_spill] sm:$0xff]  ;;  %v2153_v15 = vsel %vm5240_vm3, %v6434_v21, 0.0  ;;  %v6436_v56 = vld [vmem:[#allocation23_spill] sm:$0xff]  ;;  %v6448_v27 = vld [vmem:[#allocation70_spill] sm:$0xff] }
 0x28c   : > { %v5416_v54 = vpop.permute.xlu1 %2693  ;;  %v5418_v61 = vpop.permute.xlu0 %2537  ;;  %v1686_v1 = vadd.f32 %v6429_v42, %v6428_v17  ;;  %v6437_v42 = vld [vmem:[#allocation37_spill] sm:$0xff]  ;;  %v6440_v21 = vld [vmem:[#allocation47_spill] sm:$0xff]  ;;  %v2356_v3 = vsel %vm1815_vm0, %v2353_v31, %v2355_v24  ;;  %v2526_v24 = vsel %vm1423_vm1, %v4951_v28, %v2525_v26  ;;  %v6527_v34 = vld [vmem:[#allocation144_spill] sm:$0xff] }
 0x28d   : > { %v2011_v52 = vadd.f32 %v6432_v4, %v1685_v10  ;;  %v2184_v17 = vadd.f32 %v6436_v56, %v2010_v63  ;;  %v2155_v10 = vsel %vm5244_vm4, %v6438_v25, 0.0  ;;  %v2013_v19 = vadd.f32 %v6440_v21, %v1687_v58  ;;  %v6450_v28 = vld [vmem:[#allocation33_spill] sm:$0xff] }
 0x28e   : > { %2745 = vrot.lane.b32.xlu1 %v3940_v16, %s3965_s8  ;;  %2413 = vrot.lane.b32.xlu0 %v6430_v22, %s3963_s30  ;;  %v2012_v16 = vadd.f32 %v1980_v45, %v1686_v1  ;;  %v1688_v22 = vadd.f32 %v6437_v42, %v4431_v37  ;;  %v6441_v1 = vld [vmem:[#allocation45_spill] sm:$0xff]  ;;  %v958_v25 = vand.u32 15, %v5414_v47  ;;  %v6447_v47 = vld [vmem:[#allocation27_spill] sm:$0xff] }
 0x28f   : > { %v2185_v63 = vadd.f32 %v2153_v15, %v2011_v52  ;;  %v6444_v42 = vld [vmem:[#allocation113_spill] sm:$0xff]  ;;  %v2187_v58 = vadd.f32 %v2155_v10, %v2013_v19  ;;  %v6445_v52 = vrot.slane %v4471_v23, 1  ;;  %v2454_v23 = vsel %vm5265_vm6, %v6450_v28, 0.0 }
 0x290   : > { %v5448_v4 = vpop.permute.xlu1 %2697  ;;  %v2696_v59 = vpop.permute.xlu0 %2695  ;;  %v2186_v45 = vadd.f32 %v6441_v1, %v2012_v16  ;;  %v2014_v56 = vadd.f32 %v1982_v14, %v1688_v22  ;;  %v6446_v14 = vld [vmem:[#allocation19_spill] sm:$0xff]  ;;  %v2485_v22 = vadd.f32 %v6447_v47, %v2313_v5  ;;  %v6449_v1 = vld [vmem:[#allocation76_spill] sm:$0xff]  ;;  %v6452_v5 = vsel %vm5257_vm5, %v4484_v29, 0.0 }
 0x291   : > { %v2354_v15 = vsel %vm1815_vm0, %v6445_v52, %v2353_v31  ;;  %v2314_v16 = vadd.f32 %v6446_v14, %v2184_v17  ;;  %v1984_v19 = vsel %vm5355_vm12, %v6449_v1, 0.0  ;;  %v6451_v31 = vld [vmem:[#allocation44_spill] sm:$0xff]  ;;  %v6455_v14 = vld [vmem:[#allocation41_spill] sm:$0xff]  ;;  %v2456_v28 = vsel %vm5275_vm7, %v6457_v35, 0.0 }
 0x292   : > { %2587 = vrot.lane.b32.xlu1 %v6444_v42, %s3964_s7  ;;  %2747 = vrot.lane.b32.xlu0 %v3941_v9, %s3965_s8  ;;  %v2188_v21 = vadd.f32 %v6448_v27, %v2014_v56  ;;  %v2627_v26 = vsel %vm5213_vm2, %v6451_v31, 0.0  ;;  %v6453_v17 = vld [vmem:[#allocation56_spill] sm:$0xff]  ;;  %v6454_v9 = vld [vmem:[#allocation59_spill] sm:$0xff]  ;;  %v2316_v47 = vadd.f32 %v6455_v14, %v2186_v45  ;;  %vm5513_vm14 = vcmp.le.s32.totalorder %v958_v25, 14 }
 0x293   : > { %v1689_v56 = vadd.f32 %v6453_v17, %v6452_v5  ;;  %v1690_v52 = vadd.f32 %v6454_v9, %v4496_v38  ;;  %v6456_v27 = vld [vmem:[#allocation36_spill] sm:$0xff]  ;;  %v2486_v9 = vadd.f32 %v2454_v23, %v2314_v16  ;;  %v2659_v14 = vadd.f32 %v2627_v26, %v2485_v22  ;;  %v6550_v22 = vld [vmem:[#allocation110_spill] sm:$0xff] }
 0x294   : > { %v2540_v10 = vpop.permute.xlu1 %2539  ;;  %v2700_v42 = vpop.permute.xlu0 %2699  ;;  %v2315_v1 = vadd.f32 %v6456_v27, %v2185_v63  ;;  %v6459_v29 = vld [vmem:[#allocation72_spill] sm:$0xff]  ;;  %v2318_v55 = vadd.f32 %v6463_v20, %v2188_v21  ;;  %v2488_v53 = vadd.f32 %v2456_v28, %v2316_v47  ;;  %v2629_v20 = vsel %vm5240_vm3, %v5360_v51, 0.0 }
 0x295   : > { %v2015_v31 = vadd.f32 %v6459_v29, %v1689_v56  ;;  %v2016_v5 = vadd.f32 %v1984_v19, %v1690_v52  ;;  %v6460_v38 = vld [vmem:[#allocation60_spill] sm:$0xff]  ;;  %v6465_v19 = vld [vmem:[#allocation98_spill] sm:$0xff]  ;;  %v6467_v29 = vld [vmem:[#allocation81_spill] sm:$0xff]  ;;  %v2660_v21 = vadd.f32 %v5362_v7, %v2486_v9 }
 0x296   : > { %2419 = vrot.lane.b32.xlu1 %v2356_v3, %s3963_s30  ;;  %2589 = vrot.lane.b32.xlu0 %v2526_v24, %s3964_s7  ;;  %v2317_v17 = vadd.f32 %v6460_v38, %v2187_v58  ;;  %v6461_v45 = vld [vmem:[#allocation80_spill] sm:$0xff]  ;;  %v6464_v24 = vld [vmem:[#allocation77_spill] sm:$0xff]  ;;  %v6466_v58 = vsel %vm5279_vm8, %v4571_v39, 0.0  ;;  %v2662_v9 = vadd.f32 %v5418_v61, %v2488_v53  ;;  %v3901_v53 = vpack.i.bf16 %v5202_v0, %v5202_v0 }
 0x297   : > { %v2458_v63 = vsel %vm5311_vm10, %v6461_v45, 0.0  ;;  %v6462_v35 = vld [vmem:[#allocation52_spill] sm:$0xff]  ;;  %v2189_v56 = vadd.f32 %v2157_v49, %v2015_v31  ;;  %v2190_v52 = vadd.f32 %v6465_v19, %v2016_v5  ;;  %v1691_v16 = vadd.f32 %v6467_v29, %v6466_v58  ;;  %v6483_v29 = vld [vmem:[#allocation109_spill] sm:$0xff] }
 0x298   : > { %v2487_v27 = vadd.f32 %v6462_v35, %v2315_v1  ;;  %v2702_v18 = vpop.permute.xlu1 %2701  ;;  %v2542_v2 = vpop.permute.xlu0 %2541  ;;  %v2519_v3 = vld [vmem:[#allocation2 + $0xa8] sm:$0x7f]  ;;  %v2489_v6 = vadd.f32 %v6464_v24, %v2317_v17  ;;  %v2490_v23 = vadd.f32 %v2458_v63, %v2318_v55  ;;  %v6471_v1 = vld [vmem:[#allocation103_spill] sm:$0xff]  ;;  %v2789_v55 = vadd.f32 %v5416_v54, %v2659_v14  ;;  %v6474_v17 = vld [vmem:[#allocation85_spill] sm:$0xff] }
 0x299   : > { %v3942_v26 = vld [vmem:[#allocation2 + $0x108] sm:$0xff]  ;;  %v1986_v25 = vsel %vm5455_vm13, %v6471_v1, 0.0  ;;  %v2529_v51 = vrot.slane %v2519_v3, 7  ;;  %v2790_v49 = vadd.f32 %v2696_v59, %v2660_v21  ;;  %v2319_v45 = vadd.f32 %v6474_v17, %v2189_v56 }
 0x29a   : > { %2749 = vrot.lane.b32.xlu1 %v3942_v26, %s3965_s8  ;;  %2417 = vrot.lane.b32.xlu0 %v2354_v15, %s3963_s30  ;;  %v6470_v39 = vld [vmem:[#allocation84_spill] sm:$0xff]  ;;  %v2631_v15 = vsel %vm5244_vm4, %v2540_v10, 0.0  ;;  %v2661_v63 = vadd.f32 %v2629_v20, %v2487_v27  ;;  %v2460_v3 = vsel %vm5355_vm12, %v6475_v43, 0.0  ;;  %v6476_v54 = vand.u32 15, %v5347_v60  ;;  %v6484_v26 = vld [vmem:[#allocation111_spill] sm:$0xff] }
 0x29b   : > { %v1692_v47 = vadd.f32 %v6470_v39, %v4587_v13  ;;  %v6472_v28 = vld [vmem:[#allocation100_spill] sm:$0xff]  ;;  %v6473_v13 = vld [vmem:[#allocation90_spill] sm:$0xff]  ;;  %v2663_v10 = vadd.f32 %v2631_v15, %v2489_v6  ;;  %v2792_v14 = vadd.f32 %v2700_v42, %v2662_v9  ;;  %v2530_v27 = vsel %vm1423_vm1, %v5205_v11, %v2529_v51  ;;  %v6485_v39 = vld [vmem:[#allocation133_spill] sm:$0xff] }
 0x29c   : > { %v2017_v7 = vadd.f32 %v6472_v28, %v1691_v16  ;;  %v2544_v31 = vpop.permute.xlu1 %2543  ;;  %v2704_v5 = vpop.permute.xlu0 %2703  ;;  %v2320_v38 = vadd.f32 %v6473_v13, %v2190_v52  ;;  %vm5543_vm15 = vcmp.ge.s32.totalorder %v6476_v54, 1  ;;  %v3943_v59 = vld [vmem:[#allocation2 + $0x228] sm:$0xff]  ;;  %v2791_v61 = vadd.f32 %v5448_v4, %v2661_v63  ;;  %v6491_v15 = vld [vmem:[#allocation115_spill] sm:$0xff]  ;;  %v6496_v63 = vld [vmem:[#allocation165_spill] sm:$0xff] }
 0x29d   : > { %v2018_v35 = vadd.f32 %v1986_v25, %v1692_v47  ;;  %v6479_v60 = vld [vmem:[#allocation104_spill] sm:$0xff]  ;;  %v6480_v19 = vsel %vm5294_vm9, %v4667_v57, 0.0  ;;  %v3016_v58 = vadd.f32 %v5350_v12, %v2789_v55  ;;  %v6482_v0 = vsel %vm5265_vm6, %v5327_v36, 0.0  ;;  %v6497_v43 = vld [vmem:[#allocation123_spill] sm:$0xff] }
 0x29e   : > { %v2191_v24 = vadd.f32 %v2159_v40, %v2017_v7  ;;  %2591 = vrot.lane.b32.xlu1 %v2528_v44, %s3964_s7  ;;  %2751 = vrot.lane.b32.xlu0 %v3943_v59, %s3965_s8  ;;  %v2491_v56 = vadd.f32 %v6479_v60, %v2319_v45  ;;  %v6481_v44 = vld [vmem:[#allocation106_spill] sm:$0xff]  ;;  %v3017_v4 = vadd.f32 %v6482_v0, %v2790_v49  ;;  %v2633_v20 = vsel %vm5257_vm5, %v2544_v31, 0.0 }
 0x29f   : > { %v1693_v52 = vadd.f32 %v6481_v44, %v6480_v19  ;;  %v1694_v11 = vadd.f32 %v6483_v29, %v4683_v48  ;;  %v2192_v16 = vadd.f32 %v5003_v32, %v2018_v35  ;;  %v2492_v57 = vadd.f32 %v2460_v3, %v2320_v38  ;;  %v6486_v48 = vld [vmem:[#allocation122_spill] sm:$0xff]  ;;  %v6504_v19 = vld [vmem:[#allocation185_spill] sm:$0xff] }
 0x2a0   : > { %v2706_v6 = vpop.permute.xlu1 %2705  ;;  %v2546_v42 = vpop.permute.xlu0 %2545  ;;  %v2321_v12 = vadd.f32 %v6484_v26, %v2191_v24  ;;  %v2161_v62 = vsel %vm5294_vm9, %v6485_v39, 0.0  ;;  %v2664_v36 = vadd.f32 %v2542_v2, %v2490_v23  ;;  %v1988_v32 = vsel %vm5513_vm14, %v6486_v48, 0.0  ;;  %v6492_v38 = vld [vmem:[#allocation174_spill] sm:$0xff] }
 0x2a1   : > { %v2019_v21 = vadd.f32 %v5007_v33, %v1693_v52  ;;  %v3018_v47 = vadd.f32 %v6487_v8, %v2791_v61  ;;  %v6489_v33 = vld [vmem:[#allocation184_spill] sm:$0xff]  ;;  %v2793_v51 = vadd.f32 %v2702_v18, %v2663_v10  ;;  %v3672_v28 = vpack.c.bf16 %v3016_v58, %v3016_v58  ;;  %v6498_v3 = vld [vmem:[#allocation126_spill] sm:$0xff]  ;;  %v6502_v10 = vld [vmem:[#allocation125_spill] sm:$0xff] }
 0x2a2   : > { %3902 = vrot.lane.b32.xlu1 %v3901_v53, %s3965_s8  ;;  %2593 = vrot.lane.b32.xlu0 %v2530_v27, %s3964_s7  ;;  %v6490_v25 = vsel %vm5275_vm7, %v6489_v33, 0.0  ;;  %v3673_v7 = vpack.c.bf16 %v3017_v4, %v3017_v4  ;;  %v2665_v55 = vadd.f32 %v2633_v20, %v2491_v56  ;;  %v2794_v2 = vadd.f32 %v2704_v5, %v2664_v36  ;;  %v6500_v53 = vld [vmem:[#allocation64_spill] sm:$0xff]  ;;  %v6503_v60 = vld [vmem:[#allocation18_spill] sm:$0xff]  ;;  %v6507_v20 = vld [vmem:[#allocation87_spill] sm:$0xff] }
 0x2a3   : > { %v3019_v40 = vadd.f32 %v6490_v25, %v2792_v14  ;;  %v2322_v31 = vadd.f32 %v6491_v15, %v2192_v16  ;;  %v2193_v13 = vadd.f32 %v2161_v62, %v2019_v21  ;;  %v6493_v17 = vand.u32 15, %v6492_v38  ;;  %v6508_v21 = vld [vmem:[#allocation187_spill] sm:$0xff]  ;;  %v6512_v36 = vld [vmem:[#allocation136_spill] sm:$0xff] }
 0x2a4   : > { %v2548_v23 = vpop.permute.xlu1 %2547  ;;  %v2708_v49 = vpop.permute.xlu0 %2707  ;;  %v5593_v9 = vadd.s32 128, %v6496_v63  ;;  %v2020_v35 = vadd.f32 %v1988_v32, %v1694_v11  ;;  %v2493_v5 = vadd.f32 %v6497_v43, %v2321_v12  ;;  %v2462_v24 = vsel %vm5455_vm13, %v6498_v3, 0.0  ;;  %v6506_v11 = vld [vmem:[#allocation129_spill] sm:$0xff]  ;;  %v6510_v12 = vld [vmem:[#allocation182_spill] sm:$0xff]  ;;  %v6519_v15 = vld [vmem:[#allocation172_spill] sm:$0xff] }
 0x2a5   : > { %vm5588_vm2 = vcmp.le.s32.totalorder %v6493_v17, 14  ;;  %v2635_v18 = vsel %vm5279_vm8, %v2548_v23, 0.0  ;;  %v2666_v54 = vadd.f32 %v2546_v42, %v2492_v57  ;;  %v6501_v61 = vsel %vm5332_vm11, %v6500_v53, 0.0  ;;  %v6523_v17 = vld [vmem:[#allocation95_spill] sm:$0xff] }
 0x2a6   : > { %3208 = vrot.lane.b32.xlu0 %v3672_v28, %s3966_s9  ;;  %3210 = vrot.lane.b32.xlu1 %v3673_v7, %s3966_s9  ;;  %v1695_v46 = vadd.f32 %v6502_v10, %v6501_v61  ;;  %v3674_v14 = vpack.c.bf16 %v3018_v47, %v3018_v47  ;;  %v3675_v27 = vpack.c.bf16 %v3019_v40, %v3019_v40  ;;  %v6505_v44 = vsel %vm5311_vm10, %v6504_v19, 0.0  ;;  %v6514_v47 = vld [vmem:[#allocation15_spill] sm:$0xff]  ;;  %v2832_v40 = vld [vmem:[#allocation2 + $0xd0] sm:$0xff] }
 0x2a7   : > { %v3020_v56 = vadd.f32 %v6503_v60, %v2793_v51  ;;  %v3021_v52 = vadd.f32 %v6505_v44, %v2794_v2  ;;  %v2795_v58 = vadd.f32 %v2706_v6, %v2665_v55  ;;  %v2667_v0 = vadd.f32 %v2635_v18, %v2493_v5  ;;  %v6513_v6 = vld [vmem:[#allocation137_spill] sm:$0xff]  ;;  %v5632_v51 = vld [vmem:[#allocation2 + $0x180] sm:$0xff]  ;;  %v6524_v18 = vld [vmem:[#allocation186_spill] sm:$0xff] }
 0x2a8   : > { %v2796_v4 = vadd.f32 %v2708_v49, %v2666_v54  ;;  %v2710_v42 = vpop.permute.xlu1 %2709  ;;  %v2550_v29 = vpop.permute.xlu0 %2549  ;;  %v2323_v16 = vadd.f32 %v6506_v11, %v2193_v13  ;;  %v1535_v57 = vsel %vm5543_vm15, %v6507_v20, 0.0  ;;  %v6509_v26 = vrot.slane %v6508_v21, 1  ;;  %v6517_v28 = vld [vmem:[#allocation141_spill] sm:$0xff]  ;;  %v6518_v55 = vld [vmem:[#allocation151_spill] sm:$0xff]  ;;  %v5649_v54 = vld [vmem:[#allocation2 + $0xf8] sm:$0xff] }
 0x2a9   : > { %v6511_v39 = vrot.slane %v6510_v12, 1  ;;  %v2494_v62 = vadd.f32 %v2462_v24, %v2322_v31  ;;  %v2194_v48 = vadd.f32 %v6512_v36, %v2020_v35  ;;  %v2021_v32 = vadd.f32 %v6513_v6, %v1695_v46  ;;  %v6529_v44 = vld [vmem:[#allocation128_spill] sm:$0xff]  ;;  %v6531_v12 = vld [vmem:[#allocation173_spill] sm:$0xff]  ;;  %v6535_v6 = vld [vmem:[#allocation143_spill] sm:$0xff] }
 0x2aa   : > { %v993_v8 = vand.u32 15, %v5593_v9  ;;  %3212 = vrot.lane.b32.xlu0 %v3674_v14, %s3966_s9  ;;  %3214 = vrot.lane.b32.xlu1 %v3675_v27, %s3966_s9  ;;  %v6515_v1 = vrot.slane %v6514_v47, 1  ;;  %v6516_v33 = vmov %v6509_v26  ;;  %v2495_v7 = vadd.f32 %v6517_v28, %v2323_v16  ;;  %v6526_v14 = vld [vmem:[#allocation140_spill] sm:$0xff]  ;;  %v6540_v28 = vld [vmem:[#allocation154_spill] sm:$0xff] }
 0x2ab   : > { %v2905_v41 = vsel %vm1815_vm0, %v6511_v39, %v6509_v26  ;;  %v2163_v2 = vsel %vm5332_vm11, %v6518_v55, 0.0  ;;  %v3676_v23 = vpack.c.bf16 %v3020_v56, %v3020_v56  ;;  %v2668_v49 = vadd.f32 %v2550_v29, %v2494_v62  ;;  %v6541_v55 = vld [vmem:[#allocation155_spill] sm:$0xff] }
 0x2ac   : > { %v2907_v25 = vsel %vm1815_vm0, %v6516_v33, %v6515_v1  ;;  %v6520_v31 = vand.u32 15, %v6519_v15  ;;  %v3677_v38 = vpack.c.bf16 %v3021_v52, %v3021_v52  ;;  %v3022_v9 = vadd.f32 %v6523_v17, %v2795_v58  ;;  %v2552_v3 = vpop.permute.xlu1 %2551  ;;  %v2712_v24 = vpop.permute.xlu0 %2711  ;;  %v6530_v58 = vld [vmem:[#allocation132_spill] sm:$0xff]  ;;  %v6536_v1 = vld [vmem:[#allocation147_spill] sm:$0xff] }
 0x2ad   : > { %v6525_v35 = vsel %vm5355_vm12, %v6524_v18, 0.0  ;;  %v2797_v5 = vadd.f32 %v2710_v42, %v2667_v0  ;;  %v2637_v53 = vsel %vm5294_vm9, %v2552_v3, 0.0  ;;  %v2798_v61 = vadd.f32 %v2712_v24, %v2668_v49 }
 0x2ae   : > { %vm5640_vm3 = vcmp.le.s32.totalorder %v6520_v31, 14  ;;  %v3023_v43 = vadd.f32 %v6525_v35, %v2796_v4  ;;  %v2908_v10 = vrot.slane %v2832_v40, 1  ;;  %v2910_v46 = vrot.slane %v5632_v51, 1  ;;  %3216 = vrot.lane.b32.xlu0 %v3676_v23, %s3966_s9  ;;  %3218 = vrot.lane.b32.xlu1 %v3677_v38, %s3966_s9  ;;  %v6544_v35 = vld [vmem:[#allocation158_spill] sm:$0xff] }
 0x2af   : > { %v1990_v27 = vsel %vm5588_vm2, %v6526_v14, 0.0  ;;  %v2464_v60 = vsel %vm5513_vm14, %v6527_v34, 0.0  ;;  %v2195_v56 = vadd.f32 %v2163_v2, %v2021_v32  ;;  %v2669_v19 = vadd.f32 %v2637_v53, %v2495_v7  ;;  %v6546_v53 = vld [vmem:[#allocation146_spill] sm:$0xff] }
 0x2b0   : > { %v1696_v52 = vadd.f32 %v6529_v44, %v6528_v50  ;;  %v2324_v0 = vadd.f32 %v6530_v58, %v2194_v48  ;;  %v2993_v4 = vsel %vm5455_vm13, %v2907_v25, 0.0  ;;  %v2912_v42 = vrot.slane %v5649_v54, 1  ;;  %v2714_v21 = vpop.permute.xlu1 %2713  ;;  %v2554_v26 = vpop.permute.xlu0 %2553  ;;  %v6545_v54 = vld [vmem:[#allocation92_spill] sm:$0xff]  ;;  %v6551_v58 = vld [vmem:[#allocation161_spill] sm:$0xff] }
 0x2b1   : > { %v3678_v29 = vpack.c.bf16 %v3022_v9, %v3022_v9  ;;  %v3679_v11 = vpack.c.bf16 %v3023_v43, %v3023_v43  ;;  %v3024_v16 = vadd.f32 %v2905_v41, %v2797_v5  ;;  %v3025_v20 = vadd.f32 %v2993_v4, %v2798_v61 }
 0x2b2   : > { %v6532_v39 = vand.u32 15, %v6531_v12  ;;  %v2022_v36 = vadd.f32 %v1990_v27, %v1696_v52  ;;  %v1697_v48 = vadd.f32 %v6535_v6, %v1535_v57  ;;  %v2799_v32 = vadd.f32 %v2714_v21, %v2669_v19 }
 0x2b3   : > { %v2496_v37 = vadd.f32 %v2464_v60, %v2324_v0  ;;  %v2325_v33 = vadd.f32 %v6536_v1, %v2195_v56  ;;  %vm5676_vm5 = vcmp.ge.s32.totalorder %v993_v8, 1  ;;  %v6539_v41 = vrot.slane %v6514_v47, 1  ;;  %3220 = vrot.lane.b32.xlu0 %v3678_v29, %s3966_s9  ;;  %3222 = vrot.lane.b32.xlu1 %v3679_v11, %s3966_s9  ;;  %v6542_v8 = vld [vmem:[#allocation168_spill] sm:$0xff]  ;;  %v6543_v47 = vld [vmem:[#allocation159_spill] sm:$0xff]  ;;  %v6548_v60 = vld [vmem:[#allocation178_spill] sm:$0xff] }
 0x2b4   : > { %vm5670_vm4 = vcmp.le.s32.totalorder %v6532_v39, 14  ;;  %v2911_v57 = vsel %vm1815_vm0, %v2908_v10, %v2910_v46  ;;  %v2196_v7 = vadd.f32 %v6540_v28, %v2022_v36  ;;  %v2023_v2 = vadd.f32 %v6541_v55, %v1697_v48  ;;  %v2556_v9 = vpop.permute.xlu1 %2555  ;;  %v2716_v18 = vpop.permute.xlu0 %2715  ;;  %v6549_v56 = vld [vmem:[#allocation150_spill] sm:$0xff]  ;;  %v6555_v48 = vld [vmem:[#allocation171_spill] sm:$0xff]  ;;  %v6559_v28 = vld [vmem:[#allocation164_spill] sm:$0xff] }
 0x2b5   : > { %v2909_v40 = vsel %vm1815_vm0, %v6539_v41, %v2908_v10  ;;  %v2165_v23 = vsel %vm5543_vm15, %v6542_v8, 0.0  ;;  %v2670_v49 = vadd.f32 %v2554_v26, %v2496_v37  ;;  %v2497_v15 = vadd.f32 %v6543_v47, %v2325_v33  ;;  %v6547_v10 = vld [vmem:[#allocation162_spill] sm:$0xff]  ;;  %v6554_v26 = vld [vmem:[#allocation180_spill] sm:$0xff]  ;;  %v6557_v33 = vld [vmem:[#allocation163_spill] sm:$0xff] }
 0x2b6   : > { %v3680_v31 = vpack.c.bf16 %v3024_v16, %v3024_v16  ;;  %v3681_v38 = vpack.c.bf16 %v3025_v20, %v3025_v20  ;;  %v3026_v17 = vadd.f32 %v2909_v40, %v2799_v32  ;;  %v1992_v43 = vsel %vm5640_vm3, %v6544_v35, 0.0  ;;  %v6552_v16 = vld [vmem:[#allocation3_spill] sm:$0xff]  ;;  %v6556_v37 = vld [vmem:[#allocation176_spill] sm:$0xff]  ;;  %v6560_v55 = vld [vmem:[#allocation177_spill] sm:$0xff] }
 0x2b7   : > { %v2639_v5 = vsel %vm5332_vm11, %v2556_v9, 0.0  ;;  %v2995_v3 = vsel %vm5513_vm14, %v2911_v57, 0.0  ;;  %v2800_v24 = vadd.f32 %v2716_v18, %v2670_v49  ;;  %v1698_v61 = vadd.f32 %v6546_v53, %v6545_v54  ;;  %v6558_v57 = vld [vmem:[#allocation116_spill] sm:$0xff]  ;;  %v2836_v49 = vld [vmem:[#allocation2 + $0x80] sm:$0xff] }
 0x2b8   : > { %v2466_v14 = vsel %vm5588_vm2, %v6547_v10, 0.0  ;;  %v2197_v27 = vadd.f32 %v2165_v23, %v2023_v2  ;;  %v2671_v34 = vadd.f32 %v2639_v5, %v2497_v15  ;;  %3224 = vrot.lane.b32.xlu0 %v3680_v31, %s3966_s9  ;;  %3226 = vrot.lane.b32.xlu1 %v3681_v38, %s3966_s9  ;;  %v1007_v59 = vand.u32 15, %v6548_v60  ;;  %v2718_v29 = vpop.permute.xlu1 %2717  ;;  %v2558_v11 = vpop.permute.xlu0 %2557  ;;  %v6564_v5 = vld [vmem:[#allocation183_spill] sm:$0xff] }
 0x2b9   : > { %v2326_v19 = vadd.f32 %v6549_v56, %v2196_v7  ;;  %v1537_v50 = vsel %vm5676_vm5, %v6550_v22, 0.0  ;;  %v3027_v44 = vadd.f32 %v2995_v3, %v2800_v24  ;;  %v2024_v52 = vadd.f32 %v1992_v43, %v1698_v61  ;;  %v6565_v61 = vld [vmem:[#allocation167_spill] sm:$0xff] }
 0x2ba   : > { %v1699_v0 = vadd.f32 %v6551_v58, %v1537_v50  ;;  %v3682_v4 = vpack.c.bf16 %v3026_v17, %v3026_v17  ;;  %v6553_v20 = vrot.slane %v6552_v16, 1  ;;  %v2167_v12 = vsel %vm5676_vm5, %v6554_v26, 0.0  ;;  %v2837_v17 = vld [vmem:[#allocation2] sm:$0xff]  ;;  %v6568_v50 = vld [vmem:[#allocation25_spill] sm:$0xff] }
 0x2bb   : > { %v3683_v39 = vpack.c.bf16 %v3027_v44, %v3027_v44  ;;  %v2801_v36 = vadd.f32 %v2718_v29, %v2671_v34  ;;  %v2498_v6 = vadd.f32 %v2466_v14, %v2326_v19  ;;  %v1994_v32 = vsel %vm5670_vm4, %v6555_v48, 0.0  ;;  %v6566_v34 = vld [vmem:[#allocation118_spill] sm:$0xff] }
 0x2bc   : > { %v2915_v21 = vsel %vm1815_vm0, %v2912_v42, %v6553_v20  ;;  %v2025_v1 = vadd.f32 %v6556_v37, %v1699_v0  ;;  %v2327_v41 = vadd.f32 %v6557_v33, %v2197_v27  ;;  %v2913_v40 = vsel %vm1815_vm0, %v2910_v46, %v2912_v42  ;;  %3228 = vrot.lane.b32.xlu0 %v3682_v4, %s3966_s9  ;;  %v6563_v46 = vld [vmem:[#allocation74_spill] sm:$0xff]  ;;  %v2560_v31 = vpop.permute.xlu1 %2559  ;;  %v2720_v38 = vpop.permute.xlu0 %2719  ;;  %v2838_v0 = vld [vmem:[#allocation2 + $0x88] sm:$0xff]  ;;  %v6569_v4 = vld [vmem:[#allocation11_spill] sm:$0xff] }
 0x2bd   : > { %v1700_v7 = vadd.f32 %v6559_v28, %v6558_v57  ;;  %v2198_v2 = vadd.f32 %v6560_v55, %v2024_v52  ;;  %v3028_v8 = vadd.f32 %v2913_v40, %v2801_v36  ;;  %v2672_v23 = vadd.f32 %v2558_v11, %v2498_v6  ;;  %3230 = vrot.lane.b32.xlu1 %v3683_v39, %s3966_s9  ;;  %v6570_v11 = vld [vmem:[#allocation175_spill] sm:$0xff]  ;;  %v6576_v33 = vld [vmem:[#allocation30_spill] sm:$0xff] }
 0x2be   : > { %vm5733_vm6 = vcmp.ge.s32.totalorder %v1007_v59, 1  ;;  %v864_v51 = vadd.s32 152, %v6496_v63  ;;  %v2199_v15 = vadd.f32 %v2167_v12, %v2025_v1  ;;  %v2499_v42 = vadd.f32 %v6563_v46, %v2327_v41  ;;  %v6567_v59 = vld [vmem:[#allocation16_spill] sm:$0xff]  ;;  %v6572_v12 = vld [vmem:[#allocation42_spill] sm:$0xff]  ;;  %v2839_v28 = vld [vmem:[#allocation2 + $0x1c0] sm:$0xff] }
 0x2bf   : > { %v2026_v9 = vadd.f32 %v1994_v32, %v1700_v7  ;;  %v3684_v18 = vpack.c.bf16 %v3028_v8, %v3028_v8  ;;  %v2641_v35 = vsel %vm5543_vm15, %v2560_v31, 0.0  ;;  %v2802_v43 = vadd.f32 %v2720_v38, %v2672_v23  ;;  %v6573_v32 = vld [vmem:[#allocation24_spill] sm:$0xff]  ;;  %v6579_v31 = vld [vmem:[#allocation5_spill] sm:$0xff] }
 0x2c0   : > { %v2468_v3 = vsel %vm5640_vm3, %v6564_v5, 0.0  ;;  %v2673_v24 = vadd.f32 %v2641_v35, %v2499_v42  ;;  %v2997_v54 = vsel %vm5588_vm2, %v2915_v21, 0.0  ;;  %v2916_v53 = vrot.slane %v2836_v49, 1  ;;  %v2722_v19 = vpop.permute.xlu1 %2721  ;;  %v2562_v22 = vpop.permute.xlu0 %2561  ;;  %v6577_v8 = vld [vmem:[#allocation20_spill] sm:$0xff]  ;;  %v6578_v49 = vld [vmem:[#allocation31_spill] sm:$0xff]  ;;  %v6580_v38 = vld [vmem:[#allocation17_spill] sm:$0xff] }
 0x2c1   : > { %v2328_v10 = vadd.f32 %v6565_v61, %v2198_v2  ;;  %v3029_v14 = vadd.f32 %v2997_v54, %v2802_v43  ;;  %3232 = vrot.lane.b32.xlu0 %v3684_v18, %s3966_s9  ;;  %v2918_v27 = vrot.slane %v2837_v17, 1  ;;  %v1539_v30 = vsel %vm5733_vm6, %v6566_v34, 0.0  ;;  %v6583_v35 = vld [vmem:[#allocation35_spill] sm:$0xff] }
 0x2c2   : > { %v1014_v60 = vand.u32 15, %v864_v51  ;;  %v2329_v56 = vadd.f32 %v6567_v59, %v2199_v15  ;;  %v2200_v44 = vadd.f32 %v6568_v50, %v2026_v9  ;;  %v2803_v52 = vadd.f32 %v2722_v19, %v2673_v24  ;;  %v5793_v50 = vld [vmem:[#allocation2 + $0x138] sm:$0xff] }
 0x2c3   : > { %v3685_v45 = vpack.c.bf16 %v3029_v14, %v3029_v14  ;;  %v2500_v58 = vadd.f32 %v2468_v3, %v2328_v10  ;;  %v1701_v29 = vadd.f32 %v6569_v4, %v1539_v30  ;;  %v1021_v20 = vand.u32 15, %v6570_v11  ;;  %v6584_v10 = vld [vmem:[#allocation38_spill] sm:$0xff]  ;;  %v2840_v30 = vld [vmem:[#allocation2 + $0x1d0] sm:$0xff] }
 0x2c4   : > { %v6571_v21 = vrot.slane %v6552_v16, 1  ;;  %v2169_v39 = vsel %vm5733_vm6, %v6572_v12, 0.0  ;;  %v2919_v48 = vsel %vm1815_vm0, %v2916_v53, %v2918_v27  ;;  %vm5764_vm7 = vcmp.le.s32.totalorder %v1014_v60, 14  ;;  %v2564_v41 = vpop.permute.xlu1 %2563  ;;  %v2724_v40 = vpop.permute.xlu0 %2723  ;;  %v6585_v60 = vld [vmem:[#allocation48_spill] sm:$0xff]  ;;  %v6588_v12 = vld [vmem:[#allocation57_spill] sm:$0xff] }
 0x2c5   : > { %v2674_v6 = vadd.f32 %v2562_v22, %v2500_v58  ;;  %3234 = vrot.lane.b32.xlu1 %v3685_v45, %s3966_s9  ;;  %v2027_v37 = vadd.f32 %v6573_v32, %v1701_v29  ;;  %v2501_v16 = vadd.f32 %v6576_v33, %v2329_v56  ;;  %v2920_v57 = vrot.slane %v2838_v0, 1  ;;  %v6587_v58 = vld [vmem:[#allocation54_spill] sm:$0xff]  ;;  %v6590_v33 = vld [vmem:[#allocation43_spill] sm:$0xff] }
 0x2c6   : > { %v2917_v26 = vsel %vm1815_vm0, %v6571_v21, %v2916_v53  ;;  %v2643_v55 = vsel %vm5676_vm5, %v2564_v41, 0.0  ;;  %v2330_v23 = vadd.f32 %v6577_v8, %v2200_v44  ;;  %v1996_v51 = vsel %vm5764_vm7, %v6578_v49, 0.0  ;;  %v6586_v44 = vld [vmem:[#allocation7_spill] sm:$0xff]  ;;  %v6589_v32 = vld [vmem:[#allocation34_spill] sm:$0xff]  ;;  %v6595_v49 = vld [vmem:[#allocation53_spill] sm:$0xff] }
 0x2c7   : > { %v3030_v36 = vadd.f32 %v2917_v26, %v2803_v52  ;;  %v2804_v2 = vadd.f32 %v2724_v40, %v2674_v6  ;;  %v2201_v15 = vadd.f32 %v2169_v39, %v2027_v37  ;;  %v2675_v46 = vadd.f32 %v2643_v55, %v2501_v16  ;;  %v6593_v40 = vld [vmem:[#allocation69_spill] sm:$0xff] }
 0x2c8   : > { %v2999_v42 = vsel %vm5640_vm3, %v2919_v48, 0.0  ;;  %v1702_v17 = vadd.f32 %v6580_v38, %v6579_v31  ;;  %v2922_v25 = vrot.slane %v2839_v28, 1  ;;  %vm5780_vm8 = vcmp.ge.s32.totalorder %v1021_v20, 1  ;;  %v2726_v3 = vpop.permute.xlu1 %2725  ;;  %v2566_v13 = vpop.permute.xlu0 %2565  ;;  %v6596_v31 = vld [vmem:[#allocation8_spill] sm:$0xff]  ;;  %v6597_v38 = vld [vmem:[#allocation39_spill] sm:$0xff] }
 0x2c9   : > { %v3686_v7 = vpack.c.bf16 %v3030_v36, %v3030_v36  ;;  %v3031_v9 = vadd.f32 %v2999_v42, %v2804_v2  ;;  %v2470_v43 = vsel %vm5670_vm4, %v6583_v35, 0.0  ;;  %v866_v5 = vadd.s32 168, %v6496_v63 }
 0x2ca   : > { %v2028_v24 = vadd.f32 %v1996_v51, %v1702_v17  ;;  %v2805_v53 = vadd.f32 %v2726_v3, %v2675_v46  ;;  %v2502_v61 = vadd.f32 %v2470_v43, %v2330_v23  ;;  %v2331_v14 = vadd.f32 %v6584_v10, %v2201_v15  ;;  %v6600_v10 = vld [vmem:[#allocation73_spill] sm:$0xff] }
 0x2cb   : > { %3236 = vrot.lane.b32.xlu0 %v3686_v7, %s3966_s9  ;;  %v3687_v54 = vpack.c.bf16 %v3031_v9, %v3031_v9  ;;  %v2921_v34 = vsel %vm1815_vm0, %v2918_v27, %v2920_v57  ;;  %v2923_v22 = vsel %vm1815_vm0, %v2920_v57, %v2922_v25  ;;  %v1541_v45 = vsel %vm5780_vm8, %v6586_v44, 0.0  ;;  %v6594_v7 = vld [vmem:[#allocation50_spill] sm:$0xff]  ;;  %v6602_v44 = vld [vmem:[#allocation79_spill] sm:$0xff] }
 0x2cc   : > { %v2202_v59 = vadd.f32 %v6585_v60, %v2028_v24  ;;  %v3032_v56 = vadd.f32 %v2921_v34, %v2805_v53  ;;  %v2676_v19 = vadd.f32 %v2566_v13, %v2502_v61  ;;  %v1028_v52 = vand.u32 15, %v866_v5  ;;  %v2568_v4 = vpop.permute.xlu1 %2567  ;;  %v2728_v29 = vpop.permute.xlu0 %2727  ;;  %v6601_v34 = vld [vmem:[#allocation62_spill] sm:$0xff] }
 0x2cd   : > { %3238 = vrot.lane.b32.xlu1 %v3687_v54, %s3966_s9  ;;  %v2503_v0 = vadd.f32 %v6587_v58, %v2331_v14  ;;  %v867_v27 = vadd.s32 176, %v6496_v63  ;;  %v2645_v20 = vsel %vm5733_vm6, %v2568_v4, 0.0  ;;  %v2924_v26 = vrot.slane %v2840_v30, 1  ;;  %v6604_v4 = vld [vmem:[#allocation82_spill] sm:$0xff] }
 0x2ce   : > { %v3688_v11 = vpack.c.bf16 %v3032_v56, %v3032_v56  ;;  %v2806_v21 = vadd.f32 %v2728_v29, %v2676_v19  ;;  %v2472_v39 = vsel %vm5764_vm7, %v6588_v12, 0.0  ;;  %v3001_v6 = vsel %vm5670_vm4, %v2923_v22, 0.0  ;;  %v5837_v56 = vld [vmem:[#allocation2 + $0x250] sm:$0xff] }
 0x2cf   : > { %v2677_v36 = vadd.f32 %v2645_v20, %v2503_v0  ;;  %v2926_v48 = vrot.slane %v5793_v50, 1  ;;  %v1703_v37 = vadd.f32 %v6589_v32, %v1541_v45  ;;  %v2332_v16 = vadd.f32 %v6590_v33, %v2202_v59  ;;  %v2842_v59 = vld [vmem:[#allocation2 + $0x100] sm:$0xff]  ;;  %v6603_v0 = vld [vmem:[#allocation9_spill] sm:$0xff]  ;;  %v6605_v20 = vld [vmem:[#allocation58_spill] sm:$0xff] }
 0x2d0   : > { %v3033_v41 = vadd.f32 %v3001_v6, %v2806_v21  ;;  %3240 = vrot.lane.b32.xlu0 %v3688_v11, %s3966_s9  ;;  %vm5811_vm9 = vcmp.le.s32.totalorder %v1028_v52, 14  ;;  %v2171_v57 = vsel %vm5780_vm8, %v6593_v40, 0.0  ;;  %v2730_v28 = vpop.permute.xlu1 %2729  ;;  %v2570_v62 = vpop.permute.xlu0 %2569  ;;  %v1035_v15 = vand.u32 15, %v867_v27  ;;  %v6608_v33 = vld [vmem:[#allocation75_spill] sm:$0xff] }
 0x2d1   : > { %v2029_v55 = vadd.f32 %v6594_v7, %v1703_v37  ;;  %v2807_v8 = vadd.f32 %v2730_v28, %v2677_v36  ;;  %v2504_v23 = vadd.f32 %v2472_v39, %v2332_v16  ;;  %v1998_v51 = vsel %vm5811_vm9, %v6595_v49, 0.0  ;;  %v6607_v36 = vld [vmem:[#allocation97_spill] sm:$0xff]  ;;  %v6611_v28 = vld [vmem:[#allocation78_spill] sm:$0xff] }
 0x2d2   : > { %v3689_v2 = vpack.c.bf16 %v3033_v41, %v3033_v41  ;;  %v2925_v46 = vsel %vm1815_vm0, %v2922_v25, %v2924_v26  ;;  %v2927_v42 = vsel %vm1815_vm0, %v2924_v26, %v2926_v48  ;;  %v1704_v17 = vadd.f32 %v6597_v38, %v6596_v31  ;;  %v6606_v26 = vld [vmem:[#allocation66_spill] sm:$0xff] }
 0x2d3   : > { %v2203_v9 = vadd.f32 %v2171_v57, %v2029_v55  ;;  %v3034_v35 = vadd.f32 %v2925_v46, %v2807_v8  ;;  %v2678_v43 = vadd.f32 %v2570_v62, %v2504_v23  ;;  %v868_v24 = vadd.s32 184, %v6496_v63  ;;  %v6612_v8 = vld [vmem:[#allocation10_spill] sm:$0xff]  ;;  %v6613_v23 = vld [vmem:[#allocation61_spill] sm:$0xff] }
 0x2d4   : > { %3242 = vrot.lane.b32.xlu1 %v3689_v2, %s3966_s9  ;;  %v2572_v5 = vpop.permute.xlu1 %2571  ;;  %v2732_v3 = vpop.permute.xlu0 %2731  ;;  %v2030_v13 = vadd.f32 %v1998_v51, %v1704_v17  ;;  %v3003_v25 = vsel %vm5764_vm7, %v2927_v42, 0.0  ;;  %vm5830_vm10 = vcmp.ge.s32.totalorder %v1035_v15, 1  ;;  %v869_v52 = vadd.s32 192, %v6496_v63 }
 0x2d5   : > { %v3690_v54 = vpack.c.bf16 %v3034_v35, %v3034_v35  ;;  %v2808_v53 = vadd.f32 %v2732_v3, %v2678_v43  ;;  %v2333_v30 = vadd.f32 %v6601_v34, %v2203_v9  ;;  %v2647_v19 = vsel %vm5780_vm8, %v2572_v5, 0.0  ;;  %v6616_v5 = vld [vmem:[#allocation101_spill] sm:$0xff] }
 0x2d6   : > { %v2204_v14 = vadd.f32 %v6600_v10, %v2030_v13  ;;  %v1042_v50 = vand.u32 15, %v868_v24  ;;  %v1543_v27 = vsel %vm5830_vm10, %v6603_v0, 0.0  ;;  %v2474_v29 = vsel %vm5811_vm9, %v6604_v4, 0.0  ;;  %v6617_v13 = vld [vmem:[#allocation89_spill] sm:$0xff] }
 0x2d7   : > { %v3035_v60 = vadd.f32 %v3003_v25, %v2808_v53  ;;  %3244 = vrot.lane.b32.xlu0 %v3690_v54, %s3966_s9  ;;  %v2505_v45 = vadd.f32 %v6602_v44, %v2333_v30  ;;  %v2928_v11 = vrot.slane %v2842_v59, 1  ;;  %v2930_v18 = vrot.slane %v5837_v56, 1  ;;  %v2844_v53 = vld [vmem:[#allocation2 + $0x110] sm:$0xff]  ;;  %v6618_v56 = vld [vmem:[#allocation26_spill] sm:$0xff]  ;;  %v6619_v44 = vld [vmem:[#allocation83_spill] sm:$0xff] }
 0x2d8   : > { %v5841_v22 = vpop.permute.xlu1 %2403  ;;  %v2574_v1 = vpop.permute.xlu0 %2573  ;;  %v1705_v21 = vadd.f32 %v6605_v20, %v1543_v27  ;;  %v2334_v12 = vadd.f32 %v6606_v26, %v2204_v14  ;;  %v2173_v6 = vsel %vm5830_vm10, %v6607_v36, 0.0  ;;  %vm5859_vm11 = vcmp.le.s32.totalorder %v1042_v50, 14  ;;  %v5880_v25 = vld [vmem:[#allocation2 + $0x90] sm:$0xff]  ;;  %v6621_v27 = vld [vmem:[#allocation119_spill] sm:$0xff]  ;;  %v6622_v20 = vld [vmem:[#allocation102_spill] sm:$0xff] }
 0x2d9   : > { %v3691_v58 = vpack.c.bf16 %v3035_v60, %v3035_v60  ;;  %v2679_v39 = vadd.f32 %v2647_v19, %v2505_v45  ;;  %v2000_v62 = vsel %vm5859_vm11, %v6611_v28, 0.0  ;;  %v1049_v7 = vand.u32 15, %v869_v52  ;;  %v6620_v52 = vld [vmem:[#allocation94_spill] sm:$0xff] }
 0x2da   : > { %v2031_v16 = vadd.f32 %v6608_v33, %v1705_v21  ;;  %v2506_v40 = vadd.f32 %v2474_v29, %v2334_v12  ;;  %v2929_v55 = vsel %vm1815_vm0, %v2926_v48, %v2928_v11  ;;  %v2931_v2 = vsel %vm1815_vm0, %v2928_v11, %v2930_v18  ;;  %v6626_v33 = vld [vmem:[#allocation29_spill] sm:$0xff] }
 0x2db   : > { %3246 = vrot.lane.b32.xlu1 %v3691_v58, %s3966_s9  ;;  %v1706_v49 = vadd.f32 %v6613_v23, %v6612_v8  ;;  %v870_v17 = vadd.s32 200, %v6496_v63  ;;  %v3005_v43 = vsel %vm5811_vm9, %v2931_v2, 0.0  ;;  %vm5873_vm12 = vcmp.ge.s32.totalorder %v1049_v7, 1 }
 0x2dc   : > { %v2734_v32 = vpop.permute.xlu1 %2733  ;;  %v2402_v37 = vpop.permute.xlu0 %2401  ;;  %v2205_v51 = vadd.f32 %v2173_v6, %v2031_v16  ;;  %v2680_v15 = vadd.f32 %v2574_v1, %v2506_v40  ;;  %v871_v30 = vadd.s32 208, %v6496_v63  ;;  %v1545_v19 = vsel %vm5873_vm12, %v6618_v56, 0.0  ;;  %v6627_v16 = vld [vmem:[#allocation86_spill] sm:$0xff]  ;;  %v6635_v56 = vld [vmem:[#allocation135_spill] sm:$0xff] }
 0x2dd   : > { %v2809_v57 = vadd.f32 %v2734_v32, %v2679_v39  ;;  %v2032_v38 = vadd.f32 %v2000_v62, %v1706_v49  ;;  %v1056_v34 = vand.u32 15, %v870_v17  ;;  %v2476_v1 = vsel %vm5859_vm11, %v5841_v22, 0.0  ;;  %v6625_v39 = vld [vmem:[#allocation105_spill] sm:$0xff]  ;;  %v2846_v17 = vld [vmem:[#allocation2 + $0x18] sm:$0xff] }
 0x2de   : > { %v2335_v24 = vadd.f32 %v6617_v13, %v2205_v51  ;;  %v2932_v50 = vrot.slane %v2844_v53, 1  ;;  %v2934_v61 = vrot.slane %v5880_v25, 1  ;;  %v1707_v45 = vadd.f32 %v6619_v44, %v1545_v19  ;;  %v6636_v44 = vld [vmem:[#allocation121_spill] sm:$0xff] }
 0x2df   : > { %v3036_v46 = vadd.f32 %v2929_v55, %v2809_v57  ;;  %v2206_v3 = vadd.f32 %v6616_v5, %v2032_v38  ;;  %v2175_v4 = vsel %vm5873_vm12, %v6621_v27, 0.0  ;;  %vm5901_vm13 = vcmp.le.s32.totalorder %v1056_v34, 14 }
 0x2e0   : > { %v2576_v42 = vpop.permute.xlu1 %2575  ;;  %v2736_v31 = vpop.permute.xlu0 %2735  ;;  %v2507_v60 = vadd.f32 %v2402_v37, %v2335_v24  ;;  %v2033_v21 = vadd.f32 %v6622_v20, %v1707_v45  ;;  %v2002_v36 = vsel %vm5901_vm13, %v6625_v39, 0.0  ;;  %v1063_v6 = vand.u32 15, %v871_v30  ;;  %v6634_v30 = vld [vmem:[#allocation117_spill] sm:$0xff] }
 0x2e1   : > { %v3692_v9 = vpack.c.bf16 %v3036_v46, %v3036_v46  ;;  %v2810_v35 = vadd.f32 %v2736_v31, %v2680_v15  ;;  %v2649_v10 = vsel %vm5830_vm10, %v2576_v42, 0.0  ;;  %v2336_v58 = vadd.f32 %v6620_v52, %v2206_v3  ;;  %v6630_v15 = vld [vmem:[#allocation120_spill] sm:$0xff]  ;;  %v6631_v42 = vld [vmem:[#allocation114_spill] sm:$0xff]  ;;  %v6640_v20 = vld [vmem:[#allocation49_spill] sm:$0xff] }
 0x2e2   : > { %v2681_v0 = vadd.f32 %v2649_v10, %v2507_v60  ;;  %v2933_v32 = vsel %vm1815_vm0, %v2930_v18, %v2932_v50  ;;  %v2935_v37 = vsel %vm1815_vm0, %v2932_v50, %v2934_v61  ;;  %v1708_v40 = vadd.f32 %v6627_v16, %v6626_v33  ;;  %v6647_v18 = vld [vmem:[#allocation127_spill] sm:$0xff] }
 0x2e3   : > { %v3037_v54 = vadd.f32 %v3005_v43, %v2810_v35  ;;  %3248 = vrot.lane.b32.xlu0 %v3692_v9, %s3966_s9  ;;  %v2508_v26 = vadd.f32 %v2476_v1, %v2336_v58  ;;  %v2207_v57 = vadd.f32 %v2175_v4, %v2033_v21  ;;  %v872_v8 = vadd.s32 216, %v6496_v63  ;;  %v5922_v9 = vld [vmem:[#allocation2 + $0x120] sm:$0xff]  ;;  %v6641_v21 = vld [vmem:[#allocation112_spill] sm:$0xff] }
 0x2e4   : > { %v5884_v14 = vpop.permute.xlu1 %2407  ;;  %v2578_v47 = vpop.permute.xlu0 %2577  ;;  %v2034_v2 = vadd.f32 %v2002_v36, %v1708_v40  ;;  %v3007_v51 = vsel %vm5859_vm11, %v2935_v37, 0.0  ;;  %vm5915_vm14 = vcmp.ge.s32.totalorder %v1063_v6, 1  ;;  %v873_v3 = vadd.s32 224, %v6496_v63 }
 0x2e5   : > { %v3693_v59 = vpack.c.bf16 %v3037_v54, %v3037_v54  ;;  %v2682_v28 = vadd.f32 %v2578_v47, %v2508_v26  ;;  %v2337_v31 = vadd.f32 %v6631_v42, %v2207_v57  ;;  %v1070_v5 = vand.u32 15, %v872_v8  ;;  %v6632_v54 = vld [vmem:[#allocation46_spill] sm:$0xff]  ;;  %v6633_v47 = vld [vmem:[#allocation108_spill] sm:$0xff] }
 0x2e6   : > { %v2208_v46 = vadd.f32 %v6630_v15, %v2034_v2  ;;  %v1547_v53 = vsel %vm5915_vm14, %v6632_v54, 0.0  ;;  %v2478_v25 = vsel %vm5901_vm13, %v5884_v14, 0.0  ;;  %v2936_v10 = vrot.slane %v2846_v17, 1  ;;  %v2848_v8 = vld [vmem:[#allocation2 + $0x148] sm:$0xff]  ;;  %v6646_v17 = vld [vmem:[#allocation67_spill] sm:$0xff] }
 0x2e7   : > { %3250 = vrot.lane.b32.xlu1 %v3693_v59, %s3966_s9  ;;  %v2938_v48 = vrot.slane %v5922_v9, 1  ;;  %v1709_v34 = vadd.f32 %v6633_v47, %v1547_v53  ;;  %v2177_v19 = vsel %vm5915_vm14, %v6635_v56, 0.0  ;;  %vm5943_vm15 = vcmp.le.s32.totalorder %v1070_v5, 14 }
 0x2e8   : > { %v2738_v29 = vpop.permute.xlu1 %2737  ;;  %v2406_v11 = vpop.permute.xlu0 %2405  ;;  %v2338_v60 = vadd.f32 %v6634_v30, %v2208_v46  ;;  %v1077_v4 = vand.u32 15, %v873_v3  ;;  %v1710_v26 = vadd.f32 %v6641_v21, %v6640_v20  ;;  %v874_v6 = vadd.s32 232, %v6496_v63 }
 0x2e9   : > { %v2811_v12 = vadd.f32 %v2738_v29, %v2681_v0  ;;  %v2509_v13 = vadd.f32 %v2406_v11, %v2337_v31  ;;  %v2035_v45 = vadd.f32 %v6636_v44, %v1709_v34  ;;  %v6639_v0 = vld [vmem:[#allocation124_spill] sm:$0xff]  ;;  %v2937_v29 = vsel %vm1815_vm0, %v2934_v61, %v2936_v10  ;;  %v6652_v34 = vld [vmem:[#allocation139_spill] sm:$0xff] }
 0x2ea   : > { %v2510_v52 = vadd.f32 %v2478_v25, %v2338_v60  ;;  %v2004_v27 = vsel %vm5943_vm15, %v6639_v0, 0.0  ;;  %v2939_v11 = vsel %vm1815_vm0, %v2936_v10, %v2938_v48  ;;  %vm5957_vm2 = vcmp.ge.s32.totalorder %v1077_v4, 1  ;;  %v6651_v25 = vld [vmem:[#allocation153_spill] sm:$0xff]  ;;  %v1293_v60 = vld [vmem:[#allocation2 + $0x38] sm:$0x7f]  ;;  %v6669_v61 = vld [vmem:[#allocation152_spill] sm:$0xff] }
 0x2eb   : > { %v3038_v62 = vadd.f32 %v2933_v32, %v2811_v12  ;;  %v2209_v12 = vadd.f32 %v2177_v19, %v2035_v45  ;;  %v2036_v33 = vadd.f32 %v2004_v27, %v1710_v26  ;;  %v3009_v57 = vsel %vm5901_vm13, %v2939_v11, 0.0 }
 0x2ec   : > { %v2580_v7 = vpop.permute.xlu1 %2579  ;;  %v2740_v55 = vpop.permute.xlu0 %2739  ;;  %v876_v42 = vadd.s32 248, %v6496_v63  ;;  %v1549_v9 = vsel %vm5957_vm2, %v6646_v17, 0.0  ;;  %v2179_v10 = vsel %vm5957_vm2, %v6651_v25, 0.0  ;;  %v1487_v20 = vrot.slane %v1293_v60, 7  ;;  %v3944_v25 = vld [vmem:[#allocation2 + $0x240] sm:$0xff]  ;;  %v6670_v60 = vld [vmem:[#allocation181_spill] sm:$0xff] }
 0x2ed   : > { %v3694_v23 = vpack.c.bf16 %v3038_v62, %v3038_v62  ;;  %v2812_v49 = vadd.f32 %v2740_v55, %v2682_v28  ;;  %v2651_v35 = vsel %vm5873_vm12, %v2580_v7, 0.0  ;;  %v6644_v28 = vld [vmem:[#allocation138_spill] sm:$0xff]  ;;  %v6645_v7 = vld [vmem:[#allocation131_spill] sm:$0xff]  ;;  %v1711_v3 = vadd.f32 %v6647_v18, %v1549_v9 }
 0x2ee   : > { %v2683_v59 = vadd.f32 %v2651_v35, %v2509_v13  ;;  %v2210_v62 = vadd.f32 %v6644_v28, %v2036_v33  ;;  %v2339_v55 = vadd.f32 %v6645_v7, %v2209_v12  ;;  %v6648_v13 = vld [vmem:[#allocation134_spill] sm:$0xff]  ;;  %v6661_v33 = vld [vmem:[#allocation156_spill] sm:$0xff]  ;;  %v6663_v7 = vld [vmem:[#allocation145_spill] sm:$0xff]  ;;  %vm3304_vm6 = vcmask 191552  }
 0x2ef   : > { %v3039_v38 = vadd.f32 %v3007_v51, %v2812_v49  ;;  %3252 = vrot.lane.b32.xlu0 %v3694_v23, %s3966_s9  ;;  %v5964_v23 = vld [vmem:[#allocation2 + $0xe0] sm:$0xff]  ;;  %v1084_v49 = vand.u32 15, %v874_v6  ;;  %v875_v51 = vadd.s32 240, %v6496_v63  ;;  %v2037_v30 = vadd.f32 %v6652_v34, %v1711_v3 }
 0x2f0   : > { %v5926_v43 = vpop.permute.xlu1 %2411  ;;  %v2582_v41 = vpop.permute.xlu0 %2581  ;;  %v2942_v5 = vrot.slane %v5964_v23, 1 }
 0x2f1   : > { %v3695_v24 = vpack.c.bf16 %v3039_v38, %v3039_v38  ;;  %v2684_v39 = vadd.f32 %v2582_v41, %v2510_v52  ;;  %v2480_v35 = vsel %vm5943_vm15, %v5926_v43, 0.0  ;;  %v2940_v41 = vrot.slane %v2848_v8, 1  ;;  %v6654_v52 = vld [vmem:[#allocation71_spill] sm:$0xff] }
 0x2f2   : > { %vm5982_vm3 = vcmp.le.s32.totalorder %v1084_v49, 14  ;;  %v1091_v53 = vand.u32 15, %v875_v51  ;;  %v2211_v27 = vadd.f32 %v2179_v10, %v2037_v30  ;;  %v6665_v49 = vld [vmem:[#allocation160_spill] sm:$0xff]  ;;  %v2946_v10 = vrot.slane %v3944_v25, 1 }
 0x2f3   : > { %3254 = vrot.lane.b32.xlu1 %v3695_v24, %s3966_s9  ;;  %v2340_v24 = vadd.f32 %v6648_v13, %v2210_v62  ;;  %v2941_v44 = vsel %vm1815_vm0, %v2938_v48, %v2940_v41  ;;  %v2943_v45 = vsel %vm1815_vm0, %v2940_v41, %v2942_v5  ;;  %v2850_v62 = vld [vmem:[#allocation2 + $0x210] sm:$0xff] }
 0x2f4   : > { %v2742_v1 = vpop.permute.xlu1 %2741  ;;  %v2410_v50 = vpop.permute.xlu0 %2409  ;;  %vm5999_vm4 = vcmp.ge.s32.totalorder %v1091_v53, 1  ;;  %v3011_v6 = vsel %vm5943_vm15, %v2943_v45, 0.0  ;;  %v6668_v41 = vld [vmem:[#allocation157_spill] sm:$0xff]  ;;  %v2944_v13 = vrot.slane %v2850_v62, 1 }
 0x2f5   : > { %v2813_v58 = vadd.f32 %v2742_v1, %v2683_v59  ;;  %v2511_v31 = vadd.f32 %v2410_v50, %v2339_v55  ;;  %v1098_v59 = vand.u32 15, %v876_v42  ;;  %v2512_v56 = vadd.f32 %v2480_v35, %v2340_v24  ;;  %v6653_v1 = vld [vmem:[#allocation142_spill] sm:$0xff]  ;;  %v6666_v42 = vld [vmem:[#allocation148_spill] sm:$0xff] }
 0x2f6   : > { %v2006_v50 = vsel %vm5982_vm3, %v6653_v1, 0.0 }
 0x2f7   : > { %v3040_v36 = vadd.f32 %v2937_v29, %v2813_v58  ;;  %v6655_v58 = vld [vmem:[#allocation130_spill] sm:$0xff]  ;;  %vm6003_vm5 = vcmp.le.s32.totalorder %v1098_v59, 14 }
 0x2f8   : > { %v2584_v32 = vpop.permute.xlu1 %2583  ;;  %v2744_v37 = vpop.permute.xlu0 %2743  ;;  %v1712_v0 = vadd.f32 %v6655_v58, %v6654_v52  ;;  %v2008_v14 = vsel %vm6003_vm5, %v6665_v49, 0.0  ;;  %v6671_v58 = vld [vmem:[#allocation166_spill] sm:$0xff] }
 0x2f9   : > { %v3696_v16 = vpack.c.bf16 %v3040_v36, %v3040_v36  ;;  %v2814_v40 = vadd.f32 %v2744_v37, %v2684_v39  ;;  %v2653_v22 = vsel %vm5915_vm14, %v2584_v32, 0.0  ;;  %v6660_v32 = vld [vmem:[#allocation91_spill] sm:$0xff] }
 0x2fa   : > { %v2685_v54 = vadd.f32 %v2653_v22, %v2511_v31  ;;  %v2038_v12 = vadd.f32 %v2006_v50, %v1712_v0  ;;  %v1551_v37 = vsel %vm5999_vm4, %v6660_v32, 0.0 }
 0x2fb   : > { %v3041_v2 = vadd.f32 %v3009_v57, %v2814_v40  ;;  %3256 = vrot.lane.b32.xlu0 %v3696_v16, %s3966_s9  ;;  %v6662_v40 = vld [vmem:[#allocation149_spill] sm:$0xff]  ;;  %v1713_v55 = vadd.f32 %v6663_v7, %v1551_v37 }
 0x2fc   : > { %v5969_v15 = vpop.permute.xlu1 %2415  ;;  %v2586_v46 = vpop.permute.xlu0 %2585  ;;  %v2212_v16 = vadd.f32 %v6661_v33, %v2038_v12  ;;  %v2341_v57 = vadd.f32 %v6662_v40, %v2211_v27 }
 0x2fd   : > { %v3697_v38 = vpack.c.bf16 %v3041_v2, %v3041_v2  ;;  %v2686_v4 = vadd.f32 %v2586_v46, %v2512_v56  ;;  %v6664_v2 = vld [vmem:[#allocation88_spill] sm:$0xff]  ;;  %v2039_v18 = vadd.f32 %v6668_v41, %v1713_v55  ;;  %v2482_v3 = vsel %vm5982_vm3, %v5969_v15, 0.0 }
 0x2fe   : > { %v1488_v8 = vsel %vm1423_vm1, %v6664_v2, %v1487_v20  ;;  %v2945_v15 = vsel %vm1815_vm0, %v2942_v5, %v2944_v13 }
 0x2ff   : > { %3258 = vrot.lane.b32.xlu1 %v3697_v38, %s3966_s9  ;;  %v1714_v31 = vadd.f32 %v6666_v42, %v1488_v8  ;;  %v6667_v38 = vld [vmem:[#allocation170_spill] sm:$0xff] }
 0x300   : > { %v2746_v43 = vpop.permute.xlu1 %2745  ;;  %v2414_v47 = vpop.permute.xlu0 %2413  ;;  %v2181_v17 = vsel %vm5999_vm4, %v6667_v38, 0.0 }
 0x301   : > { %v2815_v19 = vadd.f32 %v2746_v43, %v2685_v54  ;;  %v2513_v9 = vadd.f32 %v2414_v47, %v2341_v57  ;;  %v2040_v24 = vadd.f32 %v2008_v14, %v1714_v31  ;;  %v2342_v54 = vadd.f32 %v6669_v61, %v2212_v16  ;;  %v2853_v47 = vld [vmem:[#allocation2 + $0xd8] sm:$0x1] }
 0x302   : > { %v2213_v43 = vadd.f32 %v2181_v17, %v2039_v18  ;;  %v2950_v45 = vrot.slane %v2853_v47, 1 }
 0x303   : > { %v3042_v29 = vadd.f32 %v2941_v44, %v2815_v19  ;;  %v2214_v59 = vadd.f32 %v6670_v60, %v2040_v24  ;;  %v2514_v56 = vadd.f32 %v2482_v3, %v2342_v54  ;;  %v2947_v44 = vsel %vm1815_vm0, %v2944_v13, %v2946_v10 }
 0x304   : > { %v2588_v21 = vpop.permute.xlu1 %2587  ;;  %v2748_v26 = vpop.permute.xlu0 %2747  ;;  %v2343_v0 = vadd.f32 %v6671_v58, %v2213_v43  ;;  %v3013_v12 = vsel %vm5982_vm3, %v2947_v44, 0.0 }
 0x305   : > { %v3698_v39 = vpack.c.bf16 %v3042_v29, %v3042_v29  ;;  %v2816_v36 = vadd.f32 %v2748_v26, %v2686_v4  ;;  %v2655_v51 = vsel %vm5957_vm2, %v2588_v21, 0.0  ;;  %v6672_v29 = vld [vmem:[#allocation169_spill] sm:$0xff] }
 0x306   : > { %v2687_v53 = vadd.f32 %v2655_v51, %v2513_v9  ;;  %v2344_v20 = vadd.f32 %v6672_v29, %v2214_v59 }
 0x307   : > { %v3043_v28 = vadd.f32 %v3011_v6, %v2816_v36  ;;  %3260 = vrot.lane.b32.xlu0 %v3698_v39, %s3966_s9  ;;  %v2951_v6 = vsel %vm1815_vm0, %v2946_v10, %v2950_v45 }
 0x308   : > { %v2420_v22 = vpop.permute.xlu1 %2419  ;;  %v2590_v46 = vpop.permute.xlu0 %2589  ;;  %v3015_v11 = vsel %vm6003_vm5, %v2951_v6, 0.0 }
 0x309   : > { %v3699_v35 = vpack.c.bf16 %v3043_v28, %v3043_v28  ;;  %v2688_v1 = vadd.f32 %v2590_v46, %v2514_v56  ;;  %v2484_v52 = vsel %vm6003_vm5, %v2420_v22, 0.0 }
 0x30a   : > { %v2516_v39 = vadd.f32 %v2484_v52, %v2344_v20 }
 0x30b   : > { %3262 = vrot.lane.b32.xlu1 %v3699_v35, %s3966_s9 }
 0x30c   : > { %v2750_v34 = vpop.permute.xlu1 %2749  ;;  %v2418_v30 = vpop.permute.xlu0 %2417 }
 0x30d   : > { %v2817_v19 = vadd.f32 %v2750_v34, %v2687_v53  ;;  %v2515_v5 = vadd.f32 %v2418_v30, %v2343_v0 }
 0x30f   : > { %v3044_v50 = vadd.f32 %v2945_v15, %v2817_v19 }
 0x310   : > { %v2592_v27 = vpop.permute.xlu1 %2591  ;;  %v2752_v4 = vpop.permute.xlu0 %2751 }
 0x311   : > { %v3700_v21 = vpack.c.bf16 %v3044_v50, %v3044_v50  ;;  %v2657_v23 = vsel %vm5999_vm4, %v2592_v27, 0.0  ;;  %v2818_v26 = vadd.f32 %v2752_v4, %v2688_v1 }
 0x312   : > { %v2689_v32 = vadd.f32 %v2657_v23, %v2515_v5 }
 0x313   : > { %v3045_v36 = vadd.f32 %v3013_v12, %v2818_v26  ;;  %3264 = vrot.lane.b32.xlu0 %v3700_v21, %s3966_s9 }
 0x314   : > { %v3903_v37 = vpop.permute.xlu1 %3902  ;;  %v2594_v33 = vpop.permute.xlu0 %2593 }
 0x315   : > { %v3701_v16 = vpack.c.bf16 %v3045_v36, %v3045_v36  ;;  %v2690_v40 = vadd.f32 %v2594_v33, %v2516_v39  ;;  %v3947_v63 = vadd.low.f32.bf16 %v2689_v32, %v3903_v37 }
 0x317   : > { %v3948_v57 = vadd.high.f32.bf16 %v2690_v40, %v3903_v37  ;;  %3266 = vrot.lane.b32.xlu1 %v3701_v16, %s3966_s9  ;;  %v3046_v7 = vadd.f32 %v3947_v63, %v2946_v10 }
 0x318   : > { %v3211_v28 = vpop.permute.xlu1 %3210  ;;  %v3209_v62 = vpop.permute.xlu0 %3208 }
 0x319   : > { %v3047_v55 = vadd.f32 %v3948_v57, %v3015_v11  ;;  %3306 = vst.msk [vmem:[%s4111_s19 + $0x4] sm:$0xf] %vm3304_vm6, %v3211_v28  ;;  %3305 = vst.msk [vmem:[%s4111_s19] sm:$0xf] %vm3304_vm6, %v3209_v62  ;;  %v3702_v48 = vpack.c.bf16 %v3046_v7, %v3046_v7 }
 0x31b   : > { %v3703_v2 = vpack.c.bf16 %v3047_v55, %v3047_v55  ;;  %3268 = vrot.lane.b32.xlu0 %v3702_v48, %s3966_s9 }
 0x31c   : > { %v3215_v8 = vpop.permute.xlu1 %3214  ;;  %v3213_v49 = vpop.permute.xlu0 %3212 }
 0x31d   : > { %3308 = vst.msk [vmem:[%s4111_s19 + $0xc] sm:$0xf] %vm3304_vm6, %v3215_v8  ;;  %3307 = vst.msk [vmem:[%s4111_s19 + $0x8] sm:$0xf] %vm3304_vm6, %v3213_v49  ;;  %3270 = vrot.lane.b32.xlu1 %v3703_v2, %s3966_s9 }
 0x320   : > { %v3219_v14 = vpop.permute.xlu1 %3218  ;;  %v3217_v51 = vpop.permute.xlu0 %3216  ;;  %v3769_v35 = vld [vmem:[%s4111_s19] sm:$0xff]  }
 0x321   : > { %3310 = vst.msk [vmem:[%s4111_s19 + $0x14] sm:$0xf] %vm3304_vm6, %v3219_v14  ;;  %3309 = vst.msk [vmem:[%s4111_s19 + $0x10] sm:$0xf] %vm3304_vm6, %v3217_v51  ;;  %v3770_v3 = vunpack.c.l.bf16 %v3769_v35  ;;  %v3771_v13 = vunpack.c.h.bf16 %v3769_v35 }
 0x323   : > { %v3438_v54 = vmul.f32 %v3770_v3, %v3770_v3  ;;  %v3439_v53 = vmul.f32 %v3771_v13, %v3771_v13  ;;  %v3401_v25 = vadd.f32 %v3771_v13, %v3770_v3 }
 0x324   : > { %v3847_v41 = vld [vmem:[%s4111_s19 + $0x8] sm:$0xff]  }
 0x325   : > { %v3223_v22 = vpop.permute.xlu1 %3222  ;;  %v3221_v46 = vpop.permute.xlu0 %3220  ;;  %v3774_v24 = vunpack.c.l.bf16 %v3847_v41  ;;  %v3470_v30 = vadd.f32 %v3439_v53, %v3438_v54  ;;  %v3775_v47 = vunpack.c.h.bf16 %v3847_v41 }
 0x326   : > { %3312 = vst.msk [vmem:[%s4111_s19 + $0x1c] sm:$0xf] %vm3304_vm6, %v3223_v22  ;;  %3311 = vst.msk [vmem:[%s4111_s19 + $0x18] sm:$0xf] %vm3304_vm6, %v3221_v46 }
 0x327   : > { %v3440_v10 = vmul.f32 %v3774_v24, %v3774_v24  ;;  %v3402_v60 = vadd.f32 %v3774_v24, %v3401_v25  ;;  %v3441_v1 = vmul.f32 %v3775_v47, %v3775_v47 }
 0x328   : > { %v3848_v43 = vld [vmem:[%s4111_s19 + $0x10] sm:$0xff]  }
 0x329   : > { %v3471_v59 = vadd.f32 %v3470_v30, %v3440_v10  ;;  %v3778_v56 = vunpack.c.l.bf16 %v3848_v43  ;;  %v3403_v15 = vadd.f32 %v3775_v47, %v3402_v60  ;;  %v3779_v58 = vunpack.c.h.bf16 %v3848_v43 }
 0x32a   : > { %v3227_v42 = vpop.permute.xlu1 %3226  ;;  %v3225_v31 = vpop.permute.xlu0 %3224 }
 0x32b   : > { %3314 = vst.msk [vmem:[%s4111_s19 + $0x24] sm:$0xf] %vm3304_vm6, %v3227_v42  ;;  %3313 = vst.msk [vmem:[%s4111_s19 + $0x20] sm:$0xf] %vm3304_vm6, %v3225_v31  ;;  %v3472_v50 = vadd.f32 %v3471_v59, %v3441_v1  ;;  %v3442_v44 = vmul.f32 %v3778_v56, %v3778_v56  ;;  %v3404_v0 = vadd.f32 %v3778_v56, %v3403_v15 }
 0x32c   : > { %v3443_v21 = vmul.f32 %v3779_v58, %v3779_v58 }
 0x32d   : > { %v3849_v45 = vld [vmem:[%s4111_s19 + $0x18] sm:$0xff]   ;;  %v3473_v27 = vadd.f32 %v3472_v50, %v3442_v44  ;;  %v3405_v20 = vadd.f32 %v3779_v58, %v3404_v0 }
 0x32e   : > { %v3229_v38 = vpop.permute.xlu0 %3228  ;;  %v3782_v4 = vunpack.c.l.bf16 %v3849_v45  ;;  %v3783_v39 = vunpack.c.h.bf16 %v3849_v45 }
 0x32f   : > { %3315 = vst.msk [vmem:[%s4111_s19 + $0x28] sm:$0xf] %vm3304_vm6, %v3229_v38  ;;  %v3231_v17 = vpop.permute.xlu1 %3230  ;;  %v3474_v23 = vadd.f32 %v3473_v27, %v3443_v21 }
 0x330   : > { %3316 = vst.msk [vmem:[%s4111_s19 + $0x2c] sm:$0xf] %vm3304_vm6, %v3231_v17  ;;  %v3444_v26 = vmul.f32 %v3782_v4, %v3782_v4  ;;  %v3406_v36 = vadd.f32 %v3782_v4, %v3405_v20  ;;  %v3445_v33 = vmul.f32 %v3783_v39, %v3783_v39 }
 0x332   : > { %v3850_v5 = vld [vmem:[%s4111_s19 + $0x20] sm:$0xff]   ;;  %v3475_v6 = vadd.f32 %v3474_v23, %v3444_v26  ;;  %v3407_v37 = vadd.f32 %v3783_v39, %v3406_v36 }
 0x333   : > { %v3233_v9 = vpop.permute.xlu0 %3232  ;;  %v3786_v32 = vunpack.c.l.bf16 %v3850_v5  ;;  %v3787_v57 = vunpack.c.h.bf16 %v3850_v5 }
 0x334   : > { %3317 = vst.msk [vmem:[%s4111_s19 + $0x30] sm:$0xf] %vm3304_vm6, %v3233_v9  ;;  %v3476_v16 = vadd.f32 %v3475_v6, %v3445_v33 }
 0x335   : > { %v3446_v40 = vmul.f32 %v3786_v32, %v3786_v32  ;;  %v3408_v28 = vadd.f32 %v3786_v32, %v3407_v37  ;;  %v3447_v2 = vmul.f32 %v3787_v57, %v3787_v57 }
 0x337   : > { %v3235_v18 = vpop.permute.xlu1 %3234  ;;  %v3851_v11 = vld [vmem:[%s4111_s19 + $0x28] sm:$0xff]   ;;  %v3477_v62 = vadd.f32 %v3476_v16, %v3446_v40  ;;  %v3409_v48 = vadd.f32 %v3787_v57, %v3408_v28 }
 0x338   : > { %3318 = vst.msk [vmem:[%s4111_s19 + $0x34] sm:$0xf] %vm3304_vm6, %v3235_v18  ;;  %v3790_v7 = vunpack.c.l.bf16 %v3851_v11  ;;  %v3791_v51 = vunpack.c.h.bf16 %v3851_v11 }
 0x339   : > { %v3478_v49 = vadd.f32 %v3477_v62, %v3447_v2 }
 0x33a   : > { %v3448_v14 = vmul.f32 %v3790_v7, %v3790_v7  ;;  %v3410_v22 = vadd.f32 %v3790_v7, %v3409_v48  ;;  %v3449_v9 = vmul.f32 %v3791_v51, %v3791_v51 }
 0x33c   : > { %v3479_v42 = vadd.f32 %v3478_v49, %v3448_v14  ;;  %v3411_v17 = vadd.f32 %v3791_v51, %v3410_v22 }
 0x33d   : > { %v3237_v61 = vpop.permute.xlu0 %3236 }
 0x33e   : > { %3319 = vst.msk [vmem:[%s4111_s19 + $0x38] sm:$0xf] %vm3304_vm6, %v3237_v61  ;;  %v3480_v41 = vadd.f32 %v3479_v42, %v3449_v9 }
 0x33f   : > { %v3239_v34 = vpop.permute.xlu1 %3238  ;;  %v3852_v8 = vld [vmem:[%s4111_s19 + $0x30] sm:$0xff]  }
 0x340   : > { %3320 = vst.msk [vmem:[%s4111_s19 + $0x3c] sm:$0xf] %vm3304_vm6, %v3239_v34  ;;  %v3794_v46 = vunpack.c.l.bf16 %v3852_v8  ;;  %v3795_v18 = vunpack.c.h.bf16 %v3852_v8 }
 0x342   : > { %v3241_v19 = vpop.permute.xlu0 %3240  ;;  %v3450_v35 = vmul.f32 %v3794_v46, %v3794_v46  ;;  %v3412_v3 = vadd.f32 %v3794_v46, %v3411_v17  ;;  %v3451_v25 = vmul.f32 %v3795_v18, %v3795_v18 }
 0x343   : > { %3321 = vst.msk [vmem:[%s4111_s19 + $0x40] sm:$0xf] %vm3304_vm6, %v3241_v19 }
 0x344   : > { %v3481_v61 = vadd.f32 %v3480_v41, %v3450_v35  ;;  %v3413_v53 = vadd.f32 %v3795_v18, %v3412_v3 }
 0x346   : > { %v3243_v52 = vpop.permute.xlu1 %3242  ;;  %v3482_v43 = vadd.f32 %v3481_v61, %v3451_v25 }
 0x347   : > { %3322 = vst.msk [vmem:[%s4111_s19 + $0x44] sm:$0xf] %vm3304_vm6, %v3243_v52  ;;  %v3853_v31 = vld [vmem:[%s4111_s19 + $0x38] sm:$0xff]  }
 0x348   : > { %v3798_v13 = vunpack.c.l.bf16 %v3853_v31  ;;  %v3799_v34 = vunpack.c.h.bf16 %v3853_v31 }
 0x349   : > { %v3245_v29 = vpop.permute.xlu0 %3244 }
 0x34a   : > { %3323 = vst.msk [vmem:[%s4111_s19 + $0x48] sm:$0xf] %vm3304_vm6, %v3245_v29  ;;  %v3452_v10 = vmul.f32 %v3798_v13, %v3798_v13  ;;  %v3414_v30 = vadd.f32 %v3798_v13, %v3413_v53  ;;  %v3453_v15 = vmul.f32 %v3799_v34, %v3799_v34 }
 0x34c   : > { %v3483_v60 = vadd.f32 %v3482_v43, %v3452_v10  ;;  %v3415_v19 = vadd.f32 %v3799_v34, %v3414_v30 }
 0x34d   : > { %v3247_v12 = vpop.permute.xlu1 %3246 }
 0x34e   : > { %3324 = vst.msk [vmem:[%s4111_s19 + $0x4c] sm:$0xf] %vm3304_vm6, %v3247_v12  ;;  %v3854_v54 = vld [vmem:[%s4111_s19 + $0x40] sm:$0xff]   ;;  %v3484_v50 = vadd.f32 %v3483_v60, %v3453_v15 }
 0x34f   : > { %v3802_v47 = vunpack.c.l.bf16 %v3854_v54  ;;  %v3803_v44 = vunpack.c.h.bf16 %v3854_v54 }
 0x351   : > { %v3454_v1 = vmul.f32 %v3802_v47, %v3802_v47  ;;  %v3416_v45 = vadd.f32 %v3802_v47, %v3415_v19  ;;  %v3455_v29 = vmul.f32 %v3803_v44, %v3803_v44 }
 0x353   : > { %v3485_v0 = vadd.f32 %v3484_v50, %v3454_v1  ;;  %v3417_v4 = vadd.f32 %v3803_v44, %v3416_v45 }
 0x355   : > { %v3249_v63 = vpop.permute.xlu0 %3248  ;;  %v3855_v59 = vld [vmem:[%s4111_s19 + $0x48] sm:$0xff]   ;;  %v3486_v21 = vadd.f32 %v3485_v0, %v3455_v29 }
 0x356   : > { %3325 = vst.msk [vmem:[%s4111_s19 + $0x50] sm:$0xf] %vm3304_vm6, %v3249_v63  ;;  %v3806_v52 = vunpack.c.l.bf16 %v3855_v59  ;;  %v3807_v23 = vunpack.c.h.bf16 %v3855_v59 }
 0x358   : > { %v3456_v20 = vmul.f32 %v3806_v52, %v3806_v52  ;;  %v3418_v26 = vadd.f32 %v3806_v52, %v3417_v4  ;;  %v3457_v32 = vmul.f32 %v3807_v23, %v3807_v23 }
 0x359   : > { %v3251_v55 = vpop.permute.xlu1 %3250 }
 0x35a   : > { %3326 = vst.msk [vmem:[%s4111_s19 + $0x54] sm:$0xf] %vm3304_vm6, %v3251_v55  ;;  %v3487_v12 = vadd.f32 %v3486_v21, %v3456_v20  ;;  %v3419_v6 = vadd.f32 %v3807_v23, %v3418_v26 }
 0x35c   : > { %v3488_v33 = vadd.f32 %v3487_v12, %v3457_v32 }
 0x361   : > { %v3253_v38 = vpop.permute.xlu0 %3252  ;;  %v3856_v27 = vld [vmem:[%s4111_s19 + $0x50] sm:$0xff]  }
 0x362   : > { %3327 = vst.msk [vmem:[%s4111_s19 + $0x58] sm:$0xf] %vm3304_vm6, %v3253_v38  ;;  %v3810_v5 = vunpack.c.l.bf16 %v3856_v27  ;;  %v3811_v16 = vunpack.c.h.bf16 %v3856_v27 }
 0x364   : > { %v3458_v37 = vmul.f32 %v3810_v5, %v3810_v5  ;;  %v3420_v40 = vadd.f32 %v3810_v5, %v3419_v6  ;;  %v3459_v7 = vmul.f32 %v3811_v16, %v3811_v16 }
 0x365   : > { %v3255_v24 = vpop.permute.xlu1 %3254 }
 0x366   : > { %3328 = vst.msk [vmem:[%s4111_s19 + $0x5c] sm:$0xf] %vm3304_vm6, %v3255_v24  ;;  %v3489_v57 = vadd.f32 %v3488_v33, %v3458_v37  ;;  %v3421_v62 = vadd.f32 %v3811_v16, %v3420_v40 }
 0x368   : > { %v3490_v48 = vadd.f32 %v3489_v57, %v3459_v7 }
 0x36d   : > { %v3257_v56 = vpop.permute.xlu0 %3256  ;;  %v3857_v39 = vld [vmem:[%s4111_s19 + $0x58] sm:$0xff]  }
 0x36e   : > { %3329 = vst.msk [vmem:[%s4111_s19 + $0x60] sm:$0xf] %vm3304_vm6, %v3257_v56  ;;  %v3814_v11 = vunpack.c.l.bf16 %v3857_v39  ;;  %v3815_v2 = vunpack.c.h.bf16 %v3857_v39 }
 0x370   : > { %v3460_v55 = vmul.f32 %v3814_v11, %v3814_v11  ;;  %v3422_v8 = vadd.f32 %v3814_v11, %v3421_v62  ;;  %v3461_v42 = vmul.f32 %v3815_v2, %v3815_v2 }
 0x371   : > { %v3259_v58 = vpop.permute.xlu1 %3258 }
 0x372   : > { %3330 = vst.msk [vmem:[%s4111_s19 + $0x64] sm:$0xf] %vm3304_vm6, %v3259_v58  ;;  %v3491_v14 = vadd.f32 %v3490_v48, %v3460_v55  ;;  %v3423_v46 = vadd.f32 %v3815_v2, %v3422_v8 }
 0x374   : > { %v3492_v38 = vadd.f32 %v3491_v14, %v3461_v42 }
 0x379   : > { %v3261_v36 = vpop.permute.xlu0 %3260  ;;  %v3858_v28 = vld [vmem:[%s4111_s19 + $0x60] sm:$0xff]  }
 0x37a   : > { %3331 = vst.msk [vmem:[%s4111_s19 + $0x68] sm:$0xf] %vm3304_vm6, %v3261_v36  ;;  %v3818_v49 = vunpack.c.l.bf16 %v3858_v28  ;;  %v3819_v17 = vunpack.c.h.bf16 %v3858_v28 }
 0x37c   : > { %v3462_v31 = vmul.f32 %v3818_v49, %v3818_v49  ;;  %v3424_v9 = vadd.f32 %v3818_v49, %v3423_v46  ;;  %v3463_v13 = vmul.f32 %v3819_v17, %v3819_v17 }
 0x37d   : > { %v3263_v63 = vpop.permute.xlu1 %3262 }
 0x37e   : > { %3332 = vst.msk [vmem:[%s4111_s19 + $0x6c] sm:$0xf] %vm3304_vm6, %v3263_v63  ;;  %v3493_v18 = vadd.f32 %v3492_v38, %v3462_v31  ;;  %v3425_v3 = vadd.f32 %v3819_v17, %v3424_v9 }
 0x380   : > { %v3494_v61 = vadd.f32 %v3493_v18, %v3463_v13 }
 0x385   : > { %v3859_v51 = vld [vmem:[%s4111_s19 + $0x68] sm:$0xff]   ;;  %v3265_v22 = vpop.permute.xlu0 %3264 }
 0x386   : > { %3333 = vst.msk [vmem:[%s4111_s19 + $0x70] sm:$0xf] %vm3304_vm6, %v3265_v22  ;;  %v3822_v35 = vunpack.c.l.bf16 %v3859_v51  ;;  %v3823_v54 = vunpack.c.h.bf16 %v3859_v51 }
 0x388   : > { %v3464_v24 = vmul.f32 %v3822_v35, %v3822_v35  ;;  %v3426_v53 = vadd.f32 %v3822_v35, %v3425_v3  ;;  %v3465_v47 = vmul.f32 %v3823_v54, %v3823_v54 }
 0x389   : > { %v3267_v41 = vpop.permute.xlu1 %3266 }
 0x38a   : > { %3334 = vst.msk [vmem:[%s4111_s19 + $0x74] sm:$0xf] %vm3304_vm6, %v3267_v41  ;;  %v3495_v43 = vadd.f32 %v3494_v61, %v3464_v24  ;;  %v3427_v30 = vadd.f32 %v3823_v54, %v3426_v53 }
 0x38c   : > { %v3496_v59 = vadd.f32 %v3495_v43, %v3465_v47 }
 0x38d   : > { %v3269_v10 = vpop.permute.xlu0 %3268 }
 0x38e   : > { %3335 = vst.msk [vmem:[%s4111_s19 + $0x78] sm:$0xf] %vm3304_vm6, %v3269_v10 }
 0x38f   : > { %v3271_v25 = vpop.permute.xlu1 %3270 }
 0x390   : > { %3336 = vst.msk [vmem:[%s4111_s19 + $0x7c] sm:$0xf] %vm3304_vm6, %v3271_v25 }
 0x391   : > { %v3860_v34 = vld [vmem:[%s4111_s19 + $0x70] sm:$0xff]  }
 0x392   : > { %v3826_v60 = vunpack.c.l.bf16 %v3860_v34  ;;  %v3827_v56 = vunpack.c.h.bf16 %v3860_v34 }
 0x394   : > { %v3428_v19 = vadd.f32 %v3826_v60, %v3427_v30  ;;  %v3466_v15 = vmul.f32 %v3826_v60, %v3826_v60  ;;  %v3467_v45 = vmul.f32 %v3827_v56, %v3827_v56 }
 0x396   : > { %v3497_v1 = vadd.f32 %v3496_v59, %v3466_v15  ;;  %v3429_v44 = vadd.f32 %v3827_v56, %v3428_v19 }
 0x397   : > { %v3861_v50 = vld [vmem:[%s4111_s19 + $0x78] sm:$0xff]  }
 0x398   : > { %v3830_v52 = vunpack.c.l.bf16 %v3861_v50  ;;  %v3831_v58 = vunpack.c.h.bf16 %v3861_v50  ;;  %v3498_v0 = vadd.f32 %v3497_v1, %v3467_v45 }
 0x39a   : > { %v3430_v27 = vadd.f32 %v3830_v52, %v3429_v44  ;;  %v3468_v4 = vmul.f32 %v3830_v52, %v3830_v52  ;;  %v3469_v20 = vmul.f32 %v3831_v58, %v3831_v58 }
 0x39c   : > { %v3431_v29 = vadd.f32 %v3831_v58, %v3430_v27  ;;  %v3499_v21 = vadd.f32 %v3498_v0, %v3468_v4 }
 0x39e   : > { %v3432_v23 = vrot.slane %v3431_v29, 4  ;;  %v3500_v26 = vadd.f32 %v3499_v21, %v3469_v20 }
 0x3a0   : > { %v3433_v5 = vadd.f32 %v3432_v23, %v3431_v29  ;;  %v3501_v12 = vrot.slane %v3500_v26, 4 }
 0x3a2   : > { %v3434_v39 = vrot.slane %v3433_v5, 2  ;;  %v3502_v36 = vadd.f32 %v3501_v12, %v3500_v26 }
 0x3a4   : > { %v3435_v6 = vadd.f32 %v3434_v39, %v3433_v5  ;;  %v3503_v32 = vrot.slane %v3502_v36, 2 }
 0x3a6   : > { %v3436_v37 = vrot.slane %v3435_v6, 1  ;;  %v3504_v33 = vadd.f32 %v3503_v32, %v3502_v36 }
 0x3a8   : > { %v3505_v16 = vrot.slane %v3504_v33, 1  ;;  %v3437_v40 = vadd.f32 %v3436_v37, %v3435_v6 }
 0x3aa   : > { %v3506_v11 = vadd.f32 %v3505_v16, %v3504_v33 }
 0x3ac   : > { %v3507_v63 = vsel %vm1423_vm1, %v3437_v40, %v3506_v11 }
 0x3ad   : > { %3508 = vst [vmem:[%s287_s14] sm:$0x3] %v3507_v63 }
 0x3ae PF: > { %s17_s21 = sadd.s32 1, %s3955_s21  }
 0x3af   : > { %p14_p5 = scmp.ge.s32.totalorder %s17_s21, 4  }
 0x3b1   :  { %16 = sbr.rel (!%p14_p5) target bundleno = 1 (0x1), region = 85 }

// kernel: dense_block_forward.7
= control target key start
LH: loop header
LB: loop body
LE: loop exit
PB: predicated region body
PF: predicated region fallthrough
CT: control target
= control target key end

     0   :  { %12 = vsyncpa [#allocation4], 0  ;;  %s6345_s0 = inlined_call_operand.vmem [shape: bf16[512,128], index: 0, kind: input, shape index: {}]   ;;  %s6346_s1 = inlined_call_operand.vmem [shape: f32[1,128], index: 1, kind: input, shape index: {}]   ;;  %s6347_s2 = inlined_call_operand.vmem [shape: f32[1,128], index: 2, kind: input, shape index: {}]   ;;  %s6348_s3 = inlined_call_operand.vmem [shape: bf16[128,256], index: 3, kind: input, shape index: {}]   ;;  %s6349_s4 = inlined_call_operand.vmem [shape: bf16[512,128], index: 4, kind: input, shape index: {}, may-alias: {4,5}]   ;;  %s6350_s5 = inlined_call_operand.vmem [shape: bf16[512,128], index: 5, kind: output, shape index: {0}, may-alias: {4,5}]   ;;  %s6351_s6 = inlined_call_operand.hbm [shape: f32[2,2,128], index: 6, kind: output, shape index: {1}]  }
   0x1   :  { %14 = vsyncpa [#allocation4 + $0x1], 0  ;;  %s4109_s21 = smov 0   ;;  %s4111_s22 = smov 0  }
   0x2   :  { %s4113_s23 = smov 0   ;;  %s4115_s24 = smov 0  }
   0x3 LB: > { %s3627_s25 = sadd.s32 4294967295, %s4061_s24   ;;  %s3628_s26 = sadd.s32 4294967294, %s4061_s24   ;;  %s4061_s24 = sphi %s4115_s24, %s6882_s24   ;;  %s4057_s23 = sphi %s4113_s23, %s6881_s23   ;;  %s4053_s22 = sphi %s4111_s22, %s6880_s22   ;;  %s4049_s21 = sphi %s4109_s21, %s6879_s21  }
   0x4   : > { %s4132_s27 = sadd.s32 1, %s4061_s24   ;;  %s168_s28 = sadd.s32 1, %s4057_s23 }
   0x5   : > { %s165_s29 = ssub.s32 %s4061_s24, %s4132_s27  ;;  %p178_p0 = scmp.ne.s32.totalorder %s4057_s23, %s4053_s22 }
   0x6   : > { %p166_p1 = scmp.eq.s32.totalorder %s165_s29, 0  ;;  %p179_p2 = scmp.eq.s32.totalorder %s3627_s25, 1 }
   0x7   : > { %p184_p3 = scmp.ne.s32.totalorder %s4053_s22, %s4049_s21  ;;  %p185_p4 = scmp.eq.s32.totalorder %s3628_s26, 1 }
   0x8   : > { %s4142_s30 = scalar_select %p166_p1, %s4057_s23, %s168_s28  }
   0x9   : > { %p4144_p5 = por %p179_p2, %p178_p0  ;;  %p4148_p6 = por %p185_p4, %p184_p3 }
   0xa   : > { %p3631_p7 = scmp.ge.s32.totalorder %s4061_s24, 1  ;;  %p230_p8 = scmp.lt.s32.totalorder %s4061_s24, 3 }
   0xc   : > { %p231_p9 = pnand %p3631_p7, %p230_p8 }
   0xe   : > { %234 = sbr.rel (%p231_p9) target bundleno = 967 (0x3c7), region = 40 }
  0x13   : > { %v3958_v0 = vld [vmem:[%s6348_s3 + $0x74] ss:$8 sps:$4 sm:$0xff]   ;;  %s4157_s11 = sshll.u32 %s3627_s25, 5  ;;  %v3960_v1 = vld [vmem:[%s6348_s3 + $0x70] ss:$8 sps:$4 sm:$0xff]   ;;  %v4063_v2 = vmov 0  }
  0x14   : > { %607 = vmatprep.mubr.bf16.mxu0 %v4063_v2  ;;  %687 = vmatprep.mubr.bf16.mxu1 %v4063_v2  ;;  %p271_p10 = scmp.lt.s32.totalorder %s4157_s11, 63  ;;  %v3961_v3 = vld [vmem:[%s6348_s3 + $0x64] ss:$8 sps:$4 sm:$0xff]   ;;  %v3963_v4 = vld [vmem:[%s6348_s3 + $0x60] ss:$8 sps:$4 sm:$0xff]   ;;  %s4065_s29 = smov 112  }
  0x15   : > { %575 = vmatprep.subr.bf16.mxu0 %v3958_v0  ;;  %3883 = vmatprep.subr.bf16.mxu1 %v3958_v0  ;;  %v3964_v5 = vld [vmem:[%s6348_s3 + $0x54] ss:$8 sps:$4 sm:$0xff]   ;;  %v3966_v6 = vld [vmem:[%s6348_s3 + $0x50] ss:$8 sps:$4 sm:$0xff]   ;;  %v3967_v7 = vld [vmem:[%s6348_s3 + $0x44] ss:$8 sps:$4 sm:$0xff]  }
  0x16   : > { %576 = vmatpush1.bf16.msra.mxu0 %v3960_v1  ;;  %3891 = vmatpush1.bf16.msra.mxu1 %v3960_v1  ;;  %s272_s18 = scalar_select %p271_p10, %s4157_s11, 63  ;;  %v3969_v9 = vld [vmem:[%s6348_s3 + $0x40] ss:$8 sps:$4 sm:$0xff]   ;;  %v3970_v11 = vld [vmem:[%s6348_s3 + $0x34] ss:$8 sps:$4 sm:$0xff]   ;;  %vm1815_vm0 = vcmask 1046528  }
  0x17   : > { %577 = vmatprep.subr.bf16.mxu0 %v3961_v3  ;;  %3884 = vmatprep.subr.bf16.mxu1 %v3961_v3  ;;  %v4200_v14 = vld [vmem:[%s6346_s1] ss:$0 sm:$0xff]  ;;  %v3972_v17 = vld [vmem:[%s6348_s3 + $0x30] ss:$8 sps:$4 sm:$0xff]   ;;  %v3973_v18 = vld [vmem:[%s6348_s3 + $0x24] ss:$8 sps:$4 sm:$0xff]  }
  0x18   : > { %s4175_s25 = sshll.u32 %s272_s18, 2  ;;  %v4213_v21 = vld [vmem:[%s6347_s2] ss:$0 sm:$0xff]  ;;  %v3976_v27 = vld [vmem:[%s6348_s3 + $0x14] ss:$8 sps:$4 sm:$0xff]   ;;  %s4066_s9 = smov 96  }
  0x19   : > { %s4184_s10 = scalar_lea.vmem %s6345_s0, %s4175_s25  ;;  %v3975_v25 = vld [vmem:[%s6348_s3 + $0x20] ss:$8 sps:$4 sm:$0xff]   ;;  %v3978_v36 = vld [vmem:[%s6348_s3 + $0x10] ss:$8 sps:$4 sm:$0xff]   ;;  %v3979_v37 = vld [vmem:[%s6348_s3 + $0x4] ss:$8 sps:$4 sm:$0xff]   ;;  %s5621_s18 = scalar_lea.vmem %s6349_s4, %s4175_s25 }
  0x1a   : > { %578 = vmatpush1.bf16.msra.mxu0 %v3963_v4  ;;  %3892 = vmatpush1.bf16.msra.mxu1 %v3963_v4  ;;  %v3726_v8 = vld [vmem:[%s4184_s10] sm:$0xff]   ;;  %v3853_v24 = vld [vmem:[%s4184_s10 + $0x8] sm:$0xff]   ;;  %v3854_v42 = vld [vmem:[%s4184_s10 + $0x10] sm:$0xff]   ;;  %vm1423_vm1 = vcmask 1040384   ;;  %s4068_s12 = smov 80   ;;  %s4069_s13 = smov 48  }
  0x1b   : > { %579 = vmatprep.subr.bf16.mxu0 %v3964_v5  ;;  %3885 = vmatprep.subr.bf16.mxu1 %v3964_v5  ;;  %v3860_v10 = vld [vmem:[%s4184_s10 + $0x40] sm:$0xff]   ;;  %v3727_v12 = vunpack.c.l.bf16 %v3726_v8  ;;  %v3728_v13 = vunpack.c.h.bf16 %v3726_v8  ;;  %v3861_v26 = vld [vmem:[%s4184_s10 + $0x48] sm:$0xff]   ;;  %v3731_v30 = vunpack.c.l.bf16 %v3853_v24  ;;  %v3732_v31 = vunpack.c.h.bf16 %v3853_v24  ;;  %v3862_v47 = vld [vmem:[%s4184_s10 + $0x50] sm:$0xff]   ;;  %s4070_s14 = smov 32   ;;  %s4071_s15 = smov 16  }
  0x1c   : > { %v3759_v15 = vunpack.c.l.bf16 %v3860_v10  ;;  %v3760_v16 = vunpack.c.h.bf16 %v3860_v10  ;;  %v3763_v34 = vunpack.c.l.bf16 %v3861_v26  ;;  %v3764_v35 = vunpack.c.h.bf16 %v3861_v26  ;;  %v3981_v48 = vld [vmem:[%s6348_s3] ss:$8 sps:$4 sm:$0xff]   ;;  %v3855_v61 = vld [vmem:[%s4184_s10 + $0x18] sm:$0xff]   ;;  %s5700_s26 = scalar_lea.vmem %s6350_s5, %s4175_s25  ;;  %s4072_s25 = smov 24  }
  0x1d   : > { %v360_v19 = vmul.f32 %v3727_v12, %v4200_v14  ;;  %v361_v20 = vmul.f32 %v3728_v13, %v4200_v14  ;;  %v362_v40 = vmul.f32 %v3731_v30, %v4200_v14  ;;  %v363_v41 = vmul.f32 %v3732_v31, %v4200_v14  ;;  %v3863_v5 = vld [vmem:[%s4184_s10 + $0x58] sm:$0xff]   ;;  %v3856_v24 = vld [vmem:[%s4184_s10 + $0x20] sm:$0xff]   ;;  %s267_s28 = sand.u32 1, %s4053_s22   ;;  %s4073_s17 = smov [#allocation3]  }
  0x1e   : > { %580 = vmatpush1.bf16.msra.mxu0 %v3966_v6  ;;  %3893 = vmatpush1.bf16.msra.mxu1 %v3966_v6  ;;  %v376_v22 = vmul.f32 %v3759_v15, %v4200_v14  ;;  %v377_v23 = vmul.f32 %v3760_v16, %v4200_v14  ;;  %v378_v45 = vmul.f32 %v3763_v34, %v4200_v14  ;;  %v3735_v49 = vunpack.c.l.bf16 %v3854_v42 }
  0x1f   : > { %581 = vmatprep.subr.bf16.mxu0 %v3967_v7  ;;  %3886 = vmatprep.subr.bf16.mxu1 %v3967_v7  ;;  %v399_v28 = vadd.f32 %v4213_v21, %v360_v19  ;;  %v400_v29 = vadd.f32 %v4213_v21, %v361_v20  ;;  %v379_v46 = vmul.f32 %v3764_v35, %v4200_v14  ;;  %v3736_v50 = vunpack.c.h.bf16 %v3854_v42  ;;  %v3857_v42 = vld [vmem:[%s4184_s10 + $0x28] sm:$0xff]  }
  0x20   : > { %v415_v32 = vadd.f32 %v4213_v21, %v376_v22  ;;  %v416_v33 = vadd.f32 %v4213_v21, %v377_v23  ;;  %v401_v51 = vadd.f32 %v4213_v21, %v362_v40  ;;  %v402_v52 = vadd.f32 %v4213_v21, %v363_v41 }
  0x21   : > { %v431_v38 = vmax.f32 %v399_v28, 0.0  ;;  %v432_v39 = vmax.f32 %v400_v29, 0.0  ;;  %v3767_v53 = vunpack.c.l.bf16 %v3862_v47  ;;  %v3768_v54 = vunpack.c.h.bf16 %v3862_v47  ;;  %v3865_v47 = vld [vmem:[%s4184_s10 + $0x68] sm:$0xff]  }
  0x22   : > { %582 = vmatpush1.bf16.msra.mxu0 %v3969_v9  ;;  %3894 = vmatpush1.bf16.msra.mxu1 %v3969_v9  ;;  %v447_v43 = vmax.f32 %v415_v32, 0.0  ;;  %v448_v44 = vmax.f32 %v416_v33, 0.0  ;;  %v417_v57 = vadd.f32 %v4213_v21, %v378_v45  ;;  %v418_v58 = vadd.f32 %v4213_v21, %v379_v46 }
  0x23   : > { %583 = vmatprep.subr.bf16.mxu0 %v3970_v11  ;;  %3887 = vmatprep.subr.bf16.mxu1 %v3970_v11  ;;  %v463_v55 = vpack.c.bf16 %v432_v39, %v431_v38  ;;  %v364_v59 = vmul.f32 %v3735_v49, %v4200_v14  ;;  %v365_v60 = vmul.f32 %v3736_v50, %v4200_v14  ;;  %v433_v0 = vmax.f32 %v401_v51, 0.0 }
  0x24   : > { %v471_v56 = vpack.c.bf16 %v448_v44, %v447_v43  ;;  %v380_v62 = vmul.f32 %v3767_v53, %v4200_v14  ;;  %v381_v63 = vmul.f32 %v3768_v54, %v4200_v14  ;;  %v434_v1 = vmax.f32 %v402_v52, 0.0 }
  0x25   : > { %v449_v3 = vmax.f32 %v417_v57, 0.0  ;;  %v450_v4 = vmax.f32 %v418_v58, 0.0  ;;  %v403_v6 = vadd.f32 %v4213_v21, %v364_v59  ;;  %v3739_v7 = vunpack.c.l.bf16 %v3855_v61 }
  0x26   : > { %584 = vmatpush1.bf16.msra.mxu0 %v3972_v17  ;;  %3895 = vmatpush1.bf16.msra.mxu1 %v3972_v17  ;;  %v404_v8 = vadd.f32 %v4213_v21, %v365_v60  ;;  %v3740_v9 = vunpack.c.h.bf16 %v3855_v61  ;;  %v419_v10 = vadd.f32 %v4213_v21, %v380_v62  ;;  %v420_v11 = vadd.f32 %v4213_v21, %v381_v63  ;;  %v3858_v62 = vld [vmem:[%s4184_s10 + $0x30] sm:$0xff]  }
  0x27   : > { %585 = vmatprep.subr.bf16.mxu0 %v3973_v18  ;;  %3888 = vmatprep.subr.bf16.mxu1 %v3973_v18  ;;  %v464_v12 = vpack.c.bf16 %v434_v1, %v433_v0  ;;  %v472_v13 = vpack.c.bf16 %v450_v4, %v449_v3  ;;  %v3771_v15 = vunpack.c.l.bf16 %v3863_v5  ;;  %v3772_v16 = vunpack.c.h.bf16 %v3863_v5  ;;  %v3866_v4 = vld [vmem:[%s4184_s10 + $0x70] sm:$0xff]  }
  0x28   : > { %v435_v17 = vmax.f32 %v403_v6, 0.0  ;;  %v366_v18 = vmul.f32 %v3739_v7, %v4200_v14  ;;  %v436_v19 = vmax.f32 %v404_v8, 0.0  ;;  %v367_v20 = vmul.f32 %v3740_v9, %v4200_v14 }
  0x29   : > { %v451_v22 = vmax.f32 %v419_v10, 0.0  ;;  %v452_v23 = vmax.f32 %v420_v11, 0.0  ;;  %v383_v26 = vmul.f32 %v3772_v16, %v4200_v14  ;;  %v3743_v29 = vunpack.c.l.bf16 %v3856_v24 }
  0x2a   : > { %586 = vmatpush1.bf16.msra.mxu0 %v3975_v25  ;;  %3896 = vmatpush1.bf16.msra.mxu1 %v3975_v25  ;;  %v382_v25 = vmul.f32 %v3771_v15, %v4200_v14  ;;  %v405_v28 = vadd.f32 %v4213_v21, %v366_v18  ;;  %v465_v30 = vpack.c.bf16 %v436_v19, %v435_v17  ;;  %v3744_v33 = vunpack.c.h.bf16 %v3856_v24 }
  0x2b   : > { %587 = vmatprep.subr.bf16.mxu0 %v3976_v27  ;;  %3889 = vmatprep.subr.bf16.mxu1 %v3976_v27  ;;  %v3864_v27 = vld [vmem:[%s4184_s10 + $0x60] sm:$0xff]   ;;  %v406_v31 = vadd.f32 %v4213_v21, %v367_v20  ;;  %v473_v32 = vpack.c.bf16 %v452_v23, %v451_v22  ;;  %v422_v35 = vadd.f32 %v4213_v21, %v383_v26  ;;  %v3747_v49 = vunpack.c.l.bf16 %v3857_v42  ;;  %v3859_v20 = vld [vmem:[%s4184_s10 + $0x38] sm:$0xff]  }
  0x2c   : > { %v421_v34 = vadd.f32 %v4213_v21, %v382_v25  ;;  %v368_v38 = vmul.f32 %v3743_v29, %v4200_v14  ;;  %v437_v39 = vmax.f32 %v405_v28, 0.0  ;;  %v369_v41 = vmul.f32 %v3744_v33, %v4200_v14 }
  0x2d   : > { %v438_v40 = vmax.f32 %v406_v31, 0.0  ;;  %v454_v44 = vmax.f32 %v422_v35, 0.0  ;;  %v3748_v52 = vunpack.c.h.bf16 %v3857_v42  ;;  %v3779_v53 = vunpack.c.l.bf16 %v3865_v47 }
  0x2e   : > { %588 = vmatpush1.bf16.msra.mxu0 %v3978_v36  ;;  %3897 = vmatpush1.bf16.msra.mxu1 %v3978_v36  ;;  %v3775_v36 = vunpack.c.l.bf16 %v3864_v27  ;;  %v453_v43 = vmax.f32 %v421_v34, 0.0  ;;  %v408_v51 = vadd.f32 %v4213_v21, %v369_v41  ;;  %v3780_v57 = vunpack.c.h.bf16 %v3865_v47 }
  0x2f   : > { %589 = vmatprep.subr.bf16.mxu0 %v3979_v37  ;;  %3890 = vmatprep.subr.bf16.mxu1 %v3979_v37  ;;  %v3776_v37 = vunpack.c.h.bf16 %v3864_v27  ;;  %v466_v50 = vpack.c.bf16 %v438_v40, %v437_v39  ;;  %v370_v58 = vmul.f32 %v3747_v49, %v4200_v14  ;;  %v371_v61 = vmul.f32 %v3748_v52, %v4200_v14 }
  0x30   : > { %v384_v45 = vmul.f32 %v3775_v36, %v4200_v14  ;;  %v474_v54 = vpack.c.bf16 %v454_v44, %v453_v43  ;;  %v440_v60 = vmax.f32 %v408_v51, 0.0  ;;  %v386_v1 = vmul.f32 %v3779_v53, %v4200_v14 }
  0x31   : > { %v385_v46 = vmul.f32 %v3776_v37, %v4200_v14  ;;  %v387_v3 = vmul.f32 %v3780_v57, %v4200_v14  ;;  %v409_v5 = vadd.f32 %v4213_v21, %v370_v58  ;;  %v3751_v6 = vunpack.c.l.bf16 %v3858_v62 }
  0x32   : > { %590 = vmatpush1.bf16.msra.mxu0 %v3981_v48  ;;  %3898 = vmatpush1.bf16.msra.mxu1 %v3981_v48  ;;  %v407_v48 = vadd.f32 %v4213_v21, %v368_v38  ;;  %v410_v8 = vadd.f32 %v4213_v21, %v371_v61  ;;  %v3752_v9 = vunpack.c.h.bf16 %v3858_v62  ;;  %v3783_v10 = vunpack.c.l.bf16 %v3866_v4 }
  0x33   : > { %v3784_v15 = vunpack.c.h.bf16 %v3866_v4  ;;  %v441_v16 = vmax.f32 %v409_v5, 0.0  ;;  %v372_v18 = vmul.f32 %v3751_v6, %v4200_v14  ;;  %v3755_v28 = vunpack.c.l.bf16 %v3859_v20 }
  0x34   : > { %v439_v59 = vmax.f32 %v407_v48, 0.0  ;;  %v442_v17 = vmax.f32 %v410_v8, 0.0  ;;  %v373_v19 = vmul.f32 %v3752_v9, %v4200_v14  ;;  %v388_v24 = vmul.f32 %v3783_v10, %v4200_v14 }
  0x35   : > { %608 = vmatmul.mubr.bf16.vlgmr.msra.gmra.mxu0 %v463_v55  ;;  %688 = vmatmul.mubr.bf16.vlgmr.msra.gmra.mxu1 %v471_v56  ;;  %v423_v55 = vadd.f32 %v4213_v21, %v384_v45  ;;  %v424_v56 = vadd.f32 %v4213_v21, %v385_v46  ;;  %v389_v25 = vmul.f32 %v3784_v15, %v4200_v14  ;;  %v3756_v29 = vunpack.c.h.bf16 %v3859_v20 }
  0x36   : > { %617 = vmatprep.mubr.bf16.mxu0 %v4063_v2  ;;  %697 = vmatprep.mubr.bf16.mxu1 %v4063_v2  ;;  %v467_v7 = vpack.c.bf16 %v440_v60, %v439_v59  ;;  %v411_v26 = vadd.f32 %v4213_v21, %v372_v18  ;;  %v412_v27 = vadd.f32 %v4213_v21, %v373_v19  ;;  %v4064_v46 = vmov 0.0  }
  0x37   : > { %v455_v63 = vmax.f32 %v423_v55, 0.0  ;;  %v456_v0 = vmax.f32 %v424_v56, 0.0  ;;  %v428_v33 = vadd.f32 %v4213_v21, %v389_v25  ;;  %v374_v34 = vmul.f32 %v3755_v28, %v4200_v14  ;;  %770 = vst [vmem:[#allocation2 + $0x240] sm:$0xff] %v4064_v46  ;;  %772 = vst [vmem:[#allocation2 + $0xb8] sm:$0xff] %v4064_v46  ;;  %3949 = vrot.lane.b32.xlu0 %v4064_v46, %s4065_s29 }
  0x38   : > { %v375_v35 = vmul.f32 %v3756_v29, %v4200_v14  ;;  %v443_v36 = vmax.f32 %v411_v26, 0.0  ;;  %v444_v37 = vmax.f32 %v412_v27, 0.0  ;;  %768 = vst [vmem:[#allocation2 + $0x98] sm:$0xff] %v4064_v46  ;;  %774 = vst [vmem:[#allocation2 + $0x40] sm:$0xff] %v4064_v46 }
  0x39   : > { %v475_v11 = vpack.c.bf16 %v456_v0, %v455_v63  ;;  %v460_v39 = vmax.f32 %v428_v33, 0.0  ;;  %v413_v41 = vadd.f32 %v4213_v21, %v374_v34  ;;  %776 = vst [vmem:[#allocation2 + $0xa8] sm:$0xff] %v4064_v46  ;;  %779 = vst [vmem:[#allocation2 + $0xd8] sm:$0xff] %v4064_v46 }
  0x3a   : > { %v469_v40 = vpack.c.bf16 %v444_v37, %v443_v36  ;;  %v414_v42 = vadd.f32 %v4213_v21, %v375_v35 }
  0x3b   : > { %v445_v44 = vmax.f32 %v413_v41, 0.0 }
  0x3c   : > { %v446_v45 = vmax.f32 %v414_v42, 0.0 }
  0x3d   : > { %618 = vmatmul.mubr.bf16.gmra.mxu0 %v464_v12  ;;  %698 = vmatmul.mubr.bf16.gmra.mxu1 %v472_v13  ;;  %v425_v12 = vadd.f32 %v4213_v21, %v386_v1  ;;  %v426_v13 = vadd.f32 %v4213_v21, %v387_v3 }
  0x3e   : > { %627 = vmatprep.mubr.bf16.mxu0 %v4063_v2  ;;  %707 = vmatprep.mubr.bf16.mxu1 %v4063_v2  ;;  %v470_v47 = vpack.c.bf16 %v446_v45, %v445_v44  ;;  %v1715_v48 = vld [vmem:[#allocation2 + $0x240] sm:$0xfe]  ;;  %v2041_v4 = vld [vmem:[#allocation2 + $0xb8] sm:$0x80] }
  0x3f   : > { %v457_v22 = vmax.f32 %v425_v12, 0.0  ;;  %v458_v23 = vmax.f32 %v426_v13, 0.0  ;;  %v1816_v49 = vrot.slane %v1715_v48, 1  ;;  %v2047_v10 = vrot.slane %v2041_v4, 7 }
  0x41   : > { %v476_v31 = vpack.c.bf16 %v458_v23, %v457_v22 }
  0x45   : > { %628 = vmatmul.mubr.bf16.gmra.mxu0 %v465_v30  ;;  %708 = vmatmul.mubr.bf16.gmra.mxu1 %v473_v32  ;;  %v468_v30 = vpack.c.bf16 %v442_v17, %v441_v16  ;;  %v427_v32 = vadd.f32 %v4213_v21, %v388_v24 }
  0x46   : > { %637 = vmatprep.mubr.bf16.mxu0 %v4063_v2  ;;  %717 = vmatprep.mubr.bf16.mxu1 %v4063_v2 }
  0x47   : > { %v459_v38 = vmax.f32 %v427_v32, 0.0 }
  0x49   : > { %v477_v43 = vpack.c.bf16 %v460_v39, %v459_v38 }
  0x4d   : > { %638 = vmatmul.mubr.bf16.gmra.mxu0 %v466_v50  ;;  %718 = vmatmul.mubr.bf16.gmra.mxu1 %v474_v54  ;;  %v1817_v50 = vrot.slane %v4064_v46, 1 }
  0x4e   : > { %647 = vmatprep.mubr.bf16.mxu0 %v4063_v2  ;;  %727 = vmatprep.mubr.bf16.mxu1 %v4063_v2 }
  0x4f   : > { %v1818_v51 = vsel %vm1815_vm0, %v1816_v49, %v1817_v50 }
  0x50   : > { %1881 = vrot.lane.b32.xlu1 %v1818_v51, %s4066_s9 }
  0x55   : > { %648 = vmatmul.mubr.bf16.gmra.mxu0 %v467_v7  ;;  %728 = vmatmul.mubr.bf16.gmra.mxu1 %v475_v11 }
  0x56   : > { %657 = vmatprep.mubr.bf16.mxu0 %v4063_v2  ;;  %737 = vmatprep.mubr.bf16.mxu1 %v4063_v2 }
  0x5d   : > { %658 = vmatmul.mubr.bf16.gmra.mxu0 %v468_v30  ;;  %738 = vmatmul.mubr.bf16.gmra.mxu1 %v476_v31 }
  0x5e   : > { %667 = vmatprep.mubr.bf16.mxu0 %v4063_v2  ;;  %747 = vmatprep.mubr.bf16.mxu1 %v4063_v2 }
  0x65   : > { %668 = vmatmul.mubr.bf16.gmra.mxu0 %v469_v40  ;;  %748 = vmatmul.mubr.bf16.gmra.mxu1 %v477_v43 }
  0x66   : > { %677 = vmatprep.mubr.bf16.mxu0 %v4063_v2  ;;  %757 = vmatprep.mubr.bf16.mxu1 %v4063_v2  ;;  %v3867_v2 = vld [vmem:[%s4184_s10 + $0x78] sm:$0xff]   ;;  %s4067_s10 = smov 64  }
  0x67   : > { %v3787_v52 = vunpack.c.l.bf16 %v3867_v2  ;;  %v3788_v53 = vunpack.c.h.bf16 %v3867_v2 }
  0x69   : > { %v390_v54 = vmul.f32 %v3787_v52, %v4200_v14  ;;  %v391_v55 = vmul.f32 %v3788_v53, %v4200_v14 }
  0x6b   : > { %v429_v56 = vadd.f32 %v4213_v21, %v390_v54  ;;  %v430_v57 = vadd.f32 %v4213_v21, %v391_v55 }
  0x6d   : > { %678 = vmatmul.mubr.bf16.gmra.mxu0 %v470_v47  ;;  %v461_v58 = vmax.f32 %v429_v56, 0.0  ;;  %v462_v59 = vmax.f32 %v430_v57, 0.0 }
  0x6f   : > { %v478_v60 = vpack.c.bf16 %v462_v59, %v461_v58 }
  0x71   : > { %758 = vmatmul.mubr.bf16.gmra.mxu1 %v478_v60 }
  0xf5   : > { %v609_v61 = vpop.f32.mrf.mxu0  ;;  %v4323_v62 = vpop.f32.mrf.mxu1 }
  0xf6   : > { %780 = vst [vmem:[#allocation2 + $0x158] sm:$0xff] %v609_v61  ;;  %812 = vst [vmem:[#allocation2 + $0xe8] sm:$0xff] %v4323_v62  ;;  %1623 = vrot.lane.b32.xlu1 %v4323_v62, %s4065_s29  ;;  %1591 = vrot.lane.b32.xlu0 %v609_v61, %s4065_s29  ;;  %v1819_v14 = vrot.slane %v609_v61, 1  ;;  %v4342_v9 = vrot.slane %v609_v61, 7  ;;  %v6353_v34 = vrot.slane %v4323_v62, 1  ;;  %v6352_v35 = vrot.slane %v4323_v62, 7 }
  0xf7   : > { %v611_v63 = vpop.f32.mrf.mxu0  ;;  %v691_v0 = vpop.f32.mrf.mxu1 }
  0xf8   : > { %813 = vst [vmem:[#allocation2 + $0x238] sm:$0xff] %v691_v0  ;;  %v1820_v21 = vsel %vm1815_vm0, %v1817_v50, %v1819_v14  ;;  %6405 = vst [vmem:[#allocation6_spill] sm:$0xff] %v4342_v9  ;;  %v2048_v15 = vsel %vm1423_vm1, %v2047_v10, %v4342_v9 }
  0xf9   : > { %v4330_v1 = vpop.f32.mrf.mxu0  ;;  %v4332_v3 = vpop.f32.mrf.mxu1 }
  0xfa   : > { %782 = vst [vmem:[#allocation2 + $0x200] sm:$0xff] %v4330_v1  ;;  %814 = vst [vmem:[#allocation2 + $0x198] sm:$0xff] %v4332_v3  ;;  %2217 = vrot.lane.b32.xlu1 %v609_v61, %s4067_s10  ;;  %1883 = vrot.lane.b32.xlu0 %v1820_v21, %s4066_s9  ;;  %v1821_v22 = vrot.slane %v4330_v1, 1  ;;  %v1431_v23 = vrot.slane %v4330_v1, 7  ;;  %v1853_v29 = vrot.slane %v4332_v3, 1  ;;  %v1463_v30 = vrot.slane %v4332_v3, 7 }
  0xfb   : > { %v615_v5 = vpop.f32.mrf.mxu0  ;;  %v695_v6 = vpop.f32.mrf.mxu1 }
  0xfc   : > { %815 = vst [vmem:[#allocation2 + $0x80] sm:$0xff] %v695_v6  ;;  %v1822_v27 = vsel %vm1815_vm0, %v1819_v14, %v1821_v22  ;;  %v4377_v28 = vsel %vm1423_vm1, %v4342_v9, %v1431_v23  ;;  %v1854_v38 = vsel %vm1815_vm0, %v6353_v34, %v1853_v29  ;;  %v4399_v39 = vsel %vm1423_vm1, %v6352_v35, %v1463_v30 }
  0xfd   : > { %v4338_v7 = vpop.f32.mrf.mxu0  ;;  %v4340_v8 = vpop.f32.mrf.mxu1  ;;  %6406 = vst [vmem:[#allocation7_spill] sm:$0xff] %v4377_v28  ;;  %v2345_v32 = vld [vmem:[#allocation2 + $0x158] sm:$0xfe]  ;;  %6407 = vst [vmem:[#allocation8_spill] sm:$0xff] %v4399_v39 }
  0xfe   : > { %816 = vst [vmem:[#allocation2 + $0x1e8] sm:$0xff] %v4340_v8  ;;  %2249 = vrot.lane.b32.xlu1 %v4323_v62, %s4067_s10  ;;  %1625 = vrot.lane.b32.xlu0 %v4332_v3, %s4065_s29  ;;  %v2349_v40 = vrot.slane %v2345_v32, 1  ;;  %v1823_v41 = vrot.slane %v4338_v7, 1  ;;  %v1855_v48 = vrot.slane %v4340_v8, 1  ;;  %v1433_v10 = vrot.slane %v4338_v7, 7 }
  0xff   : > { %v621_v11 = vpop.f32.mrf.mxu0  ;;  %v701_v12 = vpop.f32.mrf.mxu1 }
 0x100   : > { %785 = vst [vmem:[#allocation2 + $0x30] sm:$0xff] %v621_v11  ;;  %817 = vst [vmem:[#allocation2] sm:$0xff] %v701_v12  ;;  %v2350_v46 = vsel %vm1815_vm0, %v2349_v40, %v1821_v22  ;;  %v1824_v47 = vsel %vm1815_vm0, %v1821_v22, %v1823_v41  ;;  %v1856_v52 = vsel %vm1815_vm0, %v1853_v29, %v1855_v48  ;;  %v1465_v22 = vrot.slane %v4340_v8, 7 }
 0x101   : > { %v4349_v13 = vpop.f32.mrf.mxu0  ;;  %v4353_v16 = vpop.f32.mrf.mxu1 }
 0x102   : > { %2055 = vrot.lane.b32.xlu1 %v2048_v15, %s4068_s12  ;;  %2219 = vrot.lane.b32.xlu0 %v4330_v1, %s4067_s10  ;;  %818 = vst [vmem:[#allocation2 + $0xa0] sm:$0xff] %v4353_v16  ;;  %v1435_v29 = vrot.slane %v4349_v13, 7 }
 0x103   : > { %v625_v17 = vpop.f32.mrf.mxu0  ;;  %v705_v18 = vpop.f32.mrf.mxu1 }
 0x104   : > { %787 = vst [vmem:[#allocation2 + $0x1f0] sm:$0xff] %v625_v17  ;;  %819 = vst [vmem:[#allocation2 + $0x88] sm:$0xff] %v705_v18  ;;  %v4467_v18 = vsel %vm1423_vm1, %v1431_v23, %v1433_v10 }
 0x105   : > { %v4359_v19 = vpop.f32.mrf.mxu0  ;;  %v4361_v20 = vpop.f32.mrf.mxu1  ;;  %6408 = vst [vmem:[#allocation9_spill] sm:$0xff] %v4467_v18 }
 0x106   : > { %2251 = vrot.lane.b32.xlu0 %v4332_v3, %s4067_s10  ;;  %1593 = vrot.lane.b32.xlu1 %v4330_v1, %s4065_s29  ;;  %820 = vst [vmem:[#allocation2 + $0x1d8] sm:$0xff] %v4361_v20  ;;  %v4479_v1 = vsel %vm1423_vm1, %v1463_v30, %v1465_v22  ;;  %v4490_v3 = vsel %vm1423_vm1, %v1433_v10, %v1435_v29  ;;  %v1825_v30 = vrot.slane %v4349_v13, 1 }
 0x107   : > { %v631_v24 = vpop.f32.mrf.mxu0  ;;  %v711_v25 = vpop.f32.mrf.mxu1  ;;  %6409 = vst [vmem:[#allocation10_spill] sm:$0xff] %v4479_v1 }
 0x108   : > { %789 = vst [vmem:[#allocation2 + $0x60] sm:$0xff] %v631_v24  ;;  %821 = vst [vmem:[#allocation2 + $0x1c0] sm:$0xff] %v711_v25  ;;  %v2517_v24 = vld [vmem:[#allocation2 + $0x200] sm:$0x80] }
 0x109   : > { %v4370_v26 = vpop.f32.mrf.mxu0  ;;  %v4381_v31 = vpop.f32.mrf.mxu1  ;;  %v2523_v23 = vrot.slane %v2517_v24, 7 }
 0x10a   : > { %1885 = vrot.lane.b32.xlu1 %v1822_v27, %s4066_s9  ;;  %2057 = vrot.lane.b32.xlu0 %v4377_v28, %s4068_s12  ;;  %822 = vst [vmem:[#allocation2 + $0x1e0] sm:$0xff] %v4381_v31 }
 0x10b   : > { %v635_v33 = vpop.f32.mrf.mxu0  ;;  %v715_v36 = vpop.f32.mrf.mxu1 }
 0x10c   : > { %791 = vst [vmem:[#allocation2 + $0x150] sm:$0xff] %v635_v33  ;;  %823 = vst [vmem:[#allocation2 + $0x1d0] sm:$0xff] %v715_v36  ;;  %v2524_v36 = vsel %vm1423_vm1, %v2523_v23, %v1433_v10  ;;  %v1471_v10 = vrot.slane %v4381_v31, 7 }
 0x10d   : > { %v4389_v37 = vpop.f32.mrf.mxu0  ;;  %v4402_v42 = vpop.f32.mrf.mxu1 }
 0x10e   : > { %1917 = vrot.lane.b32.xlu1 %v1854_v38, %s4066_s9  ;;  %2089 = vrot.lane.b32.xlu0 %v4399_v39, %s4068_s12  ;;  %v1863_v23 = vrot.slane %v4402_v42, 1 }
 0x10f   : > { %v641_v43 = vpop.f32.mrf.mxu0  ;;  %v721_v44 = vpop.f32.mrf.mxu1 }
 0x110   : > { %793 = vst [vmem:[#allocation2 + $0x190] sm:$0xff] %v641_v43  ;;  %825 = vst [vmem:[#allocation2 + $0x138] sm:$0xff] %v721_v44  ;;  %v1826_v43 = vsel %vm1815_vm0, %v1823_v41, %v1825_v30  ;;  %v1859_v41 = vrot.slane %v4361_v20, 1 }
 0x111   : > { %v4407_v45 = vpop.f32.mrf.mxu0  ;;  %v4414_v49 = vpop.f32.mrf.mxu1 }
 0x112   : > { %2357 = vrot.lane.b32.xlu1 %v2350_v46, %s4069_s13  ;;  %1887 = vrot.lane.b32.xlu0 %v1824_v47, %s4066_s9  ;;  %v1857_v46 = vrot.slane %v4353_v16, 1  ;;  %v1475_v35 = vrot.slane %v4414_v49, 7 }
 0x113   : > { %v645_v50 = vpop.f32.mrf.mxu0  ;;  %v725_v51 = vpop.f32.mrf.mxu1 }
 0x114   : > { %795 = vst [vmem:[#allocation2 + $0x178] sm:$0xff] %v645_v50  ;;  %827 = vst [vmem:[#allocation2 + $0x100] sm:$0xff] %v725_v51  ;;  %v1858_v50 = vsel %vm1815_vm0, %v1855_v48, %v1857_v46 }
 0x115   : > { %v4418_v2 = vpop.f32.mrf.mxu0  ;;  %v4423_v53 = vpop.f32.mrf.mxu1 }
 0x116   : > { %2389 = vrot.lane.b32.xlu1 %v1854_v38, %s4069_s13  ;;  %1919 = vrot.lane.b32.xlu0 %v1856_v52, %s4066_s9  ;;  %v1467_v38 = vrot.slane %v4353_v16, 7 }
 0x117   : > { %v651_v54 = vpop.f32.mrf.mxu0  ;;  %v731_v55 = vpop.f32.mrf.mxu1 }
 0x118   : > { %797 = vst [vmem:[#allocation2 + $0x50] sm:$0xff] %v651_v54  ;;  %829 = vst [vmem:[#allocation2 + $0x250] sm:$0xff] %v731_v55  ;;  %v4501_v44 = vsel %vm1423_vm1, %v1465_v22, %v1467_v38  ;;  %v1437_v55 = vrot.slane %v4359_v19, 7  ;;  %v1831_v22 = vrot.slane %v4389_v37, 1 }
 0x119   : > { %v4427_v56 = vpop.f32.mrf.mxu0  ;;  %v4429_v57 = vpop.f32.mrf.mxu1  ;;  %6410 = vst [vmem:[#allocation11_spill] sm:$0xff] %v4501_v44 }
 0x11a   : > { %1595 = vrot.lane.b32.xlu1 %v4338_v7, %s4065_s29  ;;  %2359 = vrot.lane.b32.xlu0 %v1824_v47, %s4069_s13  ;;  %830 = vst [vmem:[#allocation2 + $0x1a8] sm:$0xff] %v4429_v57  ;;  %v1827_v47 = vrot.slane %v4359_v19, 1 }
 0x11b   : > { %v655_v58 = vpop.f32.mrf.mxu0  ;;  %v735_v59 = vpop.f32.mrf.mxu1 }
 0x11c   : > { %799 = vst [vmem:[#allocation2 + $0x170] sm:$0xff] %v655_v58  ;;  %831 = vst [vmem:[#allocation2 + $0x110] sm:$0xff] %v735_v59  ;;  %v1828_v51 = vsel %vm1815_vm0, %v1825_v30, %v1827_v47  ;;  %v4543_v58 = vsel %vm1423_vm1, %v1435_v29, %v1437_v55  ;;  %v1469_v59 = vrot.slane %v4361_v20, 7  ;;  %v4577_v29 = vpop.permute.xlu1 %1881 }
 0x11d   : > { %v4435_v60 = vpop.f32.mrf.mxu0  ;;  %v4437_v61 = vpop.f32.mrf.mxu1 }
 0x11e   : > { %1627 = vrot.lane.b32.xlu1 %v4340_v8, %s4065_s29  ;;  %2391 = vrot.lane.b32.xlu0 %v1856_v52, %s4069_s13  ;;  %832 = vst [vmem:[#allocation2 + $0x48] sm:$0xff] %v4437_v61 }
 0x11f   : > { %v661_v14 = vpop.f32.mrf.mxu0  ;;  %v741_v63 = vpop.f32.mrf.mxu1 }
 0x120   : > { %801 = vst [vmem:[#allocation2 + $0xb0] sm:$0xff] %v661_v14  ;;  %833 = vst [vmem:[#allocation2 + $0x90] sm:$0xff] %v741_v63  ;;  %v1439_v14 = vrot.slane %v4370_v26, 7  ;;  %v4552_v63 = vsel %vm1423_vm1, %v1467_v38, %v1469_v59 }
 0x121   : > { %v4443_v0 = vpop.f32.mrf.mxu0  ;;  %v4445_v21 = vpop.f32.mrf.mxu1  ;;  %6411 = vst [vmem:[#allocation12_spill] sm:$0xff] %v4552_v63 }
 0x122   : > { %2221 = vrot.lane.b32.xlu1 %v4338_v7, %s4067_s10  ;;  %1597 = vrot.lane.b32.xlu0 %v4349_v13, %s4065_s29  ;;  %834 = vst [vmem:[#allocation2 + $0x160] sm:$0xff] %v4445_v21 }
 0x123   : > { %v665_v4 = vpop.f32.mrf.mxu0  ;;  %v745_v5 = vpop.f32.mrf.mxu1 }
 0x124   : > { %803 = vst [vmem:[#allocation2 + $0x168] sm:$0xff] %v665_v4  ;;  %835 = vst [vmem:[#allocation2 + $0x18] sm:$0xff] %v745_v5  ;;  %v4555_v4 = vsel %vm1423_vm1, %v1437_v55, %v1439_v14  ;;  %v1829_v5 = vrot.slane %v4370_v26, 1 }
 0x125   : > { %v4452_v6 = vpop.f32.mrf.mxu0  ;;  %v4455_v11 = vpop.f32.mrf.mxu1 }
 0x126   : > { %2253 = vrot.lane.b32.xlu1 %v4340_v8, %s4067_s10  ;;  %1629 = vrot.lane.b32.xlu0 %v4353_v16, %s4065_s29  ;;  %836 = vst [vmem:[#allocation2 + $0x1b8] sm:$0xff] %v4455_v11 }
 0x127   : > { %v671_v12 = vpop.f32.mrf.mxu0  ;;  %v751_v15 = vpop.f32.mrf.mxu1 }
 0x128   : > { %805 = vst [vmem:[#allocation2 + $0x1b0] sm:$0xff] %v671_v12  ;;  %837 = vst [vmem:[#allocation2 + $0x120] sm:$0xff] %v751_v15  ;;  %v4565_v12 = vsel %vm1423_vm1, %v1469_v59, %v1471_v10  ;;  %v1861_v15 = vrot.slane %v4381_v31, 1 }
 0x129   : > { %v4462_v17 = vpop.f32.mrf.mxu0  ;;  %v4520_v8 = vpop.f32.mrf.mxu1  ;;  %6412 = vst [vmem:[#allocation13_spill] sm:$0xff] %v4565_v12 }
 0x12a   : > { %2059 = vrot.lane.b32.xlu1 %v4467_v18, %s4068_s12  ;;  %2223 = vrot.lane.b32.xlu0 %v4349_v13, %s4067_s10  ;;  %838 = vst [vmem:[#allocation2 + $0x38] sm:$0xff] %v4520_v8  ;;  %v1862_v24 = vsel %vm1815_vm0, %v1859_v41, %v1861_v15  ;;  %v4955_v18 = vrot.slane %v4520_v8, 1 }
 0x12b   : > { %v675_v25 = vpop.f32.mrf.mxu0  ;;  %v755_v48 = vpop.f32.mrf.mxu1 }
 0x12c   : > { %807 = vst [vmem:[#allocation2 + $0xd0] sm:$0xff] %v675_v25  ;;  %839 = vst [vmem:[#allocation2 + $0x148] sm:$0xff] %v755_v48  ;;  %v1832_v25 = vsel %vm1815_vm0, %v1829_v5, %v1831_v22 }
 0x12d   : > { %v4474_v27 = vpop.f32.mrf.mxu0  ;;  %6498 = vst [vmem:[#allocation99_spill] sm:$0xff] %v4955_v18 }
 0x12e   : > { %2091 = vrot.lane.b32.xlu1 %v4479_v1, %s4068_s12  ;;  %2255 = vrot.lane.b32.xlu0 %v4353_v16, %s4067_s10  ;;  %v1860_v16 = vsel %vm1815_vm0, %v1857_v46, %v1859_v41 }
 0x12f   : > { %v681_v32 = vpop.f32.mrf.mxu0 }
 0x130   : > { %809 = vst [vmem:[#allocation2 + $0x180] sm:$0xff] %v681_v32  ;;  %v1864_v32 = vsel %vm1815_vm0, %v1861_v15, %v1863_v23  ;;  %v1443_v15 = vrot.slane %v4407_v45, 7 }
 0x131   : > { %v4486_v33 = vpop.f32.mrf.mxu0  ;;  %v4530_v52 = vpop.f32.mrf.mxu1 }
 0x132   : > { %2531 = vrot.lane.b32.xlu1 %v2524_v36, %s4070_s14  ;;  %2061 = vrot.lane.b32.xlu0 %v4490_v3, %s4068_s12  ;;  %840 = vst [vmem:[#allocation2 + $0x108] sm:$0xff] %v4530_v52 }
 0x133   : > { %v685_v40 = vpop.f32.mrf.mxu0  ;;  %v761_v54 = vpop.f32.mrf.mxu1 }
 0x134   : > { %811 = vst [vmem:[#allocation2 + $0xf8] sm:$0xff] %v685_v40  ;;  %841 = vst [vmem:[#allocation2 + $0xe0] sm:$0xff] %v761_v54  ;;  %v1441_v54 = vrot.slane %v4389_v37, 7 }
 0x135   : > { %v4588_v38 = vpop.f32.mrf.mxu1 }
 0x136   : > { %1889 = vrot.lane.b32.xlu1 %v1826_v43, %s4066_s9  ;;  %2093 = vrot.lane.b32.xlu0 %v4501_v44, %s4068_s12  ;;  %6415 = vst [vmem:[#allocation16_spill] sm:$0xff] %v4588_v38  ;;  %842 = vst [vmem:[#allocation2 + $0x228] sm:$0xff] %v4588_v38 }
 0x137   : > { %v765_v46 = vpop.f32.mrf.mxu1 }
 0x138   : > { %843 = vst [vmem:[#allocation2 + $0x210] sm:$0xff] %v765_v46  ;;  %v1833_v46 = vrot.slane %v4407_v45, 1 }
 0x13a   : > { %1921 = vrot.lane.b32.xlu1 %v1858_v50, %s4066_s9  ;;  %1891 = vrot.lane.b32.xlu0 %v1828_v51, %s4066_s9 }
 0x13e   : > { %2361 = vrot.lane.b32.xlu1 %v1826_v43, %s4069_s13  ;;  %1923 = vrot.lane.b32.xlu0 %v1860_v16, %s4066_s9 }
 0x142   : > { %2393 = vrot.lane.b32.xlu1 %v1858_v50, %s4069_s13  ;;  %2363 = vrot.lane.b32.xlu0 %v1828_v51, %s4069_s13 }
 0x146   : > { %1599 = vrot.lane.b32.xlu1 %v4359_v19, %s4065_s29  ;;  %2395 = vrot.lane.b32.xlu0 %v1860_v16, %s4069_s13 }
 0x14a   : > { %1631 = vrot.lane.b32.xlu1 %v4361_v20, %s4065_s29  ;;  %1601 = vrot.lane.b32.xlu0 %v4370_v26, %s4065_s29 }
 0x14e   : > { %2225 = vrot.lane.b32.xlu1 %v4359_v19, %s4067_s10  ;;  %1633 = vrot.lane.b32.xlu0 %v4381_v31, %s4065_s29 }
 0x152   : > { %2257 = vrot.lane.b32.xlu1 %v4361_v20, %s4067_s10  ;;  %2227 = vrot.lane.b32.xlu0 %v4370_v26, %s4067_s10  ;;  %v1830_v20 = vsel %vm1815_vm0, %v1827_v47, %v1829_v5  ;;  %v4630_v5 = vsel %vm1423_vm1, %v1439_v14, %v1441_v54  ;;  %v4646_v14 = vsel %vm1423_vm1, %v1441_v54, %v1443_v15  ;;  %v1865_v54 = vrot.slane %v4414_v49, 1 }
 0x156   : > { %2063 = vrot.lane.b32.xlu1 %v4543_v58, %s4068_s12  ;;  %2259 = vrot.lane.b32.xlu0 %v4381_v31, %s4067_s10  ;;  %v4579_v31 = vpop.permute.xlu0 %3949 }
 0x15a   : > { %2095 = vrot.lane.b32.xlu1 %v4552_v63, %s4068_s12  ;;  %2065 = vrot.lane.b32.xlu0 %v4555_v4, %s4068_s12 }
 0x15e   : > { %1893 = vrot.lane.b32.xlu1 %v1830_v20, %s4066_s9  ;;  %2097 = vrot.lane.b32.xlu0 %v4565_v12, %s4068_s12 }
 0x162   : > { %1925 = vrot.lane.b32.xlu1 %v1862_v24, %s4066_s9  ;;  %1895 = vrot.lane.b32.xlu0 %v1832_v25, %s4066_s9 }
 0x166   : > { %2365 = vrot.lane.b32.xlu1 %v1830_v20, %s4069_s13  ;;  %1927 = vrot.lane.b32.xlu0 %v1864_v32, %s4066_s9  ;;  %v1473_v20 = vrot.slane %v4402_v42, 7 }
 0x168   : > { %v4584_v36 = vpop.permute.xlu1 %1623  ;;  %v4586_v30 = vpop.permute.xlu0 %1591 }
 0x169   : > { %6413 = vst [vmem:[#allocation14_spill] sm:$0xff] %v4584_v36  ;;  %6414 = vst [vmem:[#allocation15_spill] sm:$0xff] %v4586_v30  ;;  %v1843_v30 = vrot.slane %v4452_v6, 1 }
 0x16a   : > { %2397 = vrot.lane.b32.xlu1 %v1862_v24, %s4069_s13  ;;  %2367 = vrot.lane.b32.xlu0 %v1832_v25, %s4069_s13 }
 0x16c   : > { %v4593_v40 = vpop.permute.xlu1 %2217  ;;  %v4595_v43 = vpop.permute.xlu0 %1883 }
 0x16d   : > { %6416 = vst [vmem:[#allocation17_spill] sm:$0xff] %v4593_v40  ;;  %6417 = vst [vmem:[#allocation18_spill] sm:$0xff] %v4595_v43  ;;  %v1477_v40 = vrot.slane %v4423_v53, 7 }
 0x16e   : > { %1603 = vrot.lane.b32.xlu1 %v4389_v37, %s4065_s29  ;;  %2399 = vrot.lane.b32.xlu0 %v1864_v32, %s4069_s13  ;;  %v4643_v32 = vsel %vm1423_vm1, %v1471_v10, %v1473_v20  ;;  %v1834_v10 = vsel %vm1815_vm0, %v1831_v22, %v1833_v46 }
 0x16f   : > { %6428 = vst [vmem:[#allocation29_spill] sm:$0xff] %v4643_v32 }
 0x170   : > { %v4600_v47 = vpop.permute.xlu1 %2249  ;;  %v4602_v50 = vpop.permute.xlu0 %1625 }
 0x171   : > { %6418 = vst [vmem:[#allocation19_spill] sm:$0xff] %v4600_v47  ;;  %6419 = vst [vmem:[#allocation20_spill] sm:$0xff] %v4602_v50  ;;  %v4672_v47 = vsel %vm1815_vm0, %v1863_v23, %v1865_v54 }
 0x172   : > { %1635 = vrot.lane.b32.xlu1 %v4402_v42, %s4065_s29  ;;  %1605 = vrot.lane.b32.xlu0 %v4407_v45, %s4065_s29 }
 0x174   : > { %v4608_v51 = vpop.permute.xlu1 %2055  ;;  %v4610_v41 = vpop.permute.xlu0 %2219 }
 0x175   : > { %6420 = vst [vmem:[#allocation21_spill] sm:$0xff] %v4608_v51  ;;  %6421 = vst [vmem:[#allocation22_spill] sm:$0xff] %v4610_v41 }
 0x176   : > { %2229 = vrot.lane.b32.xlu1 %v4389_v37, %s4067_s10  ;;  %1637 = vrot.lane.b32.xlu0 %v4414_v49, %s4065_s29 }
 0x178   : > { %v4616_v16 = vpop.permute.xlu0 %2251  ;;  %v4618_v48 = vpop.permute.xlu1 %1593 }
 0x179   : > { %6422 = vst [vmem:[#allocation23_spill] sm:$0xff] %v4616_v16  ;;  %6423 = vst [vmem:[#allocation24_spill] sm:$0xff] %v4618_v48  ;;  %v4660_v16 = vsel %vm1423_vm1, %v1473_v20, %v1475_v35  ;;  %v1867_v20 = vrot.slane %v4423_v53, 1 }
 0x17a   : > { %2261 = vrot.lane.b32.xlu1 %v4402_v42, %s4067_s10  ;;  %2231 = vrot.lane.b32.xlu0 %v4407_v45, %s4067_s10  ;;  %6431 = vst [vmem:[#allocation32_spill] sm:$0xff] %v4660_v16 }
 0x17c   : > { %v4625_v55 = vpop.permute.xlu1 %1885  ;;  %v4627_v59 = vpop.permute.xlu0 %2057 }
 0x17d   : > { %6424 = vst [vmem:[#allocation25_spill] sm:$0xff] %v4625_v55  ;;  %6425 = vst [vmem:[#allocation26_spill] sm:$0xff] %v4627_v59  ;;  %v1839_v55 = vrot.slane %v4435_v60, 1 }
 0x17e   : > { %2067 = vrot.lane.b32.xlu1 %v4630_v5, %s4068_s12  ;;  %2263 = vrot.lane.b32.xlu0 %v4414_v49, %s4067_s10 }
 0x180   : > { %v4638_v24 = vpop.permute.xlu1 %1917  ;;  %v4640_v25 = vpop.permute.xlu0 %2089 }
 0x181   : > { %6426 = vst [vmem:[#allocation27_spill] sm:$0xff] %v4638_v24  ;;  %6427 = vst [vmem:[#allocation28_spill] sm:$0xff] %v4640_v25  ;;  %v1835_v24 = vrot.slane %v4418_v2, 1 }
 0x182   : > { %2099 = vrot.lane.b32.xlu1 %v4643_v32, %s4068_s12  ;;  %2069 = vrot.lane.b32.xlu0 %v4646_v14, %s4068_s12 }
 0x183   : > { %v1836_v22 = vsel %vm1815_vm0, %v1833_v46, %v1835_v24 }
 0x184   : > { %v4654_v34 = vpop.permute.xlu1 %2357  ;;  %v4656_v50 = vpop.permute.xlu0 %1887 }
 0x185   : > { %6429 = vst [vmem:[#allocation30_spill] sm:$0xff] %v4654_v34  ;;  %6430 = vst [vmem:[#allocation31_spill] sm:$0xff] %v4656_v50 }
 0x186   : > { %1897 = vrot.lane.b32.xlu1 %v1834_v10, %s4066_s9  ;;  %2101 = vrot.lane.b32.xlu0 %v4660_v16, %s4068_s12 }
 0x188   : > { %v4667_v36 = vpop.permute.xlu1 %2389  ;;  %v4669_v25 = vpop.permute.xlu0 %1919 }
 0x189   : > { %6432 = vst [vmem:[#allocation33_spill] sm:$0xff] %v4667_v36  ;;  %6433 = vst [vmem:[#allocation34_spill] sm:$0xff] %v4669_v25  ;;  %v4684_v36 = vsel %vm1815_vm0, %v1865_v54, %v1867_v20 }
 0x18a   : > { %1929 = vrot.lane.b32.xlu1 %v4672_v47, %s4066_s9  ;;  %1899 = vrot.lane.b32.xlu0 %v1836_v22, %s4066_s9 }
 0x18c   : > { %v4679_v34 = vpop.permute.xlu1 %1595  ;;  %v4681_v41 = vpop.permute.xlu0 %2359 }
 0x18d   : > { %6434 = vst [vmem:[#allocation35_spill] sm:$0xff] %v4679_v34  ;;  %6435 = vst [vmem:[#allocation36_spill] sm:$0xff] %v4681_v41 }
 0x18e   : > { %2369 = vrot.lane.b32.xlu1 %v1834_v10, %s4069_s13  ;;  %1931 = vrot.lane.b32.xlu0 %v4684_v36, %s4066_s9 }
 0x190   : > { %v4689_v23 = vpop.permute.xlu1 %1627  ;;  %v4691_v46 = vpop.permute.xlu0 %2391 }
 0x191   : > { %6436 = vst [vmem:[#allocation37_spill] sm:$0xff] %v4689_v23  ;;  %6437 = vst [vmem:[#allocation38_spill] sm:$0xff] %v4691_v46  ;;  %v1445_v46 = vrot.slane %v4418_v2, 7 }
 0x192   : > { %1607 = vrot.lane.b32.xlu1 %v4418_v2, %s4065_s29  ;;  %2371 = vrot.lane.b32.xlu0 %v1836_v22, %s4069_s13 }
 0x194   : > { %v4696_v25 = vpop.permute.xlu1 %2221  ;;  %v4698_v41 = vpop.permute.xlu0 %1597 }
 0x195   : > { %6438 = vst [vmem:[#allocation39_spill] sm:$0xff] %v4696_v25  ;;  %6439 = vst [vmem:[#allocation40_spill] sm:$0xff] %v4698_v41  ;;  %v4726_v25 = vsel %vm1423_vm1, %v1443_v15, %v1445_v46  ;;  %v1447_v41 = vrot.slane %v4427_v56, 7 }
 0x196   : > { %1639 = vrot.lane.b32.xlu1 %v4423_v53, %s4065_s29  ;;  %1609 = vrot.lane.b32.xlu0 %v4427_v56, %s4065_s29 }
 0x197   : > { %v4742_v15 = vsel %vm1423_vm1, %v1445_v46, %v1447_v41  ;;  %v1869_v46 = vrot.slane %v4429_v57, 1 }
 0x198   : > { %v4704_v10 = vpop.permute.xlu1 %2253  ;;  %v4706_v54 = vpop.permute.xlu0 %1629 }
 0x199   : > { %6440 = vst [vmem:[#allocation41_spill] sm:$0xff] %v4704_v10  ;;  %6441 = vst [vmem:[#allocation42_spill] sm:$0xff] %v4706_v54 }
 0x19a   : > { %2233 = vrot.lane.b32.xlu1 %v4418_v2, %s4067_s10  ;;  %1641 = vrot.lane.b32.xlu0 %v4429_v57, %s4065_s29 }
 0x19c   : > { %v4712_v22 = vpop.permute.xlu1 %2059  ;;  %v4714_v23 = vpop.permute.xlu0 %2223 }
 0x19d   : > { %6442 = vst [vmem:[#allocation43_spill] sm:$0xff] %v4712_v22  ;;  %6443 = vst [vmem:[#allocation44_spill] sm:$0xff] %v4714_v23  ;;  %v1479_v22 = vrot.slane %v4429_v57, 7 }
 0x19e   : > { %2265 = vrot.lane.b32.xlu1 %v4423_v53, %s4067_s10  ;;  %2235 = vrot.lane.b32.xlu0 %v4427_v56, %s4067_s10 }
 0x1a0   : > { %v4721_v10 = vpop.permute.xlu1 %2091  ;;  %v4723_v54 = vpop.permute.xlu0 %2255 }
 0x1a1   : > { %6444 = vst [vmem:[#allocation45_spill] sm:$0xff] %v4721_v10  ;;  %6445 = vst [vmem:[#allocation46_spill] sm:$0xff] %v4723_v54  ;;  %v4739_v10 = vsel %vm1423_vm1, %v1475_v35, %v1477_v40  ;;  %v1837_v54 = vrot.slane %v4427_v56, 1 }
 0x1a2   : > { %2071 = vrot.lane.b32.xlu1 %v4726_v25, %s4068_s12  ;;  %2267 = vrot.lane.b32.xlu0 %v4429_v57, %s4067_s10  ;;  %6448 = vst [vmem:[#allocation49_spill] sm:$0xff] %v4739_v10 }
 0x1a3   : > { %v1838_v35 = vsel %vm1815_vm0, %v1835_v24, %v1837_v54  ;;  %v1840_v24 = vsel %vm1815_vm0, %v1837_v54, %v1839_v55 }
 0x1a4   : > { %v4734_v23 = vpop.permute.xlu1 %2531  ;;  %v4736_v59 = vpop.permute.xlu0 %2061 }
 0x1a5   : > { %6446 = vst [vmem:[#allocation47_spill] sm:$0xff] %v4734_v23  ;;  %6447 = vst [vmem:[#allocation48_spill] sm:$0xff] %v4736_v59  ;;  %v4756_v59 = vsel %vm1423_vm1, %v1477_v40, %v1479_v22  ;;  %v1871_v40 = vrot.slane %v4437_v61, 1 }
 0x1a6   : > { %2103 = vrot.lane.b32.xlu1 %v4739_v10, %s4068_s12  ;;  %2073 = vrot.lane.b32.xlu0 %v4742_v15, %s4068_s12  ;;  %6451 = vst [vmem:[#allocation52_spill] sm:$0xff] %v4756_v59 }
 0x1a8   : > { %v4750_v34 = vpop.permute.xlu1 %1889  ;;  %v4752_v23 = vpop.permute.xlu0 %2093 }
 0x1a9   : > { %6449 = vst [vmem:[#allocation50_spill] sm:$0xff] %v4750_v34  ;;  %6450 = vst [vmem:[#allocation51_spill] sm:$0xff] %v4752_v23  ;;  %v4768_v23 = vsel %vm1815_vm0, %v1867_v20, %v1869_v46 }
 0x1aa   : > { %1901 = vrot.lane.b32.xlu1 %v1838_v35, %s4066_s9  ;;  %2105 = vrot.lane.b32.xlu0 %v4756_v59, %s4068_s12 }
 0x1ac   : > { %v4763_v48 = vpop.permute.xlu1 %1921  ;;  %v4765_v28 = vpop.permute.xlu0 %1891 }
 0x1ad   : > { %6452 = vst [vmem:[#allocation53_spill] sm:$0xff] %v4763_v48  ;;  %6453 = vst [vmem:[#allocation54_spill] sm:$0xff] %v4765_v28  ;;  %v4780_v48 = vsel %vm1815_vm0, %v1869_v46, %v1871_v40 }
 0x1ae   : > { %1933 = vrot.lane.b32.xlu1 %v4768_v23, %s4066_s9  ;;  %1903 = vrot.lane.b32.xlu0 %v1840_v24, %s4066_s9 }
 0x1b0   : > { %v4775_v57 = vpop.permute.xlu1 %2361  ;;  %v4777_v34 = vpop.permute.xlu0 %1923 }
 0x1b1   : > { %6454 = vst [vmem:[#allocation55_spill] sm:$0xff] %v4775_v57  ;;  %6455 = vst [vmem:[#allocation56_spill] sm:$0xff] %v4777_v34 }
 0x1b2   : > { %2373 = vrot.lane.b32.xlu1 %v1838_v35, %s4069_s13  ;;  %1935 = vrot.lane.b32.xlu0 %v4780_v48, %s4066_s9 }
 0x1b4   : > { %v4785_v20 = vpop.permute.xlu1 %2393  ;;  %v4787_v54 = vpop.permute.xlu0 %2363 }
 0x1b5   : > { %6456 = vst [vmem:[#allocation57_spill] sm:$0xff] %v4785_v20  ;;  %6457 = vst [vmem:[#allocation58_spill] sm:$0xff] %v4787_v54 }
 0x1b6   : > { %1611 = vrot.lane.b32.xlu1 %v4435_v60, %s4065_s29  ;;  %2375 = vrot.lane.b32.xlu0 %v1840_v24, %s4069_s13 }
 0x1b8   : > { %v4792_v57 = vpop.permute.xlu1 %1599  ;;  %v4794_v34 = vpop.permute.xlu0 %2395 }
 0x1b9   : > { %6458 = vst [vmem:[#allocation59_spill] sm:$0xff] %v4792_v57  ;;  %6459 = vst [vmem:[#allocation60_spill] sm:$0xff] %v4794_v34  ;;  %v1449_v34 = vrot.slane %v4435_v60, 7  ;;  %v1481_v57 = vrot.slane %v4437_v61, 7 }
 0x1ba   : > { %1643 = vrot.lane.b32.xlu1 %v4437_v61, %s4065_s29  ;;  %1613 = vrot.lane.b32.xlu0 %v4443_v0, %s4065_s29 }
 0x1bc   : > { %v4800_v35 = vpop.permute.xlu1 %1631  ;;  %v4802_v46 = vpop.permute.xlu0 %1601 }
 0x1bd   : > { %6460 = vst [vmem:[#allocation61_spill] sm:$0xff] %v4800_v35  ;;  %6461 = vst [vmem:[#allocation62_spill] sm:$0xff] %v4802_v46  ;;  %v4822_v46 = vsel %vm1423_vm1, %v1447_v41, %v1449_v34 }
 0x1be   : > { %2237 = vrot.lane.b32.xlu1 %v4435_v60, %s4067_s10  ;;  %1645 = vrot.lane.b32.xlu0 %v4445_v21, %s4065_s29  ;;  %6466 = vst [vmem:[#allocation67_spill] sm:$0xff] %v4822_v46 }
 0x1c0   : > { %v4808_v24 = vpop.permute.xlu1 %2225  ;;  %v4810_v20 = vpop.permute.xlu0 %1633 }
 0x1c1   : > { %6462 = vst [vmem:[#allocation63_spill] sm:$0xff] %v4808_v24  ;;  %6463 = vst [vmem:[#allocation64_spill] sm:$0xff] %v4810_v20  ;;  %v1451_v24 = vrot.slane %v4443_v0, 7 }
 0x1c2   : > { %2269 = vrot.lane.b32.xlu1 %v4437_v61, %s4067_s10  ;;  %2239 = vrot.lane.b32.xlu0 %v4443_v0, %s4067_s10  ;;  %v1841_v61 = vrot.slane %v4443_v0, 1 }
 0x1c3   : > { %v4838_v41 = vsel %vm1423_vm1, %v1449_v34, %v1451_v24  ;;  %v1873_v34 = vrot.slane %v4445_v21, 1 }
 0x1c4   : > { %v4817_v35 = vpop.permute.xlu1 %2257  ;;  %v4819_v54 = vpop.permute.xlu0 %2227  ;;  %6470 = vst [vmem:[#allocation71_spill] sm:$0xff] %v4838_v41 }
 0x1c5   : > { %6464 = vst [vmem:[#allocation65_spill] sm:$0xff] %v4817_v35  ;;  %6465 = vst [vmem:[#allocation66_spill] sm:$0xff] %v4819_v54  ;;  %v4835_v35 = vsel %vm1423_vm1, %v1479_v22, %v1481_v57  ;;  %v1483_v54 = vrot.slane %v4445_v21, 7  ;;  %v1842_v22 = vsel %vm1815_vm0, %v1839_v55, %v1841_v61  ;;  %v1844_v55 = vsel %vm1815_vm0, %v1841_v61, %v1843_v30 }
 0x1c6   : > { %2075 = vrot.lane.b32.xlu1 %v4822_v46, %s4068_s12  ;;  %2271 = vrot.lane.b32.xlu0 %v4445_v21, %s4067_s10  ;;  %6469 = vst [vmem:[#allocation70_spill] sm:$0xff] %v4835_v35 }
 0x1c8   : > { %v4830_v20 = vpop.permute.xlu1 %2063  ;;  %v4832_v28 = vpop.permute.xlu0 %2259 }
 0x1c9   : > { %6467 = vst [vmem:[#allocation68_spill] sm:$0xff] %v4830_v20  ;;  %6468 = vst [vmem:[#allocation69_spill] sm:$0xff] %v4832_v28  ;;  %v4852_v28 = vsel %vm1423_vm1, %v1481_v57, %v1483_v54  ;;  %v1875_v57 = vrot.slane %v4455_v11, 1 }
 0x1ca   : > { %2107 = vrot.lane.b32.xlu1 %v4835_v35, %s4068_s12  ;;  %2077 = vrot.lane.b32.xlu0 %v4838_v41, %s4068_s12  ;;  %6473 = vst [vmem:[#allocation74_spill] sm:$0xff] %v4852_v28 }
 0x1cc   : > { %v4846_v50 = vpop.permute.xlu1 %2095  ;;  %v4848_v20 = vpop.permute.xlu0 %2065 }
 0x1cd   : > { %6471 = vst [vmem:[#allocation72_spill] sm:$0xff] %v4846_v50  ;;  %6472 = vst [vmem:[#allocation73_spill] sm:$0xff] %v4848_v20  ;;  %v4864_v50 = vsel %vm1815_vm0, %v1871_v40, %v1873_v34 }
 0x1ce   : > { %1905 = vrot.lane.b32.xlu1 %v1842_v22, %s4066_s9  ;;  %2109 = vrot.lane.b32.xlu0 %v4852_v28, %s4068_s12  ;;  %6476 = vst [vmem:[#allocation77_spill] sm:$0xff] %v4864_v50 }
 0x1d0   : > { %v4859_v43 = vpop.permute.xlu1 %1893  ;;  %v4861_v51 = vpop.permute.xlu0 %2097 }
 0x1d1   : > { %6474 = vst [vmem:[#allocation75_spill] sm:$0xff] %v4859_v43  ;;  %6475 = vst [vmem:[#allocation76_spill] sm:$0xff] %v4861_v51  ;;  %v4876_v43 = vsel %vm1815_vm0, %v1873_v34, %v1875_v57 }
 0x1d2   : > { %1937 = vrot.lane.b32.xlu1 %v4864_v50, %s4066_s9  ;;  %1907 = vrot.lane.b32.xlu0 %v1844_v55, %s4066_s9  ;;  %v1847_v50 = vrot.slane %v4474_v27, 1 }
 0x1d4   : > { %v4871_v21 = vpop.permute.xlu1 %1925  ;;  %v4873_v20 = vpop.permute.xlu0 %1895 }
 0x1d5   : > { %6477 = vst [vmem:[#allocation78_spill] sm:$0xff] %v4871_v21  ;;  %6478 = vst [vmem:[#allocation79_spill] sm:$0xff] %v4873_v20 }
 0x1d6   : > { %2377 = vrot.lane.b32.xlu1 %v1842_v22, %s4069_s13  ;;  %1939 = vrot.lane.b32.xlu0 %v4876_v43, %s4066_s9 }
 0x1d8   : > { %v4881_v40 = vpop.permute.xlu1 %2365  ;;  %v4883_v61 = vpop.permute.xlu0 %1927 }
 0x1d9   : > { %6479 = vst [vmem:[#allocation80_spill] sm:$0xff] %v4881_v40  ;;  %6480 = vst [vmem:[#allocation81_spill] sm:$0xff] %v4883_v61 }
 0x1da   : > { %1615 = vrot.lane.b32.xlu1 %v4452_v6, %s4065_s29  ;;  %2379 = vrot.lane.b32.xlu0 %v1844_v55, %s4069_s13 }
 0x1dc   : > { %v4888_v21 = vpop.permute.xlu1 %2397  ;;  %v4890_v51 = vpop.permute.xlu0 %2367 }
 0x1dd   : > { %6481 = vst [vmem:[#allocation82_spill] sm:$0xff] %v4888_v21  ;;  %6482 = vst [vmem:[#allocation83_spill] sm:$0xff] %v4890_v51  ;;  %v1453_v21 = vrot.slane %v4452_v6, 7  ;;  %v4921_v51 = vrot.slane %v4455_v11, 7 }
 0x1de   : > { %1647 = vrot.lane.b32.xlu1 %v4455_v11, %s4065_s29  ;;  %1617 = vrot.lane.b32.xlu0 %v4462_v17, %s4065_s29 }
 0x1df   : > { %v4918_v40 = vsel %vm1423_vm1, %v1451_v24, %v1453_v21  ;;  %6490 = vst [vmem:[#allocation91_spill] sm:$0xff] %v4921_v51 }
 0x1e0   : > { %v4896_v22 = vpop.permute.xlu1 %1603  ;;  %v4898_v34 = vpop.permute.xlu0 %2399  ;;  %6489 = vst [vmem:[#allocation90_spill] sm:$0xff] %v4918_v40 }
 0x1e1   : > { %6483 = vst [vmem:[#allocation84_spill] sm:$0xff] %v4896_v22  ;;  %6484 = vst [vmem:[#allocation85_spill] sm:$0xff] %v4898_v34 }
 0x1e2   : > { %2241 = vrot.lane.b32.xlu1 %v4452_v6, %s4067_s10  ;;  %1649 = vrot.lane.b32.xlu0 %v4520_v8, %s4065_s29 }
 0x1e4   : > { %v4904_v55 = vpop.permute.xlu1 %1635  ;;  %v4906_v61 = vpop.permute.xlu0 %1605 }
 0x1e5   : > { %6485 = vst [vmem:[#allocation86_spill] sm:$0xff] %v4904_v55  ;;  %6486 = vst [vmem:[#allocation87_spill] sm:$0xff] %v4906_v61  ;;  %v1455_v55 = vrot.slane %v4462_v17, 7 }
 0x1e6   : > { %2273 = vrot.lane.b32.xlu1 %v4455_v11, %s4067_s10  ;;  %2243 = vrot.lane.b32.xlu0 %v4462_v17, %s4067_s10  ;;  %v1845_v11 = vrot.slane %v4462_v17, 1 }
 0x1e7   : > { %v4937_v24 = vsel %vm1423_vm1, %v1453_v21, %v1455_v55 }
 0x1e8   : > { %v4913_v22 = vpop.permute.xlu1 %2229  ;;  %v4915_v34 = vpop.permute.xlu0 %1637  ;;  %6494 = vst [vmem:[#allocation95_spill] sm:$0xff] %v4937_v24 }
 0x1e9   : > { %6487 = vst [vmem:[#allocation88_spill] sm:$0xff] %v4913_v22  ;;  %6488 = vst [vmem:[#allocation89_spill] sm:$0xff] %v4915_v34  ;;  %v4934_v34 = vsel %vm1423_vm1, %v1483_v54, %v4921_v51  ;;  %v2049_v22 = vrot.slane %v4520_v8, 7  ;;  %v1846_v54 = vsel %vm1815_vm0, %v1843_v30, %v1845_v11  ;;  %v4967_v30 = vsel %vm1815_vm0, %v1875_v57, %v4955_v18 }
 0x1ea   : > { %2079 = vrot.lane.b32.xlu1 %v4918_v40, %s4068_s12  ;;  %2275 = vrot.lane.b32.xlu0 %v4520_v8, %s4067_s10  ;;  %6493 = vst [vmem:[#allocation94_spill] sm:$0xff] %v4934_v34  ;;  %6501 = vst [vmem:[#allocation102_spill] sm:$0xff] %v4967_v30 }
 0x1eb   : > { %v4952_v21 = vsel %vm1423_vm1, %v4921_v51, %v2049_v22  ;;  %v1848_v51 = vsel %vm1815_vm0, %v1845_v11, %v1847_v50 }
 0x1ec   : > { %v4928_v61 = vpop.permute.xlu1 %2261  ;;  %v4930_v20 = vpop.permute.xlu0 %2231  ;;  %6497 = vst [vmem:[#allocation98_spill] sm:$0xff] %v4952_v21 }
 0x1ed   : > { %6491 = vst [vmem:[#allocation92_spill] sm:$0xff] %v4928_v61  ;;  %6492 = vst [vmem:[#allocation93_spill] sm:$0xff] %v4930_v20 }
 0x1ee   : > { %2111 = vrot.lane.b32.xlu1 %v4934_v34, %s4068_s12  ;;  %2081 = vrot.lane.b32.xlu0 %v4937_v24, %s4068_s12  ;;  %v1716_v34 = vld [vmem:[#allocation2 + $0x108] sm:$0x1] }
 0x1ef   : > { %v1879_v8 = vrot.slane %v1716_v34, 1 }
 0x1f0   : > { %v4945_v61 = vpop.permute.xlu1 %2067  ;;  %v4947_v20 = vpop.permute.xlu0 %2263 }
 0x1f1   : > { %6495 = vst [vmem:[#allocation96_spill] sm:$0xff] %v4945_v61  ;;  %6496 = vst [vmem:[#allocation97_spill] sm:$0xff] %v4947_v20 }
 0x1f2   : > { %1909 = vrot.lane.b32.xlu1 %v1846_v54, %s4066_s9  ;;  %2113 = vrot.lane.b32.xlu0 %v4952_v21, %s4068_s12 }
 0x1f4   : > { %v4961_v61 = vpop.permute.xlu1 %2099  ;;  %v4963_v20 = vpop.permute.xlu0 %2069 }
 0x1f5   : > { %6499 = vst [vmem:[#allocation100_spill] sm:$0xff] %v4961_v61  ;;  %6500 = vst [vmem:[#allocation101_spill] sm:$0xff] %v4963_v20  ;;  %v1880_v61 = vsel %vm1815_vm0, %v4955_v18, %v1879_v8  ;;  %v1457_v8 = vrot.slane %v4474_v27, 7  ;;  %v1459_v20 = vrot.slane %v4486_v33, 7  ;;  %v6521_v18 = vrot.slane %v4323_v62, 7 }
 0x1f6   : > { %1941 = vrot.lane.b32.xlu1 %v4967_v30, %s4066_s9  ;;  %1911 = vrot.lane.b32.xlu0 %v1848_v51, %s4066_s9 }
 0x1f8   : > { %v4973_v9 = vpop.permute.xlu1 %1897  ;;  %v4975_v21 = vpop.permute.xlu0 %2101 }
 0x1f9   : > { %6502 = vst [vmem:[#allocation103_spill] sm:$0xff] %v4973_v9  ;;  %6503 = vst [vmem:[#allocation104_spill] sm:$0xff] %v4975_v21  ;;  %v5013_v21 = vsel %vm1423_vm1, %v1455_v55, %v1457_v8 }
 0x1fa   : > { %2381 = vrot.lane.b32.xlu1 %v1846_v54, %s4069_s13  ;;  %1943 = vrot.lane.b32.xlu0 %v1880_v61, %s4066_s9  ;;  %6512 = vst [vmem:[#allocation113_spill] sm:$0xff] %v5013_v21 }
 0x1fc   : > { %v4981_v57 = vpop.permute.xlu1 %1929  ;;  %v4983_v11 = vpop.permute.xlu0 %1899 }
 0x1fd   : > { %6504 = vst [vmem:[#allocation105_spill] sm:$0xff] %v4981_v57  ;;  %6505 = vst [vmem:[#allocation106_spill] sm:$0xff] %v4983_v11  ;;  %v5010_v57 = vrot.slane %v4530_v52, 7  ;;  %v2043_v11 = vld [vmem:[#allocation2 + $0x228] sm:$0x7f] }
 0x1fe   : > { %1619 = vrot.lane.b32.xlu1 %v4474_v27, %s4065_s29  ;;  %2383 = vrot.lane.b32.xlu0 %v1848_v51, %s4069_s13 }
 0x200   : > { %v4988_v34 = vpop.permute.xlu1 %2369  ;;  %v4990_v9 = vpop.permute.xlu0 %1931 }
 0x201   : > { %6506 = vst [vmem:[#allocation107_spill] sm:$0xff] %v4988_v34  ;;  %6507 = vst [vmem:[#allocation108_spill] sm:$0xff] %v4990_v9 }
 0x202   : > { %2245 = vrot.lane.b32.xlu1 %v4474_v27, %s4067_s10  ;;  %1621 = vrot.lane.b32.xlu0 %v4486_v33, %s4065_s29  ;;  %s3632_s29 = sshll.u32 %s267_s28, 1 }
 0x204   : > { %v4996_v61 = vpop.permute.xlu1 %1607  ;;  %v4998_v54 = vpop.permute.xlu0 %2371 }
 0x205   : > { %6508 = vst [vmem:[#allocation109_spill] sm:$0xff] %v4996_v61  ;;  %6509 = vst [vmem:[#allocation110_spill] sm:$0xff] %v4998_v54  ;;  %v1849_v61 = vrot.slane %v4486_v33, 1 }
 0x206   : > { %2277 = vrot.lane.b32.xlu1 %v4530_v52, %s4067_s10  ;;  %2247 = vrot.lane.b32.xlu0 %v4486_v33, %s4067_s10 }
 0x208   : > { %v5005_v51 = vpop.permute.xlu1 %1639  ;;  %v5007_v9 = vpop.permute.xlu0 %1609 }
 0x209   : > { %6510 = vst [vmem:[#allocation111_spill] sm:$0xff] %v5005_v51  ;;  %6511 = vst [vmem:[#allocation112_spill] sm:$0xff] %v5007_v9  ;;  %v5026_v51 = vsel %vm1423_vm1, %v2049_v22, %v5010_v57  ;;  %v6516_v9 = vrot.slane %v4323_v62, 1  ;;  %v5041_v22 = vsel %vm1423_vm1, %v1457_v8, %v1459_v20 }
 0x20a   : > { %2083 = vrot.lane.b32.xlu1 %v5013_v21, %s4068_s12  ;;  %2279 = vrot.lane.b32.xlu0 %v4588_v38, %s4067_s10  ;;  %6515 = vst [vmem:[#allocation116_spill] sm:$0xff] %v5026_v51  ;;  %6519 = vst [vmem:[#allocation119_spill] sm:$0xff] %v5041_v22  ;;  %v2053_v38 = vrot.slane %v2043_v11, 7 }
 0x20b   : > { %v1852_v55 = vsel %vm1815_vm0, %v1849_v61, %v6516_v9 }
 0x20c   : > { %v5020_v34 = vpop.permute.xlu1 %2233  ;;  %v5022_v54 = vpop.permute.xlu0 %1641 }
 0x20d   : > { %6513 = vst [vmem:[#allocation114_spill] sm:$0xff] %v5020_v34  ;;  %6514 = vst [vmem:[#allocation115_spill] sm:$0xff] %v5022_v54  ;;  %v1850_v54 = vsel %vm1815_vm0, %v1847_v50, %v1849_v61  ;;  %v2054_v50 = vsel %vm1423_vm1, %v5010_v57, %v2053_v38 }
 0x20e   : > { %2115 = vrot.lane.b32.xlu1 %v5026_v51, %s4068_s12  ;;  %1915 = vrot.lane.b32.xlu0 %v1852_v55, %s4066_s9 }
 0x210   : > { %v5035_v30 = vpop.permute.xlu1 %2265  ;;  %v5037_v34 = vpop.permute.xlu0 %2235 }
 0x211   : > { %6517 = vst [vmem:[#allocation117_spill] sm:$0xff] %v5035_v30  ;;  %6518 = vst [vmem:[#allocation118_spill] sm:$0xff] %v5037_v34  ;;  %v5053_v30 = vsel %vm1423_vm1, %v1459_v20, %v6521_v18 }
 0x212   : > { %1913 = vrot.lane.b32.xlu1 %v1850_v54, %s4066_s9  ;;  %2085 = vrot.lane.b32.xlu0 %v5041_v22, %s4068_s12  ;;  %6522 = vst [vmem:[#allocation121_spill] sm:$0xff] %v5053_v30  ;;  %s269_s9 = scalar_lea.vmem [#allocation3], %s3632_s29 }
 0x213   : > { %s3532_s10 = sshll.u32 %s269_s9, 4  ;;  %s3533_s10 = int_to_ptr.vmem [resolvable:$true] %s3532_s10 }
 0x214   : > { %v5046_v9 = vpop.permute.xlu1 %2071  ;;  %v5048_v51 = vpop.permute.xlu0 %2267  ;;  %s4001_s16 = scalar_lea.vmem %s3533_s10, 32 }
 0x215   : > { %6520 = vst [vmem:[#allocation120_spill] sm:$0xff] %v5048_v51  ;;  %v3982_v51 = vld [vmem:[#allocation2 + $0xe8] sm:$0xff]  ;;  %p4002_p11 = scmp.ne.s32.totalorder %s3533_s10, %s4001_s16 }
 0x216   : > { %2087 = vrot.lane.b32.xlu1 %v5053_v30, %s4068_s12  ;;  %2117 = vrot.lane.b32.xlu0 %v2054_v50, %s4068_s12 }
 0x217   : > { %p4003_p12 = pnand %p4002_p11, %p4144_p5 }
 0x218   : > { %v5060_v11 = vpop.permute.xlu1 %2103  ;;  %v5062_v61 = vpop.permute.xlu0 %2073 }
 0x219   : > { %6523 = vst [vmem:[#allocation122_spill] sm:$0xff] %v5060_v11  ;;  %p4004_p13 = pneg %p4003_p12 }
 0x21a   : > { %2385 = vrot.lane.b32.xlu1 %v1850_v54, %s4069_s13  ;;  %2387 = vrot.lane.b32.xlu0 %v1852_v55, %s4069_s13 }
 0x21c   : > { %v5066_v62 = vpop.permute.xlu1 %1901  ;;  %v5068_v18 = vpop.permute.xlu0 %2105 }
 0x21d   : > { %6524 = vst [vmem:[#allocation123_spill] sm:$0xff] %v5066_v62  ;;  %6525 = vst [vmem:[#allocation124_spill] sm:$0xff] %v5068_v18  ;;  %v3983_v18 = vld [vmem:[#allocation2 + $0x198] sm:$0xff] }
 0x21e   : > { %2535 = vrot.lane.b32.xlu1 %v4543_v58, %s4070_s14  ;;  %2533 = vrot.lane.b32.xlu0 %v4490_v3, %s4070_s14 }
 0x220   : > { %v5074_v38 = vpop.permute.xlu1 %1933  ;;  %v5076_v20 = vpop.permute.xlu0 %1903 }
 0x221   : > { %6526 = vst [vmem:[#allocation125_spill] sm:$0xff] %v5074_v38 }
 0x222   : > { %2693 = vrot.lane.b32.xlu1 %v4338_v7, %s4071_s15  ;;  %2537 = vrot.lane.b32.xlu0 %v4555_v4, %s4070_s14 }
 0x224   : > { %v5082_v54 = vpop.permute.xlu1 %2373  ;;  %v5084_v8 = vpop.permute.xlu0 %1935 }
 0x225   : > { %6527 = vst [vmem:[#allocation126_spill] sm:$0xff] %v5082_v54  ;;  %6528 = vst [vmem:[#allocation127_spill] sm:$0xff] %v5084_v8  ;;  %v6643_v54 = vld [vmem:[#allocation68_spill] sm:$0xff] }
 0x226   : > { %2697 = vrot.lane.b32.xlu1 %v4359_v19, %s4071_s15  ;;  %2695 = vrot.lane.b32.xlu0 %v4349_v13, %s4071_s15 }
 0x228   : > { %v5090_v55 = vpop.permute.xlu1 %1611  ;;  %v5092_v50 = vpop.permute.xlu0 %2375 }
 0x229   : > { %6529 = vst [vmem:[#allocation128_spill] sm:$0xff] %v5090_v55  ;;  %6530 = vst [vmem:[#allocation129_spill] sm:$0xff] %v5092_v50  ;;  %v6639_v50 = vld [vmem:[#allocation43_spill] sm:$0xff] }
 0x22a   : > { %2539 = vrot.lane.b32.xlu1 %v4630_v5, %s4070_s14  ;;  %2699 = vrot.lane.b32.xlu0 %v4370_v26, %s4071_s15 }
 0x22c   : > { %v5098_v7 = vpop.permute.xlu1 %1643  ;;  %v5100_v38 = vpop.permute.xlu0 %1613 }
 0x22d   : > { %6531 = vst [vmem:[#allocation130_spill] sm:$0xff] %v5098_v7  ;;  %6532 = vst [vmem:[#allocation131_spill] sm:$0xff] %v5100_v38  ;;  %v3990_v38 = vld [vmem:[#allocation2 + $0x48] sm:$0xff] }
 0x22e   : > { %2701 = vrot.lane.b32.xlu1 %v4389_v37, %s4071_s15  ;;  %2541 = vrot.lane.b32.xlu0 %v4646_v14, %s4070_s14 }
 0x230   : > { %v5106_v13 = vpop.permute.xlu1 %2237  ;;  %v5108_v19 = vpop.permute.xlu0 %1645 }
 0x231   : > { %6533 = vst [vmem:[#allocation132_spill] sm:$0xff] %v5106_v13  ;;  %6534 = vst [vmem:[#allocation133_spill] sm:$0xff] %v5108_v19 }
 0x232   : > { %2543 = vrot.lane.b32.xlu1 %v4726_v25, %s4070_s14  ;;  %2703 = vrot.lane.b32.xlu0 %v4407_v45, %s4071_s15 }
 0x234   : > { %v5114_v26 = vpop.permute.xlu1 %2269  ;;  %v5116_v7 = vpop.permute.xlu0 %2239 }
 0x235   : > { %6535 = vst [vmem:[#allocation134_spill] sm:$0xff] %v5114_v26  ;;  %6536 = vst [vmem:[#allocation135_spill] sm:$0xff] %v5116_v7  ;;  %v6603_v7 = vld [vmem:[#allocation6_spill] sm:$0xff] }
 0x236   : > { %2705 = vrot.lane.b32.xlu1 %v4418_v2, %s4071_s15  ;;  %2545 = vrot.lane.b32.xlu0 %v4742_v15, %s4070_s14 }
 0x238   : > { %v5122_v37 = vpop.permute.xlu1 %2075  ;;  %v5124_v8 = vpop.permute.xlu0 %2271 }
 0x239   : > { %6537 = vst [vmem:[#allocation136_spill] sm:$0xff] %v5122_v37  ;;  %6538 = vst [vmem:[#allocation137_spill] sm:$0xff] %v5124_v8 }
 0x23a   : > { %2547 = vrot.lane.b32.xlu1 %v4822_v46, %s4070_s14  ;;  %2707 = vrot.lane.b32.xlu0 %v4427_v56, %s4071_s15  ;;  %v3992_v46 = vld [vmem:[#allocation2 + $0x1b8] sm:$0xff] }
 0x23c   : > { %v5130_v45 = vpop.permute.xlu1 %2107  ;;  %v5132_v19 = vpop.permute.xlu0 %2077 }
 0x23d   : > { %6539 = vst [vmem:[#allocation138_spill] sm:$0xff] %v5130_v45  ;;  %6540 = vst [vmem:[#allocation139_spill] sm:$0xff] %v5132_v19  ;;  %v5444_v19 = vld [vmem:[#allocation2 + $0x168] sm:$0xff] }
 0x23e   : > { %2709 = vrot.lane.b32.xlu1 %v4435_v60, %s4071_s15  ;;  %2549 = vrot.lane.b32.xlu0 %v4838_v41, %s4070_s14  ;;  %6624 = vst [vmem:[#allocation190_spill] sm:$0xff] %v5444_v19 }
 0x240   : > { %v5138_v2 = vpop.permute.xlu1 %1905  ;;  %v5140_v26 = vpop.permute.xlu0 %2109 }
 0x241   : > { %6541 = vst [vmem:[#allocation140_spill] sm:$0xff] %v5138_v2  ;;  %6542 = vst [vmem:[#allocation141_spill] sm:$0xff] %v5140_v26 }
 0x242   : > { %2551 = vrot.lane.b32.xlu1 %v4918_v40, %s4070_s14  ;;  %2711 = vrot.lane.b32.xlu0 %v4443_v0, %s4071_s15 }
 0x244   : > { %v5146_v56 = vpop.permute.xlu1 %1937  ;;  %v5148_v8 = vpop.permute.xlu0 %1907 }
 0x245   : > { %6543 = vst [vmem:[#allocation142_spill] sm:$0xff] %v5146_v56  ;;  %6544 = vst [vmem:[#allocation143_spill] sm:$0xff] %v5148_v8  ;;  %v5368_v8 = vld [vmem:[#allocation2 + $0x238] sm:$0xff] }
 0x246   : > { %2713 = vrot.lane.b32.xlu1 %v4452_v6, %s4071_s15  ;;  %2553 = vrot.lane.b32.xlu0 %v4937_v24, %s4070_s14  ;;  %6605 = vst [vmem:[#allocation6_spill] sm:$0xff] %v5368_v8  ;;  %v6621_v8 = vrot.slane %v4530_v52, 1 }
 0x248   : > { %v5154_v60 = vpop.permute.xlu1 %2377  ;;  %v5156_v45 = vpop.permute.xlu0 %1939 }
 0x249   : > { %6545 = vst [vmem:[#allocation144_spill] sm:$0xff] %v5154_v60  ;;  %6546 = vst [vmem:[#allocation145_spill] sm:$0xff] %v5156_v45 }
 0x24a   : > { %2555 = vrot.lane.b32.xlu1 %v5013_v21, %s4070_s14  ;;  %2715 = vrot.lane.b32.xlu0 %v4462_v17, %s4071_s15 }
 0x24c   : > { %v5162_v0 = vpop.permute.xlu1 %1615  ;;  %v5164_v56 = vpop.permute.xlu0 %2379 }
 0x24d   : > { %6547 = vst [vmem:[#allocation146_spill] sm:$0xff] %v5162_v0  ;;  %6548 = vst [vmem:[#allocation147_spill] sm:$0xff] %v5164_v56 }
 0x24e   : > { %2717 = vrot.lane.b32.xlu1 %v4474_v27, %s4071_s15  ;;  %2557 = vrot.lane.b32.xlu0 %v5041_v22, %s4070_s14 }
 0x250   : > { %v5170_v6 = vpop.permute.xlu1 %1647  ;;  %v5172_v26 = vpop.permute.xlu0 %1617 }
 0x251   : > { %6549 = vst [vmem:[#allocation148_spill] sm:$0xff] %v5170_v6  ;;  %6550 = vst [vmem:[#allocation149_spill] sm:$0xff] %v5172_v26 }
 0x252   : > { %2559 = vrot.lane.b32.xlu1 %v5053_v30, %s4070_s14  ;;  %2719 = vrot.lane.b32.xlu0 %v4486_v33, %s4071_s15 }
 0x254   : > { %v5178_v17 = vpop.permute.xlu1 %2241  ;;  %v5180_v45 = vpop.permute.xlu0 %1649 }
 0x255   : > { %6551 = vst [vmem:[#allocation150_spill] sm:$0xff] %v5178_v17  ;;  %6552 = vst [vmem:[#allocation151_spill] sm:$0xff] %v5180_v45  ;;  %v3984_v45 = vld [vmem:[#allocation2 + $0x1e8] sm:$0xff] }
 0x256   : > { %2721 = vrot.lane.b32.xlu1 %v3982_v51, %s4071_s15  ;;  %2561 = vrot.lane.b32.xlu0 %v4399_v39, %s4070_s14  ;;  %v6733_v17 = vld [vmem:[#allocation71_spill] sm:$0xff] }
 0x258   : > { %v5185_v27 = vpop.permute.xlu1 %2273  ;;  %v5187_v6 = vpop.permute.xlu0 %2243 }
 0x259   : > { %6553 = vst [vmem:[#allocation152_spill] sm:$0xff] %v5185_v27  ;;  %6554 = vst [vmem:[#allocation153_spill] sm:$0xff] %v5187_v6 }
 0x25a   : > { %2563 = vrot.lane.b32.xlu1 %v4479_v1, %s4070_s14  ;;  %2723 = vrot.lane.b32.xlu0 %v3983_v18, %s4071_s15  ;;  %v3985_v1 = vld [vmem:[#allocation2 + $0xa0] sm:$0xff] }
 0x25c   : > { %v5192_v33 = vpop.permute.xlu1 %2079  ;;  %v5194_v11 = vpop.permute.xlu0 %2275 }
 0x25d   : > { %6555 = vst [vmem:[#allocation154_spill] sm:$0xff] %v5192_v33  ;;  %6556 = vst [vmem:[#allocation155_spill] sm:$0xff] %v5194_v11  ;;  %v3986_v11 = vld [vmem:[#allocation2 + $0x1d8] sm:$0xff]  ;;  %v6622_v33 = vld [vmem:[#allocation99_spill] sm:$0xff] }
 0x25e   : > { %2725 = vrot.lane.b32.xlu1 %v3984_v45, %s4071_s15  ;;  %2565 = vrot.lane.b32.xlu0 %v4501_v44, %s4070_s14  ;;  %v2352_v60 = vsel %vm1815_vm0, %v6622_v33, %v6621_v8  ;;  %v6626_v8 = vld [vmem:[#allocation98_spill] sm:$0xff] }
 0x260   : > { %v5199_v51 = vpop.permute.xlu1 %2111  ;;  %v5201_v27 = vpop.permute.xlu0 %2081 }
 0x261   : > { %6557 = vst [vmem:[#allocation156_spill] sm:$0xff] %v5199_v51  ;;  %6558 = vst [vmem:[#allocation157_spill] sm:$0xff] %v5201_v27  ;;  %v2827_v27 = vld [vmem:[#allocation2 + $0x50] sm:$0xff] }
 0x262   : > { %2567 = vrot.lane.b32.xlu1 %v4552_v63, %s4070_s14  ;;  %2727 = vrot.lane.b32.xlu0 %v3985_v1, %s4071_s15  ;;  %v3987_v63 = vld [vmem:[#allocation2 + $0x1e0] sm:$0xff]  ;;  %v2898_v56 = vrot.slane %v2827_v27, 1 }
 0x264   : > { %v5206_v18 = vpop.permute.xlu1 %1909  ;;  %v5208_v39 = vpop.permute.xlu0 %2113 }
 0x265   : > { %6559 = vst [vmem:[#allocation158_spill] sm:$0xff] %v5206_v18  ;;  %6560 = vst [vmem:[#allocation159_spill] sm:$0xff] %v5208_v39  ;;  %v2826_v18 = vld [vmem:[#allocation2 + $0x178] sm:$0xff] }
 0x266   : > { %2729 = vrot.lane.b32.xlu1 %v3986_v11, %s4071_s15  ;;  %2569 = vrot.lane.b32.xlu0 %v4565_v12, %s4070_s14  ;;  %v2896_v41 = vrot.slane %v2826_v18, 1 }
 0x268   : > { %v5213_v45 = vpop.permute.xlu1 %1941  ;;  %v5215_v51 = vpop.permute.xlu0 %1911 }
 0x269   : > { %6561 = vst [vmem:[#allocation160_spill] sm:$0xff] %v5213_v45  ;;  %6562 = vst [vmem:[#allocation161_spill] sm:$0xff] %v5215_v51 }
 0x26a   : > { %2571 = vrot.lane.b32.xlu1 %v4643_v32, %s4070_s14  ;;  %2731 = vrot.lane.b32.xlu0 %v3987_v63, %s4071_s15  ;;  %v844_v63 = vlaneseq }
 0x26c   : > { %v5220_v1 = vpop.permute.xlu1 %2381  ;;  %v5222_v44 = vpop.permute.xlu0 %1943 }
 0x26d   : > { %6563 = vst [vmem:[#allocation162_spill] sm:$0xff] %v5220_v1  ;;  %6564 = vst [vmem:[#allocation163_spill] sm:$0xff] %v5222_v44 }
 0x26e   : > { %2403 = vrot.lane.b32.xlu1 %v4684_v36, %s4069_s13  ;;  %2573 = vrot.lane.b32.xlu0 %v4660_v16, %s4070_s14  ;;  %v5244_v36 = vshrl.u32 %v844_v63, 7  ;;  %v1261_v16 = vld [vmem:[#allocation2 + $0x98] sm:$0x80] }
 0x26f   : > { %v1424_v12 = vrot.slane %v1261_v16, 7 }
 0x270   : > { %v5228_v11 = vpop.permute.xlu1 %1619  ;;  %v5230_v45 = vpop.permute.xlu0 %2383  ;;  %6569 = vst [vmem:[#allocation168_spill] sm:$0xff] %v5244_v36  ;;  %v853_v22 = vadd.s32 64, %v5244_v36  ;;  %v5291_v26 = vadd.s32 136, %v5244_v36  ;;  %v5322_v51 = vadd.s32 144, %v5244_v36  ;;  %v5473_v13 = vadd.s32 88, %v5244_v36 }
 0x271   : > { %6565 = vst [vmem:[#allocation164_spill] sm:$0xff] %v5228_v11  ;;  %6566 = vst [vmem:[#allocation165_spill] sm:$0xff] %v5230_v45 }
 0x272   : > { %2733 = vrot.lane.b32.xlu1 %v4402_v42, %s4071_s15  ;;  %2401 = vrot.lane.b32.xlu0 %v4672_v47, %s4069_s13  ;;  %v881_v47 = vand.u32 15, %v5244_v36  ;;  %6579 = vst [vmem:[#allocation176_spill] sm:$0xff] %v5291_v26  ;;  %6590 = vst [vmem:[#allocation181_spill] sm:$0xff] %v5322_v51  ;;  %v5343_v51 = vld [vmem:[#allocation2 + $0x190] sm:$0xff] }
 0x273   : > { %v2828_v26 = vld [vmem:[#allocation2 + $0x170] sm:$0xff] }
 0x274   : > { %v5236_v39 = vpop.permute.xlu1 %2245  ;;  %v5238_v44 = vpop.permute.xlu0 %1621  ;;  %vm5272_vm2 = vcmp.ge.s32.totalorder %v881_v47, 1  ;;  %v5286_v47 = vadd.s32 120, %v5244_v36 }
 0x275   : > { %6567 = vst [vmem:[#allocation166_spill] sm:$0xff] %v5236_v39  ;;  %6568 = vst [vmem:[#allocation167_spill] sm:$0xff] %v5238_v44  ;;  %v848_v44 = vadd.s32 24, %v5244_v36 }
 0x276   : > { %2575 = vrot.lane.b32.xlu1 %v4739_v10, %s4070_s14  ;;  %2735 = vrot.lane.b32.xlu0 %v4414_v49, %s4071_s15  ;;  %v847_v10 = vadd.s32 16, %v5244_v36  ;;  %v849_v49 = vadd.s32 32, %v5244_v36  ;;  %6578 = vst [vmem:[#allocation175_spill] sm:$0xff] %v5286_v47 }
 0x278   : > { %v5246_v32 = vpop.permute.xlu1 %2277  ;;  %v5248_v42 = vpop.permute.xlu0 %2247  ;;  %v895_v39 = vand.u32 15, %v847_v10  ;;  %v909_v11 = vand.u32 15, %v849_v49  ;;  %v3989_v10 = vld [vmem:[#allocation2 + $0x1a8] sm:$0xff]  ;;  %v902_v49 = vand.u32 15, %v848_v44 }
 0x279   : > { %6570 = vst [vmem:[#allocation169_spill] sm:$0xff] %v5246_v32  ;;  %6571 = vst [vmem:[#allocation170_spill] sm:$0xff] %v5248_v42  ;;  %v5261_v32 = vld [vmem:[#allocation2 + $0x240] sm:$0xff] }
 0x27a   : > { %2407 = vrot.lane.b32.xlu1 %v4780_v48, %s4069_s13  ;;  %2577 = vrot.lane.b32.xlu0 %v4756_v59, %s4070_s14  ;;  %v5264_v42 = vrot.slane %v5261_v32, 7  ;;  %v851_v48 = vadd.s32 48, %v5244_v36  ;;  %v846_v59 = vadd.s32 8, %v5244_v36  ;;  %vm5299_vm3 = vcmp.ge.s32.totalorder %v895_v39, 1  ;;  %v6691_v39 = vld [vmem:[#allocation123_spill] sm:$0xff] }
 0x27b   : > { %vm5303_vm4 = vcmp.ge.s32.totalorder %v909_v11, 1  ;;  %vm5334_vm7 = vcmp.le.s32.totalorder %v902_v49, 14  ;;  %v2824_v11 = vld [vmem:[#allocation2 + $0x150] sm:$0xff] }
 0x27c   : > { %v5257_v63 = vpop.permute.xlu1 %2083  ;;  %v5259_v30 = vpop.permute.xlu0 %2279  ;;  %v2821_v49 = vld [vmem:[#allocation2 + $0x30] sm:$0xfe] }
 0x27d   : > { %6572 = vst [vmem:[#allocation171_spill] sm:$0xff] %v5257_v63  ;;  %6573 = vst [vmem:[#allocation172_spill] sm:$0xff] %v5259_v30  ;;  %v1426_v30 = vsel %vm1423_vm1, %v1424_v12, %v5264_v42  ;;  %v888_v12 = vand.u32 15, %v846_v59 }
 0x27e   : > { %2737 = vrot.lane.b32.xlu1 %v4423_v53, %s4071_s15  ;;  %2405 = vrot.lane.b32.xlu0 %v4768_v23, %s4069_s13  ;;  %v923_v53 = vand.u32 15, %v851_v48  ;;  %v855_v23 = vadd.s32 80, %v5244_v36  ;;  %v1521_v45 = vsel %vm5272_vm2, %v1426_v30, 0.0  ;;  %v937_v48 = vand.u32 15, %v853_v22 }
 0x27f   : > { %v5308_v30 = vadd.s32 160, %v5244_v36  ;;  %v3997_v22 = vadd.low.f32.bf16 %v1521_v45, %v4579_v31  ;;  %vm5324_vm6 = vcmp.le.s32.totalorder %v888_v12, 14  ;;  %v2822_v45 = vld [vmem:[#allocation2 + $0x1f0] sm:$0xff] }
 0x280   : > { %v5280_v21 = vpop.permute.xlu1 %2115  ;;  %v5282_v6 = vpop.permute.xlu0 %1915  ;;  %vm5316_vm5 = vcmp.ge.s32.totalorder %v923_v53, 1  ;;  %v2823_v53 = vld [vmem:[#allocation2 + $0x60] sm:$0xff]  ;;  %vm5338_vm8 = vcmp.ge.s32.totalorder %v937_v48, 1  ;;  %v3092_v12 = vld [vmem:[%s5621_s18 + $0x70] sm:$0xf] }
 0x281   : > { %6576 = vst [vmem:[#allocation173_spill] sm:$0xff] %v5280_v21  ;;  %6577 = vst [vmem:[#allocation174_spill] sm:$0xff] %v5282_v6  ;;  %v5297_v21 = vadd.s32 104, %v5244_v36  ;;  %v5351_v48 = vadd.f32 %v3997_v22, %v4577_v29  ;;  %v2890_v0 = vrot.slane %v2823_v53, 1  ;;  %v6604_v29 = vld [vmem:[#allocation77_spill] sm:$0xff]  ;;  %v2892_v22 = vrot.slane %v2824_v11, 1 }
 0x282   : > { %2579 = vrot.lane.b32.xlu1 %v4835_v35, %s4070_s14  ;;  %2739 = vrot.lane.b32.xlu0 %v3989_v10, %s4071_s15  ;;  %6585 = vst [vmem:[#allocation178_spill] sm:$0xff] %v5308_v30  ;;  %v850_v35 = vadd.s32 40, %v5244_v36  ;;  %v951_v10 = vand.u32 15, %v855_v23  ;;  %v6593_v23 = vmov 0  ;;  %v2887_v53 = vrot.slane %v2821_v49, 1  ;;  %v6610_v49 = vld [vmem:[#allocation9_spill] sm:$0xff] }
 0x283   : > { %6580 = vst [vmem:[#allocation177_spill] sm:$0xff] %v5297_v21  ;;  %v6594_v23 = vsel %vm5334_vm7, 4294967295, %v6593_v23  ;;  %v2900_v11 = vrot.slane %v2828_v26, 1  ;;  %v1525_v27 = vsel %vm5303_vm4, %v6610_v49, 0.0  ;;  %v6611_v26 = vmov 0 }
 0x284   : > { %v5311_v24 = vpop.permute.xlu1 %1913  ;;  %v5313_v44 = vpop.permute.xlu0 %2085  ;;  %6595 = vst [vmem:[#allocation182_spill] sm:$0xff] %v6594_v23  ;;  %v916_v1 = vand.u32 15, %v850_v35  ;;  %vm5353_vm9 = vcmp.ge.s32.totalorder %v951_v10, 1  ;;  %v5357_v35 = vld [vmem:[#allocation2 + $0xb0] sm:$0xff]  ;;  %v2894_v10 = vrot.slane %v5343_v51, 1  ;;  %v5439_v2 = vsel %vm1815_vm0, %v2890_v0, %v2892_v22  ;;  %v6628_v51 = vld [vmem:[#allocation18_spill] sm:$0xff] }
 0x285   : > { %6586 = vst [vmem:[#allocation179_spill] sm:$0xff] %v5311_v24  ;;  %6587 = vst [vmem:[#allocation180_spill] sm:$0xff] %v5313_v44  ;;  %v857_v44 = vadd.s32 96, %v5244_v36  ;;  %v2888_v24 = vrot.slane %v2822_v45, 1  ;;  %v3998_v45 = vadd.high.f32.bf16 %v5264_v42, %v4579_v31  ;;  %v2159_v6 = vsel %vm5338_vm8, %v5046_v9, 0.0 }
 0x286   : > { %2411 = vrot.lane.b32.xlu1 %v4876_v43, %s4069_s13  ;;  %2581 = vrot.lane.b32.xlu0 %v4852_v28, %s4070_s14  ;;  %v852_v43 = vadd.s32 56, %v5244_v36  ;;  %6602 = vst [vmem:[#allocation185_spill] sm:$0xff] %v5357_v35  ;;  %vm5370_vm10 = vcmp.le.s32.totalorder %v916_v1, 14  ;;  %v5399_v49 = vsel %vm1815_vm0, %v2892_v22, %v2894_v10  ;;  %6623 = vst [vmem:[#allocation99_spill] sm:$0xff] %v5439_v2 }
 0x287   : > { %v5386_v1 = vsel %vm1815_vm0, %v2888_v24, %v2890_v0  ;;  %6615 = vst [vmem:[#allocation187_spill] sm:$0xff] %v5399_v49  ;;  %v2346_v0 = vld [vmem:[#allocation2 + $0x40] sm:$0x1]  ;;  %v5456_v33 = vsel %vm1815_vm0, %v2894_v10, %v2896_v41  ;;  %v6668_v49 = vld [vmem:[#allocation66_spill] sm:$0xff] }
 0x288   : > { %v5346_v63 = vpop.permute.xlu1 %2087  ;;  %v5348_v28 = vpop.permute.xlu0 %2117 }
 0x289   : > { %6598 = vst [vmem:[#allocation183_spill] sm:$0xff] %v5346_v63  ;;  %6599 = vst [vmem:[#allocation184_spill] sm:$0xff] %v5348_v28  ;;  %v1430_v63 = vsel %vm1423_vm1, %v5264_v42, %v6603_v7  ;;  %v965_v28 = vand.u32 15, %v857_v44  ;;  %v930_v44 = vand.u32 15, %v852_v43  ;;  %v5409_v43 = vsel %vm1815_vm0, %v2887_v53, %v2888_v24  ;;  %v6711_v7 = vld [vmem:[#allocation132_spill] sm:$0xff] }
 0x28a   : > { %2741 = vrot.lane.b32.xlu1 %v3990_v38, %s4071_s15  ;;  %2409 = vrot.lane.b32.xlu0 %v6604_v29, %s4069_s13  ;;  %v1523_v31 = vsel %vm5299_vm3, %v1430_v63, 0.0  ;;  %v6614_v29 = vld [vmem:[#allocation94_spill] sm:$0xff]  ;;  %v6619_v24 = vrot.slane %v5357_v35, 1 }
 0x28b   : > { %vm5391_vm11 = vcmp.ge.s32.totalorder %v965_v28, 1  ;;  %v3991_v63 = vld [vmem:[#allocation2 + $0x160] sm:$0xff]  ;;  %v5406_v28 = vadd.s32 112, %v5244_v36  ;;  %vm5414_vm12 = vcmp.le.s32.totalorder %v930_v44, 14  ;;  %v5466_v44 = vsel %vm1815_vm0, %v2898_v56, %v2900_v11 }
 0x28c   : > { %v5374_v38 = vpop.permute.xlu1 %2385  ;;  %v5376_v47 = vpop.permute.xlu0 %2387  ;;  %v6612_v26 = vsel %vm5391_vm11, 4294967295, %v6611_v26  ;;  %v5429_v53 = vsel %vm1815_vm0, %v2900_v11, %v6619_v24  ;;  %v6625_v24 = vld [vmem:[#allocation21_spill] sm:$0xff]  ;;  %6629 = vst [vmem:[#allocation98_spill] sm:$0xff] %v5466_v44  ;;  %v6632_v44 = vld [vmem:[#allocation16_spill] sm:$0xff] }
 0x28d   : > { %6608 = vst [vmem:[#allocation77_spill] sm:$0xff] %v5374_v38  ;;  %6609 = vst [vmem:[#allocation186_spill] sm:$0xff] %v5376_v47  ;;  %v854_v47 = vadd.s32 72, %v5244_v36  ;;  %v2151_v35 = vsel %vm5272_vm2, %v6625_v24, 0.0  ;;  %v1978_v24 = vsel %vm5324_vm6, %v6628_v51, 0.0  ;;  %v2525_v55 = vrot.slane %v6632_v44, 7 }
 0x28e   : > { %6613 = vst [vmem:[#allocation9_spill] sm:$0xff] %v6612_v26  ;;  %2583 = vrot.lane.b32.xlu1 %v6614_v29, %s4070_s14  ;;  %2743 = vrot.lane.b32.xlu0 %v3991_v63, %s4071_s15  ;;  %v5412_v29 = vsel %vm1815_vm0, %v2896_v41, %v2898_v56  ;;  %6620 = vst [vmem:[#allocation189_spill] sm:$0xff] %v5429_v53  ;;  %v2183_v40 = vadd.f32 %v2151_v35, %v5351_v48  ;;  %v6631_v56 = vld [vmem:[#allocation31_spill] sm:$0xff]  ;;  %v2355_v53 = vrot.slane %v2346_v0, 1  ;;  %v6635_v51 = vld [vmem:[#allocation102_spill] sm:$0xff] }
 0x28f   : > { %6616 = vst [vmem:[#allocation188_spill] sm:$0xff] %v5412_v29  ;;  %6627 = vst [vmem:[#allocation21_spill] sm:$0xff] %v5456_v33  ;;  %v944_v10 = vand.u32 15, %v854_v47  ;;  %v1980_v11 = vsel %vm5334_vm7, %v6631_v56, 0.0  ;;  %v6633_v47 = vld [vmem:[#allocation7_spill] sm:$0xff]  ;;  %v6637_v35 = vld [vmem:[#allocation25_spill] sm:$0xff] }
 0x290   : > { %v5419_v18 = vpop.permute.xlu1 %2535  ;;  %v5421_v38 = vpop.permute.xlu0 %2533  ;;  %v5491_v48 = vld [vmem:[#allocation2 + $0x1b0] sm:$0xff]  ;;  %v6640_v0 = vld [vmem:[#allocation54_spill] sm:$0xff]  ;;  %v6681_v59 = vand.u32 15, %v5406_v28 }
 0x291   : > { %6636 = vst [vmem:[#allocation18_spill] sm:$0xff] %v5491_v48  ;;  %v6638_v56 = vld [vmem:[#allocation35_spill] sm:$0xff]  ;;  %vm5514_vm13 = vcmp.le.s32.totalorder %v944_v10, 14  ;;  %v2528_v10 = vsel %vm1423_vm1, %v2525_v55, %v5264_v42  ;;  %v6663_v48 = vld [vmem:[#allocation96_spill] sm:$0xff] }
 0x292   : > { %2415 = vrot.lane.b32.xlu1 %v2352_v60, %s4069_s13  ;;  %2585 = vrot.lane.b32.xlu0 %v6626_v8, %s4070_s14  ;;  %v6630_v8 = vld [vmem:[#allocation15_spill] sm:$0xff]  ;;  %v2353_v60 = vrot.slane %v6632_v44, 1  ;;  %v1687_v26 = vadd.f32 %v6638_v56, %v1525_v27  ;;  %v1982_v44 = vsel %vm5370_vm10, %v6640_v0, 0.0  ;;  %v6644_v56 = vld [vmem:[#allocation17_spill] sm:$0xff]  ;;  %v6662_v0 = vld [vmem:[#allocation58_spill] sm:$0xff]  ;;  %v2157_v16 = vsel %vm5316_vm5, %v6663_v48, 0.0 }
 0x293   : > { %v1685_v41 = vadd.f32 %v6630_v8, %v1523_v31  ;;  %v2010_v31 = vadd.f32 %v3998_v45, %v1978_v24  ;;  %v6634_v8 = vld [vmem:[#allocation24_spill] sm:$0xff]  ;;  %v2153_v45 = vsel %vm5299_vm3, %v6639_v50, 0.0  ;;  %v6641_v24 = vld [vmem:[#allocation26_spill] sm:$0xff]  ;;  %v2313_v36 = vadd.f32 %v6644_v56, %v2183_v40  ;;  %v6653_v56 = vld [vmem:[#allocation73_spill] sm:$0xff] }
 0x294   : > { %v5475_v22 = vpop.permute.xlu1 %2693  ;;  %v5477_v29 = vpop.permute.xlu0 %2537  ;;  %v1686_v33 = vadd.f32 %v6634_v8, %v6633_v47  ;;  %v6642_v8 = vld [vmem:[#allocation40_spill] sm:$0xff]  ;;  %v6645_v50 = vld [vmem:[#allocation50_spill] sm:$0xff]  ;;  %v2356_v34 = vsel %vm1815_vm0, %v2353_v60, %v2355_v53  ;;  %v2526_v53 = vsel %vm1423_vm1, %v5010_v57, %v2525_v55  ;;  %vm5606_vm15 = vcmp.ge.s32.totalorder %v6681_v59, 1  ;;  %v6684_v28 = vld [vmem:[#allocation107_spill] sm:$0xff] }
 0x295   : > { %v2011_v19 = vadd.f32 %v6637_v35, %v1685_v41  ;;  %v2184_v47 = vadd.f32 %v6641_v24, %v2010_v31  ;;  %v2155_v41 = vsel %vm5303_vm4, %v6643_v54, 0.0  ;;  %v2013_v21 = vadd.f32 %v6645_v50, %v1687_v26  ;;  %v3993_v40 = vld [vmem:[#allocation2 + $0x38] sm:$0xff]  ;;  %v3083_v59 = vld [vmem:[%s5621_s18 + $0x4c] sm:$0xf] }
 0x296   : > { %2745 = vrot.lane.b32.xlu1 %v3992_v46, %s4071_s15  ;;  %2413 = vrot.lane.b32.xlu0 %v6635_v51, %s4069_s13  ;;  %v2012_v46 = vadd.f32 %v1980_v11, %v1686_v33  ;;  %v1688_v51 = vadd.f32 %v6642_v8, %v4490_v3  ;;  %v6646_v33 = vld [vmem:[#allocation48_spill] sm:$0xff]  ;;  %v958_v54 = vand.u32 15, %v5473_v13  ;;  %v6652_v13 = vld [vmem:[#allocation30_spill] sm:$0xff]  ;;  %v6732_v63 = vld [vmem:[#allocation147_spill] sm:$0xff] }
 0x297   : > { %v2185_v31 = vadd.f32 %v2153_v45, %v2011_v19  ;;  %v6649_v8 = vld [vmem:[#allocation116_spill] sm:$0xff]  ;;  %v2187_v26 = vadd.f32 %v2155_v41, %v2013_v21  ;;  %v6650_v19 = vrot.slane %v4530_v52, 1 }
 0x298   : > { %v5507_v35 = vpop.permute.xlu1 %2697  ;;  %v2696_v27 = vpop.permute.xlu0 %2695  ;;  %v2186_v11 = vadd.f32 %v6646_v33, %v2012_v46  ;;  %v2014_v24 = vadd.f32 %v1982_v44, %v1688_v51  ;;  %v6651_v44 = vld [vmem:[#allocation22_spill] sm:$0xff]  ;;  %v2485_v51 = vadd.f32 %v6652_v13, %v2313_v36  ;;  %v6654_v33 = vld [vmem:[#allocation79_spill] sm:$0xff]  ;;  %v6655_v57 = vld [vmem:[#allocation36_spill] sm:$0xff]  ;;  %v6657_v36 = vsel %vm5316_vm5, %v4543_v58, 0.0 }
 0x299   : > { %v2354_v45 = vsel %vm1815_vm0, %v6650_v19, %v2353_v60  ;;  %v2314_v46 = vadd.f32 %v6651_v44, %v2184_v47  ;;  %v1984_v21 = vsel %vm5414_vm12, %v6654_v33, 0.0  ;;  %v2454_v52 = vsel %vm5324_vm6, %v6655_v57, 0.0  ;;  %v6656_v60 = vld [vmem:[#allocation47_spill] sm:$0xff]  ;;  %v6660_v44 = vld [vmem:[#allocation44_spill] sm:$0xff] }
 0x29a   : > { %2587 = vrot.lane.b32.xlu1 %v6649_v8, %s4070_s14  ;;  %2747 = vrot.lane.b32.xlu0 %v3993_v40, %s4071_s15  ;;  %v2188_v50 = vadd.f32 %v6653_v56, %v2014_v24  ;;  %v2627_v55 = vsel %vm5272_vm2, %v6656_v60, 0.0  ;;  %v6658_v47 = vld [vmem:[#allocation59_spill] sm:$0xff]  ;;  %v6659_v40 = vld [vmem:[#allocation62_spill] sm:$0xff]  ;;  %v2316_v13 = vadd.f32 %v6660_v44, %v2186_v11  ;;  %v2456_v57 = vsel %vm5334_vm7, %v6662_v0, 0.0 }
 0x29b   : > { %v1689_v24 = vadd.f32 %v6658_v47, %v6657_v36  ;;  %v1690_v19 = vadd.f32 %v6659_v40, %v4555_v4  ;;  %v6661_v56 = vld [vmem:[#allocation39_spill] sm:$0xff]  ;;  %v2486_v40 = vadd.f32 %v2454_v52, %v2314_v46  ;;  %v2659_v44 = vadd.f32 %v2627_v55, %v2485_v51  ;;  %v6674_v51 = vld [vmem:[#allocation84_spill] sm:$0xff] }
 0x29c   : > { %v2540_v41 = vpop.permute.xlu1 %2539  ;;  %v2700_v8 = vpop.permute.xlu0 %2699  ;;  %v2315_v33 = vadd.f32 %v6661_v56, %v2185_v31  ;;  %v6664_v58 = vld [vmem:[#allocation75_spill] sm:$0xff]  ;;  %v2318_v23 = vadd.f32 %v6668_v49, %v2188_v50  ;;  %v2488_v62 = vadd.f32 %v2456_v57, %v2316_v13  ;;  %vm5567_vm14 = vcmp.le.s32.totalorder %v958_v54, 14  ;;  %v6676_v57 = vld [vmem:[#allocation106_spill] sm:$0xff] }
 0x29d   : > { %v2015_v60 = vadd.f32 %v6664_v58, %v1689_v24  ;;  %v2016_v36 = vadd.f32 %v1984_v21, %v1690_v19  ;;  %v6665_v4 = vld [vmem:[#allocation63_spill] sm:$0xff]  ;;  %v6670_v21 = vld [vmem:[#allocation101_spill] sm:$0xff]  ;;  %v6673_v46 = vsel %vm5338_vm8, %v4630_v5, 0.0  ;;  %v2629_v49 = vsel %vm5299_vm3, %v5419_v18, 0.0 }
 0x29e   : > { %2419 = vrot.lane.b32.xlu1 %v2356_v34, %s4069_s13  ;;  %2589 = vrot.lane.b32.xlu0 %v2526_v53, %s4070_s14  ;;  %v2317_v47 = vadd.f32 %v6665_v4, %v2187_v26  ;;  %v6666_v11 = vld [vmem:[#allocation83_spill] sm:$0xff]  ;;  %v6669_v53 = vld [vmem:[#allocation80_spill] sm:$0xff]  ;;  %v1691_v52 = vadd.f32 %v6674_v51, %v6673_v46  ;;  %v2660_v50 = vadd.f32 %v5421_v38, %v2486_v40  ;;  %v1986_v5 = vsel %vm5514_vm13, %v6676_v57, 0.0  ;;  %v6755_v26 = vld [vmem:[#allocation113_spill] sm:$0xff] }
 0x29f   : > { %v2458_v31 = vsel %vm5370_vm10, %v6666_v11, 0.0  ;;  %v6667_v0 = vld [vmem:[#allocation55_spill] sm:$0xff]  ;;  %v2189_v24 = vadd.f32 %v2157_v16, %v2015_v60  ;;  %v2190_v19 = vadd.f32 %v6670_v21, %v2016_v36  ;;  %v6678_v36 = vld [vmem:[#allocation93_spill] sm:$0xff]  ;;  %v2662_v9 = vadd.f32 %v5477_v29, %v2488_v62  ;;  %v6688_v46 = vld [vmem:[#allocation112_spill] sm:$0xff] }
 0x2a0   : > { %v2487_v56 = vadd.f32 %v6667_v0, %v2315_v33  ;;  %v2702_v48 = vpop.permute.xlu1 %2701  ;;  %v2542_v2 = vpop.permute.xlu0 %2541  ;;  %v2519_v34 = vld [vmem:[#allocation2 + $0xa8] sm:$0x7f]  ;;  %v2489_v37 = vadd.f32 %v6669_v53, %v2317_v47  ;;  %v2490_v55 = vadd.f32 %v2458_v31, %v2318_v23  ;;  %v2789_v23 = vadd.f32 %v5475_v22, %v2659_v44  ;;  %v6679_v47 = vld [vmem:[#allocation88_spill] sm:$0xff]  ;;  %v6686_v21 = vld [vmem:[#allocation109_spill] sm:$0xff] }
 0x2a1   : > { %v3994_v13 = vld [vmem:[#allocation2 + $0x108] sm:$0xff]  ;;  %v2529_v18 = vrot.slane %v2519_v34, 7  ;;  %v2790_v58 = vadd.f32 %v2696_v27, %v2660_v50  ;;  %v2320_v4 = vadd.f32 %v6678_v36, %v2190_v19  ;;  %v2319_v11 = vadd.f32 %v6679_v47, %v2189_v24  ;;  %v6690_v50 = vld [vmem:[#allocation136_spill] sm:$0xff]  ;;  %v3072_v36 = vld [vmem:[%s5621_s18 + $0x20] sm:$0xf] }
 0x2a2   : > { %2749 = vrot.lane.b32.xlu1 %v3994_v13, %s4071_s15  ;;  %2417 = vrot.lane.b32.xlu0 %v2354_v45, %s4069_s13  ;;  %v6675_v54 = vld [vmem:[#allocation87_spill] sm:$0xff]  ;;  %v2631_v45 = vsel %vm5303_vm4, %v2540_v41, 0.0  ;;  %v2661_v31 = vadd.f32 %v2629_v49, %v2487_v56  ;;  %v6680_v0 = vld [vmem:[#allocation110_spill] sm:$0xff]  ;;  %v3953_v62 = vpack.i.bf16 %v5261_v32, %v5261_v32  ;;  %v2792_v34 = vadd.f32 %v2700_v8, %v2662_v9  ;;  %v3078_v9 = vld [vmem:[%s5621_s18 + $0x38] sm:$0xf] }
 0x2a3   : > { %v1692_v33 = vadd.f32 %v6675_v54, %v4646_v14  ;;  %v6677_v16 = vld [vmem:[#allocation103_spill] sm:$0xff]  ;;  %v2460_v22 = vsel %vm5414_vm12, %v6680_v0, 0.0  ;;  %v2663_v56 = vadd.f32 %v2631_v45, %v2489_v37  ;;  %v2530_v53 = vsel %vm1423_vm1, %v5264_v42, %v2529_v18  ;;  %v3065_v18 = vld [vmem:[%s5621_s18 + $0x4] sm:$0xf]  ;;  %v3070_v45 = vld [vmem:[%s5621_s18 + $0x18] sm:$0xf] }
 0x2a4   : > { %v2017_v38 = vadd.f32 %v6677_v16, %v1691_v52  ;;  %v5594_v60 = vpop.permute.xlu1 %2543  ;;  %v5596_v14 = vpop.permute.xlu0 %2703  ;;  %v3995_v44 = vld [vmem:[#allocation2 + $0x228] sm:$0xff]  ;;  %v2791_v29 = vadd.f32 %v5507_v35, %v2661_v31  ;;  %v6685_v24 = vsel %vm5353_vm9, %v4726_v25, 0.0  ;;  %v5630_v35 = vadd.f32 %v5409_v43, %v2789_v23  ;;  %v3068_v23 = vld [vmem:[%s5621_s18 + $0x10] sm:$0xf]  ;;  %v3077_v31 = vld [vmem:[%s5621_s18 + $0x34] sm:$0xf] }
 0x2a5   : > { %v2018_v40 = vadd.f32 %v1986_v5, %v1692_v33  ;;  %v1693_v32 = vadd.f32 %v6686_v21, %v6685_v24  ;;  %v6687_v37 = vsel %vm5324_vm6, %v5386_v1, 0.0  ;;  %v1694_v51 = vadd.f32 %v6688_v46, %v4742_v15  ;;  %v6689_v52 = vld [vmem:[#allocation114_spill] sm:$0xff]  ;;  %v6694_v57 = vld [vmem:[#allocation187_spill] sm:$0xff]  ;;  %v3080_v0 = vld [vmem:[%s5621_s18 + $0x40] sm:$0xf] }
 0x2a6   : > { %v2191_v27 = vadd.f32 %v2159_v6, %v2017_v38  ;;  %2591 = vrot.lane.b32.xlu1 %v2528_v10, %s4070_s14  ;;  %2751 = vrot.lane.b32.xlu0 %v3995_v44, %s4071_s15  ;;  %v2491_v10 = vadd.f32 %v6684_v28, %v2319_v11  ;;  %v5636_v42 = vadd.f32 %v6687_v37, %v2790_v58  ;;  %v2633_v30 = vsel %vm5316_vm5, %v5594_v60, 0.0  ;;  %v3066_v16 = vld [vmem:[%s5621_s18 + $0x8] sm:$0xf]  ;;  %v3067_v38 = vld [vmem:[%s5621_s18 + $0xc] sm:$0xf] }
 0x2a7   : > { %v2192_v25 = vadd.f32 %v5062_v61, %v2018_v40  ;;  %v2492_v1 = vadd.f32 %v2460_v22, %v2320_v4  ;;  %v1988_v43 = vsel %vm5567_vm14, %v5076_v20, 0.0  ;;  %v2161_v15 = vsel %vm5353_vm9, %v6690_v50, 0.0  ;;  %v6692_v20 = vld [vmem:[#allocation99_spill] sm:$0xff]  ;;  %v3069_v58 = vld [vmem:[%s5621_s18 + $0x14] sm:$0xf] }
 0x2a8   : > { %v5638_v8 = vpop.permute.xlu1 %2705  ;;  %v2546_v19 = vpop.permute.xlu0 %2545  ;;  %v2321_v49 = vadd.f32 %v6689_v52, %v2191_v27  ;;  %v2664_v61 = vadd.f32 %v2542_v2, %v2490_v55  ;;  %v2019_v13 = vadd.f32 %v6691_v39, %v1693_v32  ;;  %v5657_v54 = vadd.f32 %v6692_v20, %v2791_v29  ;;  %v3064_v55 = vld [vmem:[%s5621_s18] sm:$0xf]  ;;  %v3071_v60 = vld [vmem:[%s5621_s18 + $0x1c] sm:$0xf]  ;;  %v3073_v4 = vld [vmem:[%s5621_s18 + $0x24] sm:$0xf] }
 0x2a9   : > { %v6695_v5 = vsel %vm5334_vm7, %v6694_v57, 0.0  ;;  %v2793_v2 = vadd.f32 %v2702_v48, %v2663_v56  ;;  %v3074_v47 = vld [vmem:[%s5621_s18 + $0x28] sm:$0xf]  ;;  %v3075_v48 = vld [vmem:[%s5621_s18 + $0x2c] sm:$0xf]  ;;  %v3693_v56 = vpack.c.bf16 %v5630_v35, %v5630_v35  ;;  %v2020_v57 = vadd.f32 %v1988_v43, %v1694_v51 }
 0x2aa   : > { %3954 = vrot.lane.b32.xlu1 %v3953_v62, %s4071_s15  ;;  %2593 = vrot.lane.b32.xlu0 %v2530_v53, %s4070_s14  ;;  %v5663_v6 = vadd.f32 %v6695_v5, %v2792_v34  ;;  %v3076_v11 = vld [vmem:[%s5621_s18 + $0x30] sm:$0xf]  ;;  %v3079_v40 = vld [vmem:[%s5621_s18 + $0x3c] sm:$0xf]  ;;  %v3694_v34 = vpack.c.bf16 %v5636_v42, %v5636_v42  ;;  %v2665_v53 = vadd.f32 %v2633_v30, %v2491_v10  ;;  %v6696_v52 = vld [vmem:[#allocation118_spill] sm:$0xff]  ;;  %s6309_s14 = scalar_lea.hbm %s6351_s6, %s4157_s11  ;;  %s3515_s15 = scalar_lea.sflag [#allocation4], %s267_s28 }
 0x2ab   : > { %v3081_v22 = vld [vmem:[%s5621_s18 + $0x44] sm:$0xf]  ;;  %v3082_v27 = vld [vmem:[%s5621_s18 + $0x48] sm:$0xf]  ;;  %v3084_v44 = vld [vmem:[%s5621_s18 + $0x50] sm:$0xf]  ;;  %v2794_v28 = vadd.f32 %v5596_v14, %v2664_v61  ;;  %v5703_v35 = vadd.f32 %v6696_v52, %v2192_v25  ;;  %v2193_v50 = vadd.f32 %v2161_v15, %v2019_v13  ;;  %v2666_v52 = vadd.f32 %v2546_v19, %v2492_v1 }
 0x2ac   : > { %v3085_v62 = vld [vmem:[%s5621_s18 + $0x54] sm:$0xf]  ;;  %v3086_v29 = vld [vmem:[%s5621_s18 + $0x58] sm:$0xf]  ;;  %v2548_v24 = vpop.permute.xlu1 %2547  ;;  %v2708_v21 = vpop.permute.xlu0 %2707  ;;  %v3087_v32 = vld [vmem:[%s5621_s18 + $0x5c] sm:$0xf]  ;;  %v3695_v19 = vpack.c.bf16 %v5657_v54, %v5657_v54  ;;  %v3696_v1 = vpack.c.bf16 %v5663_v6, %v5663_v6  ;;  %v2795_v54 = vadd.f32 %v5638_v8, %v2665_v53 }
 0x2ad   : > { %v3088_v37 = vld [vmem:[%s5621_s18 + $0x60] sm:$0xf]  ;;  %v3089_v46 = vld [vmem:[%s5621_s18 + $0x64] sm:$0xf]  ;;  %v6701_v30 = vld [vmem:[#allocation168_spill] sm:$0xff]  ;;  %v2635_v39 = vsel %vm5338_vm8, %v2548_v24, 0.0  ;;  %v2323_v8 = vadd.f32 %v6711_v7, %v2193_v50 }
 0x2ae   : > { %v6697_v42 = vld [vmem:[#allocation177_spill] sm:$0xff]  ;;  %v5712_v61 = vadd.s32 128, %v6701_v30  ;;  %v3090_v20 = vld [vmem:[%s5621_s18 + $0x68] sm:$0xf]  ;;  %v3091_v33 = vld [vmem:[%s5621_s18 + $0x6c] sm:$0xf]  ;;  %3208 = vrot.lane.b32.xlu0 %v3693_v56, %s4072_s25  ;;  %3210 = vrot.lane.b32.xlu1 %v3694_v34, %s4072_s25  ;;  %v2796_v30 = vadd.f32 %v2708_v21, %v2666_v52 }
 0x2af   : > { %v6698_v10 = vand.u32 15, %v6697_v42  ;;  %v6702_v25 = vld [vmem:[#allocation126_spill] sm:$0xff]  ;;  %v6703_v15 = vld [vmem:[#allocation129_spill] sm:$0xff]  ;;  %v3093_v24 = vld [vmem:[%s5621_s18 + $0x74] sm:$0xf] }
 0x2b0   : > { %v2493_v5 = vadd.f32 %v6702_v25, %v2321_v49  ;;  %v2462_v13 = vsel %vm5514_vm13, %v6703_v15, 0.0  ;;  %v6705_v51 = vld [vmem:[#allocation67_spill] sm:$0xff]  ;;  %v6707_v49 = vld [vmem:[#allocation128_spill] sm:$0xff]  ;;  %v6708_v56 = vld [vmem:[#allocation21_spill] sm:$0xff] }
 0x2b1   : > { %vm5707_vm2 = vcmp.le.s32.totalorder %v6698_v10, 14  ;;  %v6706_v43 = vsel %vm5391_vm11, %v6705_v51, 0.0  ;;  %v5736_v34 = vadd.f32 %v6708_v56, %v2793_v2  ;;  %v3094_v25 = vld [vmem:[%s5621_s18 + $0x78] sm:$0xf]  ;;  %v3095_v15 = vld [vmem:[%s5621_s18 + $0x7c] sm:$0xf]  ;;  %v2710_v2 = vpop.permute.xlu1 %2709  ;;  %v2550_v56 = vpop.permute.xlu0 %2549 }
 0x2b2   : > { %v1695_v10 = vadd.f32 %v6707_v49, %v6706_v43  ;;  %v6709_v51 = vld [vmem:[#allocation188_spill] sm:$0xff]  ;;  %v2667_v6 = vadd.f32 %v2635_v39, %v2493_v5  ;;  %3096 = vst [vmem:[%s5700_s26] sm:$0xf] %v3064_v55  ;;  %3097 = vst [vmem:[%s5700_s26 + $0x4] sm:$0xf] %v3065_v18  ;;  %v6712_v55 = vld [vmem:[#allocation90_spill] sm:$0xff]  ;;  %3212 = vrot.lane.b32.xlu0 %v3695_v19, %s4072_s25  ;;  %3214 = vrot.lane.b32.xlu1 %v3696_v1, %s4072_s25  ;;  %s4005_s18 = sshll.u32 %s4073_s17, 4  ;;  %s4006_s18 = int_to_ptr.vmem [resolvable:$false] %s4005_s18 }
 0x2b3   : > { %v6710_v43 = vsel %vm5370_vm10, %v6709_v51, 0.0  ;;  %3098 = vst [vmem:[%s5700_s26 + $0x8] sm:$0xf] %v3066_v16  ;;  %3099 = vst [vmem:[%s5700_s26 + $0xc] sm:$0xf] %v3067_v38  ;;  %v1535_v18 = vsel %vm5606_vm15, %v6712_v55, 0.0  ;;  %v3697_v53 = vpack.c.bf16 %v5736_v34, %v5736_v34  ;;  %p4008_p0 = scmp.lt.s32.totalorder %s3533_s10, %s4006_s18 }
 0x2b4   : > { %v5744_v49 = vadd.f32 %v6710_v43, %v2794_v28  ;;  %3100 = vst [vmem:[%s5700_s26 + $0x10] sm:$0xf] %v3068_v23  ;;  %3101 = vst [vmem:[%s5700_s26 + $0x14] sm:$0xf] %v3069_v58  ;;  %v6713_v16 = vld [vmem:[#allocation190_spill] sm:$0xff]  ;;  %v6715_v23 = vld [vmem:[#allocation185_spill] sm:$0xff] }
 0x2b5   : > { %3102 = vst [vmem:[%s5700_s26 + $0x18] sm:$0xf] %v3070_v45  ;;  %3103 = vst [vmem:[%s5700_s26 + $0x1c] sm:$0xf] %v3071_v60  ;;  %v6714_v38 = vrot.slane %v6713_v16, 1  ;;  %v6716_v58 = vrot.slane %v6715_v23, 1  ;;  %v2494_v60 = vadd.f32 %v2462_v13, %v5703_v35  ;;  %v2712_v5 = vpop.permute.xlu0 %2711 }
 0x2b6   : > { %3104 = vst [vmem:[%s5700_s26 + $0x20] sm:$0xf] %v3072_v36  ;;  %3105 = vst [vmem:[%s5700_s26 + $0x24] sm:$0xf] %v3073_v4  ;;  %v6717_v36 = vld [vmem:[#allocation139_spill] sm:$0xff]  ;;  %v6728_v35 = vld [vmem:[#allocation98_spill] sm:$0xff]  ;;  %3216 = vrot.lane.b32.xlu0 %v3697_v53, %s4072_s25 }
 0x2b7   : > { %3106 = vst [vmem:[%s5700_s26 + $0x28] sm:$0xf] %v3074_v47  ;;  %3107 = vst [vmem:[%s5700_s26 + $0x2c] sm:$0xf] %v3075_v48  ;;  %v2905_v45 = vsel %vm1815_vm0, %v6716_v58, %v6714_v38  ;;  %v2194_v4 = vadd.f32 %v6717_v36, %v2020_v57  ;;  %v6718_v47 = vld [vmem:[#allocation140_spill] sm:$0xff]  ;;  %v2668_v28 = vadd.f32 %v2550_v56, %v2494_v60  ;;  %v6724_v21 = vld [vmem:[#allocation175_spill] sm:$0xff]  ;;  %v2552_v57 = vpop.permute.xlu1 %2551 }
 0x2b8   : > { %3108 = vst [vmem:[%s5700_s26 + $0x30] sm:$0xf] %v3076_v11  ;;  %3109 = vst [vmem:[%s5700_s26 + $0x34] sm:$0xf] %v3077_v31  ;;  %v2021_v48 = vadd.f32 %v6718_v47, %v1695_v10  ;;  %v993_v11 = vand.u32 15, %v5712_v61  ;;  %v6719_v31 = vld [vmem:[#allocation18_spill] sm:$0xff]  ;;  %v3022_v50 = vadd.f32 %v6728_v35, %v2795_v54 }
 0x2b9   : > { %3110 = vst [vmem:[%s5700_s26 + $0x38] sm:$0xf] %v3078_v9  ;;  %3111 = vst [vmem:[%s5700_s26 + $0x3c] sm:$0xf] %v3079_v40  ;;  %v6720_v9 = vrot.slane %v6719_v31, 1  ;;  %v6721_v40 = vmov %v6714_v38  ;;  %v6729_v61 = vld [vmem:[#allocation189_spill] sm:$0xff]  ;;  %v2554_v16 = vpop.permute.xlu0 %2553 }
 0x2ba   : > { %3112 = vst [vmem:[%s5700_s26 + $0x40] sm:$0xf] %v3080_v0  ;;  %3113 = vst [vmem:[%s5700_s26 + $0x44] sm:$0xf] %v3081_v22  ;;  %v2832_v22 = vld [vmem:[#allocation2 + $0xd0] sm:$0xff]  ;;  %v6730_v39 = vsel %vm5414_vm12, %v6729_v61, 0.0 }
 0x2bb   : > { %3114 = vst [vmem:[%s5700_s26 + $0x48] sm:$0xf] %v3082_v27  ;;  %3115 = vst [vmem:[%s5700_s26 + $0x4c] sm:$0xf] %v3083_v59  ;;  %v2907_v0 = vsel %vm1815_vm0, %v6721_v40, %v6720_v9  ;;  %v5799_v27 = vld [vmem:[#allocation2 + $0x180] sm:$0xff]  ;;  %v6722_v59 = vld [vmem:[#allocation144_spill] sm:$0xff]  ;;  %v2714_v55 = vpop.permute.xlu1 %2713 }
 0x2bc   : > { %3116 = vst [vmem:[%s5700_s26 + $0x50] sm:$0xf] %v3084_v44  ;;  %3117 = vst [vmem:[%s5700_s26 + $0x54] sm:$0xf] %v3085_v62  ;;  %v2495_v44 = vadd.f32 %v6722_v59, %v2323_v8  ;;  %v6723_v62 = vld [vmem:[#allocation154_spill] sm:$0xff]  ;;  %v5820_v13 = vld [vmem:[#allocation2 + $0xf8] sm:$0xff] }
 0x2bd   : > { %3118 = vst [vmem:[%s5700_s26 + $0x58] sm:$0xf] %v3086_v29  ;;  %3119 = vst [vmem:[%s5700_s26 + $0x5c] sm:$0xf] %v3087_v32  ;;  %v2163_v29 = vsel %vm5391_vm11, %v6723_v62, 0.0  ;;  %v6725_v32 = vand.u32 15, %v6724_v21 }
 0x2be   : > { %3120 = vst [vmem:[%s5700_s26 + $0x60] sm:$0xf] %v3088_v37  ;;  %3121 = vst [vmem:[%s5700_s26 + $0x64] sm:$0xf] %v3089_v46  ;;  %v3698_v46 = vpack.c.bf16 %v5744_v49, %v5744_v49  ;;  %v2637_v52 = vsel %vm5353_vm9, %v2552_v57, 0.0  ;;  %v2910_v10 = vrot.slane %v5799_v27, 1  ;;  %v2195_v34 = vadd.f32 %v2163_v29, %v2021_v48 }
 0x2bf   : > { %3122 = vst [vmem:[%s5700_s26 + $0x68] sm:$0xf] %v3090_v20  ;;  %3123 = vst [vmem:[%s5700_s26 + $0x6c] sm:$0xf] %v3091_v33  ;;  %vm5809_vm3 = vcmp.le.s32.totalorder %v6725_v32, 14  ;;  %v3023_v20 = vadd.f32 %v6730_v39, %v2796_v30  ;;  %v2797_v33 = vadd.f32 %v2710_v2, %v2667_v6  ;;  %v6731_v19 = vld [vmem:[#allocation143_spill] sm:$0xff]  ;;  %v3699_v2 = vpack.c.bf16 %v3022_v50, %v3022_v50  ;;  %v2556_v35 = vpop.permute.xlu1 %2555  ;;  %v2716_v50 = vpop.permute.xlu0 %2715 }
 0x2c0   : > { %3124 = vst [vmem:[%s5700_s26 + $0x70] sm:$0xf] %v3092_v12  ;;  %3125 = vst [vmem:[%s5700_s26 + $0x74] sm:$0xf] %v3093_v24  ;;  %v2798_v12 = vadd.f32 %v2712_v5, %v2668_v28  ;;  %v2908_v24 = vrot.slane %v2832_v22, 1  ;;  %v1990_v1 = vsel %vm5707_vm2, %v6731_v19, 0.0  ;;  %3218 = vrot.lane.b32.xlu1 %v3698_v46, %s4072_s25 }
 0x2c1   : > { %3126 = vst [vmem:[%s5700_s26 + $0x78] sm:$0xf] %v3094_v25  ;;  %3127 = vst [vmem:[%s5700_s26 + $0x7c] sm:$0xf] %v3095_v15  ;;  %v2464_v30 = vsel %vm5567_vm14, %v6732_v63, 0.0  ;;  %v2669_v25 = vadd.f32 %v2637_v52, %v2495_v44  ;;  %v6734_v15 = vld [vmem:[#allocation131_spill] sm:$0xff]  ;;  %v3700_v56 = vpack.c.bf16 %v3023_v20, %v3023_v20  ;;  %v3024_v7 = vadd.f32 %v2905_v45, %v2797_v33 }
 0x2c2   : > { %v1696_v51 = vadd.f32 %v6734_v15, %v6733_v17  ;;  %v6735_v43 = vld [vmem:[#allocation135_spill] sm:$0xff]  ;;  %v2993_v54 = vsel %vm5514_vm13, %v2907_v0, 0.0  ;;  %v2912_v6 = vrot.slane %v5820_v13, 1  ;;  %v6736_v38 = vld [vmem:[#allocation176_spill] sm:$0xff]  ;;  %v6740_v36 = vld [vmem:[#allocation146_spill] sm:$0xff]  ;;  %vm5847_vm5 = vcmp.ge.s32.totalorder %v993_v11, 1  ;;  %3220 = vrot.lane.b32.xlu0 %v3699_v2, %s4072_s25 }
 0x2c3   : > { %v2324_v49 = vadd.f32 %v6735_v43, %v2194_v4  ;;  %v3025_v8 = vadd.f32 %v2993_v54, %v2798_v12  ;;  %v6737_v23 = vand.u32 15, %v6736_v38  ;;  %v1697_v4 = vadd.f32 %v6740_v36, %v1535_v18  ;;  %v6741_v48 = vld [vmem:[#allocation150_spill] sm:$0xff]  ;;  %v6745_v22 = vld [vmem:[#allocation157_spill] sm:$0xff]  ;;  %v6747_v11 = vld [vmem:[#allocation171_spill] sm:$0xff]  ;;  %v2718_v54 = vpop.permute.xlu1 %2717  ;;  %v2558_v2 = vpop.permute.xlu0 %2557  ;;  %s4007_s19 = scalar_lea.vmem %s4006_s18, 64 }
 0x2c4   : > { %v2022_v60 = vadd.f32 %v1990_v1, %v1696_v51  ;;  %v2799_v47 = vadd.f32 %v2714_v55, %v2669_v25  ;;  %v2325_v9 = vadd.f32 %v6741_v48, %v2195_v34  ;;  %v6744_v45 = vrot.slane %v6719_v31, 1  ;;  %3222 = vrot.lane.b32.xlu1 %v3700_v56, %s4072_s25  ;;  %v6746_v44 = vld [vmem:[#allocation158_spill] sm:$0xff]  ;;  %v6749_v61 = vld [vmem:[#allocation161_spill] sm:$0xff]  ;;  %v6750_v5 = vld [vmem:[#allocation95_spill] sm:$0xff]  ;;  %p4009_p1 = scmp.lt.s32.totalorder %s4007_s19, %s4001_s16 }
 0x2c5   : > { %vm5841_vm4 = vcmp.le.s32.totalorder %v6737_v23, 14  ;;  %v2496_v3 = vadd.f32 %v2464_v30, %v2324_v49  ;;  %v2911_v18 = vsel %vm1815_vm0, %v2908_v24, %v2910_v10  ;;  %v2023_v62 = vadd.f32 %v6746_v44, %v1697_v4  ;;  %v6748_v31 = vld [vmem:[#allocation162_spill] sm:$0xff]  ;;  %v6751_v13 = vld [vmem:[#allocation149_spill] sm:$0xff]  ;;  %v6756_v51 = vld [vmem:[#allocation164_spill] sm:$0xff] }
 0x2c6   : > { %v2909_v0 = vsel %vm1815_vm0, %v6744_v45, %v2908_v24  ;;  %v2196_v59 = vadd.f32 %v6745_v22, %v2022_v60  ;;  %v2165_v29 = vsel %vm5606_vm15, %v6747_v11, 0.0  ;;  %v2497_v28 = vadd.f32 %v6748_v31, %v2325_v9  ;;  %v6752_v12 = vld [vmem:[#allocation165_spill] sm:$0xff]  ;;  %v6757_v56 = vld [vmem:[#allocation6_spill] sm:$0xff]  ;;  %v6759_v55 = vld [vmem:[#allocation183_spill] sm:$0xff]  ;;  %p4010_p2 = por %p4009_p1, %p4008_p0 }
 0x2c7   : > { %v2670_v53 = vadd.f32 %v2554_v16, %v2496_v3  ;;  %v3701_v21 = vpack.c.bf16 %v3024_v7, %v3024_v7  ;;  %v3702_v32 = vpack.c.bf16 %v3025_v8, %v3025_v8  ;;  %v3026_v46 = vadd.f32 %v2909_v0, %v2799_v47  ;;  %v6753_v63 = vld [vmem:[#allocation181_spill] sm:$0xff]  ;;  %v6760_v36 = vld [vmem:[#allocation174_spill] sm:$0xff]  ;;  %v6761_v47 = vld [vmem:[#allocation179_spill] sm:$0xff] }
 0x2c8   : > { %v1992_v39 = vsel %vm5809_vm3, %v6749_v61, 0.0  ;;  %v2639_v20 = vsel %vm5391_vm11, %v2556_v35, 0.0  ;;  %v2995_v33 = vsel %vm5567_vm14, %v2911_v18, 0.0  ;;  %v1698_v52 = vadd.f32 %v6751_v13, %v6750_v5  ;;  %v6754_v30 = vld [vmem:[#allocation153_spill] sm:$0xff]  ;;  %v6762_v48 = vld [vmem:[#allocation166_spill] sm:$0xff]  ;;  %v6763_v0 = vld [vmem:[#allocation119_spill] sm:$0xff]  ;;  %p4011_p3 = pnand %p4010_p2, %p4004_p13 }
 0x2c9   : > { %v2800_v57 = vadd.f32 %v2716_v50, %v2670_v53  ;;  %v2466_v24 = vsel %vm5707_vm2, %v6752_v12, 0.0  ;;  %v2197_v19 = vadd.f32 %v2165_v29, %v2023_v62  ;;  %v2671_v1 = vadd.f32 %v2639_v20, %v2497_v28  ;;  %3224 = vrot.lane.b32.xlu0 %v3701_v21, %s4072_s25  ;;  %3226 = vrot.lane.b32.xlu1 %v3702_v32, %s4072_s25  ;;  %v6764_v18 = vld [vmem:[#allocation167_spill] sm:$0xff]  ;;  %v2836_v29 = vld [vmem:[#allocation2 + $0x80] sm:$0xff]  ;;  %v6768_v31 = vld [vmem:[#allocation168_spill] sm:$0xff]  ;;  %v2560_v21 = vpop.permute.xlu1 %2559  ;;  %v2720_v32 = vpop.permute.xlu0 %2719 }
 0x2ca   : > { %v1007_v42 = vand.u32 15, %v6753_v63  ;;  %v2326_v34 = vadd.f32 %v6754_v30, %v2196_v59  ;;  %v1537_v25 = vsel %vm5847_vm5, %v6755_v26, 0.0  ;;  %v2024_v15 = vadd.f32 %v1992_v39, %v1698_v52  ;;  %v6765_v59 = vld [vmem:[#allocation180_spill] sm:$0xff]  ;;  %v6770_v20 = vld [vmem:[#allocation186_spill] sm:$0xff] }
 0x2cb   : > { %v3027_v17 = vadd.f32 %v2995_v33, %v2800_v57  ;;  %v1699_v43 = vadd.f32 %v6756_v51, %v1537_v25  ;;  %v3703_v49 = vpack.c.bf16 %v3026_v46, %v3026_v46  ;;  %v6758_v7 = vrot.slane %v6757_v56, 1  ;;  %v2837_v46 = vld [vmem:[#allocation2] sm:$0xff]  ;;  %v6774_v25 = vld [vmem:[#allocation28_spill] sm:$0xff] }
 0x2cc   : > { %v2167_v16 = vsel %vm5847_vm5, %v6759_v55, 0.0  ;;  %v2801_v23 = vadd.f32 %v2718_v54, %v2671_v1  ;;  %v2498_v60 = vadd.f32 %v2466_v24, %v2326_v34  ;;  %v1994_v4 = vsel %vm5841_vm4, %v6760_v36, 0.0  ;;  %v6771_v52 = vld [vmem:[#allocation170_spill] sm:$0xff]  ;;  %v6772_v1 = vld [vmem:[#allocation121_spill] sm:$0xff] }
 0x2cd   : > { %v2915_v8 = vsel %vm1815_vm0, %v2912_v6, %v6758_v7  ;;  %v3704_v38 = vpack.c.bf16 %v3027_v17, %v3027_v17  ;;  %v2025_v3 = vadd.f32 %v6761_v47, %v1699_v43  ;;  %v2327_v9 = vadd.f32 %v6762_v48, %v2197_v19  ;;  %3228 = vrot.lane.b32.xlu0 %v3703_v49, %s4072_s25  ;;  %v2722_v34 = vpop.permute.xlu1 %2721  ;;  %v2562_v26 = vpop.permute.xlu0 %2561  ;;  %v2838_v43 = vld [vmem:[#allocation2 + $0x88] sm:$0xff]  ;;  %v6782_v48 = vld [vmem:[#allocation33_spill] sm:$0xff] }
 0x2ce   : > { %v2913_v45 = vsel %vm1815_vm0, %v2910_v10, %v2912_v6  ;;  %v1700_v22 = vadd.f32 %v6764_v18, %v6763_v0  ;;  %v2198_v44 = vadd.f32 %v6765_v59, %v2024_v15  ;;  %v2672_v11 = vadd.f32 %v2558_v2, %v2498_v60  ;;  %v6769_v10 = vld [vmem:[#allocation77_spill] sm:$0xff]  ;;  %v6775_v49 = vld [vmem:[#allocation14_spill] sm:$0xff] }
 0x2cf   : > { %v3028_v62 = vadd.f32 %v2913_v45, %v2801_v23  ;;  %3230 = vrot.lane.b32.xlu1 %v3704_v38, %s4072_s25  ;;  %vm5904_vm6 = vcmp.ge.s32.totalorder %v1007_v42, 1  ;;  %v864_v27 = vadd.s32 152, %v6768_v31  ;;  %v2199_v28 = vadd.f32 %v2167_v16, %v2025_v3  ;;  %v6773_v42 = vld [vmem:[#allocation19_spill] sm:$0xff]  ;;  %v6776_v2 = vld [vmem:[#allocation178_spill] sm:$0xff]  ;;  %v6778_v16 = vld [vmem:[#allocation45_spill] sm:$0xff] }
 0x2d0   : > { %v2499_v6 = vadd.f32 %v6769_v10, %v2327_v9  ;;  %v2026_v35 = vadd.f32 %v1994_v4, %v1700_v22  ;;  %v2641_v61 = vsel %vm5606_vm15, %v2560_v21, 0.0  ;;  %v2802_v39 = vadd.f32 %v2720_v32, %v2672_v11  ;;  %v6779_v4 = vld [vmem:[#allocation27_spill] sm:$0xff]  ;;  %v2839_v18 = vld [vmem:[#allocation2 + $0x1c0] sm:$0xff]  ;;  %v6785_v21 = vld [vmem:[#allocation8_spill] sm:$0xff] }
 0x2d1   : > { %v3705_v50 = vpack.c.bf16 %v3028_v62, %v3028_v62  ;;  %v2468_v33 = vsel %vm5809_vm3, %v6770_v20, 0.0  ;;  %v2997_v5 = vsel %vm5707_vm2, %v2915_v8, 0.0  ;;  %v2916_v13 = vrot.slane %v2836_v29, 1  ;;  %v2564_v9 = vpop.permute.xlu1 %2563  ;;  %v2724_v45 = vpop.permute.xlu0 %2723  ;;  %v6783_v62 = vld [vmem:[#allocation23_spill] sm:$0xff]  ;;  %v6784_v29 = vld [vmem:[#allocation34_spill] sm:$0xff]  ;;  %v6786_v32 = vld [vmem:[#allocation20_spill] sm:$0xff] }
 0x2d2   : > { %v2673_v57 = vadd.f32 %v2641_v61, %v2499_v6  ;;  %v2328_v12 = vadd.f32 %v6771_v52, %v2198_v44  ;;  %v3029_v24 = vadd.f32 %v2997_v5, %v2802_v39  ;;  %v2918_v19 = vrot.slane %v2837_v46, 1  ;;  %v6789_v61 = vld [vmem:[#allocation38_spill] sm:$0xff] }
 0x2d3   : > { %3232 = vrot.lane.b32.xlu0 %v3705_v50, %s4072_s25  ;;  %v1539_v41 = vsel %vm5904_vm6, %v6772_v1, 0.0  ;;  %v1014_v63 = vand.u32 15, %v864_v27  ;;  %v2329_v30 = vadd.f32 %v6773_v42, %v2199_v28  ;;  %v2200_v17 = vadd.f32 %v6774_v25, %v2026_v35  ;;  %v5964_v25 = vld [vmem:[#allocation2 + $0x138] sm:$0xff] }
 0x2d4   : > { %v3706_v14 = vpack.c.bf16 %v3029_v24, %v3029_v24  ;;  %v2803_v15 = vadd.f32 %v2722_v34, %v2673_v57  ;;  %v2500_v51 = vadd.f32 %v2468_v33, %v2328_v12  ;;  %v1701_v54 = vadd.f32 %v6775_v49, %v1539_v41  ;;  %v6790_v12 = vld [vmem:[#allocation41_spill] sm:$0xff]  ;;  %v2840_v41 = vld [vmem:[#allocation2 + $0x1d0] sm:$0xff] }
 0x2d5   : > { %v1021_v7 = vand.u32 15, %v6776_v2  ;;  %v6777_v8 = vrot.slane %v6757_v56, 1  ;;  %v2169_v38 = vsel %vm5904_vm6, %v6778_v16, 0.0  ;;  %v2919_v36 = vsel %vm1815_vm0, %v2916_v13, %v2918_v19  ;;  %v2726_v33 = vpop.permute.xlu1 %2725  ;;  %v2566_v37 = vpop.permute.xlu0 %2565  ;;  %v6794_v16 = vld [vmem:[#allocation60_spill] sm:$0xff] }
 0x2d6   : > { %v2674_v60 = vadd.f32 %v2562_v26, %v2500_v51  ;;  %3234 = vrot.lane.b32.xlu1 %v3706_v14, %s4072_s25  ;;  %v2027_v47 = vadd.f32 %v6779_v4, %v1701_v54  ;;  %vm5935_vm7 = vcmp.le.s32.totalorder %v1014_v63, 14  ;;  %v2501_v56 = vadd.f32 %v6782_v48, %v2329_v30  ;;  %v6791_v63 = vld [vmem:[#allocation51_spill] sm:$0xff]  ;;  %v6793_v51 = vld [vmem:[#allocation57_spill] sm:$0xff]  ;;  %v6796_v48 = vld [vmem:[#allocation46_spill] sm:$0xff] }
 0x2d7   : > { %v2917_v55 = vsel %vm1815_vm0, %v6777_v8, %v2916_v13  ;;  %v2920_v0 = vrot.slane %v2838_v43, 1  ;;  %v2643_v59 = vsel %vm5847_vm5, %v2564_v9, 0.0  ;;  %v2330_v11 = vadd.f32 %v6783_v62, %v2200_v17  ;;  %v6792_v17 = vld [vmem:[#allocation10_spill] sm:$0xff]  ;;  %v6795_v4 = vld [vmem:[#allocation37_spill] sm:$0xff] }
 0x2d8   : > { %v3030_v23 = vadd.f32 %v2917_v55, %v2803_v15  ;;  %v2804_v44 = vadd.f32 %v2724_v45, %v2674_v60  ;;  %v1996_v27 = vsel %vm5935_vm7, %v6784_v29, 0.0  ;;  %v2201_v28 = vadd.f32 %v2169_v38, %v2027_v47  ;;  %v6799_v45 = vld [vmem:[#allocation72_spill] sm:$0xff] }
 0x2d9   : > { %v2675_v10 = vadd.f32 %v2643_v59, %v2501_v56  ;;  %v2999_v6 = vsel %vm5809_vm3, %v2919_v36, 0.0  ;;  %v1702_v46 = vadd.f32 %v6786_v32, %v6785_v21  ;;  %v2922_v40 = vrot.slane %v2839_v18, 1  ;;  %v2568_v49 = vpop.permute.xlu1 %2567  ;;  %v2728_v54 = vpop.permute.xlu0 %2727  ;;  %v6801_v29 = vld [vmem:[#allocation56_spill] sm:$0xff]  ;;  %v6802_v21 = vld [vmem:[#allocation11_spill] sm:$0xff]  ;;  %v6803_v32 = vld [vmem:[#allocation42_spill] sm:$0xff] }
 0x2da   : > { %v3707_v22 = vpack.c.bf16 %v3030_v23, %v3030_v23  ;;  %v3031_v35 = vadd.f32 %v2999_v6, %v2804_v44  ;;  %vm5951_vm8 = vcmp.ge.s32.totalorder %v1021_v7, 1  ;;  %v2470_v39 = vsel %vm5841_vm4, %v6789_v61, 0.0 }
 0x2db   : > { %v866_v20 = vadd.s32 168, %v6768_v31  ;;  %v2028_v57 = vadd.f32 %v1996_v27, %v1702_v46  ;;  %v2805_v13 = vadd.f32 %v2726_v33, %v2675_v10  ;;  %v2502_v52 = vadd.f32 %v2470_v39, %v2330_v11 }
 0x2dc   : > { %3236 = vrot.lane.b32.xlu0 %v3707_v22, %s4072_s25  ;;  %v3708_v5 = vpack.c.bf16 %v3031_v35, %v3031_v35  ;;  %v2331_v24 = vadd.f32 %v6790_v12, %v2201_v28  ;;  %v2921_v1 = vsel %vm1815_vm0, %v2918_v19, %v2920_v0  ;;  %v2923_v26 = vsel %vm1815_vm0, %v2920_v0, %v2922_v40  ;;  %v6800_v22 = vld [vmem:[#allocation53_spill] sm:$0xff]  ;;  %v6806_v12 = vld [vmem:[#allocation76_spill] sm:$0xff] }
 0x2dd   : > { %v2202_v42 = vadd.f32 %v6791_v63, %v2028_v57  ;;  %v3032_v30 = vadd.f32 %v2921_v1, %v2805_v13  ;;  %v2676_v34 = vadd.f32 %v2566_v37, %v2502_v52  ;;  %v1541_v14 = vsel %vm5951_vm8, %v6792_v17, 0.0  ;;  %v2730_v18 = vpop.permute.xlu1 %2729  ;;  %v2570_v58 = vpop.permute.xlu0 %2569  ;;  %v6807_v1 = vld [vmem:[#allocation65_spill] sm:$0xff]  ;;  %v6808_v17 = vld [vmem:[#allocation82_spill] sm:$0xff] }
 0x2de   : > { %3238 = vrot.lane.b32.xlu1 %v3708_v5, %s4072_s25  ;;  %v1028_v15 = vand.u32 15, %v866_v20  ;;  %v2503_v43 = vadd.f32 %v6793_v51, %v2331_v24  ;;  %v867_v19 = vadd.s32 176, %v6768_v31  ;;  %v2645_v7 = vsel %vm5904_vm6, %v2568_v49, 0.0  ;;  %v6810_v49 = vld [vmem:[#allocation85_spill] sm:$0xff] }
 0x2df   : > { %v3709_v2 = vpack.c.bf16 %v3032_v30, %v3032_v30  ;;  %v2806_v8 = vadd.f32 %v2728_v54, %v2676_v34  ;;  %v2924_v55 = vrot.slane %v2840_v41, 1  ;;  %v2472_v38 = vsel %vm5935_vm7, %v6794_v16, 0.0  ;;  %v6008_v30 = vld [vmem:[#allocation2 + $0x250] sm:$0xff] }
 0x2e0   : > { %v2677_v23 = vadd.f32 %v2645_v7, %v2503_v43  ;;  %v3001_v60 = vsel %vm5841_vm4, %v2923_v26, 0.0  ;;  %v2926_v36 = vrot.slane %v5964_v25, 1  ;;  %v1703_v47 = vadd.f32 %v6795_v4, %v1541_v14  ;;  %v6809_v43 = vld [vmem:[#allocation12_spill] sm:$0xff]  ;;  %v6811_v7 = vld [vmem:[#allocation61_spill] sm:$0xff] }
 0x2e1   : > { %v2332_v56 = vadd.f32 %v6796_v48, %v2202_v42  ;;  %v3033_v9 = vadd.f32 %v3001_v60, %v2806_v8  ;;  %3240 = vrot.lane.b32.xlu0 %v3709_v2, %s4072_s25  ;;  %vm5982_vm9 = vcmp.le.s32.totalorder %v1028_v15, 14  ;;  %v2171_v0 = vsel %vm5951_vm8, %v6799_v45, 0.0  ;;  %v2572_v20 = vpop.permute.xlu1 %2571  ;;  %v2732_v33 = vpop.permute.xlu0 %2731  ;;  %v2842_v42 = vld [vmem:[#allocation2 + $0x100] sm:$0xff] }
 0x2e2   : > { %v2029_v59 = vadd.f32 %v6800_v22, %v1703_v47  ;;  %v2807_v62 = vadd.f32 %v2730_v18, %v2677_v23  ;;  %v1998_v27 = vsel %vm5982_vm9, %v6801_v29, 0.0  ;;  %v1035_v28 = vand.u32 15, %v867_v19  ;;  %v6813_v23 = vld [vmem:[#allocation100_spill] sm:$0xff]  ;;  %v6814_v48 = vld [vmem:[#allocation78_spill] sm:$0xff]  ;;  %v6817_v18 = vld [vmem:[#allocation81_spill] sm:$0xff] }
 0x2e3   : > { %v3710_v44 = vpack.c.bf16 %v3033_v9, %v3033_v9  ;;  %v2504_v11 = vadd.f32 %v2472_v38, %v2332_v56  ;;  %v2925_v10 = vsel %vm1815_vm0, %v2922_v40, %v2924_v55  ;;  %v2927_v6 = vsel %vm1815_vm0, %v2924_v55, %v2926_v36  ;;  %v6812_v55 = vld [vmem:[#allocation69_spill] sm:$0xff] }
 0x2e4   : > { %v1704_v46 = vadd.f32 %v6803_v32, %v6802_v21  ;;  %v2203_v35 = vadd.f32 %v2171_v0, %v2029_v59  ;;  %v3034_v61 = vadd.f32 %v2925_v10, %v2807_v62  ;;  %v868_v57 = vadd.s32 184, %v6768_v31  ;;  %v6818_v62 = vld [vmem:[#allocation13_spill] sm:$0xff] }
 0x2e5   : > { %v2678_v39 = vadd.f32 %v2570_v58, %v2504_v11  ;;  %3242 = vrot.lane.b32.xlu1 %v3710_v44, %s4072_s25  ;;  %v3003_v40 = vsel %vm5935_vm7, %v2927_v6, 0.0  ;;  %vm6001_vm10 = vcmp.ge.s32.totalorder %v1035_v28, 1  ;;  %v2647_v34 = vsel %vm5951_vm8, %v2572_v20, 0.0  ;;  %v6012_v26 = vpop.permute.xlu1 %2403  ;;  %v2574_v3 = vpop.permute.xlu0 %2573  ;;  %v6819_v11 = vld [vmem:[#allocation64_spill] sm:$0xff] }
 0x2e6   : > { %v2030_v37 = vadd.f32 %v1998_v27, %v1704_v46  ;;  %v3711_v5 = vpack.c.bf16 %v3034_v61, %v3034_v61  ;;  %v2333_v41 = vadd.f32 %v6807_v1, %v2203_v35  ;;  %v1042_v25 = vand.u32 15, %v868_v57  ;;  %v6822_v20 = vld [vmem:[#allocation104_spill] sm:$0xff] }
 0x2e7   : > { %v2808_v13 = vadd.f32 %v2732_v33, %v2678_v39  ;;  %v869_v15 = vadd.s32 192, %v6768_v31  ;;  %v1543_v19 = vsel %vm6001_vm10, %v6809_v43, 0.0  ;;  %v2474_v54 = vsel %vm5982_vm9, %v6810_v49, 0.0 }
 0x2e8   : > { %v2204_v24 = vadd.f32 %v6806_v12, %v2030_v37  ;;  %3244 = vrot.lane.b32.xlu0 %v3711_v5, %s4072_s25  ;;  %v2505_v14 = vadd.f32 %v6808_v17, %v2333_v41  ;;  %v2928_v2 = vrot.slane %v2842_v42, 1  ;;  %v2930_v50 = vrot.slane %v6008_v30, 1  ;;  %v6823_v37 = vld [vmem:[#allocation92_spill] sm:$0xff]  ;;  %v6824_v30 = vld [vmem:[#allocation29_spill] sm:$0xff]  ;;  %v6825_v17 = vld [vmem:[#allocation86_spill] sm:$0xff] }
 0x2e9   : > { %v3035_v63 = vadd.f32 %v3003_v40, %v2808_v13  ;;  %v1705_v8 = vadd.f32 %v6811_v7, %v1543_v19  ;;  %v2173_v60 = vsel %vm6001_vm10, %v6813_v23, 0.0  ;;  %v2734_v4 = vpop.permute.xlu1 %2733  ;;  %v2402_v47 = vpop.permute.xlu0 %2401  ;;  %vm6030_vm11 = vcmp.le.s32.totalorder %v1042_v25, 14  ;;  %v2844_v13 = vld [vmem:[#allocation2 + $0x110] sm:$0xff]  ;;  %v6827_v19 = vld [vmem:[#allocation122_spill] sm:$0xff]  ;;  %v6828_v7 = vld [vmem:[#allocation105_spill] sm:$0xff] }
 0x2ea   : > { %v2334_v16 = vadd.f32 %v6812_v55, %v2204_v24  ;;  %v2679_v38 = vadd.f32 %v2647_v34, %v2505_v14  ;;  %v2000_v58 = vsel %vm6030_vm11, %v6817_v18, 0.0  ;;  %v1049_v22 = vand.u32 15, %v869_v15  ;;  %v6051_v40 = vld [vmem:[#allocation2 + $0x90] sm:$0xff]  ;;  %v6826_v15 = vld [vmem:[#allocation97_spill] sm:$0xff] }
 0x2eb   : > { %v3712_v51 = vpack.c.bf16 %v3035_v63, %v3035_v63  ;;  %v2031_v56 = vadd.f32 %v6814_v48, %v1705_v8  ;;  %v2929_v59 = vsel %vm1815_vm0, %v2926_v36, %v2928_v2  ;;  %v2931_v44 = vsel %vm1815_vm0, %v2928_v2, %v2930_v50  ;;  %v6832_v48 = vld [vmem:[#allocation32_spill] sm:$0xff] }
 0x2ec   : > { %v2506_v45 = vadd.f32 %v2474_v54, %v2334_v16  ;;  %v2809_v0 = vadd.f32 %v2734_v4, %v2679_v38  ;;  %v1706_v29 = vadd.f32 %v6819_v11, %v6818_v62  ;;  %v870_v46 = vadd.s32 200, %v6768_v31  ;;  %v6831_v38 = vld [vmem:[#allocation108_spill] sm:$0xff] }
 0x2ed   : > { %3246 = vrot.lane.b32.xlu1 %v3712_v51, %s4072_s25  ;;  %v2205_v27 = vadd.f32 %v2173_v60, %v2031_v56  ;;  %v2576_v6 = vpop.permute.xlu1 %2575  ;;  %v2736_v21 = vpop.permute.xlu0 %2735  ;;  %v3005_v39 = vsel %vm5982_vm9, %v2931_v44, 0.0  ;;  %vm6044_vm12 = vcmp.ge.s32.totalorder %v1049_v22, 1  ;;  %v871_v41 = vadd.s32 208, %v6768_v31  ;;  %v6833_v56 = vld [vmem:[#allocation89_spill] sm:$0xff] }
 0x2ee   : > { %v2680_v28 = vadd.f32 %v2574_v3, %v2506_v45  ;;  %v3036_v10 = vadd.f32 %v2929_v59, %v2809_v0  ;;  %v2032_v32 = vadd.f32 %v2000_v58, %v1706_v29  ;;  %v2649_v12 = vsel %vm6001_vm10, %v2576_v6, 0.0  ;;  %v6837_v6 = vld [vmem:[#allocation117_spill] sm:$0xff] }
 0x2ef   : > { %v2335_v57 = vadd.f32 %v6823_v37, %v2205_v27  ;;  %v1056_v1 = vand.u32 15, %v870_v46  ;;  %v1545_v34 = vsel %vm6044_vm12, %v6824_v30, 0.0  ;;  %v2476_v3 = vsel %vm6030_vm11, %v6012_v26, 0.0  ;;  %v2846_v46 = vld [vmem:[#allocation2 + $0x18] sm:$0xff]  ;;  %v6841_v30 = vld [vmem:[#allocation138_spill] sm:$0xff] }
 0x2f0   : > { %v3713_v35 = vpack.c.bf16 %v3036_v10, %v3036_v10  ;;  %v2810_v61 = vadd.f32 %v2736_v21, %v2680_v28  ;;  %v2206_v33 = vadd.f32 %v6822_v20, %v2032_v32  ;;  %v2932_v25 = vrot.slane %v2844_v13, 1  ;;  %v6836_v28 = vld [vmem:[#allocation124_spill] sm:$0xff] }
 0x2f1   : > { %v6055_v24 = vpop.permute.xlu1 %2407  ;;  %v2578_v53 = vpop.permute.xlu0 %2577  ;;  %v2507_v63 = vadd.f32 %v2402_v47, %v2335_v57  ;;  %v2934_v52 = vrot.slane %v6051_v40, 1  ;;  %v1707_v14 = vadd.f32 %v6825_v17, %v1545_v34  ;;  %v2175_v49 = vsel %vm6044_vm12, %v6827_v19, 0.0  ;;  %v6842_v17 = vld [vmem:[#allocation125_spill] sm:$0xff] }
 0x2f2   : > { %v3037_v5 = vadd.f32 %v3005_v39, %v2810_v61  ;;  %3248 = vrot.lane.b32.xlu0 %v3713_v35, %s4072_s25  ;;  %v2336_v51 = vadd.f32 %v6826_v15, %v2206_v33  ;;  %vm6072_vm13 = vcmp.le.s32.totalorder %v1056_v1, 14  ;;  %v1063_v60 = vand.u32 15, %v871_v41  ;;  %v6093_v35 = vld [vmem:[#allocation2 + $0x120] sm:$0xff]  ;;  %v6840_v41 = vld [vmem:[#allocation120_spill] sm:$0xff] }
 0x2f3   : > { %v2681_v43 = vadd.f32 %v2649_v12, %v2507_v63  ;;  %v2033_v8 = vadd.f32 %v6828_v7, %v1707_v14  ;;  %v2002_v23 = vsel %vm6072_vm13, %v6831_v38, 0.0  ;;  %v2933_v4 = vsel %vm1815_vm0, %v2930_v50, %v2932_v25  ;;  %v6846_v7 = vld [vmem:[#allocation52_spill] sm:$0xff]  ;;  %v6853_v50 = vld [vmem:[#allocation130_spill] sm:$0xff] }
 0x2f4   : > { %v3714_v42 = vpack.c.bf16 %v3037_v5, %v3037_v5  ;;  %v2508_v55 = vadd.f32 %v2476_v3, %v2336_v51  ;;  %v2935_v47 = vsel %vm1815_vm0, %v2932_v25, %v2934_v52  ;;  %v1708_v45 = vadd.f32 %v6833_v56, %v6832_v48  ;;  %v6838_v5 = vld [vmem:[#allocation49_spill] sm:$0xff] }
 0x2f5   : > { %v2738_v54 = vpop.permute.xlu1 %2737  ;;  %v2406_v2 = vpop.permute.xlu0 %2405  ;;  %v2207_v0 = vadd.f32 %v2175_v49, %v2033_v8  ;;  %v872_v62 = vadd.s32 216, %v6768_v31  ;;  %v3007_v27 = vsel %vm6030_vm11, %v2935_v47, 0.0  ;;  %vm6086_vm14 = vcmp.ge.s32.totalorder %v1063_v60, 1  ;;  %v6847_v8 = vld [vmem:[#allocation115_spill] sm:$0xff] }
 0x2f6   : > { %3250 = vrot.lane.b32.xlu1 %v3714_v42, %s4072_s25  ;;  %v2811_v16 = vadd.f32 %v2738_v54, %v2681_v43  ;;  %v2682_v18 = vadd.f32 %v2578_v53, %v2508_v55  ;;  %v2034_v44 = vadd.f32 %v2002_v23, %v1708_v45  ;;  %v873_v33 = vadd.s32 224, %v6768_v31  ;;  %v6839_v53 = vld [vmem:[#allocation111_spill] sm:$0xff] }
 0x2f7   : > { %v2337_v21 = vadd.f32 %v6837_v6, %v2207_v0  ;;  %v1070_v20 = vand.u32 15, %v872_v62  ;;  %v1547_v13 = vsel %vm6086_vm14, %v6838_v5, 0.0  ;;  %v2478_v40 = vsel %vm6072_vm13, %v6055_v24, 0.0  ;;  %v6845_v43 = vld [vmem:[#allocation127_spill] sm:$0xff] }
 0x2f8   : > { %v3038_v58 = vadd.f32 %v2933_v4, %v2811_v16  ;;  %v2208_v10 = vadd.f32 %v6836_v28, %v2034_v44  ;;  %v2936_v12 = vrot.slane %v2846_v46, 1  ;;  %v2938_v36 = vrot.slane %v6093_v35, 1  ;;  %v2848_v62 = vld [vmem:[#allocation2 + $0x148] sm:$0xff] }
 0x2f9   : > { %v2580_v22 = vpop.permute.xlu1 %2579  ;;  %v2740_v59 = vpop.permute.xlu0 %2739  ;;  %v2509_v37 = vadd.f32 %v2406_v2, %v2337_v21  ;;  %v1709_v1 = vadd.f32 %v6839_v53, %v1547_v13  ;;  %v2177_v34 = vsel %vm6086_vm14, %v6841_v30, 0.0  ;;  %vm6114_vm15 = vcmp.le.s32.totalorder %v1070_v20, 14  ;;  %v6852_v46 = vld [vmem:[#allocation70_spill] sm:$0xff] }
 0x2fa   : > { %v3715_v11 = vpack.c.bf16 %v3038_v58, %v3038_v58  ;;  %v2812_v29 = vadd.f32 %v2740_v59, %v2682_v18  ;;  %v2651_v61 = vsel %vm6044_vm12, %v2580_v22, 0.0  ;;  %v2338_v63 = vadd.f32 %v6840_v41, %v2208_v10  ;;  %v6850_v18 = vld [vmem:[#allocation141_spill] sm:$0xff]  ;;  %v6851_v22 = vld [vmem:[#allocation134_spill] sm:$0xff] }
 0x2fb   : > { %v2683_v42 = vadd.f32 %v2651_v61, %v2509_v37  ;;  %v2035_v14 = vadd.f32 %v6842_v17, %v1709_v1  ;;  %v2004_v19 = vsel %vm6114_vm15, %v6845_v43, 0.0  ;;  %v1077_v49 = vand.u32 15, %v873_v33  ;;  %v6854_v37 = vld [vmem:[#allocation137_spill] sm:$0xff]  ;;  %v6858_v1 = vld [vmem:[#allocation142_spill] sm:$0xff] }
 0x2fc   : > { %v3039_v32 = vadd.f32 %v3007_v27, %v2812_v29  ;;  %3252 = vrot.lane.b32.xlu0 %v3715_v11, %s4072_s25  ;;  %v2510_v15 = vadd.f32 %v2478_v40, %v2338_v63  ;;  %v2937_v54 = vsel %vm1815_vm0, %v2934_v52, %v2936_v12  ;;  %v2939_v2 = vsel %vm1815_vm0, %v2936_v12, %v2938_v36  ;;  %v6135_v11 = vld [vmem:[#allocation2 + $0xe0] sm:$0xff]  ;;  %v6857_v40 = vld [vmem:[#allocation156_spill] sm:$0xff]  ;;  %v6875_v52 = vld [vmem:[#allocation155_spill] sm:$0xff] }
 0x2fd   : > { %v6097_v39 = vpop.permute.xlu1 %2411  ;;  %v2582_v9 = vpop.permute.xlu0 %2581  ;;  %v1710_v55 = vadd.f32 %v6847_v8, %v6846_v7  ;;  %v2209_v16 = vadd.f32 %v2177_v34, %v2035_v14  ;;  %v874_v60 = vadd.s32 232, %v6768_v31  ;;  %v3009_v0 = vsel %vm6072_vm13, %v2939_v2, 0.0  ;;  %v1293_v63 = vld [vmem:[#allocation2 + $0x38] sm:$0x7f] }
 0x2fe   : > { %v3716_v57 = vpack.c.bf16 %v3039_v32, %v3039_v32  ;;  %v2684_v38 = vadd.f32 %v2582_v9, %v2510_v15  ;;  %vm6128_vm2 = vcmp.ge.s32.totalorder %v1077_v49, 1  ;;  %v875_v27 = vadd.s32 240, %v6768_v31  ;;  %v6860_v15 = vld [vmem:[#allocation74_spill] sm:$0xff] }
 0x2ff   : > { %v2036_v48 = vadd.f32 %v2004_v19, %v1710_v55  ;;  %v2339_v59 = vadd.f32 %v6851_v22, %v2209_v16  ;;  %v1084_v29 = vand.u32 15, %v874_v60  ;;  %v876_v6 = vadd.s32 248, %v6768_v31  ;;  %v6869_v22 = vld [vmem:[#allocation148_spill] sm:$0xff] }
 0x300   : > { %3254 = vrot.lane.b32.xlu1 %v3716_v57, %s4072_s25  ;;  %v1549_v35 = vsel %vm6128_vm2, %v6852_v46, 0.0  ;;  %v2480_v61 = vsel %vm6114_vm15, %v6097_v39, 0.0  ;;  %v2940_v9 = vrot.slane %v2848_v62, 1  ;;  %v2942_v20 = vrot.slane %v6135_v11, 1 }
 0x301   : > { %v2742_v3 = vpop.permute.xlu1 %2741  ;;  %v2410_v25 = vpop.permute.xlu0 %2409  ;;  %v2210_v58 = vadd.f32 %v6850_v18, %v2036_v48  ;;  %v1711_v33 = vadd.f32 %v6853_v50, %v1549_v35  ;;  %vm6153_vm3 = vcmp.le.s32.totalorder %v1084_v29, 14  ;;  %v1091_v13 = vand.u32 15, %v875_v27  ;;  %v6867_v48 = vld [vmem:[#allocation159_spill] sm:$0xff] }
 0x302   : > { %v2813_v51 = vadd.f32 %v2742_v3, %v2683_v42  ;;  %v2511_v21 = vadd.f32 %v2410_v25, %v2339_v59  ;;  %v2179_v12 = vsel %vm6128_vm2, %v6857_v40, 0.0  ;;  %v1098_v42 = vand.u32 15, %v876_v6  ;;  %v6859_v3 = vld [vmem:[#allocation145_spill] sm:$0xff]  ;;  %v6871_v29 = vld [vmem:[#allocation163_spill] sm:$0xff] }
 0x303   : > { %v2340_v57 = vadd.f32 %v6854_v37, %v2210_v58  ;;  %v2037_v41 = vadd.f32 %v6858_v1, %v1711_v33  ;;  %v2006_v25 = vsel %vm6153_vm3, %v6859_v3, 0.0  ;;  %v2941_v17 = vsel %vm1815_vm0, %v2938_v36, %v2940_v9  ;;  %v2850_v58 = vld [vmem:[#allocation2 + $0x210] sm:$0xff]  ;;  %v3996_v40 = vld [vmem:[#allocation2 + $0x240] sm:$0xff] }
 0x304   : > { %v3040_v23 = vadd.f32 %v2937_v54, %v2813_v51  ;;  %v2943_v14 = vsel %vm1815_vm0, %v2940_v9, %v2942_v20  ;;  %v6861_v51 = vld [vmem:[#allocation133_spill] sm:$0xff]  ;;  %vm6170_vm4 = vcmp.ge.s32.totalorder %v1091_v13, 1  ;;  %v1487_v7 = vrot.slane %v1293_v63, 7  ;;  %v6872_v6 = vld [vmem:[#allocation151_spill] sm:$0xff]  ;;  %v6874_v9 = vld [vmem:[#allocation160_spill] sm:$0xff] }
 0x305   : > { %v2584_v4 = vpop.permute.xlu1 %2583  ;;  %v2744_v47 = vpop.permute.xlu0 %2743  ;;  %v2512_v30 = vadd.f32 %v2480_v61, %v2340_v57  ;;  %v1712_v43 = vadd.f32 %v6861_v51, %v6860_v15  ;;  %v2211_v19 = vadd.f32 %v2179_v12, %v2037_v41  ;;  %vm6174_vm5 = vcmp.le.s32.totalorder %v1098_v42, 14  ;;  %v6876_v63 = vld [vmem:[#allocation184_spill] sm:$0xff]  ;;  %v6877_v51 = vld [vmem:[#allocation169_spill] sm:$0xff] }
 0x306   : > { %v3717_v56 = vpack.c.bf16 %v3040_v23, %v3040_v23  ;;  %v2814_v45 = vadd.f32 %v2744_v47, %v2684_v38  ;;  %v2653_v26 = vsel %vm6086_vm14, %v2584_v4, 0.0  ;;  %v3011_v60 = vsel %vm6114_vm15, %v2943_v14, 0.0  ;;  %v6866_v4 = vld [vmem:[#allocation94_spill] sm:$0xff] }
 0x307   : > { %v2685_v5 = vadd.f32 %v2653_v26, %v2511_v21  ;;  %v2038_v16 = vadd.f32 %v2006_v25, %v1712_v43  ;;  %v1551_v47 = vsel %vm6170_vm4, %v6866_v4, 0.0  ;;  %v2008_v24 = vsel %vm6174_vm5, %v6871_v29, 0.0 }
 0x308   : > { %v3041_v44 = vadd.f32 %v3009_v0, %v2814_v45  ;;  %3256 = vrot.lane.b32.xlu0 %v3717_v56, %s4072_s25  ;;  %v6868_v45 = vld [vmem:[#allocation152_spill] sm:$0xff]  ;;  %v1713_v59 = vadd.f32 %v6869_v22, %v1551_v47  ;;  %v2944_v37 = vrot.slane %v2850_v58, 1  ;;  %v2946_v12 = vrot.slane %v3996_v40, 1 }
 0x309   : > { %v6140_v28 = vpop.permute.xlu1 %2415  ;;  %v2586_v10 = vpop.permute.xlu0 %2585  ;;  %v2212_v56 = vadd.f32 %v6867_v48, %v2038_v16  ;;  %v2341_v0 = vadd.f32 %v6868_v45, %v2211_v19  ;;  %vm3304_vm6 = vcmask 322752  }
 0x30a   : > { %v3718_v32 = vpack.c.bf16 %v3041_v44, %v3041_v44  ;;  %v2686_v49 = vadd.f32 %v2586_v10, %v2512_v30  ;;  %v6870_v44 = vld [vmem:[#allocation91_spill] sm:$0xff]  ;;  %v2039_v50 = vadd.f32 %v6874_v9, %v1713_v59  ;;  %v2482_v33 = vsel %vm6153_vm3, %v6140_v28, 0.0 }
 0x30b   : > { %v1488_v62 = vsel %vm1423_vm1, %v6870_v44, %v1487_v7  ;;  %v2945_v28 = vsel %vm1815_vm0, %v2942_v20, %v2944_v37 }
 0x30c   : > { %3258 = vrot.lane.b32.xlu1 %v3718_v32, %s4072_s25  ;;  %v1714_v21 = vadd.f32 %v6872_v6, %v1488_v62  ;;  %v6873_v32 = vld [vmem:[#allocation173_spill] sm:$0xff] }
 0x30d   : > { %v2746_v39 = vpop.permute.xlu1 %2745  ;;  %v2414_v53 = vpop.permute.xlu0 %2413  ;;  %v2181_v46 = vsel %vm6170_vm4, %v6873_v32, 0.0 }
 0x30e   : > { %v2815_v34 = vadd.f32 %v2746_v39, %v2685_v5  ;;  %v2513_v35 = vadd.f32 %v2414_v53, %v2341_v0  ;;  %v2040_v57 = vadd.f32 %v2008_v24, %v1714_v21  ;;  %v2342_v5 = vadd.f32 %v6875_v52, %v2212_v56  ;;  %v2853_v53 = vld [vmem:[#allocation2 + $0xd8] sm:$0x1] }
 0x30f   : > { %v2213_v39 = vadd.f32 %v2181_v46, %v2039_v50  ;;  %v2950_v14 = vrot.slane %v2853_v53, 1 }
 0x310   : > { %v3042_v54 = vadd.f32 %v2941_v17, %v2815_v34  ;;  %v2214_v42 = vadd.f32 %v6876_v63, %v2040_v57  ;;  %v2514_v30 = vadd.f32 %v2482_v33, %v2342_v5  ;;  %v2947_v17 = vsel %vm1815_vm0, %v2944_v37, %v2946_v12 }
 0x311   : > { %v2588_v8 = vpop.permute.xlu1 %2587  ;;  %v2748_v55 = vpop.permute.xlu0 %2747  ;;  %v2343_v43 = vadd.f32 %v6877_v51, %v2213_v39  ;;  %v3013_v16 = vsel %vm6153_vm3, %v2947_v17, 0.0 }
 0x312   : > { %v3719_v38 = vpack.c.bf16 %v3042_v54, %v3042_v54  ;;  %v2816_v23 = vadd.f32 %v2748_v55, %v2686_v49  ;;  %v2655_v27 = vsel %vm6128_vm2, %v2588_v8, 0.0  ;;  %v6878_v54 = vld [vmem:[#allocation172_spill] sm:$0xff] }
 0x313   : > { %v2687_v13 = vadd.f32 %v2655_v27, %v2513_v35  ;;  %v2344_v7 = vadd.f32 %v6878_v54, %v2214_v42 }
 0x314   : > { %v3043_v18 = vadd.f32 %v3011_v60, %v2816_v23  ;;  %3260 = vrot.lane.b32.xlu0 %v3719_v38, %s4072_s25  ;;  %v2951_v60 = vsel %vm1815_vm0, %v2946_v12, %v2950_v14 }
 0x315   : > { %v2420_v26 = vpop.permute.xlu1 %2419  ;;  %v2590_v10 = vpop.permute.xlu0 %2589  ;;  %v3015_v2 = vsel %vm6174_vm5, %v2951_v60, 0.0 }
 0x316   : > { %v3720_v61 = vpack.c.bf16 %v3043_v18, %v3043_v18  ;;  %v2688_v3 = vadd.f32 %v2590_v10, %v2514_v30  ;;  %v2484_v15 = vsel %vm6174_vm5, %v2420_v26, 0.0 }
 0x317   : > { %v2516_v38 = vadd.f32 %v2484_v15, %v2344_v7 }
 0x318   : > { %3262 = vrot.lane.b32.xlu1 %v3720_v61, %s4072_s25 }
 0x319   : > { %v2750_v1 = vpop.permute.xlu1 %2749  ;;  %v2418_v41 = vpop.permute.xlu0 %2417 }
 0x31a   : > { %v2817_v34 = vadd.f32 %v2750_v1, %v2687_v13  ;;  %v2515_v20 = vadd.f32 %v2418_v41, %v2343_v43 }
 0x31c   : > { %v3044_v25 = vadd.f32 %v2945_v28, %v2817_v34 }
 0x31d   : > { %v2592_v19 = vpop.permute.xlu1 %2591  ;;  %v2752_v49 = vpop.permute.xlu0 %2751 }
 0x31e   : > { %v3721_v8 = vpack.c.bf16 %v3044_v25, %v3044_v25  ;;  %v2657_v11 = vsel %vm6170_vm4, %v2592_v19, 0.0  ;;  %v2818_v55 = vadd.f32 %v2752_v49, %v2688_v3 }
 0x31f   : > { %v2689_v4 = vadd.f32 %v2657_v11, %v2515_v20 }
 0x320   : > { %v3045_v23 = vadd.f32 %v3013_v16, %v2818_v55  ;;  %3264 = vrot.lane.b32.xlu0 %v3721_v8, %s4072_s25 }
 0x321   : > { %v3955_v47 = vpop.permute.xlu1 %3954  ;;  %v2594_v48 = vpop.permute.xlu0 %2593 }
 0x322   : > { %v3722_v56 = vpack.c.bf16 %v3045_v23, %v3045_v23  ;;  %v2690_v45 = vadd.f32 %v2594_v48, %v2516_v38  ;;  %v3999_v31 = vadd.low.f32.bf16 %v2689_v4, %v3955_v47 }
 0x324   : > { %v4000_v0 = vadd.high.f32.bf16 %v2690_v45, %v3955_v47  ;;  %3266 = vrot.lane.b32.xlu1 %v3722_v56, %s4072_s25  ;;  %v3046_v22 = vadd.f32 %v3999_v31, %v2946_v12 }
 0x325   : > { %v3211_v18 = vpop.permute.xlu1 %3210  ;;  %v3209_v58 = vpop.permute.xlu0 %3208 }
 0x326   : > { %v3047_v59 = vadd.f32 %v4000_v0, %v3015_v2  ;;  %3305 = vst.msk [vmem:[%s5700_s26] sm:$0xf] %vm3304_vm6, %v3209_v58  ;;  %3306 = vst.msk [vmem:[%s5700_s26 + $0x4] sm:$0xf] %vm3304_vm6, %v3211_v18  ;;  %v3723_v36 = vpack.c.bf16 %v3046_v22, %v3046_v22 }
 0x328   : > { %v3724_v44 = vpack.c.bf16 %v3047_v59, %v3047_v59  ;;  %3268 = vrot.lane.b32.xlu0 %v3723_v36, %s4072_s25 }
 0x329   : > { %v3215_v62 = vpop.permute.xlu1 %3214  ;;  %v3213_v29 = vpop.permute.xlu0 %3212 }
 0x32a   : > { %3270 = vrot.lane.b32.xlu1 %v3724_v44, %s4072_s25  ;;  %3307 = vst.msk [vmem:[%s5700_s26 + $0x8] sm:$0xf] %vm3304_vm6, %v3213_v29  ;;  %3308 = vst.msk [vmem:[%s5700_s26 + $0xc] sm:$0xf] %vm3304_vm6, %v3215_v62 }
 0x32d   : > { %v3217_v27 = vpop.permute.xlu0 %3216  ;;  %v3790_v61 = vld [vmem:[%s5700_s26] sm:$0xff]  }
 0x32e   : > { %3309 = vst.msk [vmem:[%s5700_s26 + $0x10] sm:$0xf] %vm3304_vm6, %v3217_v27  ;;  %v3791_v33 = vunpack.c.l.bf16 %v3790_v61  ;;  %v3792_v37 = vunpack.c.h.bf16 %v3790_v61 }
 0x330   : > { %v3438_v5 = vmul.f32 %v3791_v33, %v3791_v33  ;;  %v3439_v13 = vmul.f32 %v3792_v37, %v3792_v37  ;;  %v3401_v40 = vadd.f32 %v3792_v37, %v3791_v33 }
 0x331   : > { %v3868_v50 = vld [vmem:[%s5700_s26 + $0x8] sm:$0xff]  }
 0x332   : > { %v3219_v24 = vpop.permute.xlu1 %3218  ;;  %v3795_v57 = vunpack.c.l.bf16 %v3868_v50  ;;  %v3796_v41 = vunpack.c.h.bf16 %v3868_v50  ;;  %v3470_v63 = vadd.f32 %v3439_v13, %v3438_v5 }
 0x333   : > { %3310 = vst.msk [vmem:[%s5700_s26 + $0x14] sm:$0xf] %vm3304_vm6, %v3219_v24 }
 0x334   : > { %v3221_v10 = vpop.permute.xlu0 %3220  ;;  %v3440_v12 = vmul.f32 %v3795_v57, %v3795_v57  ;;  %v3402_v53 = vadd.f32 %v3795_v57, %v3401_v40  ;;  %v3441_v3 = vmul.f32 %v3796_v41, %v3796_v41 }
 0x335   : > { %3311 = vst.msk [vmem:[%s5700_s26 + $0x18] sm:$0xf] %vm3304_vm6, %v3221_v10 }
 0x336   : > { %v3223_v26 = vpop.permute.xlu1 %3222  ;;  %v3471_v30 = vadd.f32 %v3470_v63, %v3440_v12  ;;  %v3403_v28 = vadd.f32 %v3796_v41, %v3402_v53 }
 0x337   : > { %3312 = vst.msk [vmem:[%s5700_s26 + $0x1c] sm:$0xf] %vm3304_vm6, %v3223_v26 }
 0x338   : > { %v3472_v17 = vadd.f32 %v3471_v30, %v3441_v3 }
 0x33a   : > { %v3869_v1 = vld [vmem:[%s5700_s26 + $0x10] sm:$0xff]  }
 0x33b   : > { %v3227_v6 = vpop.permute.xlu1 %3226  ;;  %v3225_v21 = vpop.permute.xlu0 %3224  ;;  %v3799_v42 = vunpack.c.l.bf16 %v3869_v1  ;;  %v3800_v51 = vunpack.c.h.bf16 %v3869_v1 }
 0x33c   : > { %3313 = vst.msk [vmem:[%s5700_s26 + $0x20] sm:$0xf] %vm3304_vm6, %v3225_v21  ;;  %3314 = vst.msk [vmem:[%s5700_s26 + $0x24] sm:$0xf] %vm3304_vm6, %v3227_v6 }
 0x33d   : > { %v3442_v25 = vmul.f32 %v3799_v42, %v3799_v42  ;;  %v3404_v43 = vadd.f32 %v3799_v42, %v3403_v28  ;;  %v3443_v8 = vmul.f32 %v3800_v51, %v3800_v51 }
 0x33e   : > { %v3870_v15 = vld [vmem:[%s5700_s26 + $0x18] sm:$0xff]  }
 0x33f   : > { %v3229_v32 = vpop.permute.xlu0 %3228  ;;  %v3803_v19 = vunpack.c.l.bf16 %v3870_v15  ;;  %v3473_v49 = vadd.f32 %v3472_v17, %v3442_v25  ;;  %v3405_v7 = vadd.f32 %v3800_v51, %v3404_v43  ;;  %v3804_v38 = vunpack.c.h.bf16 %v3870_v15 }
 0x340   : > { %3315 = vst.msk [vmem:[%s5700_s26 + $0x28] sm:$0xf] %vm3304_vm6, %v3229_v32 }
 0x341   : > { %v3231_v46 = vpop.permute.xlu1 %3230  ;;  %v3444_v11 = vmul.f32 %v3803_v19, %v3803_v19  ;;  %v3474_v55 = vadd.f32 %v3473_v49, %v3443_v8  ;;  %v3406_v23 = vadd.f32 %v3803_v19, %v3405_v7  ;;  %v3445_v48 = vmul.f32 %v3804_v38, %v3804_v38 }
 0x342   : > { %3316 = vst.msk [vmem:[%s5700_s26 + $0x2c] sm:$0xf] %vm3304_vm6, %v3231_v46 }
 0x343   : > { %v3871_v16 = vld [vmem:[%s5700_s26 + $0x20] sm:$0xff]   ;;  %v3475_v4 = vadd.f32 %v3474_v55, %v3444_v11  ;;  %v3407_v47 = vadd.f32 %v3804_v38, %v3406_v23 }
 0x344   : > { %v3807_v60 = vunpack.c.l.bf16 %v3871_v16  ;;  %v3808_v0 = vunpack.c.h.bf16 %v3871_v16 }
 0x345   : > { %v3233_v35 = vpop.permute.xlu0 %3232  ;;  %v3476_v45 = vadd.f32 %v3475_v4, %v3445_v48 }
 0x346   : > { %3317 = vst.msk [vmem:[%s5700_s26 + $0x30] sm:$0xf] %vm3304_vm6, %v3233_v35  ;;  %v3446_v56 = vmul.f32 %v3807_v60, %v3807_v60  ;;  %v3408_v18 = vadd.f32 %v3807_v60, %v3407_v47  ;;  %v3447_v44 = vmul.f32 %v3808_v0, %v3808_v0 }
 0x348   : > { %v3235_v9 = vpop.permute.xlu1 %3234  ;;  %v3477_v22 = vadd.f32 %v3476_v45, %v3446_v56  ;;  %v3409_v36 = vadd.f32 %v3808_v0, %v3408_v18 }
 0x349   : > { %3318 = vst.msk [vmem:[%s5700_s26 + $0x34] sm:$0xf] %vm3304_vm6, %v3235_v9  ;;  %v3872_v31 = vld [vmem:[%s5700_s26 + $0x28] sm:$0xff]  }
 0x34a   : > { %v3811_v58 = vunpack.c.l.bf16 %v3872_v31  ;;  %v3478_v24 = vadd.f32 %v3477_v22, %v3447_v44  ;;  %v3812_v27 = vunpack.c.h.bf16 %v3872_v31 }
 0x34c   : > { %v3448_v29 = vmul.f32 %v3811_v58, %v3811_v58  ;;  %v3410_v10 = vadd.f32 %v3811_v58, %v3409_v36  ;;  %v3449_v35 = vmul.f32 %v3812_v27, %v3812_v27 }
 0x34e   : > { %v3237_v52 = vpop.permute.xlu0 %3236  ;;  %v3479_v6 = vadd.f32 %v3478_v24, %v3448_v29  ;;  %v3411_v46 = vadd.f32 %v3812_v27, %v3410_v10 }
 0x34f   : > { %3319 = vst.msk [vmem:[%s5700_s26 + $0x38] sm:$0xf] %vm3304_vm6, %v3237_v52 }
 0x350   : > { %v3239_v39 = vpop.permute.xlu1 %3238  ;;  %v3873_v62 = vld [vmem:[%s5700_s26 + $0x30] sm:$0xff]   ;;  %v3480_v37 = vadd.f32 %v3479_v6, %v3449_v35 }
 0x351   : > { %3320 = vst.msk [vmem:[%s5700_s26 + $0x3c] sm:$0xf] %vm3304_vm6, %v3239_v39  ;;  %v3815_v26 = vunpack.c.l.bf16 %v3873_v62  ;;  %v3816_v9 = vunpack.c.h.bf16 %v3873_v62 }
 0x353   : > { %v3241_v34 = vpop.permute.xlu0 %3240  ;;  %v3450_v61 = vmul.f32 %v3815_v26, %v3815_v26  ;;  %v3412_v33 = vadd.f32 %v3815_v26, %v3411_v46  ;;  %v3451_v40 = vmul.f32 %v3816_v9, %v3816_v9 }
 0x354   : > { %3321 = vst.msk [vmem:[%s5700_s26 + $0x40] sm:$0xf] %vm3304_vm6, %v3241_v34 }
 0x355   : > { %v3481_v52 = vadd.f32 %v3480_v37, %v3450_v61  ;;  %v3413_v13 = vadd.f32 %v3816_v9, %v3412_v33 }
 0x357   : > { %v3243_v14 = vpop.permute.xlu1 %3242  ;;  %v3482_v53 = vadd.f32 %v3481_v52, %v3451_v40 }
 0x358   : > { %3322 = vst.msk [vmem:[%s5700_s26 + $0x44] sm:$0xf] %vm3304_vm6, %v3243_v14  ;;  %v3874_v32 = vld [vmem:[%s5700_s26 + $0x38] sm:$0xff]  }
 0x359   : > { %v3819_v50 = vunpack.c.l.bf16 %v3874_v32  ;;  %v3820_v39 = vunpack.c.h.bf16 %v3874_v32 }
 0x35a   : > { %v3245_v54 = vpop.permute.xlu0 %3244 }
 0x35b   : > { %3323 = vst.msk [vmem:[%s5700_s26 + $0x48] sm:$0xf] %vm3304_vm6, %v3245_v54  ;;  %v3452_v12 = vmul.f32 %v3819_v50, %v3819_v50  ;;  %v3414_v41 = vadd.f32 %v3819_v50, %v3413_v13  ;;  %v3453_v28 = vmul.f32 %v3820_v39, %v3820_v39 }
 0x35d   : > { %v3483_v63 = vadd.f32 %v3482_v53, %v3452_v12  ;;  %v3415_v34 = vadd.f32 %v3820_v39, %v3414_v41 }
 0x35f   : > { %v3247_v20 = vpop.permute.xlu1 %3246  ;;  %v3875_v5 = vld [vmem:[%s5700_s26 + $0x40] sm:$0xff]   ;;  %v3484_v15 = vadd.f32 %v3483_v63, %v3453_v28 }
 0x360   : > { %3324 = vst.msk [vmem:[%s5700_s26 + $0x4c] sm:$0xf] %vm3304_vm6, %v3247_v20  ;;  %v3823_v1 = vunpack.c.l.bf16 %v3875_v5  ;;  %v3824_v25 = vunpack.c.h.bf16 %v3875_v5 }
 0x362   : > { %v3454_v3 = vmul.f32 %v3823_v1, %v3823_v1  ;;  %v3416_v14 = vadd.f32 %v3823_v1, %v3415_v34  ;;  %v3455_v54 = vmul.f32 %v3824_v25, %v3824_v25 }
 0x364   : > { %v3249_v2 = vpop.permute.xlu0 %3248  ;;  %v3485_v43 = vadd.f32 %v3484_v15, %v3454_v3  ;;  %v3417_v49 = vadd.f32 %v3824_v25, %v3416_v14 }
 0x365   : > { %3325 = vst.msk [vmem:[%s5700_s26 + $0x50] sm:$0xf] %vm3304_vm6, %v3249_v2 }
 0x366   : > { %v3486_v20 = vadd.f32 %v3485_v43, %v3455_v54 }
 0x367   : > { %v3876_v30 = vld [vmem:[%s5700_s26 + $0x48] sm:$0xff]  }
 0x368   : > { %v3251_v59 = vpop.permute.xlu1 %3250  ;;  %v3827_v17 = vunpack.c.l.bf16 %v3876_v30  ;;  %v3828_v8 = vunpack.c.h.bf16 %v3876_v30 }
 0x369   : > { %3326 = vst.msk [vmem:[%s5700_s26 + $0x54] sm:$0xf] %vm3304_vm6, %v3251_v59 }
 0x36a   : > { %v3456_v7 = vmul.f32 %v3827_v17, %v3827_v17  ;;  %v3418_v55 = vadd.f32 %v3827_v17, %v3417_v49  ;;  %v3457_v4 = vmul.f32 %v3828_v8, %v3828_v8 }
 0x36c   : > { %v3487_v16 = vadd.f32 %v3486_v20, %v3456_v7  ;;  %v3419_v60 = vadd.f32 %v3828_v8, %v3418_v55 }
 0x36e   : > { %v3253_v21 = vpop.permute.xlu0 %3252  ;;  %v3488_v2 = vadd.f32 %v3487_v16, %v3457_v4 }
 0x36f   : > { %3327 = vst.msk [vmem:[%s5700_s26 + $0x58] sm:$0xf] %vm3304_vm6, %v3253_v21 }
 0x370   : > { %v3877_v19 = vld [vmem:[%s5700_s26 + $0x50] sm:$0xff]  }
 0x371   : > { %v3831_v11 = vunpack.c.l.bf16 %v3877_v19  ;;  %v3832_v48 = vunpack.c.h.bf16 %v3877_v19 }
 0x372   : > { %v3255_v57 = vpop.permute.xlu1 %3254 }
 0x373   : > { %3328 = vst.msk [vmem:[%s5700_s26 + $0x5c] sm:$0xf] %vm3304_vm6, %v3255_v57  ;;  %v3458_v47 = vmul.f32 %v3831_v11, %v3831_v11  ;;  %v3420_v45 = vadd.f32 %v3831_v11, %v3419_v60  ;;  %v3459_v22 = vmul.f32 %v3832_v48, %v3832_v48 }
 0x375   : > { %v3489_v0 = vadd.f32 %v3488_v2, %v3458_v47  ;;  %v3421_v58 = vadd.f32 %v3832_v48, %v3420_v45 }
 0x377   : > { %v3490_v29 = vadd.f32 %v3489_v0, %v3459_v22 }
 0x37a   : > { %v3257_v42 = vpop.permute.xlu0 %3256  ;;  %v3878_v23 = vld [vmem:[%s5700_s26 + $0x58] sm:$0xff]  }
 0x37b   : > { %3329 = vst.msk [vmem:[%s5700_s26 + $0x60] sm:$0xf] %vm3304_vm6, %v3257_v42  ;;  %v3835_v56 = vunpack.c.l.bf16 %v3878_v23  ;;  %v3836_v36 = vunpack.c.h.bf16 %v3878_v23 }
 0x37d   : > { %v3460_v59 = vmul.f32 %v3835_v56, %v3835_v56  ;;  %v3422_v62 = vadd.f32 %v3835_v56, %v3421_v58  ;;  %v3461_v6 = vmul.f32 %v3836_v36, %v3836_v36 }
 0x37e   : > { %v3259_v51 = vpop.permute.xlu1 %3258 }
 0x37f   : > { %3330 = vst.msk [vmem:[%s5700_s26 + $0x64] sm:$0xf] %vm3304_vm6, %v3259_v51  ;;  %v3491_v24 = vadd.f32 %v3490_v29, %v3460_v59  ;;  %v3423_v10 = vadd.f32 %v3836_v36, %v3422_v62 }
 0x381   : > { %v3492_v61 = vadd.f32 %v3491_v24, %v3461_v6 }
 0x386   : > { %v3261_v38 = vpop.permute.xlu0 %3260  ;;  %v3879_v18 = vld [vmem:[%s5700_s26 + $0x60] sm:$0xff]  }
 0x387   : > { %3331 = vst.msk [vmem:[%s5700_s26 + $0x68] sm:$0xf] %vm3304_vm6, %v3261_v38  ;;  %v3839_v44 = vunpack.c.l.bf16 %v3879_v18  ;;  %v3840_v32 = vunpack.c.h.bf16 %v3879_v18 }
 0x389   : > { %v3462_v21 = vmul.f32 %v3839_v44, %v3839_v44  ;;  %v3424_v35 = vadd.f32 %v3839_v44, %v3423_v10  ;;  %v3463_v37 = vmul.f32 %v3840_v32, %v3840_v32 }
 0x38a   : > { %v3263_v31 = vpop.permute.xlu1 %3262 }
 0x38b   : > { %3332 = vst.msk [vmem:[%s5700_s26 + $0x6c] sm:$0xf] %vm3304_vm6, %v3263_v31  ;;  %v3493_v50 = vadd.f32 %v3492_v61, %v3462_v21  ;;  %v3425_v33 = vadd.f32 %v3840_v32, %v3424_v35 }
 0x38d   : > { %v3494_v13 = vadd.f32 %v3493_v50, %v3463_v37 }
 0x392   : > { %v3265_v27 = vpop.permute.xlu0 %3264  ;;  %v3880_v26 = vld [vmem:[%s5700_s26 + $0x68] sm:$0xff]  }
 0x393   : > { %3333 = vst.msk [vmem:[%s5700_s26 + $0x70] sm:$0xf] %vm3304_vm6, %v3265_v27  ;;  %v3843_v46 = vunpack.c.l.bf16 %v3880_v26  ;;  %v3844_v52 = vunpack.c.h.bf16 %v3880_v26 }
 0x395   : > { %v3464_v57 = vmul.f32 %v3843_v46, %v3843_v46  ;;  %v3426_v5 = vadd.f32 %v3843_v46, %v3425_v33  ;;  %v3465_v63 = vmul.f32 %v3844_v52, %v3844_v52 }
 0x396   : > { %v3267_v9 = vpop.permute.xlu1 %3266 }
 0x397   : > { %3334 = vst.msk [vmem:[%s5700_s26 + $0x74] sm:$0xf] %vm3304_vm6, %v3267_v9  ;;  %v3495_v39 = vadd.f32 %v3494_v13, %v3464_v57  ;;  %v3427_v53 = vadd.f32 %v3844_v52, %v3426_v5 }
 0x399   : > { %v3496_v28 = vadd.f32 %v3495_v39, %v3465_v63 }
 0x39a   : > { %v3269_v12 = vpop.permute.xlu0 %3268 }
 0x39b   : > { %3335 = vst.msk [vmem:[%s5700_s26 + $0x78] sm:$0xf] %vm3304_vm6, %v3269_v12 }
 0x39c   : > { %v3271_v40 = vpop.permute.xlu1 %3270 }
 0x39d   : > { %3336 = vst.msk [vmem:[%s5700_s26 + $0x7c] sm:$0xf] %vm3304_vm6, %v3271_v40 }
 0x39e   : > { %v3881_v1 = vld [vmem:[%s5700_s26 + $0x70] sm:$0xff]  }
 0x39f   : > { %v3847_v41 = vunpack.c.l.bf16 %v3881_v1  ;;  %v3848_v42 = vunpack.c.h.bf16 %v3881_v1 }
 0x3a1   : > { %v3428_v30 = vadd.f32 %v3847_v41, %v3427_v53  ;;  %v3466_v34 = vmul.f32 %v3847_v41, %v3847_v41  ;;  %v3467_v51 = vmul.f32 %v3848_v42, %v3848_v42 }
 0x3a3   : > { %v3497_v3 = vadd.f32 %v3496_v28, %v3466_v34  ;;  %v3429_v15 = vadd.f32 %v3848_v42, %v3428_v30 }
 0x3a4   : > { %v3882_v25 = vld [vmem:[%s5700_s26 + $0x78] sm:$0xff]  }
 0x3a5   : > { %v3851_v17 = vunpack.c.l.bf16 %v3882_v25  ;;  %v3852_v14 = vunpack.c.h.bf16 %v3882_v25  ;;  %v3498_v49 = vadd.f32 %v3497_v3, %v3467_v51 }
 0x3a7   : > { %v3430_v43 = vadd.f32 %v3851_v17, %v3429_v15  ;;  %v3468_v19 = vmul.f32 %v3851_v17, %v3851_v17  ;;  %v3469_v7 = vmul.f32 %v3852_v14, %v3852_v14 }
 0x3a9   : > { %v3431_v54 = vadd.f32 %v3852_v14, %v3430_v43  ;;  %v3499_v8 = vadd.f32 %v3498_v49, %v3468_v19 }
 0x3ab   : > { %v3432_v11 = vrot.slane %v3431_v54, 4  ;;  %v3500_v55 = vadd.f32 %v3499_v8, %v3469_v7 }
 0x3ad   : > { %v3433_v20 = vadd.f32 %v3432_v11, %v3431_v54  ;;  %v3501_v16 = vrot.slane %v3500_v55, 4 }
 0x3af   : > { %v3434_v38 = vrot.slane %v3433_v20, 2  ;;  %v3502_v23 = vadd.f32 %v3501_v16, %v3500_v55 }
 0x3b1   : > { %v3435_v60 = vadd.f32 %v3434_v38, %v3433_v20  ;;  %v3503_v4 = vrot.slane %v3502_v23, 2 }
 0x3b3   : > { %v3436_v47 = vrot.slane %v3435_v60, 1  ;;  %v3504_v48 = vadd.f32 %v3503_v4, %v3502_v23 }
 0x3b5   : > { %v3505_v56 = vrot.slane %v3504_v48, 1  ;;  %v3437_v45 = vadd.f32 %v3436_v47, %v3435_v60 }
 0x3b7   : > { %v3506_v2 = vadd.f32 %v3505_v56, %v3504_v48 }
 0x3b9   : > { %v3507_v31 = vsel %vm1423_vm1, %v3437_v45, %v3506_v2 }
 0x3ba   : > { %3508 = vst [vmem:[%s269_s9] sm:$0x3] %v3507_v31 }
 0x3bb   : > { %4014 = shalt.err (!%p4011_p3)
}
 0x3bc   : > { %s4015_s11 = scalar_lea.hbm %s6309_s14, 32  ;;  %s4019_s25 = scalar_lea.hbm %s6351_s6, 64 }
 0x3bd   : > { %p4016_p4 = scmp.ne.s32.totalorder %s6309_s14, %s4015_s11  ;;  %p4020_p9 = scmp.lt.s32.totalorder %s6309_s14, %s6351_s6 }
 0x3be   : > { %p4021_p10 = scmp.lt.s32.totalorder %s4019_s25, %s4015_s11 }
 0x3bf   : > { %p4017_p7 = pnand %p4016_p4, %p4144_p5 }
 0x3c0   : > { %p4022_p11 = por %p4021_p10, %p4020_p9 }
 0x3c1   : > { %p4018_p8 = pneg %p4017_p7 }
 0x3c3   : > { %p4023_p12 = pnand %p4022_p11, %p4018_p8 }
 0x3c5   : > { %4026 = shalt.err (!%p4023_p12)
}
 0x3c6   : > { %3899 = dma.vmem_to_hbm [thread:$0]  (%p4144_p5), %s3533_s10, 32, %s6309_s14, %s3515_s15  }
 0x3c7 PF: > { %p3905_p13 = scmp.ge.s32.totalorder %s4061_s24, 2  ;;  %s3552_s9 = sand.u32 1, %s4049_s21  }
 0x3c8   : > { %s3553_s12 = scalar_lea.sflag [#allocation4], %s3552_s9 }
 0x3c9   : > { %p3902_p0 = pnand %p3905_p13, %p4148_p6 }
 0x3cb   : > { %p3903_p1 = pneg %p3902_p0 }
 0x3cd   : > { %4044 = dma.done.wait (%p3903_p1), %s3553_s12, 32  }
 0x3ce   : > { %4046 = vsyncadd (%p3903_p1), %s3553_s12, 4294967264  ;;  %p17_p2 = scmp.ge.s32.totalorder %s4132_s27, 4   ;;  %s6879_s21 = smov %s4053_s22 }
 0x3cf   : > { %s6880_s22 = smov %s4057_s23  ;;  %s6881_s23 = smov %s4142_s30 }
 0x3d0   : > { %s6882_s24 = smov %s4132_s27  ;;  %19 = sbr.rel (!%p17_p2) target bundleno = 3 (0x3), region = 90 }
 0x3d5   :  { %3558 = vsyncpa [#allocation4], 1 }
 0x3d6   :  { %3560 = vsyncpa [#allocation4 + $0x1], 1 }

</bundles_post_ra>
